<compile_context>
chip_gen: v6e
topology: v6e:2x2x1
jax: 0.10.0
libtpu: 0.0.40
codegen_flags: <defaults>
</compile_context>

<pallas_src>
import functools

import jax
import jax.numpy as jnp
from jax import lax
from jax.experimental import pallas as pl
from jax.experimental.pallas import tpu as pltpu


# --------------------------------------------------------------------------
# kernels
# --------------------------------------------------------------------------
def _xproj_kernel(patches_ref, w_ref, b_ref, out_ref):
    """Input->gate projection for one (t, b) frame: one long-K MXU matmul.

    patches_ref : (1, 1, H*W, K*K*Cin) bf16   im2col patches of x_t
    w_ref       : (K*K*Cin, 4F)        bf16   im2col-ordered weight
    b_ref       : (1, 4F)              f32    bias
    out_ref     : (1, 1, H*W, 4F)      f32    conv(x_t, W_x) + b
    """
    out_ref[0, 0] = b_ref[...] + lax.dot_general(
        patches_ref[0, 0], w_ref[...],
        dimension_numbers=(((1,), (0,)), ((), ())),
        preferred_element_type=jnp.float32)


def _clstm_recurrent_kernel(xproj_ref, wh_ref, hseq_ref, c_ref, hpad_ref,
                            *, K, H, W):
    """One (b, t) grid step of a ConvLSTM layer's time recurrence.

    xproj_ref : (1, 1, H*W, 4F)     f32   precomputed conv(x_t, W_x) + bias
    wh_ref    : (K*K, F, 4F)        bf16  hidden->gate conv weight, tap-major
    hseq_ref  : (1, 1, H*W, F)      f32   output h_t
    c_ref     : (1, H*W, F)         f32   cell state, VMEM-resident across t
    hpad_ref  : (H+K-1, W+K-1, F)   bf16  scratch: zero-padded previous h
    """
    t = pl.program_id(1)
    F = c_ref.shape[-1]
    HW = H * W
    pad = (K - 1) // 2

    @pl.when(t == 0)
    def _():
        c_ref[...] = jnp.zeros_like(c_ref)
        hpad_ref[...] = jnp.zeros_like(hpad_ref)

    # hidden->gate conv: K*K shifted bf16 MXU matmuls, f32 accumulation,
    # seeded with the hoisted input projection (bias already folded in).
    hp = hpad_ref[...]                       # (Hp, Wp, F) bf16, zero border
    acc = xproj_ref[0, 0]                    # (H*W, 4F) f32
    for ky in range(K):
        for kx in range(K):
            patch = hp[ky:ky + H, kx:kx + W, :].reshape(HW, F)
            acc = acc + lax.dot_general(
                patch, wh_ref[ky * K + kx],
                dimension_numbers=(((1,), (0,)), ((), ())),
                preferred_element_type=jnp.float32)

    # gate order matches torch.split(A, F, dim=1): i, f, o, g
    sig = jax.nn.sigmoid(acc)                # full 128-lane EUP ops
    th = jnp.tanh(acc)
    i = sig[:, 0 * F:1 * F]
    f = sig[:, 1 * F:2 * F]
    o = sig[:, 2 * F:3 * F]
    g = th[:, 3 * F:4 * F]

    c_prev = c_ref[0]
    next_c = f * c_prev + i * g
    next_h = o * jnp.tanh(next_c)

    c_ref[0] = next_c
    hseq_ref[0, 0] = next_h
    # stash h (bf16) in the padded scratch interior for the next step's conv;
    # the zero border never gets rewritten, so no per-step re-pad is needed.
    hpad_ref[pad:pad + H, pad:pad + W, :] = (
        next_h.reshape(H, W, F).astype(hpad_ref.dtype))


def _lastconv_kernel(patches_ref, w_ref, b_ref, out_ref):
    """Final Conv2d + ReLU for one batch element (output channels zero-padded
    to a lane-dense width).

    patches_ref : (1, H*W, K*K*F) bf16
    w_ref       : (K*K*F, Cpad)   bf16
    b_ref       : (1, Cpad)       f32
    out_ref     : (1, H*W, Cpad)  f32
    """
    acc = b_ref[...] + lax.dot_general(
        patches_ref[0], w_ref[...],
        dimension_numbers=(((1,), (0,)), ((), ())),
        preferred_element_type=jnp.float32)
    out_ref[0] = jnp.maximum(acc, 0.0)


# --------------------------------------------------------------------------
# wrappers
# --------------------------------------------------------------------------
def _im2col_nhwc(x, K, pad):
    """(..., H, W, C) -> ((..., Ho*Wo, K*K*C), Ho, Wo) zero-padded patches."""
    *lead, H, W, C = x.shape
    Ho = H + 2 * pad - K + 1
    Wo = W + 2 * pad - K + 1
    pad_cfg = [(0, 0)] * len(lead) + [(pad, pad), (pad, pad), (0, 0)]
    xp = jnp.pad(x, pad_cfg)
    cols = [xp[..., ky:ky + Ho, kx:kx + Wo, :]
            for ky in range(K) for kx in range(K)]
    patches = jnp.concatenate(cols, axis=-1)          # (..., Ho, Wo, K*K*C)
    return patches.reshape(*lead, Ho * Wo, K * K * C), Ho, Wo


def input_projection(x_tbhwc, w_x2d, b, K, pad):
    """conv(x_t, W_x) + b for all timesteps at once (hoisted out of the
    recurrence).  Returns (T, B, H*W, 4F) f32."""
    T, B = x_tbhwc.shape[:2]
    F4 = w_x2d.shape[1]
    patches, Ho, Wo = _im2col_nhwc(x_tbhwc.astype(jnp.bfloat16), K, pad)
    HW = Ho * Wo
    KKC = patches.shape[-1]
    return pl.pallas_call(
        _xproj_kernel,
        out_shape=jax.ShapeDtypeStruct((T, B, HW, F4), jnp.float32),
        grid_spec=pltpu.PrefetchScalarGridSpec(
            num_scalar_prefetch=0,
            grid=(T, B),
            in_specs=[
                pl.BlockSpec((1, 1, HW, KKC), lambda t, b_: (t, b_, 0, 0)),
                pl.BlockSpec((KKC, F4), lambda t, b_: (0, 0)),
                pl.BlockSpec((1, F4), lambda t, b_: (0, 0)),
            ],
            out_specs=pl.BlockSpec((1, 1, HW, F4), lambda t, b_: (t, b_, 0, 0)),
        ),
        compiler_params=pltpu.CompilerParams(
            dimension_semantics=("parallel", "parallel")),
    )(patches, w_x2d, b.reshape(1, -1).astype(jnp.float32))


def clstm_recurrence(xproj, w_h, H, W, K):
    """Full ConvLSTM time recurrence for one layer as a single pallas_call:
    grid=(B, T) with batch 'parallel' and time 'arbitrary'; h/c stay in VMEM
    across the whole sequence."""
    T, B, HW, F4 = xproj.shape
    F = F4 // 4
    pad = (K - 1) // 2
    Hp, Wp = H + 2 * pad, W + 2 * pad
    h_seq, c_last = pl.pallas_call(
        functools.partial(_clstm_recurrent_kernel, K=K, H=H, W=W),
        out_shape=(jax.ShapeDtypeStruct((T, B, HW, F), jnp.float32),
                   jax.ShapeDtypeStruct((B, HW, F), jnp.float32)),
        grid_spec=pltpu.PrefetchScalarGridSpec(
            num_scalar_prefetch=0,
            grid=(B, T),
            in_specs=[
                pl.BlockSpec((1, 1, HW, F4), lambda b_, t: (t, b_, 0, 0)),
                pl.BlockSpec((K * K, F, F4), lambda b_, t: (0, 0, 0)),
            ],
            out_specs=(
                pl.BlockSpec((1, 1, HW, F), lambda b_, t: (t, b_, 0, 0)),
                pl.BlockSpec((1, HW, F), lambda b_, t: (b_, 0, 0)),
            ),
            scratch_shapes=[pltpu.VMEM((Hp, Wp, F), jnp.bfloat16)],
        ),
        compiler_params=pltpu.CompilerParams(
            dimension_semantics=("parallel", "arbitrary")),
    )(xproj, w_h)
    return h_seq, c_last


def last_conv_relu(h_last, w, b, pad, lane_pad=128):
    """Conv2d(F -> Cout, stride 1) + ReLU; output channels zero-padded to a
    lane-dense width inside the kernel and sliced back in the wrapper."""
    B = h_last.shape[0]
    K, _, F, Cout = w.shape
    Cpad = max(lane_pad, Cout)
    patches, Ho, Wo = _im2col_nhwc(h_last.astype(jnp.bfloat16), K, pad)
    KKF = patches.shape[-1]
    w2 = jnp.zeros((KKF, Cpad), jnp.bfloat16).at[:, :Cout].set(
        w.reshape(KKF, Cout).astype(jnp.bfloat16))
    b2 = jnp.zeros((1, Cpad), jnp.float32).at[:, :Cout].set(
        b.astype(jnp.float32))
    out = pl.pallas_call(
        _lastconv_kernel,
        out_shape=jax.ShapeDtypeStruct((B, Ho * Wo, Cpad), jnp.float32),
        grid_spec=pltpu.PrefetchScalarGridSpec(
            num_scalar_prefetch=0,
            grid=(B,),
            in_specs=[
                pl.BlockSpec((1, Ho * Wo, KKF), lambda b_: (b_, 0, 0)),
                pl.BlockSpec((KKF, Cpad), lambda b_: (0, 0)),
                pl.BlockSpec((1, Cpad), lambda b_: (0, 0)),
            ],
            out_specs=pl.BlockSpec((1, Ho * Wo, Cpad), lambda b_: (b_, 0, 0)),
        ),
        compiler_params=pltpu.CompilerParams(
            dimension_semantics=("parallel",)),
    )(patches, w2, b2)
    return out[:, :, :Cout].reshape(B, Ho, Wo, Cout)


def clstm_forward(x_btchw, params, num_layers, num_features, filter_size):
    """Mirrors CLSTM.forward.  x_btchw: (B, T, C, H, W) float32 (NCHW frames).

    Returns (next_hidden, seq_out, out) in PyTorch NCHW conventions:
      next_hidden : list of (h, c), each (B, F, H, W)
      seq_out     : (T, B, F, H, W)  last layer's hidden sequence
      out         : (B, 1, H, W)     lastconv + ReLU
    """
    K = filter_size
    pad = (K - 1) // 2
    B, T, C, H, W = x_btchw.shape
    F = num_features

    # (B, T, C, H, W) NCHW frames -> time-major NHWC (T, B, H, W, C)
    cur = jnp.transpose(x_btchw, (1, 0, 3, 4, 2)).astype(jnp.float32)

    next_hidden = []
    for layer in range(num_layers):
        w, b = params["cells"][layer]
        cin = cur.shape[-1]
        # split the concat-conv weight (HWIO) into x- and h- input blocks;
        # gate blocks (i, f, o, g) stay contiguous along the output axis.
        w_x = w[:, :, :cin, :].reshape(K * K * cin, 4 * F).astype(jnp.bfloat16)
        w_h = w[:, :, cin:, :].reshape(K * K, F, 4 * F).astype(jnp.bfloat16)

        xproj = input_projection(cur, w_x, b, K, pad)     # (T, B, H*W, 4F)
        h_seq, c_last = clstm_recurrence(xproj, w_h, H, W, K)

        next_hidden.append((h_seq[T - 1].reshape(B, H, W, F),
                            c_last.reshape(B, H, W, F)))
        cur = h_seq.reshape(T, B, H, W, F)

    # module hardcodes padding=1 for the last conv
    out_nhwc = last_conv_relu(next_hidden[-1][0], params["last_w"],
                              params["last_b"], pad=1)

    # convert back to PyTorch conventions (NCHW)
    next_hidden_nchw = [(jnp.transpose(h, (0, 3, 1, 2)),
                         jnp.transpose(c, (0, 3, 1, 2))) for h, c in next_hidden]
    seq_out = jnp.transpose(cur, (0, 1, 4, 2, 3))          # (T, B, F, H, W)
    out = jnp.transpose(out_nhwc, (0, 3, 1, 2))            # (B, 1, H, W)
    return next_hidden_nchw, seq_out, out


def init_params(key, input_chans, num_features, filter_size, num_layers):
    """Deterministic synthetic parameters (HWIO layout, concat input-channel)."""
    params = {"cells": []}
    for layer in range(num_layers):
        cin = (input_chans if layer == 0 else num_features) + num_features
        key, kw, kb = jax.random.split(key, 3)
        w = 0.1 * jax.random.normal(
            kw, (filter_size, filter_size, cin, 4 * num_features), jnp.float32)
        b = 0.1 * jax.random.normal(kb, (4 * num_features,), jnp.float32)
        params["cells"].append((w, b))
    key, kw, kb = jax.random.split(key, 3)
    params["last_w"] = 0.1 * jax.random.normal(
        kw, (filter_size, filter_size, num_features, 1), jnp.float32)
    params["last_b"] = 0.1 * jax.random.normal(kb, (1,), jnp.float32)
    return params


# ---------------- pure-JAX references (for correctness check) ----------------
def _ref_conv(x_nhwc, w, b, pad):
    y = lax.conv_general_dilated(
        x_nhwc, w, window_strides=(1, 1), padding=[(pad, pad), (pad, pad)],
        dimension_numbers=("NHWC", "HWIO", "NHWC"),
        preferred_element_type=jnp.float32)
    return y if b is None else y + b


def _ref_forward(x_btchw, params, num_layers, num_features, filter_size,
                 mxu_dtype):
    """mxu_dtype=float32 -> exact module semantics; bfloat16 -> precision-
    matched to the Pallas kernels (bf16 MXU operands, f32 accumulation)."""
    pad = (filter_size - 1) // 2
    B, T, C, H, W = x_btchw.shape
    Fn = num_features
    cur = jnp.transpose(x_btchw, (1, 0, 3, 4, 2)).astype(jnp.float32)
    last_h = None
    for layer in range(num_layers):
        w, b = params["cells"][layer]
        cin = cur.shape[-1]
        w_x = w[:, :, :cin, :].astype(mxu_dtype)
        w_h = w[:, :, cin:, :].astype(mxu_dtype)
        h = jnp.zeros((B, H, W, Fn), jnp.float32)
        c = jnp.zeros((B, H, W, Fn), jnp.float32)
        outs = []
        for t in range(T):
            a = (_ref_conv(cur[t].astype(mxu_dtype), w_x, b, pad)
                 + _ref_conv(h.astype(mxu_dtype), w_h, None, pad))
            i = jax.nn.sigmoid(a[..., 0 * Fn:1 * Fn])
            f = jax.nn.sigmoid(a[..., 1 * Fn:2 * Fn])
            o = jax.nn.sigmoid(a[..., 2 * Fn:3 * Fn])
            g = jnp.tanh(a[..., 3 * Fn:4 * Fn])
            c = f * c + i * g
            h = o * jnp.tanh(c)
            outs.append(h)
        cur = jnp.stack(outs, axis=0)
        last_h = h
    out = jnp.maximum(
        _ref_conv(last_h.astype(mxu_dtype),
                  params["last_w"].astype(mxu_dtype),
                  params["last_b"], 1), 0.0)
    return jnp.transpose(out, (0, 3, 1, 2)), jnp.transpose(last_h, (0, 3, 1, 2))


if __name__ == "__main__":
    # small, module-consistent shapes
    B, T, C, H, W = 2, 8, 4, 16, 16
    num_features = 32
    filter_size = 3
    num_layers = 2

    key = jax.random.PRNGKey(0)
    key, kx, kp = jax.random.split(key, 3)
    x = jax.random.normal(kx, (B, T, C, H, W), jnp.float32)
    params = init_params(kp, C, num_features, filter_size, num_layers)

    fwd = jax.jit(clstm_forward, static_argnums=(2, 3, 4))
    next_hidden, seq_out, out = fwd(x, params, num_layers, num_features,
                                    filter_size)
    jax.block_until_ready((next_hidden, seq_out, out))

    assert out.shape == (B, 1, H, W)
    assert seq_out.shape == (T, B, num_features, H, W)
    assert next_hidden[-1][0].shape == (B, num_features, H, W)

    # precision-matched reference (bf16 MXU operands, like the kernels)
    ref_out_m, ref_h_m = _ref_forward(x, params, num_layers, num_features,
                                      filter_size, jnp.bfloat16)
    assert jnp.allclose(out, ref_out_m, atol=2e-2, rtol=2e-2)
    assert jnp.allclose(next_hidden[-1][0], ref_h_m, atol=2e-2, rtol=2e-2)

    # full-f32 module reference (loose bound: covers bf16 MXU drift only)
    ref_out_f, ref_h_f = _ref_forward(x, params, num_layers, num_features,
                                      filter_size, jnp.float32)
    assert jnp.allclose(out, ref_out_f, atol=1e-1, rtol=1e-1)
    assert jnp.allclose(next_hidden[-1][0], ref_h_f, atol=1e-1, rtol=1e-1)

    print("KERNEL_OK")
</pallas_src>

<mosaic_0001>
module attributes {stable_mosaic.version = 11 : i64} {
  func.func @_xproj_kernel(%arg0: i32, %arg1: i32, %arg2: memref<1x1x256x36xbf16, #tpu.memory_space<vmem>>, %arg3: memref<36x128xbf16, #tpu.memory_space<vmem>>, %arg4: memref<1x128xf32, #tpu.memory_space<vmem>>, %arg5: memref<1x1x256x128xf32, #tpu.memory_space<vmem>>) attributes {dimension_semantics = [#tpu.dimension_semantics<parallel>, #tpu.dimension_semantics<parallel>], iteration_bounds = array<i64: 8, 2>, scalar_prefetch = 0 : i64, scratch_operands = 0 : i64, tpu.core_type = #tpu.core_type<tc>, window_params = [{transform_indices = @transform_0, window_bounds = array<i64: 1, 1, 256, 36>}, {pipeline_mode = #tpu.pipeline_mode<synchronous>, transform_indices = @transform_1, window_bounds = array<i64: 36, 128>}, {pipeline_mode = #tpu.pipeline_mode<synchronous>, transform_indices = @transform_2, window_bounds = array<i64: 1, 128>}, {transform_indices = @transform_3, window_bounds = array<i64: 1, 1, 256, 128>}]} {
    %c0 = arith.constant 0 : index
    %c0_0 = arith.constant 0 : index
    %0 = vector.load %arg4[%c0, %c0_0] : memref<1x128xf32, #tpu.memory_space<vmem>>, vector<1x128xf32>
    %c0_1 = arith.constant 0 : index
    %c0_2 = arith.constant 0 : index
    %c0_3 = arith.constant 0 : index
    %c0_4 = arith.constant 0 : index
    %1 = vector.load %arg2[%c0_1, %c0_2, %c0_3, %c0_4] : memref<1x1x256x36xbf16, #tpu.memory_space<vmem>>, vector<1x1x256x36xbf16>
    %2 = vector.shape_cast %1 : vector<1x1x256x36xbf16> to vector<256x36xbf16>
    %c0_5 = arith.constant 0 : index
    %c0_6 = arith.constant 0 : index
    %3 = vector.load %arg3[%c0_5, %c0_6] : memref<36x128xbf16, #tpu.memory_space<vmem>>, vector<36x128xbf16>
    %cst = arith.constant dense<0.000000e+00> : vector<256x128xf32>
    %4 = tpu.matmul %2, %3, %cst {dimension_numbers = #tpu.dot_dimension_numbers<[1], [0], [0], [1], [0, 0, 1, 1], [], []>} : vector<256x36xbf16>, vector<36x128xbf16>, vector<256x128xf32> -> vector<256x128xf32>
    %5 = vector.broadcast %0 : vector<1x128xf32> to vector<256x128xf32>
    %6 = arith.addf %5, %4 : vector<256x128xf32>
    %c0_7 = arith.constant 0 : index
    %c0_8 = arith.constant 0 : index
    %c0_9 = arith.constant 0 : index
    %c0_10 = arith.constant 0 : index
    %7 = vector.load %arg5[%c0_7, %c0_8, %c0_9, %c0_10] : memref<1x1x256x128xf32, #tpu.memory_space<vmem>>, vector<1x1x256x128xf32>
    %8 = vector.shape_cast %7 : vector<1x1x256x128xf32> to vector<256x128xf32>
    %9 = vector.shape_cast %6 : vector<256x128xf32> to vector<1x1x256x128xf32>
    tpu.vector_store %arg5[%c0_7, %c0_8, %c0_9, %c0_10], %9 {strides = array<i32>} : memref<1x1x256x128xf32, #tpu.memory_space<vmem>>, vector<1x1x256x128xf32>,
    return
  }
  func.func @transform_0(%arg0: i32, %arg1: i32) -> (i32, i32, i32, i32) {
    %c0_i32 = arith.constant 0 : i32
    %c0_i32_0 = arith.constant 0 : i32
    %c0_i32_1 = arith.constant 0 : i32
    return %arg0, %arg1, %c0_i32, %c0_i32_0 : i32, i32, i32, i32
  }
  func.func @transform_1(%arg0: i32, %arg1: i32) -> (i32, i32) {
    %c0_i32 = arith.constant 0 : i32
    %c0_i32_0 = arith.constant 0 : i32
    %c0_i32_1 = arith.constant 0 : i32
    return %c0_i32, %c0_i32_0 : i32, i32
  }
  func.func @transform_2(%arg0: i32, %arg1: i32) -> (i32, i32) {
    %c0_i32 = arith.constant 0 : i32
    %c0_i32_0 = arith.constant 0 : i32
    %c0_i32_1 = arith.constant 0 : i32
    return %c0_i32, %c0_i32_0 : i32, i32
  }
  func.func @transform_3(%arg0: i32, %arg1: i32) -> (i32, i32, i32, i32) {
    %c0_i32 = arith.constant 0 : i32
    %c0_i32_0 = arith.constant 0 : i32
    %c0_i32_1 = arith.constant 0 : i32
    return %arg0, %arg1, %c0_i32, %c0_i32_0 : i32, i32, i32, i32
  }
}

module attributes {stable_mosaic.version = 11 : i64} {
  func.func @_clstm_recurrent_kernel(%arg0: i32, %arg1: i32, %arg2: memref<1x1x256x128xf32, #tpu.memory_space<vmem>>, %arg3: memref<9x32x128xbf16, #tpu.memory_space<vmem>>, %arg4: memref<1x1x256x32xf32, #tpu.memory_space<vmem>>, %arg5: memref<1x256x32xf32, #tpu.memory_space<vmem>>, %arg6: memref<18x18x32xbf16, #tpu.memory_space<vmem>>) attributes {dimension_semantics = [#tpu.dimension_semantics<parallel>, #tpu.dimension_semantics<arbitrary>], iteration_bounds = array<i64: 2, 8>, scalar_prefetch = 0 : i64, scratch_operands = 1 : i64, tpu.core_type = #tpu.core_type<tc>, window_params = [{transform_indices = @transform_0, window_bounds = array<i64: 1, 1, 256, 128>}, {pipeline_mode = #tpu.pipeline_mode<synchronous>, transform_indices = @transform_1, window_bounds = array<i64: 9, 32, 128>}, {transform_indices = @transform_2, window_bounds = array<i64: 1, 1, 256, 32>}, {transform_indices = @transform_3, window_bounds = array<i64: 1, 256, 32>}]} {
    %c0_i32 = arith.constant 0 : i32
    %0 = arith.cmpi eq, %arg1, %c0_i32 : i32
    %1 = arith.extui %0 : i1 to i32
    %c0_i32_0 = arith.constant 0 : i32
    %2 = arith.cmpi ne, %1, %c0_i32_0 : i32
    scf.if %2 {
      %cst_48 = arith.constant 0.000000e+00 : f32
      %86 = vector.broadcast %cst_48 : f32 to vector<1x256x32xf32>
      %c0_49 = arith.constant 0 : index
      %c0_50 = arith.constant 0 : index
      %c0_51 = arith.constant 0 : index
      %87 = vector.load %arg5[%c0_49, %c0_50, %c0_51] : memref<1x256x32xf32, #tpu.memory_space<vmem>>, vector<1x256x32xf32>
      tpu.vector_store %arg5[%c0_49, %c0_50, %c0_51], %86 {strides = array<i32>} : memref<1x256x32xf32, #tpu.memory_space<vmem>>, vector<1x256x32xf32>,
      %cst_52 = arith.constant 0.000000e+00 : bf16
      %88 = vector.broadcast %cst_52 : bf16 to vector<18x18x32xbf16>
      %c0_53 = arith.constant 0 : index
      %c0_54 = arith.constant 0 : index
      %c0_55 = arith.constant 0 : index
      %89 = vector.load %arg6[%c0_53, %c0_54, %c0_55] : memref<18x18x32xbf16, #tpu.memory_space<vmem>>, vector<18x18x32xbf16>
      tpu.vector_store %arg6[%c0_53, %c0_54, %c0_55], %88 {strides = array<i32>} : memref<18x18x32xbf16, #tpu.memory_space<vmem>>, vector<18x18x32xbf16>,
    } else {
    }
    %c0 = arith.constant 0 : index
    %c0_1 = arith.constant 0 : index
    %c0_2 = arith.constant 0 : index
    %3 = vector.load %arg6[%c0, %c0_1, %c0_2] : memref<18x18x32xbf16, #tpu.memory_space<vmem>>, vector<18x18x32xbf16>
    %c0_3 = arith.constant 0 : index
    %c0_4 = arith.constant 0 : index
    %c0_5 = arith.constant 0 : index
    %c0_6 = arith.constant 0 : index
    %4 = vector.load %arg2[%c0_3, %c0_4, %c0_5, %c0_6] : memref<1x1x256x128xf32, #tpu.memory_space<vmem>>, vector<1x1x256x128xf32>
    %5 = vector.shape_cast %4 : vector<1x1x256x128xf32> to vector<256x128xf32>
    %6 = vector.extract_strided_slice %3 {offsets = [0, 0, 0], sizes = [16, 16, 32], strides = [1, 1, 1]} : vector<18x18x32xbf16> to vector<16x16x32xbf16>
    %7 = vector.shape_cast %6 : vector<16x16x32xbf16> to vector<256x32xbf16>
    %c0_7 = arith.constant 0 : index
    %c0_8 = arith.constant 0 : index
    %c0_9 = arith.constant 0 : index
    %8 = vector.load %arg3[%c0_7, %c0_8, %c0_9] : memref<9x32x128xbf16, #tpu.memory_space<vmem>>, vector<1x32x128xbf16>
    %9 = vector.shape_cast %8 : vector<1x32x128xbf16> to vector<32x128xbf16>
    %cst = arith.constant dense<0.000000e+00> : vector<256x128xf32>
    %10 = tpu.matmul %7, %9, %cst {dimension_numbers = #tpu.dot_dimension_numbers<[1], [0], [0], [1], [0, 0, 1, 1], [], []>} : vector<256x32xbf16>, vector<32x128xbf16>, vector<256x128xf32> -> vector<256x128xf32>
    %11 = arith.addf %5, %10 : vector<256x128xf32>
    %12 = vector.extract_strided_slice %3 {offsets = [0, 1, 0], sizes = [16, 16, 32], strides = [1, 1, 1]} : vector<18x18x32xbf16> to vector<16x16x32xbf16>
    %13 = vector.shape_cast %12 : vector<16x16x32xbf16> to vector<256x32xbf16>
    %c1 = arith.constant 1 : index
    %c0_10 = arith.constant 0 : index
    %c0_11 = arith.constant 0 : index
    %14 = vector.load %arg3[%c1, %c0_10, %c0_11] : memref<9x32x128xbf16, #tpu.memory_space<vmem>>, vector<1x32x128xbf16>
    %15 = vector.shape_cast %14 : vector<1x32x128xbf16> to vector<32x128xbf16>
    %cst_12 = arith.constant dense<0.000000e+00> : vector<256x128xf32>
    %16 = tpu.matmul %13, %15, %cst_12 {dimension_numbers = #tpu.dot_dimension_numbers<[1], [0], [0], [1], [0, 0, 1, 1], [], []>} : vector<256x32xbf16>, vector<32x128xbf16>, vector<256x128xf32> -> vector<256x128xf32>
    %17 = arith.addf %11, %16 : vector<256x128xf32>
    %18 = vector.extract_strided_slice %3 {offsets = [0, 2, 0], sizes = [16, 16, 32], strides = [1, 1, 1]} : vector<18x18x32xbf16> to vector<16x16x32xbf16>
    %19 = vector.shape_cast %18 : vector<16x16x32xbf16> to vector<256x32xbf16>
    %c2 = arith.constant 2 : index
    %c0_13 = arith.constant 0 : index
    %c0_14 = arith.constant 0 : index
    %20 = vector.load %arg3[%c2, %c0_13, %c0_14] : memref<9x32x128xbf16, #tpu.memory_space<vmem>>, vector<1x32x128xbf16>
    %21 = vector.shape_cast %20 : vector<1x32x128xbf16> to vector<32x128xbf16>
    %cst_15 = arith.constant dense<0.000000e+00> : vector<256x128xf32>
    %22 = tpu.matmul %19, %21, %cst_15 {dimension_numbers = #tpu.dot_dimension_numbers<[1], [0], [0], [1], [0, 0, 1, 1], [], []>} : vector<256x32xbf16>, vector<32x128xbf16>, vector<256x128xf32> -> vector<256x128xf32>
    %23 = arith.addf %17, %22 : vector<256x128xf32>
    %24 = vector.extract_strided_slice %3 {offsets = [1, 0, 0], sizes = [16, 16, 32], strides = [1, 1, 1]} : vector<18x18x32xbf16> to vector<16x16x32xbf16>
    %25 = vector.shape_cast %24 : vector<16x16x32xbf16> to vector<256x32xbf16>
    %c3 = arith.constant 3 : index
    %c0_16 = arith.constant 0 : index
    %c0_17 = arith.constant 0 : index
    %26 = vector.load %arg3[%c3, %c0_16, %c0_17] : memref<9x32x128xbf16, #tpu.memory_space<vmem>>, vector<1x32x128xbf16>
    %27 = vector.shape_cast %26 : vector<1x32x128xbf16> to vector<32x128xbf16>
    %cst_18 = arith.constant dense<0.000000e+00> : vector<256x128xf32>
    %28 = tpu.matmul %25, %27, %cst_18 {dimension_numbers = #tpu.dot_dimension_numbers<[1], [0], [0], [1], [0, 0, 1, 1], [], []>} : vector<256x32xbf16>, vector<32x128xbf16>, vector<256x128xf32> -> vector<256x128xf32>
    %29 = arith.addf %23, %28 : vector<256x128xf32>
    %30 = vector.extract_strided_slice %3 {offsets = [1, 1, 0], sizes = [16, 16, 32], strides = [1, 1, 1]} : vector<18x18x32xbf16> to vector<16x16x32xbf16>
    %31 = vector.shape_cast %30 : vector<16x16x32xbf16> to vector<256x32xbf16>
    %c4 = arith.constant 4 : index
    %c0_19 = arith.constant 0 : index
    %c0_20 = arith.constant 0 : index
    %32 = vector.load %arg3[%c4, %c0_19, %c0_20] : memref<9x32x128xbf16, #tpu.memory_space<vmem>>, vector<1x32x128xbf16>
    %33 = vector.shape_cast %32 : vector<1x32x128xbf16> to vector<32x128xbf16>
    %cst_21 = arith.constant dense<0.000000e+00> : vector<256x128xf32>
    %34 = tpu.matmul %31, %33, %cst_21 {dimension_numbers = #tpu.dot_dimension_numbers<[1], [0], [0], [1], [0, 0, 1, 1], [], []>} : vector<256x32xbf16>, vector<32x128xbf16>, vector<256x128xf32> -> vector<256x128xf32>
    %35 = arith.addf %29, %34 : vector<256x128xf32>
    %36 = vector.extract_strided_slice %3 {offsets = [1, 2, 0], sizes = [16, 16, 32], strides = [1, 1, 1]} : vector<18x18x32xbf16> to vector<16x16x32xbf16>
    %37 = vector.shape_cast %36 : vector<16x16x32xbf16> to vector<256x32xbf16>
    %c5 = arith.constant 5 : index
    %c0_22 = arith.constant 0 : index
    %c0_23 = arith.constant 0 : index
    %38 = vector.load %arg3[%c5, %c0_22, %c0_23] : memref<9x32x128xbf16, #tpu.memory_space<vmem>>, vector<1x32x128xbf16>
    %39 = vector.shape_cast %38 : vector<1x32x128xbf16> to vector<32x128xbf16>
    %cst_24 = arith.constant dense<0.000000e+00> : vector<256x128xf32>
    %40 = tpu.matmul %37, %39, %cst_24 {dimension_numbers = #tpu.dot_dimension_numbers<[1], [0], [0], [1], [0, 0, 1, 1], [], []>} : vector<256x32xbf16>, vector<32x128xbf16>, vector<256x128xf32> -> vector<256x128xf32>
    %41 = arith.addf %35, %40 : vector<256x128xf32>
    %42 = vector.extract_strided_slice %3 {offsets = [2, 0, 0], sizes = [16, 16, 32], strides = [1, 1, 1]} : vector<18x18x32xbf16> to vector<16x16x32xbf16>
    %43 = vector.shape_cast %42 : vector<16x16x32xbf16> to vector<256x32xbf16>
    %c6 = arith.constant 6 : index
    %c0_25 = arith.constant 0 : index
    %c0_26 = arith.constant 0 : index
    %44 = vector.load %arg3[%c6, %c0_25, %c0_26] : memref<9x32x128xbf16, #tpu.memory_space<vmem>>, vector<1x32x128xbf16>
    %45 = vector.shape_cast %44 : vector<1x32x128xbf16> to vector<32x128xbf16>
    %cst_27 = arith.constant dense<0.000000e+00> : vector<256x128xf32>
    %46 = tpu.matmul %43, %45, %cst_27 {dimension_numbers = #tpu.dot_dimension_numbers<[1], [0], [0], [1], [0, 0, 1, 1], [], []>} : vector<256x32xbf16>, vector<32x128xbf16>, vector<256x128xf32> -> vector<256x128xf32>
    %47 = arith.addf %41, %46 : vector<256x128xf32>
    %48 = vector.extract_strided_slice %3 {offsets = [2, 1, 0], sizes = [16, 16, 32], strides = [1, 1, 1]} : vector<18x18x32xbf16> to vector<16x16x32xbf16>
    %49 = vector.shape_cast %48 : vector<16x16x32xbf16> to vector<256x32xbf16>
    %c7 = arith.constant 7 : index
    %c0_28 = arith.constant 0 : index
    %c0_29 = arith.constant 0 : index
    %50 = vector.load %arg3[%c7, %c0_28, %c0_29] : memref<9x32x128xbf16, #tpu.memory_space<vmem>>, vector<1x32x128xbf16>
    %51 = vector.shape_cast %50 : vector<1x32x128xbf16> to vector<32x128xbf16>
    %cst_30 = arith.constant dense<0.000000e+00> : vector<256x128xf32>
    %52 = tpu.matmul %49, %51, %cst_30 {dimension_numbers = #tpu.dot_dimension_numbers<[1], [0], [0], [1], [0, 0, 1, 1], [], []>} : vector<256x32xbf16>, vector<32x128xbf16>, vector<256x128xf32> -> vector<256x128xf32>
    %53 = arith.addf %47, %52 : vector<256x128xf32>
    %54 = vector.extract_strided_slice %3 {offsets = [2, 2, 0], sizes = [16, 16, 32], strides = [1, 1, 1]} : vector<18x18x32xbf16> to vector<16x16x32xbf16>
    %55 = vector.shape_cast %54 : vector<16x16x32xbf16> to vector<256x32xbf16>
    %c8 = arith.constant 8 : index
    %c0_31 = arith.constant 0 : index
    %c0_32 = arith.constant 0 : index
    %56 = vector.load %arg3[%c8, %c0_31, %c0_32] : memref<9x32x128xbf16, #tpu.memory_space<vmem>>, vector<1x32x128xbf16>
    %57 = vector.shape_cast %56 : vector<1x32x128xbf16> to vector<32x128xbf16>
    %cst_33 = arith.constant dense<0.000000e+00> : vector<256x128xf32>
    %58 = tpu.matmul %55, %57, %cst_33 {dimension_numbers = #tpu.dot_dimension_numbers<[1], [0], [0], [1], [0, 0, 1, 1], [], []>} : vector<256x32xbf16>, vector<32x128xbf16>, vector<256x128xf32> -> vector<256x128xf32>
    %59 = arith.addf %53, %58 : vector<256x128xf32>
    %60 = arith.negf %59 : vector<256x128xf32>
    %61 = math.exp %60 : vector<256x128xf32>
    %cst_34 = arith.constant 1.000000e+00 : f32
    %62 = vector.broadcast %cst_34 : f32 to vector<256x128xf32>
    %63 = arith.addf %62, %61 : vector<256x128xf32>
    %64 = arith.divf %62, %63 : vector<256x128xf32>
    %65 = math.tanh %59 : vector<256x128xf32>
    %66 = vector.extract_strided_slice %64 {offsets = [0, 0], sizes = [256, 32], strides = [1, 1]} : vector<256x128xf32> to vector<256x32xf32>
    %67 = vector.extract_strided_slice %64 {offsets = [0, 32], sizes = [256, 32], strides = [1, 1]} : vector<256x128xf32> to vector<256x32xf32>
    %68 = vector.extract_strided_slice %64 {offsets = [0, 64], sizes = [256, 32], strides = [1, 1]} : vector<256x128xf32> to vector<256x32xf32>
    %69 = vector.extract_strided_slice %65 {offsets = [0, 96], sizes = [256, 32], strides = [1, 1]} : vector<256x128xf32> to vector<256x32xf32>
    %c0_35 = arith.constant 0 : index
    %c0_36 = arith.constant 0 : index
    %c0_37 = arith.constant 0 : index
    %70 = vector.load %arg5[%c0_35, %c0_36, %c0_37] : memref<1x256x32xf32, #tpu.memory_space<vmem>>, vector<1x256x32xf32>
    %71 = vector.shape_cast %70 : vector<1x256x32xf32> to vector<256x32xf32>
    %72 = arith.mulf %67, %71 : vector<256x32xf32>
    %73 = arith.mulf %66, %69 : vector<256x32xf32>
    %74 = arith.addf %72, %73 : vector<256x32xf32>
    %75 = math.tanh %74 : vector<256x32xf32>
    %76 = arith.mulf %68, %75 : vector<256x32xf32>
    %c0_38 = arith.constant 0 : index
    %c0_39 = arith.constant 0 : index
    %c0_40 = arith.constant 0 : index
    %77 = vector.load %arg5[%c0_38, %c0_39, %c0_40] : memref<1x256x32xf32, #tpu.memory_space<vmem>>, vector<1x256x32xf32>
    %78 = vector.shape_cast %77 : vector<1x256x32xf32> to vector<256x32xf32>
    %79 = vector.shape_cast %74 : vector<256x32xf32> to vector<1x256x32xf32>
    tpu.vector_store %arg5[%c0_38, %c0_39, %c0_40], %79 {strides = array<i32>} : memref<1x256x32xf32, #tpu.memory_space<vmem>>, vector<1x256x32xf32>,
    %c0_41 = arith.constant 0 : index
    %c0_42 = arith.constant 0 : index
    %c0_43 = arith.constant 0 : index
    %c0_44 = arith.constant 0 : index
    %80 = vector.load %arg4[%c0_41, %c0_42, %c0_43, %c0_44] : memref<1x1x256x32xf32, #tpu.memory_space<vmem>>, vector<1x1x256x32xf32>
    %81 = vector.shape_cast %80 : vector<1x1x256x32xf32> to vector<256x32xf32>
    %82 = vector.shape_cast %76 : vector<256x32xf32> to vector<1x1x256x32xf32>
    tpu.vector_store %arg4[%c0_41, %c0_42, %c0_43, %c0_44], %82 {strides = array<i32>} : memref<1x1x256x32xf32, #tpu.memory_space<vmem>>, vector<1x1x256x32xf32>,
    %83 = vector.shape_cast %76 : vector<256x32xf32> to vector<16x16x32xf32>
    %84 = arith.truncf %83 : vector<16x16x32xf32> to vector<16x16x32xbf16>
    %c1_45 = arith.constant 1 : index
    %c1_46 = arith.constant 1 : index
    %c0_47 = arith.constant 0 : index
    %85 = vector.load %arg6[%c1_45, %c1_46, %c0_47] : memref<18x18x32xbf16, #tpu.memory_space<vmem>>, vector<16x16x32xbf16>
    tpu.vector_store %arg6[%c1_45, %c1_46, %c0_47], %84 {strides = array<i32>} : memref<18x18x32xbf16, #tpu.memory_space<vmem>>, vector<16x16x32xbf16>,
    return
  }
  func.func @transform_0(%arg0: i32, %arg1: i32) -> (i32, i32, i32, i32) {
    %c0_i32 = arith.constant 0 : i32
    %c0_i32_0 = arith.constant 0 : i32
    %c0_i32_1 = arith.constant 0 : i32
    return %arg1, %arg0, %c0_i32, %c0_i32_0 : i32, i32, i32, i32
  }
  func.func @transform_1(%arg0: i32, %arg1: i32) -> (i32, i32, i32) {
    %c0_i32 = arith.constant 0 : i32
    %c0_i32_0 = arith.constant 0 : i32
    %c0_i32_1 = arith.constant 0 : i32
    %c0_i32_2 = arith.constant 0 : i32
    return %c0_i32, %c0_i32_0, %c0_i32_1 : i32, i32, i32
  }
  func.func @transform_2(%arg0: i32, %arg1: i32) -> (i32, i32, i32, i32) {
    %c0_i32 = arith.constant 0 : i32
    %c0_i32_0 = arith.constant 0 : i32
    %c0_i32_1 = arith.constant 0 : i32
    return %arg1, %arg0, %c0_i32, %c0_i32_0 : i32, i32, i32, i32
  }
  func.func @transform_3(%arg0: i32, %arg1: i32) -> (i32, i32, i32) {
    %c0_i32 = arith.constant 0 : i32
    %c0_i32_0 = arith.constant 0 : i32
    %c0_i32_1 = arith.constant 0 : i32
    return %arg0, %c0_i32, %c0_i32_0 : i32, i32, i32
  }
}

module attributes {stable_mosaic.version = 11 : i64} {
  func.func @_xproj_kernel(%arg0: i32, %arg1: i32, %arg2: memref<1x1x256x288xbf16, #tpu.memory_space<vmem>>, %arg3: memref<288x128xbf16, #tpu.memory_space<vmem>>, %arg4: memref<1x128xf32, #tpu.memory_space<vmem>>, %arg5: memref<1x1x256x128xf32, #tpu.memory_space<vmem>>) attributes {dimension_semantics = [#tpu.dimension_semantics<parallel>, #tpu.dimension_semantics<parallel>], iteration_bounds = array<i64: 8, 2>, scalar_prefetch = 0 : i64, scratch_operands = 0 : i64, tpu.core_type = #tpu.core_type<tc>, window_params = [{transform_indices = @transform_0, window_bounds = array<i64: 1, 1, 256, 288>}, {pipeline_mode = #tpu.pipeline_mode<synchronous>, transform_indices = @transform_1, window_bounds = array<i64: 288, 128>}, {pipeline_mode = #tpu.pipeline_mode<synchronous>, transform_indices = @transform_2, window_bounds = array<i64: 1, 128>}, {transform_indices = @transform_3, window_bounds = array<i64: 1, 1, 256, 128>}]} {
    %c0 = arith.constant 0 : index
    %c0_0 = arith.constant 0 : index
    %0 = vector.load %arg4[%c0, %c0_0] : memref<1x128xf32, #tpu.memory_space<vmem>>, vector<1x128xf32>
    %c0_1 = arith.constant 0 : index
    %c0_2 = arith.constant 0 : index
    %c0_3 = arith.constant 0 : index
    %c0_4 = arith.constant 0 : index
    %1 = vector.load %arg2[%c0_1, %c0_2, %c0_3, %c0_4] : memref<1x1x256x288xbf16, #tpu.memory_space<vmem>>, vector<1x1x256x288xbf16>
    %2 = vector.shape_cast %1 : vector<1x1x256x288xbf16> to vector<256x288xbf16>
    %c0_5 = arith.constant 0 : index
    %c0_6 = arith.constant 0 : index
    %3 = vector.load %arg3[%c0_5, %c0_6] : memref<288x128xbf16, #tpu.memory_space<vmem>>, vector<288x128xbf16>
    %cst = arith.constant dense<0.000000e+00> : vector<256x128xf32>
    %4 = tpu.matmul %2, %3, %cst {dimension_numbers = #tpu.dot_dimension_numbers<[1], [0], [0], [1], [0, 0, 1, 1], [], []>} : vector<256x288xbf16>, vector<288x128xbf16>, vector<256x128xf32> -> vector<256x128xf32>
    %5 = vector.broadcast %0 : vector<1x128xf32> to vector<256x128xf32>
    %6 = arith.addf %5, %4 : vector<256x128xf32>
    %c0_7 = arith.constant 0 : index
    %c0_8 = arith.constant 0 : index
    %c0_9 = arith.constant 0 : index
    %c0_10 = arith.constant 0 : index
    %7 = vector.load %arg5[%c0_7, %c0_8, %c0_9, %c0_10] : memref<1x1x256x128xf32, #tpu.memory_space<vmem>>, vector<1x1x256x128xf32>
    %8 = vector.shape_cast %7 : vector<1x1x256x128xf32> to vector<256x128xf32>
    %9 = vector.shape_cast %6 : vector<256x128xf32> to vector<1x1x256x128xf32>
    tpu.vector_store %arg5[%c0_7, %c0_8, %c0_9, %c0_10], %9 {strides = array<i32>} : memref<1x1x256x128xf32, #tpu.memory_space<vmem>>, vector<1x1x256x128xf32>,
    return
  }
  func.func @transform_0(%arg0: i32, %arg1: i32) -> (i32, i32, i32, i32) {
    %c0_i32 = arith.constant 0 : i32
    %c0_i32_0 = arith.constant 0 : i32
    %c0_i32_1 = arith.constant 0 : i32
    return %arg0, %arg1, %c0_i32, %c0_i32_0 : i32, i32, i32, i32
  }
  func.func @transform_1(%arg0: i32, %arg1: i32) -> (i32, i32) {
    %c0_i32 = arith.constant 0 : i32
    %c0_i32_0 = arith.constant 0 : i32
    %c0_i32_1 = arith.constant 0 : i32
    return %c0_i32, %c0_i32_0 : i32, i32
  }
  func.func @transform_2(%arg0: i32, %arg1: i32) -> (i32, i32) {
    %c0_i32 = arith.constant 0 : i32
    %c0_i32_0 = arith.constant 0 : i32
    %c0_i32_1 = arith.constant 0 : i32
    return %c0_i32, %c0_i32_0 : i32, i32
  }
  func.func @transform_3(%arg0: i32, %arg1: i32) -> (i32, i32, i32, i32) {
    %c0_i32 = arith.constant 0 : i32
    %c0_i32_0 = arith.constant 0 : i32
    %c0_i32_1 = arith.constant 0 : i32
    return %arg0, %arg1, %c0_i32, %c0_i32_0 : i32, i32, i32, i32
  }
}

module attributes {stable_mosaic.version = 11 : i64} {
  func.func @_lastconv_kernel(%arg0: i32, %arg1: memref<1x256x288xbf16, #tpu.memory_space<vmem>>, %arg2: memref<288x128xbf16, #tpu.memory_space<vmem>>, %arg3: memref<1x128xf32, #tpu.memory_space<vmem>>, %arg4: memref<1x256x128xf32, #tpu.memory_space<vmem>>) attributes {dimension_semantics = [#tpu.dimension_semantics<parallel>], iteration_bounds = array<i64: 2>, scalar_prefetch = 0 : i64, scratch_operands = 0 : i64, tpu.core_type = #tpu.core_type<tc>, window_params = [{transform_indices = @transform_0, window_bounds = array<i64: 1, 256, 288>}, {pipeline_mode = #tpu.pipeline_mode<synchronous>, transform_indices = @transform_1, window_bounds = array<i64: 288, 128>}, {pipeline_mode = #tpu.pipeline_mode<synchronous>, transform_indices = @transform_2, window_bounds = array<i64: 1, 128>}, {transform_indices = @transform_3, window_bounds = array<i64: 1, 256, 128>}]} {
    %c0 = arith.constant 0 : index
    %c0_0 = arith.constant 0 : index
    %0 = vector.load %arg3[%c0, %c0_0] : memref<1x128xf32, #tpu.memory_space<vmem>>, vector<1x128xf32>
    %c0_1 = arith.constant 0 : index
    %c0_2 = arith.constant 0 : index
    %c0_3 = arith.constant 0 : index
    %1 = vector.load %arg1[%c0_1, %c0_2, %c0_3] : memref<1x256x288xbf16, #tpu.memory_space<vmem>>, vector<1x256x288xbf16>
    %2 = vector.shape_cast %1 : vector<1x256x288xbf16> to vector<256x288xbf16>
    %c0_4 = arith.constant 0 : index
    %c0_5 = arith.constant 0 : index
    %3 = vector.load %arg2[%c0_4, %c0_5] : memref<288x128xbf16, #tpu.memory_space<vmem>>, vector<288x128xbf16>
    %cst = arith.constant dense<0.000000e+00> : vector<256x128xf32>
    %4 = tpu.matmul %2, %3, %cst {dimension_numbers = #tpu.dot_dimension_numbers<[1], [0], [0], [1], [0, 0, 1, 1], [], []>} : vector<256x288xbf16>, vector<288x128xbf16>, vector<256x128xf32> -> vector<256x128xf32>
    %5 = vector.broadcast %0 : vector<1x128xf32> to vector<256x128xf32>
    %6 = arith.addf %5, %4 : vector<256x128xf32>
    %cst_6 = arith.constant 0.000000e+00 : f32
    %7 = vector.broadcast %cst_6 : f32 to vector<256x128xf32>
    %8 = arith.maximumf %6, %7 : vector<256x128xf32>
    %c0_7 = arith.constant 0 : index
    %c0_8 = arith.constant 0 : index
    %c0_9 = arith.constant 0 : index
    %9 = vector.load %arg4[%c0_7, %c0_8, %c0_9] : memref<1x256x128xf32, #tpu.memory_space<vmem>>, vector<1x256x128xf32>
    %10 = vector.shape_cast %9 : vector<1x256x128xf32> to vector<256x128xf32>
    %11 = vector.shape_cast %8 : vector<256x128xf32> to vector<1x256x128xf32>
    tpu.vector_store %arg4[%c0_7, %c0_8, %c0_9], %11 {strides = array<i32>} : memref<1x256x128xf32, #tpu.memory_space<vmem>>, vector<1x256x128xf32>,
    return
  }
  func.func @transform_0(%arg0: i32) -> (i32, i32, i32) {
    %c0_i32 = arith.constant 0 : i32
    %c0_i32_0 = arith.constant 0 : i32
    %c0_i32_1 = arith.constant 0 : i32
    return %arg0, %c0_i32, %c0_i32_0 : i32, i32, i32
  }
  func.func @transform_1(%arg0: i32) -> (i32, i32) {
    %c0_i32 = arith.constant 0 : i32
    %c0_i32_0 = arith.constant 0 : i32
    %c0_i32_1 = arith.constant 0 : i32
    return %c0_i32, %c0_i32_0 : i32, i32
  }
  func.func @transform_2(%arg0: i32) -> (i32, i32) {
    %c0_i32 = arith.constant 0 : i32
    %c0_i32_0 = arith.constant 0 : i32
    %c0_i32_1 = arith.constant 0 : i32
    return %c0_i32, %c0_i32_0 : i32, i32
  }
  func.func @transform_3(%arg0: i32) -> (i32, i32, i32) {
    %c0_i32 = arith.constant 0 : i32
    %c0_i32_0 = arith.constant 0 : i32
    %c0_i32_1 = arith.constant 0 : i32
    return %arg0, %c0_i32, %c0_i32_0 : i32, i32, i32
  }
}

</mosaic_0001>

<bundles_post_ra>
// kernel: clstm_forward.5
= control target key start
LH: loop header
LB: loop body
LE: loop exit
PB: predicated region body
PF: predicated region fallthrough
CT: control target
= control target key end

     0   :  { %s953_s12 = smov 0   ;;  %s955_s13 = smov 0   ;;  %s1126_s0 = inlined_call_operand.vmem [shape: bf16[8,2,256,36], index: 0, kind: input, shape index: {}]   ;;  %s1127_s1 = inlined_call_operand.vmem [shape: bf16[36,128], index: 1, kind: input, shape index: {}]   ;;  %s1128_s2 = inlined_call_operand.vmem [shape: f32[1,128], index: 2, kind: input, shape index: {}]   ;;  %s1129_s3 = inlined_call_operand.vmem [shape: f32[8,2,256,128], index: 3, kind: output, shape index: {}]  }
   0x1   :  { %s957_s14 = smov 0   ;;  %s959_s15 = smov 0  }
   0x2   :  { %s961_s16 = smov 0  }
   0x3 LB: > { %s22_s17 = sadd.s32 1, %s923_s14  ;;  %s25_s18 = sadd.s32 1, %s927_s15  ;;  %s931_s16 = sphi %s961_s16, %s13_s16   ;;  %s927_s15 = sphi %s959_s15, %s1133_s15   ;;  %s923_s14 = sphi %s957_s14, %s1132_s14   ;;  %s919_s13 = sphi %s955_s13, %s1131_s13   ;;  %s915_s12 = sphi %s953_s12, %s1130_s12  }
   0x4   : > { %p23_p0 = scmp.ge.s32.totalorder %s22_s17, 2  ;;  %p724_p1 = scmp.ge.s32.totalorder %s931_s16, 1 }
   0x5   : > { %p157_p2 = scmp.lt.s32.totalorder %s931_s16, 17 }
   0x6   : > { %s1135_s17 = smov (%p23_p0, %s22_s17), 0  ;;  %s1137_s18 = smov (!%p23_p0, %s25_s18), %s927_s15 }
   0x7   : > { %p158_p3 = pnand %p724_p1, %p157_p2  ;;  %p27_p4 = scmp.ge.s32.totalorder %s1137_s18, 8 }
   0x8   : > { %p189_p5 = scmp.lt.s32.totalorder (!%p158_p3), %s919_s13, 7  ;;  %p191_p6 = scmp.lt.s32.totalorder (!%p158_p3), %s915_s12, 1 }
   0x9   : > { %s1139_s18 = smov (%p27_p4, %s1137_s18), 0  ;;  %161 = sbr.rel (%p158_p3) target bundleno = 253 (0xfd), region = 32 }
   0xe   : > { %v874_v0 = vld [vmem:[%s1127_s1 + $0x10] ss:$0 sps:$4 sm:$0x33]   ;;  %vm390_vm0 = vcmask 1041408   ;;  %v875_v1 = vld [vmem:[%s1127_s1 + $0x8] sm:$0xff]   ;;  %s1141_s13 = smov (!%p189_p5, %s919_s13), 7 }
   0xf   : > { %832 = vmatprep.subr.msk.bf16.mxu0 %vm390_vm0, %v874_v0  ;;  %833 = vmatprep.subr.msk.bf16.mxu1 %vm390_vm0, %v874_v0  ;;  %v392_v2 = vsel %vm390_vm0, %v874_v0, 0  ;;  %v876_v3 = vld [vmem:[%s1127_s1] sm:$0xff]   ;;  %s726_s25 = sshll.u32 %s1141_s13, 6  ;;  %s1143_s12 = smov (!%p191_p6, %s915_s12), 1  ;;  %vm341_vm1 = vcmask 293888  }
  0x10   : > { %789 = vmatpush3.bf16.msra.mxu0 %v392_v2  ;;  %829 = vmatpush3.bf16.msra.mxu1 %v392_v2  ;;  %s725_s26 = sshll.u32 %s1143_s12, 5  ;;  %v1040_v20 = vld [vmem:[%s1128_s2] ss:$0 sm:$0xff] }
  0x11   : > { %790 = vmatprep.subr.bf16.mxu0 %v875_v1  ;;  %827 = vmatprep.subr.bf16.mxu1 %v875_v1  ;;  %s996_s27 = sadd.s32 %s726_s25, %s725_s26 }
  0x12   : > { %s727_s28 = sshll.u32 %s996_s27, 2  ;;  %s730_s5 = sshll.u32 %s996_s27, 3 }
  0x13   : > { %s1002_s4 = scalar_lea.vmem %s1126_s0, %s727_s28  ;;  %s1045_s10 = scalar_lea.vmem %s1129_s3, %s730_s5 }
  0x14   : > { %791 = vmatpush3.bf16.msra.mxu0 %v875_v1  ;;  %830 = vmatpush3.bf16.msra.mxu1 %v875_v1  ;;  %v877_v4 = vld [vmem:[%s1002_s4] sm:$0xff]   ;;  %v879_v6 = vld [vmem:[%s1002_s4 + $0x8] sm:$0xff]   ;;  %v881_v8 = vld [vmem:[%s1002_s4 + $0x10] sm:$0xff]  }
  0x15   : > { %792 = vmatprep.subr.bf16.mxu0 %v876_v3  ;;  %828 = vmatprep.subr.bf16.mxu1 %v876_v3  ;;  %v878_v5 = vld [vmem:[%s1002_s4 + $0x40] sm:$0xff]   ;;  %v880_v7 = vld [vmem:[%s1002_s4 + $0x48] sm:$0xff]   ;;  %v882_v9 = vld [vmem:[%s1002_s4 + $0x50] sm:$0xff]  }
  0x16   : > { %794 = vmatprep.mubr.msk.bf16.mxu0 %vm341_vm1, %v877_v4  ;;  %810 = vmatprep.mubr.msk.bf16.mxu1 %vm341_vm1, %v878_v5  ;;  %v883_v10 = vld [vmem:[%s1002_s4 + $0x18] sm:$0xff]   ;;  %v885_v12 = vld [vmem:[%s1002_s4 + $0x20] sm:$0xff]   ;;  %v887_v14 = vld [vmem:[%s1002_s4 + $0x28] sm:$0xff]  }
  0x17   : > { %v884_v11 = vld [vmem:[%s1002_s4 + $0x58] sm:$0xff]   ;;  %v886_v13 = vld [vmem:[%s1002_s4 + $0x60] sm:$0xff]   ;;  %v888_v15 = vld [vmem:[%s1002_s4 + $0x68] sm:$0xff]  }
  0x18   : > { %793 = vmatpush3.bf16.msra.mxu0 %v876_v3  ;;  %831 = vmatpush3.bf16.msra.mxu1 %v876_v3  ;;  %v889_v16 = vld [vmem:[%s1002_s4 + $0x30] sm:$0xff]   ;;  %v891_v18 = vld [vmem:[%s1002_s4 + $0x38] sm:$0xff]  }
  0x19   : > { %v890_v17 = vld [vmem:[%s1002_s4 + $0x70] sm:$0xff]   ;;  %v892_v19 = vld [vmem:[%s1002_s4 + $0x78] sm:$0xff]  }
  0x1b   : > { %795 = vmatmul.mubr.msk.bf16.vlgmr.msra.gmra.mxu0 %vm341_vm1, %v879_v6  ;;  %811 = vmatmul.mubr.msk.bf16.vlgmr.msra.gmra.mxu1 %vm341_vm1, %v880_v7 }
  0x1c   : > { %798 = vmatprep.mubr.msk.bf16.mxu0 %vm341_vm1, %v881_v8  ;;  %814 = vmatprep.mubr.msk.bf16.mxu1 %vm341_vm1, %v882_v9 }
  0x23   : > { %799 = vmatmul.mubr.msk.bf16.gmra.mxu0 %vm341_vm1, %v883_v10  ;;  %815 = vmatmul.mubr.msk.bf16.gmra.mxu1 %vm341_vm1, %v884_v11 }
  0x24   : > { %802 = vmatprep.mubr.msk.bf16.mxu0 %vm341_vm1, %v885_v12  ;;  %818 = vmatprep.mubr.msk.bf16.mxu1 %vm341_vm1, %v886_v13 }
  0x2b   : > { %803 = vmatmul.mubr.msk.bf16.gmra.mxu0 %vm341_vm1, %v887_v14  ;;  %819 = vmatmul.mubr.msk.bf16.gmra.mxu1 %vm341_vm1, %v888_v15 }
  0x2c   : > { %806 = vmatprep.mubr.msk.bf16.mxu0 %vm341_vm1, %v889_v16  ;;  %822 = vmatprep.mubr.msk.bf16.mxu1 %vm341_vm1, %v890_v17 }
  0x33   : > { %807 = vmatmul.mubr.msk.bf16.gmra.mxu0 %vm341_vm1, %v891_v18  ;;  %823 = vmatmul.mubr.msk.bf16.gmra.mxu1 %vm341_vm1, %v892_v19 }
  0xdb   : > { %v796_v21 = vpop.f32.mrf.mxu0  ;;  %v812_v23 = vpop.f32.mrf.mxu1 }
  0xdc   : > { %v563_v22 = vadd.f32 %v796_v21, %v1040_v20  ;;  %v579_v24 = vadd.f32 %v812_v23, %v1040_v20 }
  0xdd   : > { %v428_v25 = vpop.f32.mrf.mxu0  ;;  %v492_v27 = vpop.f32.mrf.mxu1 }
  0xde   : > { %595 = vst [vmem:[%s1045_s10 + $0x10] sm:$0xff] %v563_v22  ;;  %v561_v26 = vadd.f32 %v1040_v20, %v428_v25  ;;  %611 = vst [vmem:[%s1045_s10 + $0x90] sm:$0xff] %v579_v24  ;;  %v577_v28 = vadd.f32 %v1040_v20, %v492_v27 }
  0xdf   : > { %v797_v29 = vpop.f32.mrf.mxu0  ;;  %v813_v31 = vpop.f32.mrf.mxu1 }
  0xe0   : > { %593 = vst [vmem:[%s1045_s10] sm:$0xff] %v561_v26  ;;  %v564_v30 = vadd.f32 %v797_v29, %v1040_v20  ;;  %609 = vst [vmem:[%s1045_s10 + $0x80] sm:$0xff] %v577_v28  ;;  %v580_v32 = vadd.f32 %v813_v31, %v1040_v20 }
  0xe1   : > { %v431_v33 = vpop.f32.mrf.mxu0  ;;  %v495_v35 = vpop.f32.mrf.mxu1 }
  0xe2   : > { %596 = vst [vmem:[%s1045_s10 + $0x18] sm:$0xff] %v564_v30  ;;  %v562_v34 = vadd.f32 %v1040_v20, %v431_v33  ;;  %612 = vst [vmem:[%s1045_s10 + $0x98] sm:$0xff] %v580_v32  ;;  %v578_v36 = vadd.f32 %v1040_v20, %v495_v35 }
  0xe3   : > { %v800_v37 = vpop.f32.mrf.mxu0  ;;  %v816_v39 = vpop.f32.mrf.mxu1 }
  0xe4   : > { %594 = vst [vmem:[%s1045_s10 + $0x8] sm:$0xff] %v562_v34  ;;  %v567_v38 = vadd.f32 %v800_v37, %v1040_v20  ;;  %610 = vst [vmem:[%s1045_s10 + $0x88] sm:$0xff] %v578_v36  ;;  %v583_v40 = vadd.f32 %v816_v39, %v1040_v20 }
  0xe5   : > { %v444_v41 = vpop.f32.mrf.mxu0  ;;  %v508_v43 = vpop.f32.mrf.mxu1 }
  0xe6   : > { %599 = vst [vmem:[%s1045_s10 + $0x30] sm:$0xff] %v567_v38  ;;  %v565_v42 = vadd.f32 %v1040_v20, %v444_v41  ;;  %615 = vst [vmem:[%s1045_s10 + $0xb0] sm:$0xff] %v583_v40  ;;  %v581_v44 = vadd.f32 %v1040_v20, %v508_v43 }
  0xe7   : > { %v801_v45 = vpop.f32.mrf.mxu0  ;;  %v817_v47 = vpop.f32.mrf.mxu1 }
  0xe8   : > { %597 = vst [vmem:[%s1045_s10 + $0x20] sm:$0xff] %v565_v42  ;;  %v568_v46 = vadd.f32 %v801_v45, %v1040_v20  ;;  %613 = vst [vmem:[%s1045_s10 + $0xa0] sm:$0xff] %v581_v44  ;;  %v584_v48 = vadd.f32 %v817_v47, %v1040_v20 }
  0xe9   : > { %v447_v49 = vpop.f32.mrf.mxu0  ;;  %v511_v51 = vpop.f32.mrf.mxu1 }
  0xea   : > { %600 = vst [vmem:[%s1045_s10 + $0x38] sm:$0xff] %v568_v46  ;;  %v566_v50 = vadd.f32 %v1040_v20, %v447_v49  ;;  %616 = vst [vmem:[%s1045_s10 + $0xb8] sm:$0xff] %v584_v48  ;;  %v582_v52 = vadd.f32 %v1040_v20, %v511_v51 }
  0xeb   : > { %v804_v53 = vpop.f32.mrf.mxu0  ;;  %v820_v55 = vpop.f32.mrf.mxu1 }
  0xec   : > { %598 = vst [vmem:[%s1045_s10 + $0x28] sm:$0xff] %v566_v50  ;;  %v571_v54 = vadd.f32 %v804_v53, %v1040_v20  ;;  %614 = vst [vmem:[%s1045_s10 + $0xa8] sm:$0xff] %v582_v52  ;;  %v587_v56 = vadd.f32 %v820_v55, %v1040_v20 }
  0xed   : > { %v460_v57 = vpop.f32.mrf.mxu0  ;;  %v524_v59 = vpop.f32.mrf.mxu1 }
  0xee   : > { %603 = vst [vmem:[%s1045_s10 + $0x50] sm:$0xff] %v571_v54  ;;  %v569_v58 = vadd.f32 %v1040_v20, %v460_v57  ;;  %619 = vst [vmem:[%s1045_s10 + $0xd0] sm:$0xff] %v587_v56  ;;  %v585_v60 = vadd.f32 %v1040_v20, %v524_v59 }
  0xef   : > { %v805_v61 = vpop.f32.mrf.mxu0  ;;  %v821_v63 = vpop.f32.mrf.mxu1 }
  0xf0   : > { %601 = vst [vmem:[%s1045_s10 + $0x40] sm:$0xff] %v569_v58  ;;  %v572_v62 = vadd.f32 %v805_v61, %v1040_v20  ;;  %617 = vst [vmem:[%s1045_s10 + $0xc0] sm:$0xff] %v585_v60  ;;  %v588_v0 = vadd.f32 %v821_v63, %v1040_v20 }
  0xf1   : > { %v463_v1 = vpop.f32.mrf.mxu0  ;;  %v527_v3 = vpop.f32.mrf.mxu1 }
  0xf2   : > { %604 = vst [vmem:[%s1045_s10 + $0x58] sm:$0xff] %v572_v62  ;;  %v570_v2 = vadd.f32 %v1040_v20, %v463_v1  ;;  %620 = vst [vmem:[%s1045_s10 + $0xd8] sm:$0xff] %v588_v0  ;;  %v586_v4 = vadd.f32 %v1040_v20, %v527_v3 }
  0xf3   : > { %v808_v5 = vpop.f32.mrf.mxu0  ;;  %v824_v7 = vpop.f32.mrf.mxu1 }
  0xf4   : > { %602 = vst [vmem:[%s1045_s10 + $0x48] sm:$0xff] %v570_v2  ;;  %v575_v6 = vadd.f32 %v808_v5, %v1040_v20  ;;  %618 = vst [vmem:[%s1045_s10 + $0xc8] sm:$0xff] %v586_v4  ;;  %v591_v8 = vadd.f32 %v824_v7, %v1040_v20 }
  0xf5   : > { %v476_v9 = vpop.f32.mrf.mxu0  ;;  %v540_v11 = vpop.f32.mrf.mxu1 }
  0xf6   : > { %607 = vst [vmem:[%s1045_s10 + $0x70] sm:$0xff] %v575_v6  ;;  %v573_v10 = vadd.f32 %v1040_v20, %v476_v9  ;;  %623 = vst [vmem:[%s1045_s10 + $0xf0] sm:$0xff] %v591_v8  ;;  %v589_v12 = vadd.f32 %v1040_v20, %v540_v11 }
  0xf7   : > { %v809_v13 = vpop.f32.mrf.mxu0  ;;  %v825_v15 = vpop.f32.mrf.mxu1 }
  0xf8   : > { %605 = vst [vmem:[%s1045_s10 + $0x60] sm:$0xff] %v573_v10  ;;  %v576_v14 = vadd.f32 %v809_v13, %v1040_v20  ;;  %621 = vst [vmem:[%s1045_s10 + $0xe0] sm:$0xff] %v589_v12  ;;  %v592_v16 = vadd.f32 %v825_v15, %v1040_v20 }
  0xf9   : > { %v479_v17 = vpop.f32.mrf.mxu0  ;;  %v543_v19 = vpop.f32.mrf.mxu1 }
  0xfa   : > { %608 = vst [vmem:[%s1045_s10 + $0x78] sm:$0xff] %v576_v14  ;;  %v574_v18 = vadd.f32 %v1040_v20, %v479_v17  ;;  %624 = vst [vmem:[%s1045_s10 + $0xf8] sm:$0xff] %v592_v16  ;;  %v590_v21 = vadd.f32 %v1040_v20, %v543_v19 }
  0xfc   : > { %606 = vst [vmem:[%s1045_s10 + $0x68] sm:$0xff] %v574_v18  ;;  %622 = vst [vmem:[%s1045_s10 + $0xe8] sm:$0xff] %v590_v21 }
  0xfd PF: > { %s13_s16 = sadd.s32 1, %s931_s16   ;;  %s1130_s12 = smov %s923_s14 }
  0xfe   : > { %p10_p7 = scmp.ge.s32.totalorder %s13_s16, 18   ;;  %s1131_s13 = smov %s927_s15 }
  0xff   : > { %s1132_s14 = smov %s1135_s17  ;;  %s1133_s15 = smov %s1139_s18 }
 0x100   :  { %12 = sbr.rel (!%p10_p7) target bundleno = 3 (0x3), region = 62 }

// kernel: clstm_forward.6
= control target key start
LH: loop header
LB: loop body
LE: loop exit
PB: predicated region body
PF: predicated region fallthrough
CT: control target
= control target key end

     0   :  { %9 = vsyncpa [#allocation4], 0  ;;  %s9138_s0 = inlined_call_operand.vmem [shape: f32[8,2,256,128], index: 0, kind: input, shape index: {}]   ;;  %s9139_s1 = inlined_call_operand.vmem [shape: bf16[9,32,128], index: 1, kind: input, shape index: {}]   ;;  %s9140_s2 = inlined_call_operand.vmem [shape: f32[8,2,256,32], index: 2, kind: output, shape index: {0}]   ;;  %s9141_s3 = inlined_call_operand.hbm [shape: f32[2,256,32], index: 3, kind: output, shape index: {1}]  }
   0x1   :  { %11 = vsyncpa [#allocation4 + $0x1], 0  ;;  %s6624_s12 = smov 0   ;;  %s6626_s13 = smov 0  }
   0x2   :  { %s6628_s14 = smov 0   ;;  %s6630_s15 = smov 0  }
   0x3   :  { %s6632_s16 = smov 0   ;;  %s6634_s17 = smov 0  }
   0x4   :  { %s6636_s18 = smov 0   ;;  %s6638_s19 = smov 0  }
   0x5 LB: > { %s5261_s20 = sadd.s32 4294967295, %s6594_s19   ;;  %s5262_s21 = sadd.s32 4294967294, %s6594_s19   ;;  %s6594_s19 = sphi %s6638_s19, %s17_s19   ;;  %s6590_s18 = sphi %s6636_s18, %s9291_s18   ;;  %s6586_s17 = sphi %s6634_s17, %s9290_s17   ;;  %s6582_s16 = sphi %s6632_s16, %s9289_s16   ;;  %s6578_s15 = sphi %s6630_s15, %s9288_s15   ;;  %s6574_s14 = sphi %s6628_s14, %s9287_s14   ;;  %s6570_s13 = sphi %s6626_s13, %s9286_s13   ;;  %s6566_s12 = sphi %s6624_s12, %s9285_s12  }
   0x6   : > { %s26_s22 = sadd.s32 1, %s6586_s17  ;;  %s29_s23 = sadd.s32 1, %s6590_s18 }
   0x7   : > { %p27_p0 = scmp.ge.s32.totalorder %s26_s22, 8  ;;  %p123_p1 = scmp.ne.s32.totalorder %s6574_s14, %s6570_s13 }
   0x8   : > { %p124_p2 = scmp.eq.s32.totalorder %s5261_s20, 15  ;;  %p129_p4 = scmp.ne.s32.totalorder %s6570_s13, %s6566_s12 }
   0x9   : > { %s9293_s22 = smov (%p27_p0, %s26_s22), 0  ;;  %s9295_s23 = smov (!%p27_p0, %s29_s23), %s6590_s18 }
   0xa   : > { %p6673_p3 = por %p124_p2, %p123_p1  ;;  %p31_p5 = scmp.ge.s32.totalorder %s9295_s23, 2 }
   0xb   : > { %p130_p6 = scmp.eq.s32.totalorder %s5262_s21, 15  ;;  %p5265_p7 = scmp.ge.s32.totalorder %s6594_s19, 1 }
   0xc   : > { %p163_p8 = scmp.lt.s32.totalorder %s6594_s19, 17  ;;  %s9297_s23 = smov (%p31_p5, %s9295_s23), 0 }
   0xd   : > { %9184 = sst [smem:[#allocation6_spill]] %s9297_s23  ;;  %p6683_p9 = por %p130_p6, %p129_p4 }
   0xe   : > { %p164_p10 = pnand %p5265_p7, %p163_p8  ;;  %s110_s26 = ssub.s32 %s6590_s18, %s9297_s23 }
   0xf   : > { %s113_s27 = sadd.s32 1, %s6574_s14  ;;  %p111_p11 = scmp.eq.s32.totalorder %s110_s26, 0 }
  0x10   : > { %167 = sbr.rel (%p164_p10) target bundleno = 1196 (0x4ac), region = 28 }
  0x11   : > { %s6691_s28 = scalar_select %p111_p11, %s6574_s14, %s113_s27  }
  0x15   : > { %s197_s29 = sand.u32 1, %s6570_s13   ;;  %p200_p12 = scmp.lt.s32.totalorder %s6578_s15, 7 }
  0x16   : > { %s5266_s30 = sshll.u32 %s197_s29, 8  ;;  %p202_p13 = scmp.lt.s32.totalorder %s6582_s16, 1 }
  0x17   : > { %s201_s4 = scalar_select %p200_p12, %s6578_s15, 7 }
  0x18   : > { %s203_s5 = scalar_select %p202_p13, %s6582_s16, 1 }
  0x19   : > { %s5268_s6 = sshll.u32 %s201_s4, 6  ;;  %s6710_s23 = scalar_lea.vmem [#allocation3], %s5266_s30 }
  0x1a   : > { %s5267_s7 = sshll.u32 %s203_s5, 5  ;;  %p5273_p0 = scmp.ne.s32.totalorder %s6578_s15, 0 }
  0x1b   : > { %s206_s8 = sadd.s32 %s5268_s6, %s5267_s7 }
  0x1c   : > { %s5269_s9 = sshll.u32 %s206_s8, 3  ;;  %222 = sbr.rel (%p5273_p0) target bundleno = 77 (0x4d), region = 32 }
  0x1d   : > { %s6703_s20 = scalar_lea.vmem %s9138_s0, %s5269_s9  ;;  %s6708_s27 = scalar_lea.vmem %s9140_s2, %s5269_s9 }
  0x21   : > { %vm223_vm0 = vcmask 261120   ;;  %vm256_vm1 = vcmask 257024   ;;  %v6596_v0 = vmov 0.0   ;;  %v6597_v1 = vmov 0  }
  0x22   : > { %224 = vst.msk [vmem:[%s6710_s23] sm:$0xff] %vm223_vm0, %v6596_v0  ;;  %225 = vst.msk [vmem:[%s6710_s23 + $0x8] sm:$0xff] %vm223_vm0, %v6596_v0  ;;  %vm259_vm2 = vcmask 253952  }
  0x23   : > { %226 = vst.msk [vmem:[%s6710_s23 + $0x10] sm:$0xff] %vm223_vm0, %v6596_v0  ;;  %227 = vst.msk [vmem:[%s6710_s23 + $0x18] sm:$0xff] %vm223_vm0, %v6596_v0 }
  0x24   : > { %228 = vst.msk [vmem:[%s6710_s23 + $0x20] sm:$0xff] %vm223_vm0, %v6596_v0  ;;  %229 = vst.msk [vmem:[%s6710_s23 + $0x28] sm:$0xff] %vm223_vm0, %v6596_v0 }
  0x25   : > { %230 = vst.msk [vmem:[%s6710_s23 + $0x30] sm:$0xff] %vm223_vm0, %v6596_v0  ;;  %231 = vst.msk [vmem:[%s6710_s23 + $0x38] sm:$0xff] %vm223_vm0, %v6596_v0 }
  0x26   : > { %232 = vst.msk [vmem:[%s6710_s23 + $0x40] sm:$0xff] %vm223_vm0, %v6596_v0  ;;  %233 = vst.msk [vmem:[%s6710_s23 + $0x48] sm:$0xff] %vm223_vm0, %v6596_v0 }
  0x27   : > { %234 = vst.msk [vmem:[%s6710_s23 + $0x50] sm:$0xff] %vm223_vm0, %v6596_v0  ;;  %235 = vst.msk [vmem:[%s6710_s23 + $0x58] sm:$0xff] %vm223_vm0, %v6596_v0 }
  0x28   : > { %236 = vst.msk [vmem:[%s6710_s23 + $0x60] sm:$0xff] %vm223_vm0, %v6596_v0  ;;  %237 = vst.msk [vmem:[%s6710_s23 + $0x68] sm:$0xff] %vm223_vm0, %v6596_v0 }
  0x29   : > { %238 = vst.msk [vmem:[%s6710_s23 + $0x70] sm:$0xff] %vm223_vm0, %v6596_v0  ;;  %239 = vst.msk [vmem:[%s6710_s23 + $0x78] sm:$0xff] %vm223_vm0, %v6596_v0 }
  0x2a   : > { %240 = vst.msk [vmem:[%s6710_s23 + $0x80] sm:$0xff] %vm223_vm0, %v6596_v0  ;;  %241 = vst.msk [vmem:[%s6710_s23 + $0x88] sm:$0xff] %vm223_vm0, %v6596_v0 }
  0x2b   : > { %242 = vst.msk [vmem:[%s6710_s23 + $0x90] sm:$0xff] %vm223_vm0, %v6596_v0  ;;  %243 = vst.msk [vmem:[%s6710_s23 + $0x98] sm:$0xff] %vm223_vm0, %v6596_v0 }
  0x2c   : > { %244 = vst.msk [vmem:[%s6710_s23 + $0xa0] sm:$0xff] %vm223_vm0, %v6596_v0  ;;  %245 = vst.msk [vmem:[%s6710_s23 + $0xa8] sm:$0xff] %vm223_vm0, %v6596_v0 }
  0x2d   : > { %246 = vst.msk [vmem:[%s6710_s23 + $0xb0] sm:$0xff] %vm223_vm0, %v6596_v0  ;;  %247 = vst.msk [vmem:[%s6710_s23 + $0xb8] sm:$0xff] %vm223_vm0, %v6596_v0 }
  0x2e   : > { %248 = vst.msk [vmem:[%s6710_s23 + $0xc0] sm:$0xff] %vm223_vm0, %v6596_v0  ;;  %249 = vst.msk [vmem:[%s6710_s23 + $0xc8] sm:$0xff] %vm223_vm0, %v6596_v0 }
  0x2f   : > { %250 = vst.msk [vmem:[%s6710_s23 + $0xd0] sm:$0xff] %vm223_vm0, %v6596_v0  ;;  %251 = vst.msk [vmem:[%s6710_s23 + $0xd8] sm:$0xff] %vm223_vm0, %v6596_v0 }
  0x30   : > { %252 = vst.msk [vmem:[%s6710_s23 + $0xe0] sm:$0xff] %vm223_vm0, %v6596_v0  ;;  %253 = vst.msk [vmem:[%s6710_s23 + $0xe8] sm:$0xff] %vm223_vm0, %v6596_v0 }
  0x31   : > { %254 = vst.msk [vmem:[%s6710_s23 + $0xf0] sm:$0xff] %vm223_vm0, %v6596_v0  ;;  %255 = vst.msk [vmem:[%s6710_s23 + $0xf8] sm:$0xff] %vm223_vm0, %v6596_v0 }
  0x32   : > { %257 = vst.msk [vmem:[#allocation2] sm:$0xf] %vm256_vm1, %v6597_v1  ;;  %258 = vst.msk [vmem:[#allocation2 + $0x4] sm:$0xf] %vm256_vm1, %v6597_v1 }
  0x33   : > { %261 = vst.msk [vmem:[#allocation2 + $0xc] sm:$0xf] %vm256_vm1, %v6597_v1  ;;  %262 = vst.msk [vmem:[#allocation2 + $0x10] sm:$0xf] %vm256_vm1, %v6597_v1 }
  0x34   : > { %264 = vst.msk [vmem:[#allocation2 + $0x18] sm:$0xf] %vm256_vm1, %v6597_v1  ;;  %265 = vst.msk [vmem:[#allocation2 + $0x1c] sm:$0xf] %vm256_vm1, %v6597_v1 }
  0x35   : > { %267 = vst.msk [vmem:[#allocation2 + $0x24] sm:$0xf] %vm256_vm1, %v6597_v1  ;;  %268 = vst.msk [vmem:[#allocation2 + $0x28] sm:$0xf] %vm256_vm1, %v6597_v1 }
  0x36   : > { %270 = vst.msk [vmem:[#allocation2 + $0x30] sm:$0xf] %vm256_vm1, %v6597_v1  ;;  %271 = vst.msk [vmem:[#allocation2 + $0x34] sm:$0xf] %vm256_vm1, %v6597_v1 }
  0x37   : > { %273 = vst.msk [vmem:[#allocation2 + $0x3c] sm:$0xf] %vm256_vm1, %v6597_v1  ;;  %274 = vst.msk [vmem:[#allocation2 + $0x40] sm:$0xf] %vm256_vm1, %v6597_v1 }
  0x38   : > { %276 = vst.msk [vmem:[#allocation2 + $0x48] sm:$0xf] %vm256_vm1, %v6597_v1  ;;  %277 = vst.msk [vmem:[#allocation2 + $0x4c] sm:$0xf] %vm256_vm1, %v6597_v1 }
  0x39   : > { %279 = vst.msk [vmem:[#allocation2 + $0x54] sm:$0xf] %vm256_vm1, %v6597_v1  ;;  %280 = vst.msk [vmem:[#allocation2 + $0x58] sm:$0xf] %vm256_vm1, %v6597_v1 }
  0x3a   : > { %282 = vst.msk [vmem:[#allocation2 + $0x60] sm:$0xf] %vm256_vm1, %v6597_v1  ;;  %283 = vst.msk [vmem:[#allocation2 + $0x64] sm:$0xf] %vm256_vm1, %v6597_v1 }
  0x3b   : > { %285 = vst.msk [vmem:[#allocation2 + $0x6c] sm:$0xf] %vm256_vm1, %v6597_v1  ;;  %286 = vst.msk [vmem:[#allocation2 + $0x70] sm:$0xf] %vm256_vm1, %v6597_v1 }
  0x3c   : > { %288 = vst.msk [vmem:[#allocation2 + $0x78] sm:$0xf] %vm256_vm1, %v6597_v1  ;;  %289 = vst.msk [vmem:[#allocation2 + $0x7c] sm:$0xf] %vm256_vm1, %v6597_v1 }
  0x3d   : > { %291 = vst.msk [vmem:[#allocation2 + $0x84] sm:$0xf] %vm256_vm1, %v6597_v1  ;;  %292 = vst.msk [vmem:[#allocation2 + $0x88] sm:$0xf] %vm256_vm1, %v6597_v1 }
  0x3e   : > { %294 = vst.msk [vmem:[#allocation2 + $0x90] sm:$0xf] %vm256_vm1, %v6597_v1  ;;  %295 = vst.msk [vmem:[#allocation2 + $0x94] sm:$0xf] %vm256_vm1, %v6597_v1 }
  0x3f   : > { %297 = vst.msk [vmem:[#allocation2 + $0x9c] sm:$0xf] %vm256_vm1, %v6597_v1  ;;  %298 = vst.msk [vmem:[#allocation2 + $0xa0] sm:$0xf] %vm256_vm1, %v6597_v1 }
  0x40   : > { %300 = vst.msk [vmem:[#allocation2 + $0xa8] sm:$0xf] %vm256_vm1, %v6597_v1  ;;  %301 = vst.msk [vmem:[#allocation2 + $0xac] sm:$0xf] %vm256_vm1, %v6597_v1 }
  0x41   : > { %303 = vst.msk [vmem:[#allocation2 + $0xb4] sm:$0xf] %vm256_vm1, %v6597_v1  ;;  %304 = vst.msk [vmem:[#allocation2 + $0xb8] sm:$0xf] %vm256_vm1, %v6597_v1 }
  0x42   : > { %306 = vst.msk [vmem:[#allocation2 + $0xc0] sm:$0xf] %vm256_vm1, %v6597_v1  ;;  %307 = vst.msk [vmem:[#allocation2 + $0xc4] sm:$0xf] %vm256_vm1, %v6597_v1 }
  0x43   : > { %309 = vst.msk [vmem:[#allocation2 + $0xcc] sm:$0xf] %vm256_vm1, %v6597_v1  ;;  %310 = vst.msk [vmem:[#allocation2 + $0xd0] sm:$0xf] %vm256_vm1, %v6597_v1 }
  0x44   : > { %260 = vst.msk [vmem:[#allocation2 + $0x8] sm:$0x1] %vm259_vm2, %v6597_v1  ;;  %263 = vst.msk [vmem:[#allocation2 + $0x14] sm:$0x1] %vm259_vm2, %v6597_v1 }
  0x45   : > { %266 = vst.msk [vmem:[#allocation2 + $0x20] sm:$0x1] %vm259_vm2, %v6597_v1  ;;  %269 = vst.msk [vmem:[#allocation2 + $0x2c] sm:$0x1] %vm259_vm2, %v6597_v1 }
  0x46   : > { %272 = vst.msk [vmem:[#allocation2 + $0x38] sm:$0x1] %vm259_vm2, %v6597_v1  ;;  %275 = vst.msk [vmem:[#allocation2 + $0x44] sm:$0x1] %vm259_vm2, %v6597_v1 }
  0x47   : > { %278 = vst.msk [vmem:[#allocation2 + $0x50] sm:$0x1] %vm259_vm2, %v6597_v1  ;;  %281 = vst.msk [vmem:[#allocation2 + $0x5c] sm:$0x1] %vm259_vm2, %v6597_v1 }
  0x48   : > { %284 = vst.msk [vmem:[#allocation2 + $0x68] sm:$0x1] %vm259_vm2, %v6597_v1  ;;  %287 = vst.msk [vmem:[#allocation2 + $0x74] sm:$0x1] %vm259_vm2, %v6597_v1 }
  0x49   : > { %290 = vst.msk [vmem:[#allocation2 + $0x80] sm:$0x1] %vm259_vm2, %v6597_v1  ;;  %293 = vst.msk [vmem:[#allocation2 + $0x8c] sm:$0x1] %vm259_vm2, %v6597_v1 }
  0x4a   : > { %296 = vst.msk [vmem:[#allocation2 + $0x98] sm:$0x1] %vm259_vm2, %v6597_v1  ;;  %299 = vst.msk [vmem:[#allocation2 + $0xa4] sm:$0x1] %vm259_vm2, %v6597_v1 }
  0x4b   : > { %302 = vst.msk [vmem:[#allocation2 + $0xb0] sm:$0x1] %vm259_vm2, %v6597_v1  ;;  %305 = vst.msk [vmem:[#allocation2 + $0xbc] sm:$0x1] %vm259_vm2, %v6597_v1 }
  0x4c   : > { %308 = vst.msk [vmem:[#allocation2 + $0xc8] sm:$0x1] %vm259_vm2, %v6597_v1  ;;  %311 = vst.msk [vmem:[#allocation2 + $0xd4] sm:$0x1] %vm259_vm2, %v6597_v1 }
  0x4d PF: > { %v6210_v2 = vld [vmem:[%s9139_s1 + $0x8] sm:$0xff]   ;;  %v6211_v3 = vld [vmem:[%s9139_s1] sm:$0xff]   ;;  %vm494_vm3 = vcmask 261120   ;;  %v6216_v12 = vld [vmem:[%s9139_s1 + $0x18] sm:$0xff]   ;;  %vm1445_vm4 = vcmask 1042432   ;;  %vm1446_vm7 = vcmask 1046532  }
  0x4e   : > { %5804 = vmatprep.subr.bf16.mxu0 %v6210_v2  ;;  %6128 = vmatprep.subr.bf16.mxu1 %v6210_v2  ;;  %v6837_v4 = vld [vmem:[#allocation2] sm:$0xf]  ;;  %v6839_v5 = vld [vmem:[#allocation2 + $0x4] sm:$0xf]  ;;  %v6860_v17 = vld [vmem:[#allocation2 + $0xc] sm:$0xf] }
  0x4f   : > { %v6841_v6 = vld [vmem:[#allocation2 + $0x60] sm:$0xf]  ;;  %5805 = vmatpush3.bf16.msra.mxu0 %v6210_v2  ;;  %6130 = vmatpush3.bf16.msra.mxu1 %v6210_v2  ;;  %v5274_v7 = vcombine.low %v6837_v4, %v6839_v5  ;;  %v740_v8 = vshrl.u32 %v6837_v4, 16  ;;  %v743_v9 = vshll.u32 %v6837_v4, 16  ;;  %v749_v10 = vshll.u32 %v6839_v5, 16  ;;  %v6217_v18 = vld [vmem:[%s9139_s1 + $0x28] sm:$0xff]   ;;  %vm7054_vm9 = vmor %vm1445_vm4, %vm1446_vm7 }
  0x50   : > { %v6848_v11 = vld [vmem:[#allocation2 + $0x64] sm:$0xf]  ;;  %5806 = vmatprep.subr.bf16.mxu0 %v6211_v3  ;;  %6129 = vmatprep.subr.bf16.mxu1 %v6211_v3  ;;  %v753_v13 = vshrl.u32 %v6839_v5, 16  ;;  %v9144_v15 = vrot.slane %v6839_v5, 5  ;;  %v6868_v22 = vld [vmem:[#allocation2 + $0x10] sm:$0xf] }
  0x51   : > { %v6858_v16 = vcombine.low %v6841_v6, %v6848_v11  ;;  %5808 = vmatprep.mubr.msk.bf16.mxu0 %vm494_vm3, %v5274_v7  ;;  %v742_v19 = vrot.slane %v740_v8, 4  ;;  %v745_v20 = vrot.slane %v743_v9, 5  ;;  %v6866_v21 = vrot.slane %v749_v10, 5  ;;  %v6882_v28 = vld [vmem:[#allocation2 + $0x6c] sm:$0xf]  ;;  %v6227_v38 = vld [vmem:[%s9139_s1 + $0x20] sm:$0xff]  }
  0x52   : > { %v764_v23 = vshrl.u32 %v6860_v17, 16  ;;  %v755_v24 = vrot.slane %v753_v13, 4  ;;  %v6873_v25 = vrot.slane %v9144_v15, 4  ;;  %v6879_v26 = vcombine.low %v6860_v17, %v6868_v22  ;;  %v6888_v33 = vld [vmem:[#allocation2 + $0x70] sm:$0xf]  ;;  %v6922_v46 = vld [vmem:[%s9139_s1 + $0x48] sm:$0xff]  }
  0x53   : > { %9186 = vst [vmem:[#allocation7_spill] sm:$0xff] %v6858_v16  ;;  %5824 = vmatprep.mubr.msk.bf16.mxu1 %vm494_vm3, %v6858_v16  ;;  %v767_v27 = vshll.u32 %v6860_v17, 16  ;;  %5807 = vmatpush3.bf16.msra.mxu0 %v6211_v3  ;;  %v746_v29 = vor.u32 %v745_v20, %v742_v19  ;;  %v773_v31 = vshll.u32 %v6868_v22, 16  ;;  %v777_v32 = vshrl.u32 %v6868_v22, 16  ;;  %v6226_v43 = vld [vmem:[%s9139_s1 + $0x10] sm:$0xff]   ;;  %v6935_v50 = vld [vmem:[%s9139_s1 + $0x38] sm:$0xff]  }
  0x54   : > { %6131 = vmatpush3.bf16.msra.mxu1 %v6211_v3  ;;  %v6884_v30 = vrot.slane %v764_v23, 4  ;;  %v756_v34 = vor.u32 %v755_v24, %v6866_v21  ;;  %v9143_v37 = vrot.slane %v6868_v22, 5  ;;  %5876 = vmatprep.subr.bf16.mxu0 %v6217_v18  ;;  %v6906_v42 = vcombine.low %v6882_v28, %v6888_v33  ;;  %v6926_v47 = vld [vmem:[#allocation2 + $0x18] sm:$0xf]  ;;  %v6928_v48 = vld [vmem:[#allocation2 + $0x1c] sm:$0xf] }
  0x55   : > { %v6891_v35 = vrot.slane %v767_v27, 5  ;;  %5840 = vmatprep.subr.bf16.mxu1 %v6216_v12  ;;  %v6898_v39 = vrot.slane %v746_v29, 4  ;;  %v6900_v40 = vrot.slane %v773_v31, 5  ;;  %v6902_v41 = vrot.slane %v777_v32, 4  ;;  %v6930_v49 = vld [vmem:[#allocation2 + $0x78] sm:$0xf] }
  0x56   : > { %9187 = vst [vmem:[#allocation8_spill] sm:$0xff] %v6906_v42  ;;  %v6911_v44 = vrot.slane %v756_v34, 4  ;;  %5809 = vmatmul.mubr.msk.bf16.vlgmr.msra.gmra.mxu0 %vm494_vm3, %v6879_v26  ;;  %v6917_v45 = vrot.slane %v9143_v37, 4  ;;  %v6939_v51 = vcombine.low %v6926_v47, %v6928_v48  ;;  %v6941_v52 = vld [vmem:[#allocation2 + $0x7c] sm:$0xf]  ;;  %s6598_s15 = smov 32  }
  0x57   : > { %5825 = vmatmul.mubr.msk.bf16.vlgmr.msra.gmra.mxu1 %vm494_vm3, %v6906_v42  ;;  %5877 = vmatpush3.bf16.msra.mxu0 %v6217_v18  ;;  %v6943_v53 = vld [vmem:[#allocation2 + $0x24] sm:$0xf]  ;;  %v6945_v54 = vld [vmem:[#allocation2 + $0x28] sm:$0xf]  ;;  %v6949_v55 = vcombine.low %v6930_v49, %v6941_v52  ;;  %v6955_v58 = vld [vmem:[#allocation2 + $0x30] sm:$0xf]  ;;  %v770_v10 = vor.u32 %v6891_v35, %v6884_v30 }
  0x58   : > { %5841 = vmatpush3.bf16.msra.mxu1 %v6216_v12  ;;  %5878 = vmatprep.subr.bf16.mxu0 %v6227_v38  ;;  %v6951_v56 = vld [vmem:[#allocation2 + $0x84] sm:$0xf]  ;;  %v6953_v57 = vld [vmem:[#allocation2 + $0x88] sm:$0xf]  ;;  %v6961_v59 = vcombine.low %v6943_v53, %v6945_v54  ;;  %v6963_v60 = vld [vmem:[#allocation2 + $0x34] sm:$0xf]  ;;  %v780_v12 = vor.u32 %v6902_v41, %v6900_v40 }
  0x59   : > { %9188 = vst [vmem:[#allocation9_spill] sm:$0xff] %v6949_v55  ;;  %5842 = vmatprep.subr.bf16.mxu1 %v6226_v43  ;;  %5812 = vmatprep.mubr.msk.bf16.mxu0 %vm494_vm3, %v6939_v51  ;;  %v6965_v61 = vld [vmem:[#allocation2 + $0x90] sm:$0xf]  ;;  %v6967_v62 = vld [vmem:[#allocation2 + $0x94] sm:$0xf]  ;;  %v6973_v63 = vcombine.low %v6951_v56, %v6953_v57  ;;  %v6977_v0 = vcombine.low %v6955_v58, %v6963_v60  ;;  %v771_v37 = vrot.slane %v770_v10, 4 }
  0x5a   : > { %5828 = vmatprep.mubr.msk.bf16.mxu1 %vm494_vm3, %v6949_v55  ;;  %v6979_v1 = vld [vmem:[#allocation2 + $0x3c] sm:$0xf]  ;;  %v6981_v2 = vld [vmem:[#allocation2 + $0x40] sm:$0xf]  ;;  %v6987_v7 = vcombine.low %v6965_v61, %v6967_v62  ;;  %v6992_v9 = vld [vmem:[#allocation2 + $0x48] sm:$0xf] }
  0x5b   : > { %9189 = vst [vmem:[#allocation10_spill] sm:$0xff] %v6973_v63  ;;  %9190 = vst [vmem:[#allocation11_spill] sm:$0xff] %v6977_v0  ;;  %v6983_v3 = vld [vmem:[#allocation2 + $0x9c] sm:$0xf]  ;;  %5879 = vmatpush3.bf16.msra.mxu0 %v6227_v38  ;;  %v6989_v8 = vld [vmem:[#allocation2 + $0xa0] sm:$0xf]  ;;  %v7013_v20 = vcombine.low %v6979_v1, %v6981_v2 }
  0x5c   : > { %9191 = vst [vmem:[#allocation12_spill] sm:$0xff] %v6987_v7  ;;  %5843 = vmatpush3.bf16.msra.mxu1 %v6226_v43  ;;  %5948 = vmatprep.subr.bf16.mxu0 %v6922_v46  ;;  %v7001_v13 = vld [vmem:[#allocation2 + $0x4c] sm:$0xf]  ;;  %v7003_v18 = vld [vmem:[#allocation2 + $0xa8] sm:$0xf]  ;;  %v7025_v29 = vcombine.low %v6983_v3, %v6989_v8  ;;  %v9194_v43 = vmov 0 }
  0x5d   : > { %5912 = vmatprep.subr.bf16.mxu1 %v6935_v50  ;;  %v7005_v19 = vld [vmem:[#allocation2 + $0xac] sm:$0xf]  ;;  %v7015_v23 = vld [vmem:[#allocation2 + $0x54] sm:$0xf]  ;;  %v7017_v24 = vld [vmem:[#allocation2 + $0x58] sm:$0xf]  ;;  %v7029_v30 = vcombine.low %v6992_v9, %v7001_v13 }
  0x5e   : > { %5813 = vmatmul.mubr.msk.bf16.gmra.mxu0 %vm494_vm3, %v6961_v59  ;;  %v7019_v27 = vld [vmem:[#allocation2 + $0xb4] sm:$0xf]  ;;  %9192 = vst [vmem:[#allocation13_spill] sm:$0xff] %v7025_v29  ;;  %v7033_v31 = vcombine.low %v7003_v18, %v7005_v19  ;;  %v7035_v32 = vld [vmem:[#allocation2 + $0xb8] sm:$0xf]  ;;  %v7039_v35 = vcombine.low %v7015_v23, %v7017_v24  ;;  %v781_v14 = vrot.slane %v780_v12, 4 }
  0x5f   : > { %5829 = vmatmul.mubr.msk.bf16.gmra.mxu1 %vm494_vm3, %v6973_v63  ;;  %5816 = vmatprep.mubr.msk.bf16.mxu0 %vm494_vm3, %v6977_v0  ;;  %v314_v34 = vld [vmem:[#allocation2 + $0x8] sm:$0x1]  ;;  %vm736_vm5 = vsmask.f32 3328  ;;  %vm737_vm6 = vsmask.f32 7440 }
  0x60   : > { %5832 = vmatprep.mubr.msk.bf16.mxu1 %vm494_vm3, %v6987_v7  ;;  %9193 = vst [vmem:[#allocation14_spill] sm:$0xff] %v7033_v31  ;;  %v759_v38 = vshll.u32 %v314_v34, 16  ;;  %v317_v41 = vld [vmem:[#allocation2 + $0x14] sm:$0x1]  ;;  %vm7041_vm8 = vmor %vm736_vm5, %vm737_vm6  ;;  %v1453_v36 = vrot.slane %v314_v34, 5  ;;  %v7047_v7 = vcombine.low %v7019_v27, %v7035_v32  ;;  %v9197_v42 = vmov 0 }
  0x61   : > { %v9195_v43 = vsel %vm7041_vm8, 4294967295, %v9194_v43  ;;  %v783_v15 = vshll.u32 %v317_v41, 16  ;;  %v752_v63 = vsel %vm7041_vm8, %v6898_v39, %v6866_v21  ;;  %v9198_v42 = vsel %vm7054_vm9, 4294967295, %v9197_v42  ;;  %s6600_s30 = smov 64   ;;  %s5641_s4 = sshll.u32 %s6582_s16, 12 }
  0x62   : > { %9196 = vst [vmem:[#allocation15_spill] sm:$0xff] %v9195_v43  ;;  %v761_v55 = vrot.slane %v759_v38, 5  ;;  %9199 = vst [vmem:[#allocation16_spill] sm:$0xff] %v9198_v42  ;;  %v1460_v16 = vrot.slane %v317_v41, 5  ;;  %v9200_v10 = vrot.slane %v6839_v5, 5  ;;  %v9201_v12 = vrot.slane %v6837_v4, 9  ;;  %s8951_s7 = scalar_lea.hbm %s9141_s3, %s5641_s4 }
  0x63   : > { %v1454_v0 = vsel %vm7054_vm9, %v6873_v25, %v1453_v36  ;;  %v776_v21 = vsel %vm7041_vm8, %v771_v37, %v6900_v40  ;;  %v785_v39 = vrot.slane %v783_v15, 5  ;;  %v9202_v5 = vrot.slane %v6868_v22, 5  ;;  %v320_v36 = vld [vmem:[#allocation2 + $0x20] sm:$0x1]  ;;  %s5138_s8 = sshll.u32 %s6710_s23, 4  ;;  %s8963_s16 = scalar_lea.sflag [#allocation4], %s197_s29  ;;  %s8954_s8 = int_to_ptr.vmem [resolvable:$true] %s5138_s8 }
  0x64   : > { %v1451_v34 = vsel %vm7054_vm9, %v9201_v12, %v9200_v10  ;;  %v762_v38 = vsel %vm7041_vm8, %v6911_v44, %v761_v55  ;;  %v9203_v4 = vrot.slane %v6860_v17, 9  ;;  %v1461_v25 = vsel %vm7054_vm9, %v6917_v45, %v1460_v16  ;;  %v323_v12 = vld [vmem:[#allocation2 + $0x2c] sm:$0x1]  ;;  %s6601_s9 = smov [#allocation3]  }
  0x65   : > { %v5366_v41 = vcombine.low %v1451_v34, %v1454_v0  ;;  %v5312_v15 = vcombine.low %v752_v63, %v762_v38  ;;  %v786_v37 = vsel %vm7041_vm8, %v781_v14, %v785_v39  ;;  %v788_v22 = vshrl.u32 %v6926_v47, 16  ;;  %s6506_s10 = sshll.u32 %s6601_s9, 4  ;;  %s6507_s10 = int_to_ptr.vmem [resolvable:$false] %s6506_s10 }
  0x66   : > { %v1458_v10 = vsel %vm7054_vm9, %v9203_v4, %v9202_v5  ;;  %5817 = vmatmul.mubr.msk.bf16.gmra.mxu0 %vm494_vm3, %v7013_v20  ;;  %v7093_v17 = vcombine.low %v776_v21, %v786_v37  ;;  %v791_v16 = vshll.u32 %v6926_v47, 16  ;;  %v797_v44 = vshll.u32 %v6928_v48, 16  ;;  %s6508_s11 = scalar_lea.vmem %s6507_s10, 8192  ;;  %p6509_p5 = scmp.lt.s32.totalorder %s8954_s8, %s6507_s10 }
  0x67   : > { %v7086_v40 = vcombine.low %v1458_v10, %v1461_v25  ;;  %5833 = vmatmul.mubr.msk.bf16.gmra.mxu1 %vm494_vm3, %v7025_v29  ;;  %5820 = vmatprep.mubr.msk.bf16.mxu0 %vm494_vm3, %v7029_v30  ;;  %v801_v45 = vshrl.u32 %v6928_v48, 16  ;;  %v790_v14 = vrot.slane %v788_v22, 4  ;;  %v807_v55 = vshll.u32 %v320_v36, 16 }
  0x68   : > { %5836 = vmatprep.mubr.msk.bf16.mxu1 %vm494_vm3, %v7033_v31  ;;  %v5348_v63 = vrot.slane %v6926_v47, 9  ;;  %v1464_v0 = vrot.slane %v6928_v48, 5  ;;  %v793_v34 = vrot.slane %v791_v16, 5  ;;  %v799_v39 = vrot.slane %v797_v44, 5 }
  0x69   : > { %v803_v21 = vrot.slane %v801_v45, 4  ;;  %v1467_v38 = vrot.slane %v320_v36, 5  ;;  %v809_v5 = vrot.slane %v807_v55, 5  ;;  %v812_v25 = vshrl.u32 %v6943_v53, 16 }
  0x6a   : > { %v1465_v4 = vsel %vm7054_vm9, %v5348_v63, %v1464_v0  ;;  %v1466_v10 = vrot.slane %v1464_v0, 4  ;;  %v794_v37 = vor.u32 %v793_v34, %v790_v14  ;;  %v815_v22 = vshll.u32 %v6943_v53, 16 }
  0x6b   : > { %v804_v31 = vor.u32 %v803_v21, %v799_v39  ;;  %v821_v47 = vshll.u32 %v6945_v54, 16  ;;  %v814_v16 = vrot.slane %v812_v25, 4  ;;  %v825_v44 = vshrl.u32 %v6945_v54, 16 }
  0x6c   : > { %v1468_v48 = vsel %vm7054_vm9, %v1466_v10, %v1467_v38  ;;  %v831_v36 = vshll.u32 %v323_v12, 16  ;;  %v795_v45 = vrot.slane %v794_v37, 4  ;;  %v817_v63 = vrot.slane %v815_v22, 5  ;;  %v326_v22 = vld [vmem:[#allocation2 + $0x38] sm:$0x1] }
  0x6d   : > { %v805_v55 = vrot.slane %v804_v31, 4  ;;  %v7110_v29 = vcombine.low %v1465_v4, %v1468_v48  ;;  %v823_v14 = vrot.slane %v821_v47, 5  ;;  %v827_v0 = vrot.slane %v825_v44, 4 }
  0x6e   : > { %5821 = vmatmul.mubr.msk.bf16.gmra.mxu0 %vm494_vm3, %v7039_v35  ;;  %v833_v34 = vrot.slane %v831_v36, 5  ;;  %v5349_v21 = vrot.slane %v6943_v53, 9  ;;  %v800_v38 = vsel %vm7041_vm8, %v795_v45, %v799_v39  ;;  %v818_v4 = vor.u32 %v817_v63, %v814_v16 }
  0x6f   : > { %5837 = vmatmul.mubr.msk.bf16.gmra.mxu1 %vm494_vm3, %v7047_v7  ;;  %5880 = vmatprep.mubr.msk.bf16.mxu0 %vm494_vm3, %v5366_v41  ;;  %v810_v31 = vsel %vm7041_vm8, %v805_v55, %v809_v5  ;;  %v1471_v10 = vrot.slane %v6945_v54, 5  ;;  %v828_v37 = vor.u32 %v827_v0, %v823_v14  ;;  %v1474_v53 = vrot.slane %v323_v12, 5 }
  0x70   : > { %5844 = vmatprep.mubr.msk.bf16.mxu1 %vm494_vm3, %v5312_v15  ;;  %v7124_v25 = vcombine.low %v800_v38, %v810_v31  ;;  %v836_v47 = vshrl.u32 %v6955_v58, 16  ;;  %v819_v48 = vrot.slane %v818_v4, 4  ;;  %v839_v44 = vshll.u32 %v6955_v58, 16 }
  0x71   : > { %v1472_v41 = vsel %vm7054_vm9, %v5349_v21, %v1471_v10  ;;  %v1473_v39 = vrot.slane %v1471_v10, 4  ;;  %v829_v5 = vrot.slane %v828_v37, 4  ;;  %v845_v54 = vshll.u32 %v6963_v60, 16 }
  0x72   : > { %v838_v16 = vrot.slane %v836_v47, 4  ;;  %v849_v15 = vshrl.u32 %v6963_v60, 16  ;;  %v824_v36 = vsel %vm7041_vm8, %v819_v48, %v823_v14  ;;  %v841_v45 = vrot.slane %v839_v44, 5  ;;  %v6234_v14 = vld [vmem:[%s9139_s1 + $0x30] sm:$0xff]  }
  0x73   : > { %v1475_v12 = vsel %vm7054_vm9, %v1473_v39, %v1474_v53  ;;  %v855_v55 = vshll.u32 %v326_v22, 16  ;;  %v834_v63 = vsel %vm7041_vm8, %v829_v5, %v833_v34  ;;  %v847_v21 = vrot.slane %v845_v54, 5  ;;  %v329_v39 = vld [vmem:[#allocation2 + $0x44] sm:$0x1] }
  0x74   : > { %v7138_v0 = vcombine.low %v1472_v41, %v1475_v12  ;;  %v851_v38 = vrot.slane %v849_v15, 4  ;;  %v7140_v31 = vcombine.low %v824_v36, %v834_v63  ;;  %v842_v4 = vor.u32 %v841_v45, %v838_v16  ;;  %v6235_v41 = vld [vmem:[%s9139_s1 + $0x40] sm:$0xff]  }
  0x75   : > { %v857_v10 = vrot.slane %v855_v55, 5  ;;  %v5350_v37 = vrot.slane %v6955_v58, 9  ;;  %v1478_v34 = vrot.slane %v6963_v60, 5  ;;  %v1481_v47 = vrot.slane %v326_v22, 5  ;;  %v7176_v55 = vld [vmem:[%s9139_s1 + $0x58] sm:$0xff]  }
  0x76   : > { %5881 = vmatmul.mubr.msk.bf16.vlgmr.msra.gmra.mxu0 %vm494_vm3, %v7086_v40  ;;  %v852_v53 = vor.u32 %v851_v38, %v847_v21  ;;  %v860_v48 = vshrl.u32 %v6979_v1, 16  ;;  %v843_v58 = vrot.slane %v842_v4, 4  ;;  %v863_v44 = vshll.u32 %v6979_v1, 16 }
  0x77   : > { %5845 = vmatmul.mubr.msk.bf16.vlgmr.msra.gmra.mxu1 %vm494_vm3, %v7093_v17  ;;  %5949 = vmatpush3.bf16.msra.mxu0 %v6922_v46  ;;  %v869_v5 = vshll.u32 %v6981_v2, 16  ;;  %v873_v60 = vshrl.u32 %v6981_v2, 16  ;;  %v1479_v16 = vsel %vm7054_vm9, %v5350_v37, %v1478_v34  ;;  %v1480_v54 = vrot.slane %v1478_v34, 4  ;;  %v7167_v46 = vld [vmem:[%s9139_s1 + $0x68] sm:$0xff]  }
  0x78   : > { %5913 = vmatpush3.bf16.msra.mxu1 %v6935_v50  ;;  %5848 = vmatprep.mubr.msk.bf16.mxu1 %vm494_vm3, %v7124_v25  ;;  %v853_v22 = vrot.slane %v852_v53, 4  ;;  %v862_v15 = vrot.slane %v860_v48, 4  ;;  %v848_v50 = vsel %vm7041_vm8, %v843_v58, %v847_v21  ;;  %v865_v36 = vrot.slane %v863_v44, 5 }
  0x79   : > { %5884 = vmatprep.mubr.msk.bf16.mxu0 %vm494_vm3, %v7110_v29  ;;  %v871_v12 = vrot.slane %v869_v5, 5  ;;  %v875_v45 = vrot.slane %v873_v60, 4  ;;  %5914 = vmatprep.subr.bf16.mxu1 %v6234_v14  ;;  %v1482_v38 = vsel %vm7054_vm9, %v1480_v54, %v1481_v47  ;;  %v879_v4 = vshll.u32 %v329_v39, 16 }
  0x7a   : > { %v858_v63 = vsel %vm7041_vm8, %v853_v22, %v857_v10  ;;  %v5351_v37 = vrot.slane %v6979_v1, 9  ;;  %5950 = vmatprep.subr.bf16.mxu0 %v6235_v41  ;;  %v7185_v53 = vcombine.low %v1479_v16, %v1482_v38  ;;  %v866_v34 = vor.u32 %v865_v36, %v862_v15  ;;  %v332_v1 = vld [vmem:[#allocation2 + $0x50] sm:$0x1] }
  0x7b   : > { %v7183_v21 = vcombine.low %v848_v50, %v858_v63  ;;  %v876_v48 = vor.u32 %v875_v45, %v871_v12  ;;  %5951 = vmatpush3.bf16.msra.mxu0 %v6235_v41  ;;  %v881_v58 = vrot.slane %v879_v4, 5  ;;  %v1485_v44 = vrot.slane %v6981_v2, 5 }
  0x7c   : > { %v1488_v5 = vrot.slane %v329_v39, 5  ;;  %v884_v10 = vshrl.u32 %v6992_v9, 16  ;;  %5915 = vmatpush3.bf16.msra.mxu1 %v6234_v14  ;;  %6020 = vmatprep.subr.bf16.mxu0 %v7167_v46  ;;  %v867_v47 = vrot.slane %v866_v34, 4  ;;  %v887_v22 = vshll.u32 %v6992_v9, 16 }
  0x7d   : > { %v877_v60 = vrot.slane %v876_v48, 4  ;;  %v893_v16 = vshll.u32 %v7001_v13, 16  ;;  %5984 = vmatprep.subr.bf16.mxu1 %v7176_v55  ;;  %v1486_v2 = vsel %vm7054_vm9, %v5351_v37, %v1485_v44  ;;  %v1487_v41 = vrot.slane %v1485_v44, 4 }
  0x7e   : > { %5885 = vmatmul.mubr.msk.bf16.gmra.mxu0 %vm494_vm3, %v7138_v0  ;;  %v886_v39 = vrot.slane %v884_v10, 4  ;;  %v897_v14 = vshrl.u32 %v7001_v13, 16  ;;  %v872_v54 = vsel %vm7041_vm8, %v867_v47, %v871_v12  ;;  %v889_v50 = vrot.slane %v887_v22, 5  ;;  %v335_v47 = vld [vmem:[#allocation2 + $0x5c] sm:$0x1] }
  0x7f   : > { %5849 = vmatmul.mubr.msk.bf16.gmra.mxu1 %vm494_vm3, %v7140_v31  ;;  %5888 = vmatprep.mubr.msk.bf16.mxu0 %vm494_vm3, %v7185_v53  ;;  %v882_v15 = vsel %vm7041_vm8, %v877_v60, %v881_v58  ;;  %v895_v36 = vrot.slane %v893_v16, 5  ;;  %v1489_v63 = vsel %vm7054_vm9, %v1487_v41, %v1488_v5  ;;  %v903_v4 = vshll.u32 %v332_v1, 16 }
  0x80   : > { %5852 = vmatprep.mubr.msk.bf16.mxu1 %vm494_vm3, %v7183_v21  ;;  %v7208_v45 = vcombine.low %v872_v54, %v882_v15  ;;  %v899_v38 = vrot.slane %v897_v14, 4  ;;  %v7212_v37 = vcombine.low %v1486_v2, %v1489_v63  ;;  %v890_v34 = vor.u32 %v889_v50, %v886_v39 }
  0x81   : > { %v5352_v12 = vrot.slane %v6992_v9, 9  ;;  %v1492_v48 = vrot.slane %v7001_v13, 5  ;;  %v905_v44 = vrot.slane %v903_v4, 5  ;;  %v1495_v10 = vrot.slane %v332_v1, 5 }
  0x82   : > { %v900_v58 = vor.u32 %v899_v38, %v895_v36  ;;  %v908_v60 = vshrl.u32 %v7015_v23, 16  ;;  %v891_v22 = vrot.slane %v890_v34, 4  ;;  %v911_v41 = vshll.u32 %v7015_v23, 16 }
  0x83   : > { %v1493_v16 = vsel %vm7054_vm9, %v5352_v12, %v1492_v48  ;;  %v1494_v5 = vrot.slane %v1492_v48, 4  ;;  %v917_v39 = vshll.u32 %v7017_v24, 16  ;;  %v921_v9 = vshrl.u32 %v7017_v24, 16 }
  0x84   : > { %v901_v2 = vrot.slane %v900_v58, 4  ;;  %v910_v14 = vrot.slane %v908_v60, 4  ;;  %v896_v13 = vsel %vm7041_vm8, %v891_v22, %v895_v36  ;;  %v913_v54 = vrot.slane %v911_v41, 5 }
  0x85   : > { %v1496_v1 = vsel %vm7054_vm9, %v1494_v5, %v1495_v10  ;;  %v927_v15 = vshll.u32 %v335_v47, 16  ;;  %v919_v38 = vrot.slane %v917_v39, 5  ;;  %v923_v4 = vrot.slane %v921_v9, 4 }
  0x86   : > { %5889 = vmatmul.mubr.msk.bf16.gmra.mxu0 %vm494_vm3, %v7212_v37  ;;  %v906_v50 = vsel %vm7041_vm8, %v901_v2, %v905_v44  ;;  %v7230_v63 = vcombine.low %v1493_v16, %v1496_v1  ;;  %v914_v36 = vor.u32 %v913_v54, %v910_v14  ;;  %v5353_v48 = vrot.slane %v7015_v23, 9  ;;  %v338_v16 = vld [vmem:[#allocation2 + $0x68] sm:$0x1] }
  0x87   : > { %5853 = vmatmul.mubr.msk.bf16.gmra.mxu1 %vm494_vm3, %v7208_v45  ;;  %v7234_v34 = vcombine.low %v896_v13, %v906_v50  ;;  %v929_v12 = vrot.slane %v927_v15, 5  ;;  %v924_v58 = vor.u32 %v923_v4, %v919_v38  ;;  %v1499_v10 = vrot.slane %v7017_v24, 5 }
  0x88   : > { %5892 = vmatprep.mubr.msk.bf16.mxu0 %vm494_vm3, %v7230_v63  ;;  %v1502_v44 = vrot.slane %v335_v47, 5  ;;  %v932_v60 = vshrl.u32 %v6841_v6, 16  ;;  %v915_v22 = vrot.slane %v914_v36, 4  ;;  %v935_v5 = vshll.u32 %v6841_v6, 16 }
  0x89   : > { %5856 = vmatprep.mubr.msk.bf16.mxu1 %vm494_vm3, %v7234_v34  ;;  %v941_v41 = vshll.u32 %v6848_v11, 16  ;;  %v945_v23 = vshrl.u32 %v6848_v11, 16  ;;  %v925_v2 = vrot.slane %v924_v58, 4  ;;  %v1500_v14 = vsel %vm7054_vm9, %v5353_v48, %v1499_v10 }
  0x8a   : > { %v1501_v39 = vrot.slane %v1499_v10, 4  ;;  %v934_v24 = vrot.slane %v932_v60, 4  ;;  %v920_v47 = vsel %vm7041_vm8, %v915_v22, %v919_v38  ;;  %v937_v9 = vrot.slane %v935_v5, 5 }
  0x8b   : > { %v943_v13 = vrot.slane %v941_v41, 5  ;;  %v947_v1 = vrot.slane %v945_v23, 4  ;;  %v930_v54 = vsel %vm7041_vm8, %v925_v2, %v929_v12  ;;  %v951_v50 = vshll.u32 %v338_v16, 16 }
  0x8c   : > { %v1503_v15 = vsel %vm7054_vm9, %v1501_v39, %v1502_v44  ;;  %v5354_v4 = vrot.slane %v6841_v6, 9  ;;  %v7255_v36 = vcombine.low %v920_v47, %v930_v54  ;;  %v938_v58 = vor.u32 %v937_v9, %v934_v24  ;;  %v341_v44 = vld [vmem:[#allocation2 + $0x74] sm:$0x1] }
  0x8d   : > { %v7257_v48 = vcombine.low %v1500_v14, %v1503_v15  ;;  %v948_v10 = vor.u32 %v947_v1, %v943_v13  ;;  %v953_v60 = vrot.slane %v951_v50, 5  ;;  %v1506_v38 = vrot.slane %v6848_v11, 5 }
  0x8e   : > { %v1509_v22 = vrot.slane %v338_v16, 5  ;;  %v956_v5 = vshrl.u32 %v6882_v28, 16  ;;  %v939_v12 = vrot.slane %v938_v58, 4  ;;  %v959_v41 = vshll.u32 %v6882_v28, 16 }
  0x8f   : > { %5857 = vmatmul.mubr.msk.bf16.gmra.mxu1 %vm494_vm3, %v7255_v36  ;;  %5893 = vmatmul.mubr.msk.bf16.gmra.mxu0 %vm494_vm3, %v7257_v48  ;;  %v949_v6 = vrot.slane %v948_v10, 4  ;;  %v965_v23 = vshll.u32 %v6888_v33, 16  ;;  %v1507_v2 = vsel %vm7054_vm9, %v5354_v4, %v1506_v38  ;;  %v1508_v11 = vrot.slane %v1506_v38, 4 }
  0x90   : > { %v958_v16 = vrot.slane %v956_v5, 4  ;;  %v969_v14 = vshrl.u32 %v6888_v33, 16  ;;  %v944_v39 = vsel %vm7041_vm8, %v939_v12, %v943_v13  ;;  %v961_v47 = vrot.slane %v959_v41, 5  ;;  %v344_v12 = vld [vmem:[#allocation2 + $0x80] sm:$0x1] }
  0x91   : > { %v954_v24 = vsel %vm7041_vm8, %v949_v6, %v953_v60  ;;  %v967_v9 = vrot.slane %v965_v23, 5  ;;  %v1510_v54 = vsel %vm7054_vm9, %v1508_v11, %v1509_v22  ;;  %v975_v50 = vshll.u32 %v341_v44, 16 }
  0x92   : > { %v7274_v1 = vcombine.low %v944_v39, %v954_v24  ;;  %v971_v15 = vrot.slane %v969_v14, 4  ;;  %v7278_v4 = vcombine.low %v1507_v2, %v1510_v54  ;;  %v962_v58 = vor.u32 %v961_v47, %v958_v16 }
  0x93   : > { %v5355_v10 = vrot.slane %v6882_v28, 9  ;;  %v1513_v38 = vrot.slane %v6888_v33, 5  ;;  %v977_v60 = vrot.slane %v975_v50, 5  ;;  %v1516_v5 = vrot.slane %v341_v44, 5 }
  0x94   : > { %5860 = vmatprep.mubr.msk.bf16.mxu1 %vm494_vm3, %v7274_v1  ;;  %v972_v13 = vor.u32 %v971_v15, %v967_v9  ;;  %v980_v6 = vshrl.u32 %v6930_v49, 16  ;;  %5896 = vmatprep.mubr.msk.bf16.mxu0 %vm494_vm3, %v7278_v4  ;;  %v963_v22 = vrot.slane %v962_v58, 4  ;;  %v983_v28 = vshll.u32 %v6930_v49, 16 }
  0x95   : > { %v1514_v41 = vsel %vm7054_vm9, %v5355_v10, %v1513_v38  ;;  %v1515_v23 = vrot.slane %v1513_v38, 4  ;;  %v989_v11 = vshll.u32 %v6941_v52, 16  ;;  %v993_v16 = vshrl.u32 %v6941_v52, 16 }
  0x96   : > { %v973_v33 = vrot.slane %v972_v13, 4  ;;  %v982_v2 = vrot.slane %v980_v6, 4  ;;  %v968_v44 = vsel %vm7041_vm8, %v963_v22, %v967_v9  ;;  %v985_v39 = vrot.slane %v983_v28, 5 }
  0x97   : > { %v1517_v14 = vsel %vm7054_vm9, %v1515_v23, %v1516_v5  ;;  %v999_v24 = vshll.u32 %v344_v12, 16  ;;  %v991_v15 = vrot.slane %v989_v11, 5  ;;  %v995_v50 = vrot.slane %v993_v16, 4 }
  0x98   : > { %v978_v47 = vsel %vm7041_vm8, %v973_v33, %v977_v60  ;;  %v7298_v54 = vcombine.low %v1514_v41, %v1517_v14  ;;  %v986_v10 = vor.u32 %v985_v39, %v982_v2  ;;  %v5356_v13 = vrot.slane %v6930_v49, 9  ;;  %v347_v41 = vld [vmem:[#allocation2 + $0x8c] sm:$0x1] }
  0x99   : > { %v7300_v58 = vcombine.low %v968_v44, %v978_v47  ;;  %v1001_v38 = vrot.slane %v999_v24, 5  ;;  %v996_v9 = vor.u32 %v995_v50, %v991_v15  ;;  %v1520_v5 = vrot.slane %v6941_v52, 5 }
  0x9a   : > { %5897 = vmatmul.mubr.msk.bf16.gmra.mxu0 %vm494_vm3, %v7298_v54  ;;  %v1523_v6 = vrot.slane %v344_v12, 5  ;;  %v1004_v22 = vshrl.u32 %v6951_v56, 16  ;;  %v987_v60 = vrot.slane %v986_v10, 4  ;;  %v1007_v23 = vshll.u32 %v6951_v56, 16 }
  0x9b   : > { %5861 = vmatmul.mubr.msk.bf16.gmra.mxu1 %vm494_vm3, %v7300_v58  ;;  %v1013_v28 = vshll.u32 %v6953_v57, 16  ;;  %v1017_v49 = vshrl.u32 %v6953_v57, 16  ;;  %v997_v33 = vrot.slane %v996_v9, 4  ;;  %v1521_v2 = vsel %vm7054_vm9, %v5356_v13, %v1520_v5 }
  0x9c   : > { %v1522_v11 = vrot.slane %v1520_v5, 4  ;;  %v1006_v52 = vrot.slane %v1004_v22, 4  ;;  %v992_v12 = vsel %vm7041_vm8, %v987_v60, %v991_v15  ;;  %v1009_v16 = vrot.slane %v1007_v23, 5 }
  0x9d   : > { %v1015_v44 = vrot.slane %v1013_v28, 5  ;;  %v1019_v14 = vrot.slane %v1017_v49, 4  ;;  %v1002_v39 = vsel %vm7041_vm8, %v997_v33, %v1001_v38  ;;  %v1023_v47 = vshll.u32 %v347_v41, 16 }
  0x9e   : > { %v1524_v24 = vsel %vm7054_vm9, %v1522_v11, %v1523_v6  ;;  %v5357_v50 = vrot.slane %v6951_v56, 9  ;;  %v7321_v10 = vcombine.low %v992_v12, %v1002_v39  ;;  %v1010_v9 = vor.u32 %v1009_v16, %v1006_v52  ;;  %v350_v6 = vld [vmem:[#allocation2 + $0x98] sm:$0x1] }
  0x9f   : > { %v7323_v13 = vcombine.low %v1521_v2, %v1524_v24  ;;  %v1020_v5 = vor.u32 %v1019_v14, %v1015_v44  ;;  %v1025_v22 = vrot.slane %v1023_v47, 5  ;;  %v1527_v15 = vrot.slane %v6953_v57, 5 }
  0xa0   : > { %v1530_v60 = vrot.slane %v347_v41, 5  ;;  %v1028_v23 = vshrl.u32 %v6965_v61, 16  ;;  %5864 = vmatprep.mubr.msk.bf16.mxu1 %vm494_vm3, %v7321_v10  ;;  %v1011_v38 = vrot.slane %v1010_v9, 4  ;;  %v1031_v28 = vshll.u32 %v6965_v61, 16 }
  0xa1   : > { %5900 = vmatprep.mubr.msk.bf16.mxu0 %vm494_vm3, %v7323_v13  ;;  %v1021_v56 = vrot.slane %v1020_v5, 4  ;;  %v1037_v49 = vshll.u32 %v6967_v62, 16  ;;  %v1528_v33 = vsel %vm7054_vm9, %v5357_v50, %v1527_v15  ;;  %v1529_v57 = vrot.slane %v1527_v15, 4 }
  0xa2   : > { %v1030_v41 = vrot.slane %v1028_v23, 4  ;;  %v1041_v2 = vshrl.u32 %v6967_v62, 16  ;;  %v1016_v11 = vsel %vm7041_vm8, %v1011_v38, %v1015_v44  ;;  %v1033_v12 = vrot.slane %v1031_v28, 5  ;;  %v353_v38 = vld [vmem:[#allocation2 + $0xa4] sm:$0x1] }
  0xa3   : > { %v1026_v52 = vsel %vm7041_vm8, %v1021_v56, %v1025_v22  ;;  %v1039_v16 = vrot.slane %v1037_v49, 5  ;;  %v1531_v39 = vsel %vm7054_vm9, %v1529_v57, %v1530_v60  ;;  %v1047_v47 = vshll.u32 %v350_v6, 16 }
  0xa4   : > { %v7340_v14 = vcombine.low %v1016_v11, %v1026_v52  ;;  %v1043_v24 = vrot.slane %v1041_v2, 4  ;;  %v7344_v50 = vcombine.low %v1528_v33, %v1531_v39  ;;  %v1034_v9 = vor.u32 %v1033_v12, %v1030_v41 }
  0xa5   : > { %v5358_v5 = vrot.slane %v6965_v61, 9  ;;  %v1534_v15 = vrot.slane %v6967_v62, 5  ;;  %v1049_v22 = vrot.slane %v1047_v47, 5  ;;  %v1537_v23 = vrot.slane %v350_v6, 5 }
  0xa6   : > { %9204 = vst [vmem:[#allocation17_spill] sm:$0xff] %v7340_v14  ;;  %5865 = vmatmul.mubr.msk.bf16.gmra.mxu1 %vm494_vm3, %v7340_v14  ;;  %v1044_v44 = vor.u32 %v1043_v24, %v1039_v16  ;;  %v1052_v56 = vshrl.u32 %v6983_v3, 16  ;;  %5901 = vmatmul.mubr.msk.bf16.gmra.mxu0 %vm494_vm3, %v7344_v50  ;;  %v1035_v60 = vrot.slane %v1034_v9, 4  ;;  %v1055_v61 = vshll.u32 %v6983_v3, 16 }
  0xa7   : > { %v1535_v28 = vsel %vm7054_vm9, %v5358_v5, %v1534_v15  ;;  %v1536_v49 = vrot.slane %v1534_v15, 4  ;;  %v1061_v57 = vshll.u32 %v6989_v8, 16  ;;  %v1065_v41 = vshrl.u32 %v6989_v8, 16 }
  0xa8   : > { %v1045_v62 = vrot.slane %v1044_v44, 4  ;;  %v1054_v33 = vrot.slane %v1052_v56, 4  ;;  %v1040_v6 = vsel %vm7041_vm8, %v1035_v60, %v1039_v16  ;;  %v1057_v11 = vrot.slane %v1055_v61, 5 }
  0xa9   : > { %v1538_v2 = vsel %vm7054_vm9, %v1536_v49, %v1537_v23  ;;  %v1071_v52 = vshll.u32 %v353_v38, 16  ;;  %v1063_v24 = vrot.slane %v1061_v57, 5  ;;  %v1067_v47 = vrot.slane %v1065_v41, 4 }
  0xaa   : > { %v1050_v12 = vsel %vm7041_vm8, %v1045_v62, %v1049_v22  ;;  %v7364_v39 = vcombine.low %v1535_v28, %v1538_v2  ;;  %v1058_v5 = vor.u32 %v1057_v11, %v1054_v33  ;;  %v5359_v44 = vrot.slane %v6983_v3, 9  ;;  %v356_v28 = vld [vmem:[#allocation2 + $0xb0] sm:$0x1] }
  0xab   : > { %v7366_v9 = vcombine.low %v1040_v6, %v1050_v12  ;;  %v1073_v15 = vrot.slane %v1071_v52, 5  ;;  %v1068_v16 = vor.u32 %v1067_v47, %v1063_v24  ;;  %v1541_v23 = vrot.slane %v6989_v8, 5 }
  0xac   : > { %9205 = vst [vmem:[#allocation18_spill] sm:$0xff] %v7364_v39  ;;  %5904 = vmatprep.mubr.msk.bf16.mxu0 %vm494_vm3, %v7364_v39  ;;  %v1544_v56 = vrot.slane %v353_v38, 5  ;;  %v1076_v60 = vshrl.u32 %v7003_v18, 16  ;;  %v1059_v22 = vrot.slane %v1058_v5, 4  ;;  %v1079_v49 = vshll.u32 %v7003_v18, 16 }
  0xad   : > { %9206 = vst [vmem:[#allocation19_spill] sm:$0xff] %v7366_v9  ;;  %5868 = vmatprep.mubr.msk.bf16.mxu1 %vm494_vm3, %v7366_v9  ;;  %v1085_v61 = vshll.u32 %v7005_v19, 16  ;;  %v1089_v3 = vshrl.u32 %v7005_v19, 16  ;;  %v1069_v62 = vrot.slane %v1068_v16, 4  ;;  %v1542_v33 = vsel %vm7054_vm9, %v5359_v44, %v1541_v23 }
  0xae   : > { %v1543_v57 = vrot.slane %v1541_v23, 4  ;;  %v1078_v8 = vrot.slane %v1076_v60, 4  ;;  %v1064_v38 = vsel %vm7041_vm8, %v1059_v22, %v1063_v24  ;;  %v1081_v41 = vrot.slane %v1079_v49, 5 }
  0xaf   : > { %v1087_v6 = vrot.slane %v1085_v61, 5  ;;  %v1091_v2 = vrot.slane %v1089_v3, 4  ;;  %v1074_v11 = vsel %vm7041_vm8, %v1069_v62, %v1073_v15  ;;  %v1095_v12 = vshll.u32 %v356_v28, 16 }
  0xb0   : > { %v1545_v52 = vsel %vm7054_vm9, %v1543_v57, %v1544_v56  ;;  %v5360_v47 = vrot.slane %v7003_v18, 9  ;;  %v7387_v5 = vcombine.low %v1064_v38, %v1074_v11  ;;  %v1082_v16 = vor.u32 %v1081_v41, %v1078_v8  ;;  %v359_v56 = vld [vmem:[#allocation2 + $0xbc] sm:$0x1] }
  0xb1   : > { %v7389_v44 = vcombine.low %v1542_v33, %v1545_v52  ;;  %v1092_v23 = vor.u32 %v1091_v2, %v1087_v6  ;;  %v1097_v60 = vrot.slane %v1095_v12, 5  ;;  %v1548_v24 = vrot.slane %v7005_v19, 5 }
  0xb2   : > { %9207 = vst [vmem:[#allocation20_spill] sm:$0xff] %v7387_v5  ;;  %v1551_v22 = vrot.slane %v356_v28, 5  ;;  %v1100_v49 = vshrl.u32 %v7019_v27, 16  ;;  %5869 = vmatmul.mubr.msk.bf16.gmra.mxu1 %vm494_vm3, %v7387_v5  ;;  %v1083_v15 = vrot.slane %v1082_v16, 4  ;;  %v1103_v61 = vshll.u32 %v7019_v27, 16 }
  0xb3   : > { %9208 = vst [vmem:[#allocation21_spill] sm:$0xff] %v7389_v44  ;;  %5905 = vmatmul.mubr.msk.bf16.gmra.mxu0 %vm494_vm3, %v7389_v44  ;;  %v1093_v18 = vrot.slane %v1092_v23, 4  ;;  %v1109_v3 = vshll.u32 %v7035_v32, 16  ;;  %v1549_v62 = vsel %vm7054_vm9, %v5360_v47, %v1548_v24  ;;  %v1550_v19 = vrot.slane %v1548_v24, 4 }
  0xb4   : > { %v1102_v28 = vrot.slane %v1100_v49, 4  ;;  %v1113_v33 = vshrl.u32 %v7035_v32, 16  ;;  %v1088_v57 = vsel %vm7041_vm8, %v1083_v15, %v1087_v6  ;;  %v1105_v38 = vrot.slane %v1103_v61, 5 }
  0xb5   : > { %v1098_v8 = vsel %vm7041_vm8, %v1093_v18, %v1097_v60  ;;  %v1111_v41 = vrot.slane %v1109_v3, 5  ;;  %v1552_v11 = vsel %vm7054_vm9, %v1550_v19, %v1551_v22  ;;  %v1119_v12 = vshll.u32 %v359_v56, 16  ;;  %v6238_v19 = vld [vmem:[%s9139_s1 + $0x50] sm:$0xff]  }
  0xb6   : > { %v7406_v2 = vcombine.low %v1088_v57, %v1098_v8  ;;  %v1115_v52 = vrot.slane %v1113_v33, 4  ;;  %v7410_v47 = vcombine.low %v1549_v62, %v1552_v11  ;;  %v1106_v16 = vor.u32 %v1105_v38, %v1102_v28  ;;  %v6239_v28 = vld [vmem:[%s9139_s1 + $0x60] sm:$0xff]   ;;  %v9216_v38 = vld [vmem:[#allocation9_spill] sm:$0xff] }
  0xb7   : > { %v5361_v23 = vrot.slane %v7019_v27, 9  ;;  %v1555_v24 = vrot.slane %v7035_v32, 5  ;;  %v1121_v60 = vrot.slane %v1119_v12, 5  ;;  %v1558_v49 = vrot.slane %v359_v56, 5  ;;  %v9215_v33 = vld [vmem:[#allocation8_spill] sm:$0xff] }
  0xb8   : > { %9209 = vst [vmem:[#allocation22_spill] sm:$0xff] %v7406_v2  ;;  %9210 = vst [vmem:[#allocation23_spill] sm:$0xff] %v7410_v47  ;;  %5872 = vmatprep.mubr.msk.bf16.mxu1 %vm494_vm3, %v7406_v2  ;;  %v1116_v6 = vor.u32 %v1115_v52, %v1111_v41  ;;  %5908 = vmatprep.mubr.msk.bf16.mxu0 %vm494_vm3, %v7410_v47  ;;  %v1107_v15 = vrot.slane %v1106_v16, 4  ;;  %v7484_v57 = vld [vmem:[#allocation2 + $0xc0] sm:$0xf]  ;;  %v9217_v16 = vld [vmem:[#allocation10_spill] sm:$0xff] }
  0xb9   : > { %v1556_v22 = vsel %vm7054_vm9, %v5361_v23, %v1555_v24  ;;  %v1557_v18 = vrot.slane %v1555_v24, 4  ;;  %v7486_v8 = vld [vmem:[#allocation2 + $0xc4] sm:$0xf]  ;;  %v2088_v11 = vshll.u32 %v7484_v57, 16  ;;  %vm4574_vm10 = vsmask.f32 256 }
  0xba   : > { %v1117_v61 = vrot.slane %v1116_v6, 4  ;;  %v1112_v27 = vsel %vm7041_vm8, %v1107_v15, %v1111_v41  ;;  %v2085_v41 = vshrl.u32 %v7484_v57, 16  ;;  %v2094_v52 = vshll.u32 %v7486_v8, 16  ;;  %v9218_v15 = vld [vmem:[#allocation12_spill] sm:$0xff] }
  0xbb   : > { %v1559_v32 = vsel %vm7054_vm9, %v1557_v18, %v1558_v49  ;;  %v2098_v12 = vshrl.u32 %v7486_v8, 16  ;;  %v2090_v24 = vrot.slane %v2088_v11, 5  ;;  %v7500_v49 = vld [vmem:[#allocation2 + $0xc8] sm:$0x1]  ;;  %vm4575_vm11 = vsmask.f32 4368 }
  0xbc   : > { %v1122_v3 = vsel %vm7041_vm8, %v1117_v61, %v1121_v60  ;;  %v7426_v62 = vcombine.low %v1556_v22, %v1559_v32  ;;  %v2087_v23 = vrot.slane %v2085_v41, 4  ;;  %v2096_v6 = vrot.slane %v2094_v52, 5  ;;  %vm8722_vm12 = vmor %vm4574_vm10, %vm4575_vm11 }
  0xbd   : > { %v7428_v56 = vcombine.low %v1112_v27, %v1122_v3  ;;  %v2100_v60 = vrot.slane %v2098_v12, 4  ;;  %v2104_v61 = vshll.u32 %v7500_v49, 16  ;;  %v9219_v27 = vld [vmem:[#allocation13_spill] sm:$0xff]  ;;  %v7527_v12 = vcombine.low %v7484_v57, %v7486_v8 }
  0xbe   : > { %9211 = vst [vmem:[#allocation24_spill] sm:$0xff] %v7426_v62  ;;  %5909 = vmatmul.mubr.msk.bf16.gmra.mxu0 %vm494_vm3, %v7426_v62  ;;  %v2091_v22 = vor.u32 %v2090_v24, %v2087_v23  ;;  %v6243_v23 = vld [vmem:[%s9139_s1 + $0x70] sm:$0xff]   ;;  %v6244_v24 = vld [vmem:[%s9139_s1 + $0x80] sm:$0xff]   ;;  %vm4994_vm13 = vcmask 257024   ;;  %vm4995_vm14 = vsmask.f32 7938 }
  0xbf   : > { %9212 = vst [vmem:[#allocation25_spill] sm:$0xff] %v7428_v56  ;;  %5873 = vmatmul.mubr.msk.bf16.gmra.mxu1 %vm494_vm3, %v7428_v56  ;;  %5952 = vmatprep.mubr.msk.bf16.mxu0 %vm494_vm3, %v7093_v17  ;;  %v6241_v17 = vld [vmem:[%s9139_s1 + $0x78] sm:$0xff]   ;;  %v2101_v18 = vor.u32 %v2100_v60, %v2096_v6  ;;  %vm8875_vm15 = vmand %vm4994_vm13, %vm4995_vm14  ;;  %vm5002_vm0 = vcmask 253952  }
  0xc0   : > { %5916 = vmatprep.mubr.msk.bf16.mxu1 %vm494_vm3, %v6879_v26  ;;  %v6242_v26 = vld [vmem:[%s9139_s1 + $0x88] sm:$0xff]   ;;  %v2092_v32 = vrot.slane %v2091_v22, 4  ;;  %vm8902_vm1 = vmand %vm5002_vm0, %vm4574_vm10 }
  0xc1   : > { %v2102_v3 = vrot.slane %v2101_v18, 4 }
  0xc2   : > { %v2097_v41 = vsel %vm7041_vm8, %v2092_v32, %v2096_v6 }
  0xc6   : > { %5953 = vmatmul.mubr.msk.bf16.vlgmr.msra.gmra.mxu0 %vm494_vm3, %v7124_v25 }
  0xc7   : > { %5917 = vmatmul.mubr.msk.bf16.vlgmr.msra.gmra.mxu1 %vm494_vm3, %v6939_v51  ;;  %6021 = vmatpush3.bf16.msra.mxu0 %v7167_v46  ;;  %v9213_v46 = vld [vmem:[#allocation11_spill] sm:$0xff] }
  0xc8   : > { %5985 = vmatpush3.bf16.msra.mxu1 %v7176_v55  ;;  %5920 = vmatprep.mubr.msk.bf16.mxu1 %vm494_vm3, %v6961_v59  ;;  %v9214_v55 = vld [vmem:[#allocation7_spill] sm:$0xff] }
  0xc9   : > { %5956 = vmatprep.mubr.msk.bf16.mxu0 %vm494_vm3, %v7140_v31  ;;  %5986 = vmatprep.subr.bf16.mxu1 %v6238_v19 }
  0xca   : > { %6022 = vmatprep.subr.bf16.mxu0 %v6239_v28 }
  0xcb   : > { %6023 = vmatpush3.bf16.msra.mxu0 %v6239_v28  ;;  %v9220_v28 = vld [vmem:[#allocation14_spill] sm:$0xff] }
  0xcc   : > { %5987 = vmatpush3.bf16.msra.mxu1 %v6238_v19  ;;  %6092 = vmatprep.subr.bf16.mxu0 %v6242_v26  ;;  %v2106_v19 = vrot.slane %v2104_v61, 5 }
  0xcd   : > { %6056 = vmatprep.subr.bf16.mxu1 %v6241_v17 }
  0xce   : > { %5957 = vmatmul.mubr.msk.bf16.gmra.mxu0 %vm494_vm3, %v7183_v21  ;;  %v2107_v11 = vsel %vm7041_vm8, %v2102_v3, %v2106_v19 }
  0xcf   : > { %5921 = vmatmul.mubr.msk.bf16.gmra.mxu1 %vm494_vm3, %v9213_v46  ;;  %5960 = vmatprep.mubr.msk.bf16.mxu0 %vm494_vm3, %v7208_v45  ;;  %v7523_v52 = vcombine.low %v2097_v41, %v2107_v11 }
  0xd0   : > { %5924 = vmatprep.mubr.msk.bf16.mxu1 %vm494_vm3, %v7013_v20 }
  0xd1   : > { %9221 = vst [vmem:[#allocation11_spill] sm:$0xff] %v7523_v52 }
  0xd6   : > { %5961 = vmatmul.mubr.msk.bf16.gmra.mxu0 %vm494_vm3, %v7234_v34 }
  0xd7   : > { %5925 = vmatmul.mubr.msk.bf16.gmra.mxu1 %vm494_vm3, %v7029_v30  ;;  %5964 = vmatprep.mubr.msk.bf16.mxu0 %vm494_vm3, %v7255_v36 }
  0xd8   : > { %5928 = vmatprep.mubr.msk.bf16.mxu1 %vm494_vm3, %v7039_v35 }
  0xde   : > { %5965 = vmatmul.mubr.msk.bf16.gmra.mxu0 %vm494_vm3, %v7274_v1 }
  0xdf   : > { %5929 = vmatmul.mubr.msk.bf16.gmra.mxu1 %vm494_vm3, %v9214_v55  ;;  %5968 = vmatprep.mubr.msk.bf16.mxu0 %vm494_vm3, %v7300_v58 }
  0xe0   : > { %5932 = vmatprep.mubr.msk.bf16.mxu1 %vm494_vm3, %v9215_v33 }
  0xe6   : > { %5969 = vmatmul.mubr.msk.bf16.gmra.mxu0 %vm494_vm3, %v7321_v10 }
  0xe7   : > { %5933 = vmatmul.mubr.msk.bf16.gmra.mxu1 %vm494_vm3, %v9216_v38  ;;  %5972 = vmatprep.mubr.msk.bf16.mxu0 %vm494_vm3, %v7340_v14 }
  0xe8   : > { %5936 = vmatprep.mubr.msk.bf16.mxu1 %vm494_vm3, %v9217_v16 }
  0xee   : > { %5973 = vmatmul.mubr.msk.bf16.gmra.mxu0 %vm494_vm3, %v7366_v9 }
  0xef   : > { %5937 = vmatmul.mubr.msk.bf16.gmra.mxu1 %vm494_vm3, %v9218_v15  ;;  %5976 = vmatprep.mubr.msk.bf16.mxu0 %vm494_vm3, %v7387_v5  ;;  %v366_v5 = vld [vmem:[%s6703_s20] sm:$0xff] }
  0xf0   : > { %5940 = vmatprep.mubr.msk.bf16.mxu1 %vm494_vm3, %v9219_v27 }
  0xf6   : > { %5977 = vmatmul.mubr.msk.bf16.gmra.mxu0 %vm494_vm3, %v7406_v2  ;;  %v3454_v2 = vld [vmem:[%s6710_s23] sm:$0xff] }
  0xf7   : > { %5941 = vmatmul.mubr.msk.bf16.gmra.mxu1 %vm494_vm3, %v9220_v28  ;;  %5980 = vmatprep.mubr.msk.bf16.mxu0 %vm494_vm3, %v7428_v56  ;;  %v368_v56 = vld [vmem:[%s6703_s20 + $0x10] sm:$0xff] }
  0xf8   : > { %5944 = vmatprep.mubr.msk.bf16.mxu1 %vm494_vm3, %v7047_v7  ;;  %3518 = vrot.lane.b32.xlu0 %v3454_v2, %s6598_s15 }
  0xfe   : > { %5981 = vmatmul.mubr.msk.bf16.gmra.mxu0 %vm494_vm3, %v7523_v52  ;;  %v2327_v52 = vrot.slane %v7486_v8, 5 }
  0xff   : > { %5945 = vmatmul.mubr.msk.bf16.gmra.mxu1 %vm494_vm3, %v7527_v12  ;;  %6024 = vmatprep.mubr.msk.bf16.mxu0 %vm494_vm3, %v6939_v51 }
 0x100   : > { %5988 = vmatprep.mubr.msk.bf16.mxu1 %vm494_vm3, %v7086_v40 }
 0x106   : > { %6025 = vmatmul.mubr.msk.bf16.vlgmr.msra.gmra.mxu0 %vm494_vm3, %v6961_v59 }
 0x107   : > { %5989 = vmatmul.mubr.msk.bf16.vlgmr.msra.gmra.mxu1 %vm494_vm3, %v7110_v29  ;;  %6093 = vmatpush3.bf16.msra.mxu0 %v6242_v26 }
 0x108   : > { %6057 = vmatpush3.bf16.msra.mxu1 %v6241_v17  ;;  %5992 = vmatprep.mubr.msk.bf16.mxu1 %vm494_vm3, %v7138_v0 }
 0x109   : > { %6028 = vmatprep.mubr.msk.bf16.mxu0 %vm494_vm3, %v9213_v46  ;;  %6058 = vmatprep.subr.bf16.mxu1 %v6243_v23 }
 0x10a   : > { %6094 = vmatprep.subr.bf16.mxu0 %v6244_v24 }
 0x10b   : > { %6095 = vmatpush3.bf16.msra.mxu0 %v6244_v24 }
 0x10c   : > { %6059 = vmatpush3.bf16.msra.mxu1 %v6243_v23 }
 0x10e   : > { %6029 = vmatmul.mubr.msk.bf16.gmra.mxu0 %vm494_vm3, %v7013_v20 }
 0x10f   : > { %5993 = vmatmul.mubr.msk.bf16.gmra.mxu1 %vm494_vm3, %v7185_v53  ;;  %6032 = vmatprep.mubr.msk.bf16.mxu0 %vm494_vm3, %v7029_v30 }
 0x110   : > { %5996 = vmatprep.mubr.msk.bf16.mxu1 %vm494_vm3, %v7212_v37 }
 0x116   : > { %6033 = vmatmul.mubr.msk.bf16.gmra.mxu0 %vm494_vm3, %v7039_v35  ;;  %v5810_v51 = vpop.f32.mrf.mxu0 }
 0x117   : > { %5997 = vmatmul.mubr.msk.bf16.gmra.mxu1 %vm494_vm3, %v7230_v63  ;;  %6036 = vmatprep.mubr.msk.bf16.mxu0 %vm494_vm3, %v9214_v55  ;;  %v7565_v59 = vpop.f32.mrf.mxu1 }
 0x118   : > { %6000 = vmatprep.mubr.msk.bf16.mxu1 %vm494_vm3, %v7257_v48  ;;  %v577_v20 = vpop.f32.mrf.mxu0 }
 0x119   : > { %v7569_v30 = vpop.f32.mrf.mxu1 }
 0x11a   : > { %v7571_v40 = vpop.f32.mrf.mxu0 }
 0x11b   : > { %v7573_v26 = vpop.f32.mrf.mxu1 }
 0x11c   : > { %v7575_v35 = vpop.f32.mrf.mxu0 }
 0x11d   : > { %v7577_v17 = vpop.f32.mrf.mxu1 }
 0x11e   : > { %6037 = vmatmul.mubr.msk.bf16.gmra.mxu0 %vm494_vm3, %v9215_v33  ;;  %v7581_v46 = vpop.f32.mrf.mxu0 }
 0x11f   : > { %6001 = vmatmul.mubr.msk.bf16.gmra.mxu1 %vm494_vm3, %v7278_v4  ;;  %6040 = vmatprep.mubr.msk.bf16.mxu0 %vm494_vm3, %v9216_v38  ;;  %v7587_v55 = vpop.f32.mrf.mxu1 }
 0x120   : > { %6004 = vmatprep.mubr.msk.bf16.mxu1 %vm494_vm3, %v7298_v54  ;;  %v7591_v6 = vpop.f32.mrf.mxu0 }
 0x121   : > { %v7593_v60 = vpop.f32.mrf.mxu1 }
 0x122   : > { %v7595_v22 = vpop.f32.mrf.mxu0 }
 0x123   : > { %v7597_v33 = vpop.f32.mrf.mxu1 }
 0x124   : > { %9222 = vst [vmem:[#allocation7_spill] sm:$0xff] %v7597_v33  ;;  %v7599_v18 = vpop.f32.mrf.mxu0  ;;  %v367_v33 = vld [vmem:[%s6703_s20 + $0x8] sm:$0xff] }
 0x125   : > { %v7601_v61 = vpop.f32.mrf.mxu1  ;;  %v705_v42 = vadd.f32 %v7575_v35, %v367_v33  ;;  %v373_v33 = vld [vmem:[%s6703_s20 + $0x38] sm:$0xff] }
 0x126   : > { %9223 = vst [vmem:[#allocation8_spill] sm:$0xff] %v7601_v61  ;;  %6041 = vmatmul.mubr.msk.bf16.gmra.mxu0 %vm494_vm3, %v9217_v16  ;;  %v7605_v38 = vpop.f32.mrf.mxu0  ;;  %v3456_v61 = vld [vmem:[%s6710_s23 + $0x10] sm:$0xff] }
 0x127   : > { %6005 = vmatmul.mubr.msk.bf16.gmra.mxu1 %vm494_vm3, %v7323_v13  ;;  %6044 = vmatprep.mubr.msk.bf16.mxu0 %vm494_vm3, %v9218_v15  ;;  %v7611_v32 = vpop.f32.mrf.mxu1 }
 0x128   : > { %9224 = vst [vmem:[#allocation9_spill] sm:$0xff] %v7611_v32  ;;  %6008 = vmatprep.mubr.msk.bf16.mxu1 %vm494_vm3, %v7344_v50  ;;  %v7615_v3 = vpop.f32.mrf.mxu0  ;;  %3522 = vrot.lane.b32.xlu1 %v3456_v61, %s6598_s15 }
 0x129   : > { %v7617_v19 = vpop.f32.mrf.mxu1 }
 0x12a   : > { %9225 = vst [vmem:[#allocation10_spill] sm:$0xff] %v7617_v19  ;;  %v7619_v41 = vpop.f32.mrf.mxu0  ;;  %v5446_v19 = vrot.slane %v7484_v57, 9 }
 0x12b   : > { %v7621_v16 = vpop.f32.mrf.mxu1 }
 0x12c   : > { %9226 = vst [vmem:[#allocation12_spill] sm:$0xff] %v7621_v16  ;;  %v7623_v11 = vpop.f32.mrf.mxu0 }
 0x12d   : > { %v7625_v23 = vpop.f32.mrf.mxu1 }
 0x12e   : > { %9227 = vst [vmem:[#allocation13_spill] sm:$0xff] %v7625_v23  ;;  %6045 = vmatmul.mubr.msk.bf16.gmra.mxu0 %vm494_vm3, %v9219_v27  ;;  %v7629_v15 = vpop.f32.mrf.mxu0 }
 0x12f   : > { %6009 = vmatmul.mubr.msk.bf16.gmra.mxu1 %vm494_vm3, %v7364_v39  ;;  %6048 = vmatprep.mubr.msk.bf16.mxu0 %vm494_vm3, %v9220_v28  ;;  %v7635_v24 = vpop.f32.mrf.mxu1  ;;  %v2329_v28 = vrot.slane %v2327_v52, 4  ;;  %v3457_v39 = vld [vmem:[%s6710_s23 + $0x18] sm:$0xff] }
 0x130   : > { %9228 = vst [vmem:[#allocation14_spill] sm:$0xff] %v7635_v24  ;;  %6012 = vmatprep.mubr.msk.bf16.mxu1 %vm494_vm3, %v7389_v44  ;;  %v7640_v23 = vpop.f32.mrf.mxu0  ;;  %v2330_v24 = vrot.slane %v7500_v49, 5  ;;  %v7665_v49 = vld [vmem:[#allocation2 + $0xcc] sm:$0xf]  ;;  %v704_v44 = vadd.f32 %v577_v20, %v366_v5  ;;  %3524 = vrot.lane.b32.xlu1 %v3457_v39, %s6598_s15 }
 0x131   : > { %v7642_v27 = vpop.f32.mrf.mxu1 }
 0x132   : > { %9229 = vst [vmem:[#allocation26_spill] sm:$0xff] %v7642_v27  ;;  %v7644_v43 = vpop.f32.mrf.mxu0  ;;  %v706_v27 = vadd.f32 %v5810_v51, %v368_v56  ;;  %v2331_v56 = vsel %vm7054_vm9, %v2329_v28, %v2330_v24 }
 0x133   : > { %v7647_v16 = vpop.f32.mrf.mxu1 }
 0x134   : > { %9230 = vst [vmem:[#allocation27_spill] sm:$0xff] %v7647_v16  ;;  %v7651_v32 = vpop.f32.mrf.mxu0  ;;  %v369_v16 = vld [vmem:[%s6703_s20 + $0x18] sm:$0xff] }
 0x135   : > { %v7655_v8 = vpop.f32.mrf.mxu1  ;;  %v707_v5 = vadd.f32 %v7571_v40, %v369_v16  ;;  %v3458_v40 = vld [vmem:[%s6710_s23 + $0x20] sm:$0xff]  ;;  %v370_v16 = vld [vmem:[%s6703_s20 + $0x20] sm:$0xff] }
 0x136   : > { %9231 = vst [vmem:[#allocation28_spill] sm:$0xff] %v7655_v8  ;;  %6049 = vmatmul.mubr.msk.bf16.gmra.mxu0 %vm494_vm3, %v7047_v7  ;;  %v5882_v57 = vpop.f32.mrf.mxu0  ;;  %v7667_v8 = vld [vmem:[#allocation2 + $0xd0] sm:$0xf]  ;;  %v2328_v7 = vsel %vm7054_vm9, %v5446_v19, %v2327_v52 }
 0x137   : > { %6013 = vmatmul.mubr.msk.bf16.gmra.mxu1 %vm494_vm3, %v7410_v47  ;;  %6052 = vmatprep.mubr.msk.bf16.mxu0 %vm494_vm3, %v7527_v12  ;;  %v5846_v2 = vpop.f32.mrf.mxu1  ;;  %v3455_v12 = vld [vmem:[%s6710_s23 + $0x8] sm:$0xff]  ;;  %v5474_v52 = vcombine.low %v7665_v49, %v7667_v8  ;;  %v7686_v28 = vcombine.low %v2328_v7, %v2331_v56  ;;  %v371_v56 = vld [vmem:[%s6703_s20 + $0x28] sm:$0xff] }
 0x138   : > { %6016 = vmatprep.mubr.msk.bf16.mxu1 %vm494_vm3, %v7426_v62  ;;  %v1399_v51 = vadd.f32 %v5846_v2, %v706_v27  ;;  %v1707_v47 = vpop.f32.mrf.mxu0  ;;  %3520 = vrot.lane.b32.xlu0 %v3455_v12, %s6598_s15  ;;  %v372_v27 = vld [vmem:[%s6703_s20 + $0x30] sm:$0xff] }
 0x139   : > { %v1270_v9 = vpop.f32.mrf.mxu1 }
 0x13a   : > { %v7683_v20 = vadd.f32 %v5882_v57, %v1399_v51  ;;  %v1397_v19 = vadd.f32 %v1270_v9, %v704_v44  ;;  %v5883_v24 = vpop.f32.mrf.mxu0  ;;  %v710_v9 = vadd.f32 %v7581_v46, %v372_v27  ;;  %v708_v57 = vadd.f32 %v7591_v6, %v370_v16  ;;  %v3462_v16 = vld [vmem:[%s6710_s23 + $0x40] sm:$0xff] }
 0x13b   : > { %v5847_v2 = vpop.f32.mrf.mxu1 }
 0x13c   : > { %v7689_v61 = vadd.f32 %v1707_v47, %v1397_v19  ;;  %v1400_v62 = vadd.f32 %v5847_v2, %v707_v5  ;;  %v1710_v12 = vpop.f32.mrf.mxu0  ;;  %3526 = vrot.lane.b32.xlu0 %v3458_v40, %s6598_s15  ;;  %v3461_v40 = vld [vmem:[%s6710_s23 + $0x38] sm:$0xff] }
 0x13d   : > { %v1273_v14 = vpop.f32.mrf.mxu1 }
 0x13e   : > { %6053 = vmatmul.mubr.msk.bf16.gmra.mxu0 %vm494_vm3, %v5474_v52  ;;  %v7698_v44 = vadd.f32 %v5883_v24, %v1400_v62  ;;  %v1398_v47 = vadd.f32 %v1273_v14, %v705_v42  ;;  %v5886_v35 = vpop.f32.mrf.mxu0  ;;  %v3459_v42 = vld [vmem:[%s6710_s23 + $0x28] sm:$0xff]  ;;  %v3460_v14 = vld [vmem:[%s6710_s23 + $0x30] sm:$0xff]  ;;  %v376_v52 = vld [vmem:[%s6703_s20 + $0x50] sm:$0xff]  ;;  %v709_v24 = vadd.f32 %v7599_v18, %v371_v56 }
 0x13f   : > { %6017 = vmatmul.mubr.msk.bf16.gmra.mxu1 %vm494_vm3, %v7686_v28  ;;  %6096 = vmatprep.mubr.msk.bf16.mxu0 %vm494_vm3, %v7110_v29  ;;  %v5850_v39 = vpop.f32.mrf.mxu1  ;;  %v711_v29 = vadd.f32 %v7595_v22, %v373_v33  ;;  %v714_v22 = vadd.f32 %v7605_v38, %v376_v52  ;;  %v375_v56 = vld [vmem:[%s6703_s20 + $0x48] sm:$0xff] }
 0x140   : > { %6060 = vmatprep.mubr.msk.bf16.mxu1 %vm494_vm3, %v7124_v25  ;;  %v7708_v46 = vadd.f32 %v1710_v12, %v1398_v47  ;;  %v1403_v62 = vadd.f32 %v5850_v39, %v710_v9  ;;  %v1723_v7 = vpop.f32.mrf.mxu0  ;;  %3528 = vrot.lane.b32.xlu1 %v3459_v42, %s6598_s15  ;;  %v374_v9 = vld [vmem:[%s6703_s20 + $0x40] sm:$0xff]  ;;  %v377_v39 = vld [vmem:[%s6703_s20 + $0x58] sm:$0xff] }
 0x141   : > { %v1286_v51 = vpop.f32.mrf.mxu1  ;;  %3530 = vrot.lane.b32.xlu0 %v3460_v14, %s6598_s15  ;;  %v3463_v42 = vld [vmem:[%s6710_s23 + $0x48] sm:$0xff]  ;;  %v3464_v14 = vld [vmem:[%s6710_s23 + $0x50] sm:$0xff] }
 0x142   : > { %v7716_v6 = vadd.f32 %v5886_v35, %v1403_v62  ;;  %v1401_v25 = vadd.f32 %v1286_v51, %v708_v57  ;;  %v5887_v5 = vpop.f32.mrf.mxu0  ;;  %v712_v62 = vadd.f32 %v7615_v3, %v374_v9 }
 0x143   : > { %v5851_v19 = vpop.f32.mrf.mxu1 }
 0x144   : > { %v7720_v27 = vadd.f32 %v1723_v7, %v1401_v25  ;;  %v1404_v2 = vadd.f32 %v5851_v19, %v711_v29  ;;  %v1726_v12 = vpop.f32.mrf.mxu0  ;;  %3532 = vrot.lane.b32.xlu1 %v3461_v40, %s6598_s15  ;;  %v380_v29 = vld [vmem:[%s6703_s20 + $0x70] sm:$0xff]  ;;  %v378_v40 = vld [vmem:[%s6703_s20 + $0x60] sm:$0xff] }
 0x145   : > { %v1289_v47 = vpop.f32.mrf.mxu1  ;;  %3534 = vrot.lane.b32.xlu0 %v3462_v16, %s6598_s15 }
 0x146   : > { %6097 = vmatmul.mubr.msk.bf16.vlgmr.msra.gmra.mxu0 %vm494_vm3, %v7138_v0  ;;  %v7730_v18 = vadd.f32 %v5887_v5, %v1404_v2  ;;  %v1402_v35 = vadd.f32 %v1289_v47, %v709_v24  ;;  %v5890_v33 = vpop.f32.mrf.mxu0  ;;  %v713_v5 = vadd.f32 %v7623_v11, %v375_v56  ;;  %v3465_v2 = vld [vmem:[%s6710_s23 + $0x58] sm:$0xff]  ;;  %v381_v47 = vld [vmem:[%s6703_s20 + $0x78] sm:$0xff] }
 0x147   : > { %6061 = vmatmul.mubr.msk.bf16.vlgmr.msra.gmra.mxu1 %vm494_vm3, %v7140_v31  ;;  %6100 = vmatprep.mubr.msk.bf16.mxu0 %vm494_vm3, %v7185_v53  ;;  %v5854_v57 = vpop.f32.mrf.mxu1  ;;  %v715_v53 = vadd.f32 %v7619_v41, %v377_v39  ;;  %v718_v41 = vadd.f32 %v7629_v15, %v380_v29  ;;  %v3467_v39 = vld [vmem:[%s6710_s23 + $0x68] sm:$0xff] }
 0x148   : > { %6064 = vmatprep.mubr.msk.bf16.mxu1 %vm494_vm3, %v7183_v21  ;;  %v7740_v38 = vadd.f32 %v1726_v12, %v1402_v35  ;;  %v1407_v0 = vadd.f32 %v5854_v57, %v714_v22  ;;  %v1739_v7 = vpop.f32.mrf.mxu0  ;;  %3536 = vrot.lane.b32.xlu1 %v3463_v42, %s6598_s15  ;;  %v3466_v12 = vld [vmem:[%s6710_s23 + $0x60] sm:$0xff]  ;;  %v3468_v57 = vld [vmem:[%s6710_s23 + $0x70] sm:$0xff] }
 0x149   : > { %v1302_v31 = vpop.f32.mrf.mxu1  ;;  %3538 = vrot.lane.b32.xlu0 %v3464_v14, %s6598_s15 }
 0x14a   : > { %v7748_v3 = vadd.f32 %v5890_v33, %v1407_v0  ;;  %v1405_v21 = vadd.f32 %v1302_v31, %v712_v62  ;;  %v5891_v51 = vpop.f32.mrf.mxu0  ;;  %v716_v33 = vadd.f32 %v7640_v23, %v378_v40  ;;  %v379_v62 = vld [vmem:[%s6703_s20 + $0x68] sm:$0xff] }
 0x14b   : > { %v5855_v25 = vpop.f32.mrf.mxu1  ;;  %v717_v14 = vadd.f32 %v7651_v32, %v379_v62  ;;  %v3476_v62 = vld [vmem:[%s6710_s23 + $0xb0] sm:$0xff] }
 0x14c   : > { %v7752_v52 = vadd.f32 %v1739_v7, %v1405_v21  ;;  %v1408_v19 = vadd.f32 %v5855_v25, %v715_v53  ;;  %v1742_v24 = vpop.f32.mrf.mxu0  ;;  %3540 = vrot.lane.b32.xlu1 %v3465_v2, %s6598_s15  ;;  %v3469_v53 = vld [vmem:[%s6710_s23 + $0x78] sm:$0xff]  ;;  %v3470_v21 = vld [vmem:[%s6710_s23 + $0x80] sm:$0xff] }
 0x14d   : > { %v1305_v16 = vpop.f32.mrf.mxu1  ;;  %3542 = vrot.lane.b32.xlu0 %v3466_v12, %s6598_s15  ;;  %v384_v25 = vld [vmem:[%s6703_s20 + $0x90] sm:$0xff]  ;;  %v385_v12 = vld [vmem:[%s6703_s20 + $0x98] sm:$0xff] }
 0x14e   : > { %6101 = vmatmul.mubr.msk.bf16.gmra.mxu0 %vm494_vm3, %v7212_v37  ;;  %v7762_v11 = vadd.f32 %v5891_v51, %v1408_v19  ;;  %v1406_v9 = vadd.f32 %v1305_v16, %v713_v5  ;;  %v3472_v19 = vld [vmem:[%s6710_s23 + $0x90] sm:$0xff] }
 0x14f   : > { %6065 = vmatmul.mubr.msk.bf16.gmra.mxu1 %vm494_vm3, %v7208_v45  ;;  %6104 = vmatprep.mubr.msk.bf16.mxu0 %vm494_vm3, %v7230_v63  ;;  %v5858_v22 = vpop.f32.mrf.mxu1  ;;  %v5894_v35 = vpop.f32.mrf.mxu0  ;;  %v719_v63 = vadd.f32 %v7644_v43, %v381_v47  ;;  %v383_v47 = vld [vmem:[%s6703_s20 + $0x88] sm:$0xff] }
 0x150   : > { %6068 = vmatprep.mubr.msk.bf16.mxu1 %vm494_vm3, %v7234_v34  ;;  %v7772_v15 = vadd.f32 %v1742_v24, %v1406_v9  ;;  %v1411_v37 = vadd.f32 %v5858_v22, %v718_v41  ;;  %3544 = vrot.lane.b32.xlu1 %v3467_v39, %s6598_s15  ;;  %v382_v24 = vld [vmem:[%s6703_s20 + $0x80] sm:$0xff]  ;;  %v3474_v9 = vld [vmem:[%s6710_s23 + $0xa0] sm:$0xff]  ;;  %v721_v39 = vadd.f32 %v7577_v17, %v383_v47 }
 0x151   : > { %v1318_v0 = vpop.f32.mrf.mxu1  ;;  %v1755_v45 = vpop.f32.mrf.mxu0  ;;  %3546 = vrot.lane.b32.xlu0 %v3468_v57, %s6598_s15  ;;  %v3475_v57 = vld [vmem:[%s6710_s23 + $0xa8] sm:$0xff] }
 0x152   : > { %v7780_v23 = vadd.f32 %v5894_v35, %v1411_v37  ;;  %v1409_v34 = vadd.f32 %v1318_v0, %v716_v33  ;;  %v723_v35 = vadd.f32 %v7573_v26, %v385_v12  ;;  %v9235_v12 = vld [vmem:[#allocation7_spill] sm:$0xff]  ;;  %v9236_v47 = vld [vmem:[#allocation8_spill] sm:$0xff] }
 0x153   : > { %v5859_v7 = vpop.f32.mrf.mxu1  ;;  %v5895_v42 = vpop.f32.mrf.mxu0 }
 0x154   : > { %v7783_v56 = vadd.f32 %v1755_v45, %v1409_v34  ;;  %v1412_v31 = vadd.f32 %v5859_v7, %v719_v63  ;;  %3548 = vrot.lane.b32.xlu1 %v3469_v53, %s6598_s15  ;;  %v386_v63 = vld [vmem:[%s6703_s20 + $0xa0] sm:$0xff]  ;;  %v3478_v7 = vld [vmem:[%s6710_s23 + $0xc0] sm:$0xff] }
 0x155   : > { %v1321_v51 = vpop.f32.mrf.mxu1  ;;  %3550 = vrot.lane.b32.xlu0 %v3470_v21, %s6598_s15  ;;  %v1758_v29 = vpop.f32.mrf.mxu0  ;;  %v724_v21 = vadd.f32 %v7593_v60, %v386_v63  ;;  %v3479_v60 = vld [vmem:[%s6710_s23 + $0xc8] sm:$0xff]  ;;  %v9237_v63 = vld [vmem:[#allocation21_spill] sm:$0xff] }
 0x156   : > { %6105 = vmatmul.mubr.msk.bf16.gmra.mxu0 %vm494_vm3, %v7257_v48  ;;  %v7791_v43 = vadd.f32 %v5895_v42, %v1412_v31  ;;  %v1410_v32 = vadd.f32 %v1321_v51, %v717_v14  ;;  %v3471_v48 = vld [vmem:[%s6710_s23 + $0x88] sm:$0xff]  ;;  %v389_v14 = vld [vmem:[%s6703_s20 + $0xb8] sm:$0xff]  ;;  %v2767_v31 = vshrl.u32 %v7665_v49, 16  ;;  %v2770_v51 = vshll.u32 %v7665_v49, 16 }
 0x157   : > { %6069 = vmatmul.mubr.msk.bf16.gmra.mxu1 %vm494_vm3, %v7255_v36  ;;  %6108 = vmatprep.mubr.msk.bf16.mxu0 %vm494_vm3, %v7278_v4  ;;  %v722_v36 = vadd.f32 %v7565_v59, %v384_v25  ;;  %v720_v4 = vadd.f32 %v7569_v30, %v382_v24  ;;  %v9233_v25 = vld [vmem:[#allocation18_spill] sm:$0xff]  ;;  %v2780_v24 = vshrl.u32 %v7667_v8, 16 }
 0x158   : > { %6072 = vmatprep.mubr.msk.bf16.mxu1 %vm494_vm3, %v7274_v1  ;;  %v7800_v5 = vadd.f32 %v1758_v29, %v1410_v32  ;;  %3552 = vrot.lane.b32.xlu1 %v3471_v48, %s6598_s15  ;;  %v3473_v1 = vld [vmem:[%s6710_s23 + $0x98] sm:$0xff]  ;;  %v9232_v32 = vld [vmem:[#allocation17_spill] sm:$0xff] }
 0x159   : > { %3554 = vrot.lane.b32.xlu0 %v3472_v19, %s6598_s15  ;;  %v387_v48 = vld [vmem:[%s6703_s20 + $0xa8] sm:$0xff]  ;;  %v2776_v19 = vshll.u32 %v7667_v8, 16 }
 0x15a   : > { %v5898_v2 = vpop.f32.mrf.mxu0 }
 0x15b   : > { %v5862_v40 = vpop.f32.mrf.mxu1 }
 0x15c   : > { %v1415_v16 = vadd.f32 %v5862_v40, %v722_v36  ;;  %v1771_v41 = vpop.f32.mrf.mxu0  ;;  %3556 = vrot.lane.b32.xlu1 %v3473_v1, %s6598_s15  ;;  %v9234_v36 = vld [vmem:[#allocation19_spill] sm:$0xff]  ;;  %v727_v40 = vadd.f32 %v9235_v12, %v389_v14  ;;  %v2769_v1 = vrot.slane %v2767_v31, 4  ;;  %v9238_v14 = vld [vmem:[#allocation20_spill] sm:$0xff] }
 0x15d   : > { %v1334_v22 = vpop.f32.mrf.mxu1  ;;  %3558 = vrot.lane.b32.xlu0 %v3474_v9, %s6598_s15 }
 0x15e   : > { %6109 = vmatmul.mubr.msk.bf16.gmra.mxu0 %vm494_vm3, %v7298_v54  ;;  %v7818_v59 = vadd.f32 %v5898_v2, %v1415_v16  ;;  %v1413_v30 = vadd.f32 %v1334_v22, %v720_v4  ;;  %v5899_v37 = vpop.f32.mrf.mxu0  ;;  %v3480_v2 = vld [vmem:[%s6710_s23 + $0xd0] sm:$0xff]  ;;  %v725_v22 = vadd.f32 %v9236_v47, %v387_v48  ;;  %v390_v48 = vld [vmem:[%s6703_s20 + $0xc0] sm:$0xff] }
 0x15f   : > { %6073 = vmatmul.mubr.msk.bf16.gmra.mxu1 %vm494_vm3, %v7300_v58  ;;  %6112 = vmatprep.mubr.msk.bf16.mxu0 %vm494_vm3, %v7323_v13  ;;  %v5863_v33 = vpop.f32.mrf.mxu1  ;;  %v388_v13 = vld [vmem:[%s6703_s20 + $0xb0] sm:$0xff] }
 0x160   : > { %6076 = vmatprep.mubr.msk.bf16.mxu1 %vm494_vm3, %v7321_v10  ;;  %v7827_v54 = vadd.f32 %v1771_v41, %v1413_v30  ;;  %v1416_v26 = vadd.f32 %v5863_v33, %v723_v35  ;;  %3560 = vrot.lane.b32.xlu1 %v3475_v57, %s6598_s15  ;;  %v1774_v17 = vpop.f32.mrf.mxu0  ;;  %v3477_v10 = vld [vmem:[%s6710_s23 + $0xb8] sm:$0xff]  ;;  %v726_v42 = vadd.f32 %v7587_v55, %v388_v13  ;;  %v2772_v35 = vrot.slane %v2770_v51, 5 }
 0x161   : > { %v1337_v58 = vpop.f32.mrf.mxu1  ;;  %3562 = vrot.lane.b32.xlu0 %v3476_v62, %s6598_s15  ;;  %v3481_v62 = vld [vmem:[%s6710_s23 + $0xd8] sm:$0xff] }
 0x162   : > { %v7834_v0 = vadd.f32 %v5899_v37, %v1416_v26  ;;  %v1414_v45 = vadd.f32 %v1337_v58, %v721_v39  ;;  %v7869_v39 = vrot.slane %v2776_v19, 5  ;;  %v2782_v26 = vrot.slane %v2780_v24, 4  ;;  %v3482_v58 = vld [vmem:[%s6710_s23 + $0xe0] sm:$0xff]  ;;  %v9240_v51 = vld [vmem:[#allocation22_spill] sm:$0xff] }
 0x163   : > { %v393_v24 = vld [vmem:[%s6703_s20 + $0xd8] sm:$0xff] }
 0x164   : > { %v7837_v34 = vadd.f32 %v1774_v17, %v1414_v45  ;;  %3564 = vrot.lane.b32.xlu1 %v3477_v10, %s6598_s15  ;;  %v365_v17 = vld [vmem:[#allocation2 + $0xd4] sm:$0x1] }
 0x165   : > { %3566 = vrot.lane.b32.xlu0 %v3478_v7, %s6598_s15  ;;  %v392_v7 = vld [vmem:[%s6703_s20 + $0xd0] sm:$0xff] }
 0x166   : > { %6113 = vmatmul.mubr.msk.bf16.gmra.mxu0 %vm494_vm3, %v7344_v50  ;;  %v5866_v53 = vpop.f32.mrf.mxu1  ;;  %v5902_v29 = vpop.f32.mrf.mxu0 }
 0x167   : > { %6077 = vmatmul.mubr.msk.bf16.gmra.mxu1 %vm494_vm3, %v9232_v32  ;;  %v1419_v55 = vadd.f32 %v5866_v53, %v726_v42  ;;  %6116 = vmatprep.mubr.msk.bf16.mxu0 %vm494_vm3, %v9233_v25  ;;  %v3009_v42 = vrot.slane %v7667_v8, 5  ;;  %v9239_v53 = vld [vmem:[#allocation23_spill] sm:$0xff]  ;;  %v2783_v32 = vor.u32 %v2782_v26, %v7869_v39  ;;  %v3484_v25 = vld [vmem:[%s6710_s23 + $0xf0] sm:$0xff]  ;;  %v9243_v26 = vld [vmem:[#allocation12_spill] sm:$0xff] }
 0x168   : > { %6080 = vmatprep.mubr.msk.bf16.mxu1 %vm494_vm3, %v9234_v36  ;;  %v1350_v50 = vpop.f32.mrf.mxu1  ;;  %v1787_v41 = vpop.f32.mrf.mxu0  ;;  %3568 = vrot.lane.b32.xlu1 %v3479_v60, %s6598_s15  ;;  %v9241_v8 = vld [vmem:[#allocation9_spill] sm:$0xff]  ;;  %v5516_v36 = vrot.slane %v7665_v49, 9 }
 0x169   : > { %v7862_v4 = vadd.f32 %v5902_v29, %v1419_v55  ;;  %v1417_v16 = vadd.f32 %v1350_v50, %v724_v21  ;;  %3570 = vrot.lane.b32.xlu0 %v3480_v2, %s6598_s15  ;;  %v2773_v21 = vor.u32 %v2772_v35, %v2769_v1  ;;  %v2786_v55 = vshll.u32 %v365_v17, 16  ;;  %v3483_v29 = vld [vmem:[%s6710_s23 + $0xe8] sm:$0xff]  ;;  %v391_v35 = vld [vmem:[%s6703_s20 + $0xc8] sm:$0xff] }
 0x16a   : > { %v5867_v9 = vpop.f32.mrf.mxu1  ;;  %v5903_v37 = vpop.f32.mrf.mxu0  ;;  %v730_v19 = vadd.f32 %v9241_v8, %v392_v7  ;;  %v3011_v12 = vrot.slane %v3009_v42, 4 }
 0x16b   : > { %v7867_v30 = vadd.f32 %v1787_v41, %v1417_v16  ;;  %v1420_v33 = vadd.f32 %v5867_v9, %v727_v40  ;;  %v2774_v2 = vrot.slane %v2773_v21, 4  ;;  %v3012_v40 = vrot.slane %v365_v17, 5  ;;  %v9242_v16 = vld [vmem:[#allocation10_spill] sm:$0xff] }
 0x16c   : > { %v1353_v57 = vpop.f32.mrf.mxu1  ;;  %3572 = vrot.lane.b32.xlu1 %v3481_v62, %s6598_s15  ;;  %v1790_v10 = vpop.f32.mrf.mxu0  ;;  %v728_v41 = vadd.f32 %v9242_v16, %v390_v48  ;;  %v2784_v9 = vrot.slane %v2783_v32, 4  ;;  %v2788_v47 = vrot.slane %v2786_v55, 5  ;;  %v397_v16 = vld [vmem:[%s6703_s20 + $0xf8] sm:$0xff] }
 0x16d   : > { %v7873_v13 = vadd.f32 %v5903_v37, %v1420_v33  ;;  %v1418_v45 = vadd.f32 %v1353_v57, %v725_v22  ;;  %3574 = vrot.lane.b32.xlu0 %v3482_v58, %s6598_s15  ;;  %v3485_v22 = vld [vmem:[%s6710_s23 + $0xf8] sm:$0xff]  ;;  %v731_v57 = vadd.f32 %v9243_v26, %v393_v24  ;;  %v9244_v58 = vld [vmem:[#allocation24_spill] sm:$0xff]  ;;  %v2779_v7 = vsel %vm7041_vm8, %v2774_v2, %v7869_v39 }
 0x16e   : > { %6117 = vmatmul.mubr.msk.bf16.gmra.mxu0 %vm494_vm3, %v9237_v63  ;;  %v3013_v21 = vsel %vm7054_vm9, %v3011_v12, %v3012_v40  ;;  %v2789_v39 = vsel %vm7041_vm8, %v2784_v9, %v2788_v47  ;;  %v396_v24 = vld [vmem:[%s6703_s20 + $0xf0] sm:$0xff] }
 0x16f   : > { %6081 = vmatmul.mubr.msk.bf16.gmra.mxu1 %vm494_vm3, %v9238_v14  ;;  %v7883_v31 = vadd.f32 %v1790_v10, %v1418_v45  ;;  %6120 = vmatprep.mubr.msk.bf16.mxu0 %vm494_vm3, %v9239_v53  ;;  %v9245_v45 = vld [vmem:[#allocation25_spill] sm:$0xff]  ;;  %v3010_v53 = vsel %vm7054_vm9, %v5516_v36, %v3009_v42  ;;  %v5497_v36 = vcombine.low %v2779_v7, %v2789_v39  ;;  %v9250_v2 = vld [vmem:[#allocation14_spill] sm:$0xff] }
 0x170   : > { %6084 = vmatprep.mubr.msk.bf16.mxu1 %vm494_vm3, %v9240_v51  ;;  %3576 = vrot.lane.b32.xlu1 %v3483_v29, %s6598_s15  ;;  %v9248_v51 = vld [vmem:[#allocation13_spill] sm:$0xff]  ;;  %v734_v12 = vadd.f32 %v9250_v2, %v396_v24 }
 0x171   : > { %3578 = vrot.lane.b32.xlu0 %v3484_v25, %s6598_s15  ;;  %v729_v32 = vadd.f32 %v9248_v51, %v391_v35  ;;  %v9249_v25 = vld [vmem:[#allocation11_spill] sm:$0xff]  ;;  %v395_v35 = vld [vmem:[%s6703_s20 + $0xe8] sm:$0xff] }
 0x172   : > { %v5870_v50 = vpop.f32.mrf.mxu1 }
 0x173   : > { %v5906_v60 = vpop.f32.mrf.mxu0  ;;  %v1423_v1 = vadd.f32 %v5870_v50, %v730_v19  ;;  %v5521_v19 = vcombine.low %v3010_v53, %v3013_v21 }
 0x174   : > { %v1366_v33 = vpop.f32.mrf.mxu1  ;;  %3580 = vrot.lane.b32.xlu1 %v3485_v22, %s6598_s15 }
 0x175   : > { %v1803_v37 = vpop.f32.mrf.mxu0  ;;  %v7903_v62 = vadd.f32 %v5906_v60, %v1423_v1  ;;  %v1421_v49 = vadd.f32 %v1366_v33, %v728_v41  ;;  %v394_v60 = vld [vmem:[%s6703_s20 + $0xe0] sm:$0xff]  ;;  %v9251_v1 = vld [vmem:[#allocation26_spill] sm:$0xff]  ;;  %s6599_s20 = smov 96  }
 0x176   : > { %6121 = vmatmul.mubr.msk.bf16.gmra.mxu0 %vm494_vm3, %v9244_v58  ;;  %v5871_v17 = vpop.f32.mrf.mxu1  ;;  %v732_v9 = vadd.f32 %v9251_v1, %v394_v60 }
 0x177   : > { %6085 = vmatmul.mubr.msk.bf16.gmra.mxu1 %vm494_vm3, %v9245_v45  ;;  %v5907_v63 = vpop.f32.mrf.mxu0  ;;  %6124 = vmatprep.mubr.msk.bf16.mxu0 %vm494_vm3, %v7686_v28  ;;  %v7919_v55 = vadd.f32 %v1803_v37, %v1421_v49  ;;  %v1424_v29 = vadd.f32 %v5871_v17, %v731_v57  ;;  %v9252_v37 = vld [vmem:[#allocation27_spill] sm:$0xff]  ;;  %v9253_v17 = vld [vmem:[#allocation28_spill] sm:$0xff] }
 0x178   : > { %6088 = vmatprep.mubr.msk.bf16.mxu1 %vm494_vm3, %v9249_v25  ;;  %v1369_v28 = vpop.f32.mrf.mxu1  ;;  %v735_v26 = vadd.f32 %v9252_v37, %v397_v16 }
 0x179   : > { %v7925_v48 = vadd.f32 %v5907_v63, %v1424_v29  ;;  %v1422_v8 = vadd.f32 %v1369_v28, %v729_v32  ;;  %v1806_v42 = vpop.f32.mrf.mxu0  ;;  %v733_v63 = vadd.f32 %v9253_v17, %v395_v35 }
 0x17b   : > { %v7928_v50 = vadd.f32 %v1806_v42, %v1422_v8 }
 0x17e   : > { %v5910_v40 = vpop.f32.mrf.mxu0  ;;  %6125 = vmatmul.mubr.msk.bf16.gmra.mxu0 %vm494_vm3, %v5521_v19 }
 0x17f   : > { %v5874_v41 = vpop.f32.mrf.mxu1  ;;  %6089 = vmatmul.mubr.msk.bf16.gmra.mxu1 %vm494_vm3, %v5497_v36 }
 0x180   : > { %v1427_v47 = vadd.f32 %v5874_v41, %v734_v12  ;;  %v1819_v22 = vpop.f32.mrf.mxu0 }
 0x181   : > { %v1382_v33 = vpop.f32.mrf.mxu1 }
 0x182   : > { %v7938_v57 = vadd.f32 %v5910_v40, %v1427_v47  ;;  %v1425_v49 = vadd.f32 %v1382_v33, %v732_v9  ;;  %v5911_v58 = vpop.f32.mrf.mxu0 }
 0x183   : > { %v5875_v45 = vpop.f32.mrf.mxu1 }
 0x184   : > { %v7941_v10 = vadd.f32 %v1819_v22, %v1425_v49  ;;  %v1428_v7 = vadd.f32 %v5875_v45, %v735_v26  ;;  %v1822_v14 = vpop.f32.mrf.mxu0 }
 0x185   : > { %v1385_v53 = vpop.f32.mrf.mxu1 }
 0x186   : > { %v7943_v21 = vadd.f32 %v5911_v58, %v1428_v7  ;;  %v1426_v51 = vadd.f32 %v1385_v53, %v733_v63  ;;  %v5954_v32 = vpop.f32.mrf.mxu0 }
 0x187   : > { %v5918_v29 = vpop.f32.mrf.mxu1 }
 0x188   : > { %v7945_v25 = vadd.f32 %v1822_v14, %v1426_v51  ;;  %v2054_v39 = vadd.f32 %v5918_v29, %v7683_v20  ;;  %v2165_v28 = vpop.f32.mrf.mxu0 }
 0x189   : > { %v1925_v8 = vpop.f32.mrf.mxu1 }
 0x18a   : > { %v7948_v42 = vadd.f32 %v5954_v32, %v2054_v39  ;;  %v2052_v19 = vadd.f32 %v1925_v8, %v7689_v61  ;;  %v5955_v24 = vpop.f32.mrf.mxu0 }
 0x18b   : > { %v5919_v36 = vpop.f32.mrf.mxu1 }
 0x18c   : > { %v7951_v60 = vadd.f32 %v2165_v28, %v2052_v19  ;;  %v2055_v2 = vadd.f32 %v5919_v36, %v7698_v44  ;;  %v2168_v12 = vpop.f32.mrf.mxu0 }
 0x18d   : > { %v1928_v40 = vpop.f32.mrf.mxu1 }
 0x18e   : > { %v7954_v16 = vadd.f32 %v5955_v24, %v2055_v2  ;;  %v2053_v41 = vadd.f32 %v1928_v40, %v7708_v46  ;;  %v5958_v1 = vpop.f32.mrf.mxu0 }
 0x18f   : > { %v5922_v20 = vpop.f32.mrf.mxu1 }
 0x190   : > { %v7957_v9 = vadd.f32 %v2168_v12, %v2053_v41  ;;  %v2058_v47 = vadd.f32 %v5922_v20, %v7716_v6  ;;  %v2181_v22 = vpop.f32.mrf.mxu0 }
 0x191   : > { %v1941_v61 = vpop.f32.mrf.mxu1 }
 0x192   : > { %v7960_v35 = vadd.f32 %v5958_v1, %v2058_v47  ;;  %v2056_v33 = vadd.f32 %v1941_v61, %v7720_v27  ;;  %v5959_v37 = vpop.f32.mrf.mxu0 }
 0x193   : > { %v5923_v44 = vpop.f32.mrf.mxu1 }
 0x194   : > { %v7963_v26 = vadd.f32 %v2181_v22, %v2056_v33  ;;  %v2059_v49 = vadd.f32 %v5923_v44, %v7730_v18  ;;  %v2184_v58 = vpop.f32.mrf.mxu0 }
 0x195   : > { %v1944_v46 = vpop.f32.mrf.mxu1 }
 0x196   : > { %v7966_v45 = vadd.f32 %v5959_v37, %v2059_v49  ;;  %v2057_v17 = vadd.f32 %v1944_v46, %v7740_v38  ;;  %v5962_v63 = vpop.f32.mrf.mxu0 }
 0x197   : > { %v5926_v6 = vpop.f32.mrf.mxu1 }
 0x198   : > { %v7969_v7 = vadd.f32 %v2184_v58, %v2057_v17  ;;  %v2062_v14 = vadd.f32 %v5926_v6, %v7748_v3  ;;  %v2197_v53 = vpop.f32.mrf.mxu0 }
 0x199   : > { %v1957_v27 = vpop.f32.mrf.mxu1 }
 0x19a   : > { %v7972_v51 = vadd.f32 %v5962_v63, %v2062_v14  ;;  %v2060_v32 = vadd.f32 %v1957_v27, %v7752_v52  ;;  %v5963_v29 = vpop.f32.mrf.mxu0 }
 0x19b   : > { %v5927_v18 = vpop.f32.mrf.mxu1 }
 0x19c   : > { %v7975_v39 = vadd.f32 %v2197_v53, %v2060_v32  ;;  %v2063_v28 = vadd.f32 %v5927_v18, %v7762_v11  ;;  %v2200_v8 = vpop.f32.mrf.mxu0 }
 0x19d   : > { %v1960_v38 = vpop.f32.mrf.mxu1 }
 0x19e   : > { %v7978_v19 = vadd.f32 %v5963_v29, %v2063_v28  ;;  %v2061_v24 = vadd.f32 %v1960_v38, %v7772_v15  ;;  %v5966_v36 = vpop.f32.mrf.mxu0 }
 0x19f   : > { %v5930_v3 = vpop.f32.mrf.mxu1 }
 0x1a0   : > { %v7981_v2 = vadd.f32 %v2200_v8, %v2061_v24  ;;  %v2066_v12 = vadd.f32 %v5930_v3, %v7780_v23  ;;  %v2213_v40 = vpop.f32.mrf.mxu0 }
 0x1a1   : > { %v1973_v52 = vpop.f32.mrf.mxu1 }
 0x1a2   : > { %v7984_v41 = vadd.f32 %v5966_v36, %v2066_v12  ;;  %v2064_v1 = vadd.f32 %v1973_v52, %v7783_v56  ;;  %v5967_v20 = vpop.f32.mrf.mxu0 }
 0x1a3   : > { %v5931_v11 = vpop.f32.mrf.mxu1 }
 0x1a4   : > { %v7987_v47 = vadd.f32 %v2213_v40, %v2064_v1  ;;  %v2067_v22 = vadd.f32 %v5931_v11, %v7791_v43  ;;  %v2216_v61 = vpop.f32.mrf.mxu0 }
 0x1a5   : > { %v1976_v15 = vpop.f32.mrf.mxu1 }
 0x1a6   : > { %v7990_v33 = vadd.f32 %v5967_v20, %v2067_v22  ;;  %v2065_v37 = vadd.f32 %v1976_v15, %v7800_v5  ;;  %v5970_v44 = vpop.f32.mrf.mxu0 }
 0x1a7   : > { %v5934_v23 = vpop.f32.mrf.mxu1 }
 0x1a8   : > { %v7993_v49 = vadd.f32 %v2216_v61, %v2065_v37  ;;  %v2070_v58 = vadd.f32 %v5934_v23, %v7818_v59  ;;  %v2229_v46 = vpop.f32.mrf.mxu0 }
 0x1a9   : > { %v1989_v56 = vpop.f32.mrf.mxu1 }
 0x1aa   : > { %v7996_v17 = vadd.f32 %v5970_v44, %v2070_v58  ;;  %v2068_v63 = vadd.f32 %v1989_v56, %v7827_v54  ;;  %v5971_v6 = vpop.f32.mrf.mxu0 }
 0x1ab   : > { %v5935_v43 = vpop.f32.mrf.mxu1 }
 0x1ac   : > { %v7999_v14 = vadd.f32 %v2229_v46, %v2068_v63  ;;  %v2071_v53 = vadd.f32 %v5935_v43, %v7834_v0  ;;  %v2232_v27 = vpop.f32.mrf.mxu0 }
 0x1ad   : > { %v1992_v5 = vpop.f32.mrf.mxu1 }
 0x1ae   : > { %v8002_v32 = vadd.f32 %v5971_v6, %v2071_v53  ;;  %v2069_v29 = vadd.f32 %v1992_v5, %v7837_v34  ;;  %v5974_v18 = vpop.f32.mrf.mxu0 }
 0x1af   : > { %v5938_v59 = vpop.f32.mrf.mxu1 }
 0x1b0   : > { %v8005_v28 = vadd.f32 %v2232_v27, %v2069_v29  ;;  %v2074_v8 = vadd.f32 %v5938_v59, %v7862_v4  ;;  %v2245_v38 = vpop.f32.mrf.mxu0 }
 0x1b1   : > { %v2005_v54 = vpop.f32.mrf.mxu1 }
 0x1b2   : > { %v8008_v24 = vadd.f32 %v5974_v18, %v2074_v8  ;;  %v2072_v36 = vadd.f32 %v2005_v54, %v7867_v30  ;;  %v5975_v3 = vpop.f32.mrf.mxu0 }
 0x1b3   : > { %v5939_v0 = vpop.f32.mrf.mxu1 }
 0x1b4   : > { %v8011_v12 = vadd.f32 %v2245_v38, %v2072_v36  ;;  %v2075_v40 = vadd.f32 %v5939_v0, %v7873_v13  ;;  %v2248_v52 = vpop.f32.mrf.mxu0 }
 0x1b5   : > { %v2008_v34 = vpop.f32.mrf.mxu1 }
 0x1b6   : > { %v8014_v1 = vadd.f32 %v5975_v3, %v2075_v40  ;;  %v2073_v20 = vadd.f32 %v2008_v34, %v7883_v31  ;;  %v5978_v11 = vpop.f32.mrf.mxu0 }
 0x1b7   : > { %v5942_v4 = vpop.f32.mrf.mxu1 }
 0x1b8   : > { %v8017_v22 = vadd.f32 %v2248_v52, %v2073_v20  ;;  %v2078_v61 = vadd.f32 %v5942_v4, %v7903_v62  ;;  %v2261_v15 = vpop.f32.mrf.mxu0 }
 0x1b9   : > { %v2021_v30 = vpop.f32.mrf.mxu1 }
 0x1ba   : > { %v8020_v37 = vadd.f32 %v5978_v11, %v2078_v61  ;;  %v2076_v44 = vadd.f32 %v2021_v30, %v7919_v55  ;;  %v5979_v23 = vpop.f32.mrf.mxu0 }
 0x1bb   : > { %v5943_v13 = vpop.f32.mrf.mxu1 }
 0x1bc   : > { %v8023_v58 = vadd.f32 %v2261_v15, %v2076_v44  ;;  %v2079_v46 = vadd.f32 %v5943_v13, %v7925_v48  ;;  %v2264_v56 = vpop.f32.mrf.mxu0 }
 0x1bd   : > { %v2024_v31 = vpop.f32.mrf.mxu1 }
 0x1be   : > { %v8026_v63 = vadd.f32 %v5979_v23, %v2079_v46  ;;  %v2077_v6 = vadd.f32 %v2024_v31, %v7928_v50  ;;  %v5982_v43 = vpop.f32.mrf.mxu0 }
 0x1bf   : > { %v5946_v62 = vpop.f32.mrf.mxu1 }
 0x1c0   : > { %v8029_v53 = vadd.f32 %v2264_v56, %v2077_v6  ;;  %v2082_v27 = vadd.f32 %v5946_v62, %v7938_v57  ;;  %v2277_v5 = vpop.f32.mrf.mxu0 }
 0x1c1   : > { %v2037_v55 = vpop.f32.mrf.mxu1 }
 0x1c2   : > { %v8032_v29 = vadd.f32 %v5982_v43, %v2082_v27  ;;  %v2080_v18 = vadd.f32 %v2037_v55, %v7941_v10  ;;  %v5983_v59 = vpop.f32.mrf.mxu0 }
 0x1c3   : > { %v5947_v48 = vpop.f32.mrf.mxu1 }
 0x1c4   : > { %v8035_v8 = vadd.f32 %v2277_v5, %v2080_v18  ;;  %v2083_v38 = vadd.f32 %v5947_v48, %v7943_v21  ;;  %v2280_v54 = vpop.f32.mrf.mxu0 }
 0x1c5   : > { %v2040_v50 = vpop.f32.mrf.mxu1 }
 0x1c6   : > { %v8038_v36 = vadd.f32 %v5983_v59, %v2083_v38  ;;  %v2081_v3 = vadd.f32 %v2040_v50, %v7945_v25  ;;  %v8041_v0 = vpop.f32.mrf.mxu0 }
 0x1c7   : > { %v8043_v57 = vpop.f32.mrf.mxu1 }
 0x1c8   : > { %v8045_v40 = vadd.f32 %v2280_v54, %v2081_v3  ;;  %v8047_v52 = vpop.f32.mrf.mxu0 }
 0x1c9   : > { %v8049_v10 = vpop.f32.mrf.mxu1 }
 0x1ca   : > { %v8051_v34 = vpop.f32.mrf.mxu0 }
 0x1cb   : > { %v8053_v20 = vpop.f32.mrf.mxu1 }
 0x1cc   : > { %v8055_v21 = vpop.f32.mrf.mxu0 }
 0x1cd   : > { %v8057_v11 = vpop.f32.mrf.mxu1 }
 0x1ce   : > { %v8059_v4 = vpop.f32.mrf.mxu0 }
 0x1cf   : > { %v8061_v25 = vpop.f32.mrf.mxu1 }
 0x1d0   : > { %v8063_v61 = vpop.f32.mrf.mxu0 }
 0x1d1   : > { %v8065_v15 = vpop.f32.mrf.mxu1 }
 0x1d2   : > { %v8067_v30 = vpop.f32.mrf.mxu0 }
 0x1d3   : > { %v8069_v44 = vpop.f32.mrf.mxu1 }
 0x1d4   : > { %v8071_v23 = vpop.f32.mrf.mxu0 }
 0x1d5   : > { %9254 = vst [vmem:[#allocation17_spill] sm:$0xff] %v8071_v23  ;;  %v8073_v13 = vpop.f32.mrf.mxu1 }
 0x1d6   : > { %v8075_v46 = vpop.f32.mrf.mxu0 }
 0x1d7   : > { %9255 = vst [vmem:[#allocation18_spill] sm:$0xff] %v8075_v46  ;;  %v8077_v56 = vpop.f32.mrf.mxu1 }
 0x1d8   : > { %v2639_v31 = vpop.f32.mrf.mxu0 }
 0x1d9   : > { %v2421_v6 = vpop.f32.mrf.mxu1 }
 0x1da   : > { %v2524_v43 = vadd.f32 %v2421_v6, %v7975_v39  ;;  %v6035_v62 = vpop.f32.mrf.mxu0 }
 0x1db   : > { %v5999_v27 = vpop.f32.mrf.mxu1 }
 0x1dc   : > { %v8080_v5 = vadd.f32 %v2639_v31, %v2524_v43  ;;  %v2527_v55 = vadd.f32 %v5999_v27, %v7978_v19  ;;  %v2642_v18 = vpop.f32.mrf.mxu0 }
 0x1dd   : > { %v2424_v59 = vpop.f32.mrf.mxu1 }
 0x1de   : > { %v8083_v48 = vadd.f32 %v6035_v62, %v2527_v55  ;;  %v2525_v38 = vadd.f32 %v2424_v59, %v7981_v2  ;;  %v6038_v54 = vpop.f32.mrf.mxu0 }
 0x1df   : > { %v6002_v50 = vpop.f32.mrf.mxu1 }
 0x1e0   : > { %v8086_v3 = vadd.f32 %v2642_v18, %v2525_v38  ;;  %v2530_v46 = vadd.f32 %v6002_v50, %v7984_v41  ;;  %v2655_v23 = vpop.f32.mrf.mxu0 }
 0x1e1   : > { %v2437_v39 = vpop.f32.mrf.mxu1 }
 0x1e2   : > { %v8089_v6 = vadd.f32 %v6038_v54, %v2530_v46  ;;  %v2528_v31 = vadd.f32 %v2437_v39, %v7987_v47  ;;  %v6039_v43 = vpop.f32.mrf.mxu0 }
 0x1e3   : > { %v6003_v19 = vpop.f32.mrf.mxu1 }
 0x1e4   : > { %v8092_v27 = vadd.f32 %v2655_v23, %v2528_v31  ;;  %v2531_v62 = vadd.f32 %v6003_v19, %v7990_v33  ;;  %v2658_v55 = vpop.f32.mrf.mxu0 }
 0x1e5   : > { %v2440_v2 = vpop.f32.mrf.mxu1 }
 0x1e6   : > { %v8095_v59 = vadd.f32 %v6039_v43, %v2531_v62  ;;  %v2529_v18 = vadd.f32 %v2440_v2, %v7993_v49  ;;  %v6042_v38 = vpop.f32.mrf.mxu0 }
 0x1e7   : > { %v6006_v41 = vpop.f32.mrf.mxu1 }
 0x1e8   : > { %v8098_v50 = vadd.f32 %v2658_v55, %v2529_v18  ;;  %v2534_v46 = vadd.f32 %v6006_v41, %v7996_v17  ;;  %v2671_v54 = vpop.f32.mrf.mxu0 }
 0x1e9   : > { %v2453_v47 = vpop.f32.mrf.mxu1 }
 0x1ea   : > { %v8101_v39 = vadd.f32 %v6042_v38, %v2534_v46  ;;  %v2532_v23 = vadd.f32 %v2453_v47, %v7999_v14  ;;  %v6043_v31 = vpop.f32.mrf.mxu0 }
 0x1eb   : > { %v6007_v33 = vpop.f32.mrf.mxu1 }
 0x1ec   : > { %v8104_v19 = vadd.f32 %v2671_v54, %v2532_v23  ;;  %v2535_v43 = vadd.f32 %v6007_v33, %v8002_v32  ;;  %v2674_v62 = vpop.f32.mrf.mxu0 }
 0x1ed   : > { %v2456_v49 = vpop.f32.mrf.mxu1 }
 0x1ee   : > { %v8107_v2 = vadd.f32 %v6043_v31, %v2535_v43  ;;  %v2533_v55 = vadd.f32 %v2456_v49, %v8005_v28  ;;  %v6046_v18 = vpop.f32.mrf.mxu0 }
 0x1ef   : > { %v6010_v17 = vpop.f32.mrf.mxu1 }
 0x1f0   : > { %v8110_v41 = vadd.f32 %v2674_v62, %v2533_v55  ;;  %v2538_v38 = vadd.f32 %v6010_v17, %v8008_v24  ;;  %v2687_v46 = vpop.f32.mrf.mxu0 }
 0x1f1   : > { %v2469_v14 = vpop.f32.mrf.mxu1 }
 0x1f2   : > { %v8113_v47 = vadd.f32 %v6046_v18, %v2538_v38  ;;  %v2536_v54 = vadd.f32 %v2469_v14, %v8011_v12  ;;  %v6047_v23 = vpop.f32.mrf.mxu0 }
 0x1f3   : > { %v6011_v32 = vpop.f32.mrf.mxu1 }
 0x1f4   : > { %v8116_v33 = vadd.f32 %v2687_v46, %v2536_v54  ;;  %v2539_v31 = vadd.f32 %v6011_v32, %v8014_v1  ;;  %v2690_v43 = vpop.f32.mrf.mxu0 }
 0x1f5   : > { %v2472_v28 = vpop.f32.mrf.mxu1 }
 0x1f6   : > { %v8119_v49 = vadd.f32 %v6047_v23, %v2539_v31  ;;  %v2537_v62 = vadd.f32 %v2472_v28, %v8017_v22  ;;  %v6050_v55 = vpop.f32.mrf.mxu0 }
 0x1f7   : > { %v6014_v24 = vpop.f32.mrf.mxu1 }
 0x1f8   : > { %v8122_v17 = vadd.f32 %v2690_v43, %v2537_v62  ;;  %v2542_v18 = vadd.f32 %v6014_v24, %v8020_v37  ;;  %v2703_v38 = vpop.f32.mrf.mxu0 }
 0x1f9   : > { %v2485_v12 = vpop.f32.mrf.mxu1 }
 0x1fa   : > { %v8125_v14 = vadd.f32 %v6050_v55, %v2542_v18  ;;  %v2540_v46 = vadd.f32 %v2485_v12, %v8023_v58  ;;  %v6051_v54 = vpop.f32.mrf.mxu0 }
 0x1fb   : > { %v6015_v1 = vpop.f32.mrf.mxu1 }
 0x1fc   : > { %v8128_v32 = vadd.f32 %v2703_v38, %v2540_v46  ;;  %v2543_v23 = vadd.f32 %v6015_v1, %v8026_v63  ;;  %v2706_v31 = vpop.f32.mrf.mxu0  ;;  %v2518_v38 = vadd.f32 %v8043_v57, %v7948_v42  ;;  %v2519_v42 = vadd.f32 %v8053_v20, %v7954_v16 }
 0x1fd   : > { %v2488_v22 = vpop.f32.mrf.mxu1  ;;  %v2522_v16 = vadd.f32 %v8061_v25, %v7960_v35  ;;  %v2523_v35 = vadd.f32 %v8069_v44, %v7966_v45  ;;  %v2526_v44 = vadd.f32 %v8077_v56, %v7972_v51 }
 0x1fe   : > { %v8131_v28 = vadd.f32 %v6051_v54, %v2543_v23  ;;  %v2541_v43 = vadd.f32 %v2488_v22, %v8029_v53  ;;  %v6054_v62 = vpop.f32.mrf.mxu0  ;;  %v2516_v53 = vadd.f32 %v8049_v10, %v7951_v60  ;;  %v2736_v22 = vadd.f32 %v8041_v0, %v2518_v38 }
 0x1ff   : > { %v6018_v37 = vpop.f32.mrf.mxu1  ;;  %v2517_v60 = vadd.f32 %v8057_v11, %v7957_v9  ;;  %v2737_v0 = vadd.f32 %v8051_v34, %v2519_v42  ;;  %v2741_v45 = vadd.f32 %v8067_v30, %v2523_v35  ;;  %v9257_v30 = vld [vmem:[#allocation18_spill] sm:$0xff] }
 0x200   : > { %v8134_v24 = vadd.f32 %v2706_v31, %v2541_v43  ;;  %v2546_v55 = vadd.f32 %v6018_v37, %v8032_v29  ;;  %v2719_v18 = vpop.f32.mrf.mxu0  ;;  %v2734_v37 = vadd.f32 %v8047_v52, %v2516_v53  ;;  %v2520_v52 = vadd.f32 %v8065_v15, %v7963_v26 }
 0x201   : > { %v2501_v58 = vpop.f32.mrf.mxu1  ;;  %v2735_v9 = vadd.f32 %v8055_v21, %v2517_v60  ;;  %v2521_v21 = vadd.f32 %v8073_v13, %v7969_v7  ;;  %v9256_v7 = vld [vmem:[#allocation17_spill] sm:$0xff] }
 0x202   : > { %v8139_v12 = vadd.f32 %v6054_v62, %v2546_v55  ;;  %v2544_v63 = vadd.f32 %v2501_v58, %v8035_v8  ;;  %v6055_v46 = vpop.f32.mrf.mxu0  ;;  %v2738_v26 = vadd.f32 %v8063_v61, %v2520_v52 }
 0x203   : > { %v6019_v54 = vpop.f32.mrf.mxu1  ;;  %v2739_v13 = vadd.f32 %v9256_v7, %v2521_v21 }
 0x204   : > { %v8144_v1 = vadd.f32 %v2719_v18, %v2544_v63  ;;  %v2547_v23 = vadd.f32 %v6019_v54, %v8038_v36  ;;  %v2722_v31 = vpop.f32.mrf.mxu0  ;;  %v2740_v54 = vadd.f32 %v8059_v4, %v2522_v16 }
 0x205   : > { %v2504_v29 = vpop.f32.mrf.mxu1 }
 0x206   : > { %v8150_v57 = vadd.f32 %v6055_v46, %v2547_v23  ;;  %v2545_v8 = vadd.f32 %v2504_v29, %v8045_v40  ;;  %v6098_v43 = vpop.f32.mrf.mxu0 }
 0x207   : > { %v6062_v62 = vpop.f32.mrf.mxu1 }
 0x208   : > { %v8156_v10 = vadd.f32 %v2722_v31, %v2545_v8  ;;  %v2976_v36 = vadd.f32 %v6062_v62, %v2736_v22  ;;  %v3071_v55 = vpop.f32.mrf.mxu0 }
 0x209   : > { %v2847_v18 = vpop.f32.mrf.mxu1 }
 0x20a   : > { %v8161_v20 = vadd.f32 %v6098_v43, %v2976_v36  ;;  %v2974_v40 = vadd.f32 %v2847_v18, %v2734_v37  ;;  %v6099_v58 = vpop.f32.mrf.mxu0 }
 0x20b   : > { %v6063_v38 = vpop.f32.mrf.mxu1 }
 0x20c   : > { %6246 = vtanh.f32 %v8161_v20  ;;  %v8167_v11 = vadd.f32 %v3071_v55, %v2974_v40  ;;  %v2977_v63 = vadd.f32 %v6063_v38, %v2737_v0  ;;  %v3074_v46 = vpop.f32.mrf.mxu0  ;;  %v2744_v55 = vadd.f32 %v9257_v30, %v2526_v44 }
 0x20d   : > { %v2850_v34 = vpop.f32.mrf.mxu1 }
 0x20e   : > { %v8172_v25 = vadd.f32 %v6099_v58, %v2977_v63  ;;  %v2975_v53 = vadd.f32 %v2850_v34, %v2735_v9  ;;  %v6102_v23 = vpop.f32.mrf.mxu0  ;;  %6248 = vtanh.f32 %v8167_v11 }
 0x20f   : > { %v6066_v15 = vpop.f32.mrf.mxu1 }
 0x210   : > { %v8178_v31 = vadd.f32 %v3074_v46, %v2975_v53  ;;  %v2980_v29 = vadd.f32 %v6066_v15, %v2740_v54  ;;  %v3087_v22 = vpop.f32.mrf.mxu0  ;;  %6250 = vtanh.f32 %v8172_v25 }
 0x211   : > { %v2863_v4 = vpop.f32.mrf.mxu1 }
 0x212   : > { %v8184_v42 = vadd.f32 %v6102_v23, %v2980_v29  ;;  %v2978_v61 = vadd.f32 %v2863_v4, %v2738_v26  ;;  %v6103_v8 = vpop.f32.mrf.mxu0  ;;  %6252 = vtanh.f32 %v8178_v31 }
 0x213   : > { %v6067_v43 = vpop.f32.mrf.mxu1 }
 0x214   : > { %v8188_v62 = vadd.f32 %v3087_v22, %v2978_v61  ;;  %v2981_v37 = vadd.f32 %v6067_v43, %v2741_v45  ;;  %v3090_v60 = vpop.f32.mrf.mxu0  ;;  %6254 = vtanh.f32 %v8184_v42 }
 0x215   : > { %v2866_v36 = vpop.f32.mrf.mxu1 }
 0x216   : > { %v8192_v18 = vadd.f32 %v6103_v8, %v2981_v37  ;;  %v2979_v51 = vadd.f32 %v2866_v36, %v2739_v13  ;;  %v6106_v56 = vpop.f32.mrf.mxu0  ;;  %6256 = vtanh.f32 %v8188_v62 }
 0x217   : > { %v6070_v0 = vpop.f32.mrf.mxu1 }
 0x218   : > { %v8195_v16 = vadd.f32 %v3090_v60, %v2979_v51  ;;  %v2984_v40 = vadd.f32 %v6070_v0, %v2744_v55  ;;  %v3103_v58 = vpop.f32.mrf.mxu0  ;;  %6258 = vtanh.f32 %v8192_v18 }
 0x219   : > { %v6247_v52 = vpop.eup %6246  ;;  %v2879_v38 = vpop.f32.mrf.mxu1 }
 0x21a   : > { %v8198_v9 = vadd.f32 %v6106_v56, %v2984_v40  ;;  %3682 = vrot.lane.b32.xlu0 %v6247_v52, %s6598_s15  ;;  %v6107_v63 = vpop.f32.mrf.mxu0  ;;  %v2982_v46 = vadd.f32 %v2879_v38, %v8080_v5  ;;  %6260 = vtanh.f32 %v8195_v16 }
 0x21b   : > { %v6071_v34 = vpop.f32.mrf.mxu1  ;;  %v6249_v35 = vpop.eup %6248 }
 0x21c   : > { %v3106_v54 = vpop.f32.mrf.mxu0  ;;  %6262 = vtanh.f32 %v8198_v9  ;;  %v2985_v15 = vadd.f32 %v6071_v34, %v8083_v48  ;;  %v8206_v21 = vadd.f32 %v3103_v58, %v2982_v46  ;;  %v8231_v34 = vpop.permute.xlu0 %3518 }
 0x21d   : > { %v2882_v53 = vpop.f32.mrf.mxu1  ;;  %v6251_v23 = vpop.eup %6250 }
 0x21e   : > { %3678 = vrot.lane.b32.xlu0 %v6249_v35, %s6598_s15  ;;  %v6110_v26 = vpop.f32.mrf.mxu0  ;;  %3684 = vrot.lane.b32.xlu1 %v6251_v23, %s6598_s15  ;;  %6264 = vtanh.f32 %v8206_v21  ;;  %v2983_v61 = vadd.f32 %v2882_v53, %v8086_v3  ;;  %v8211_v8 = vadd.f32 %v6107_v63, %v2985_v15 }
 0x21f   : > { %v6074_v29 = vpop.f32.mrf.mxu1  ;;  %v6253_v22 = vpop.eup %6252 }
 0x220   : > { %v3119_v5 = vpop.f32.mrf.mxu0  ;;  %v2988_v60 = vadd.f32 %v6074_v29, %v8089_v6  ;;  %6266 = vtanh.f32 %v8211_v8  ;;  %v8217_v30 = vadd.f32 %v3106_v54, %v2983_v61 }
 0x221   : > { %v2895_v4 = vpop.f32.mrf.mxu1  ;;  %v6255_v45 = vpop.eup %6254 }
 0x222   : > { %v6111_v44 = vpop.f32.mrf.mxu0  ;;  %3680 = vrot.lane.b32.xlu1 %v6253_v22, %s6598_s15  ;;  %3690 = vrot.lane.b32.xlu0 %v6255_v45, %s6598_s15  ;;  %v2986_v40 = vadd.f32 %v2895_v4, %v8092_v27  ;;  %v8222_v58 = vadd.f32 %v6110_v26, %v2988_v60  ;;  %6268 = vtanh.f32 %v8217_v30  ;;  %v8239_v26 = vpop.permute.xlu1 %3522 }
 0x223   : > { %v6075_v48 = vpop.f32.mrf.mxu1  ;;  %v6257_v7 = vpop.eup %6256 }
 0x224   : > { %v3122_v43 = vpop.f32.mrf.mxu0  ;;  %v2989_v52 = vadd.f32 %v6075_v48, %v8095_v59  ;;  %6270 = vtanh.f32 %v8222_v58  ;;  %v8229_v46 = vadd.f32 %v3119_v5, %v2986_v40  ;;  %v8244_v5 = vpop.permute.xlu0 %3520 }
 0x225   : > { %v2898_v13 = vpop.f32.mrf.mxu1  ;;  %v6259_v37 = vpop.eup %6258 }
 0x226   : > { %v6114_v36 = vpop.f32.mrf.mxu0  ;;  %3686 = vrot.lane.b32.xlu0 %v6257_v7, %s6598_s15  ;;  %3692 = vrot.lane.b32.xlu1 %v6259_v37, %s6598_s15  ;;  %v2987_v54 = vadd.f32 %v2898_v13, %v8098_v50  ;;  %v8234_v35 = vadd.f32 %v6111_v44, %v2989_v52  ;;  %6272 = vtanh.f32 %v8229_v46  ;;  %v8252_v61 = vpop.permute.xlu1 %3524 }
 0x227   : > { %v6078_v3 = vpop.f32.mrf.mxu1  ;;  %v6261_v55 = vpop.eup %6260 }
 0x228   : > { %v3135_v56 = vpop.f32.mrf.mxu0  ;;  %v2992_v59 = vadd.f32 %v6078_v3, %v8101_v39  ;;  %6274 = vtanh.f32 %v8234_v35  ;;  %v8242_v29 = vadd.f32 %v3122_v43, %v2987_v54  ;;  %v8258_v13 = vpop.permute.xlu0 %3526 }
 0x229   : > { %v2911_v51 = vpop.f32.mrf.mxu1  ;;  %v6263_v0 = vpop.eup %6262 }
 0x22a   : > { %3688 = vrot.lane.b32.xlu1 %v6261_v55, %s6598_s15  ;;  %3698 = vrot.lane.b32.xlu0 %v6263_v0, %s6598_s15  ;;  %v6115_v63 = vpop.f32.mrf.mxu0  ;;  %v2990_v4 = vadd.f32 %v2911_v51, %v8104_v19  ;;  %v8248_v45 = vadd.f32 %v6114_v36, %v2992_v59  ;;  %6276 = vtanh.f32 %v8242_v29  ;;  %v8266_v55 = vpop.permute.xlu1 %3528 }
 0x22b   : > { %v6079_v6 = vpop.f32.mrf.mxu1  ;;  %v6265_v27 = vpop.eup %6264 }
 0x22c   : > { %v3138_v23 = vpop.f32.mrf.mxu0  ;;  %v2993_v44 = vadd.f32 %v6079_v6, %v8107_v2  ;;  %6278 = vtanh.f32 %v8248_v45  ;;  %v8256_v7 = vadd.f32 %v3135_v56, %v2990_v4  ;;  %v8271_v0 = vpop.permute.xlu0 %3530 }
 0x22d   : > { %v2914_v38 = vpop.f32.mrf.mxu1  ;;  %v6267_v15 = vpop.eup %6266 }
 0x22e   : > { %3694 = vrot.lane.b32.xlu0 %v6265_v27, %s6598_s15  ;;  %3700 = vrot.lane.b32.xlu1 %v6267_v15, %s6598_s15  ;;  %v6118_v22 = vpop.f32.mrf.mxu0  ;;  %v2991_v37 = vadd.f32 %v2914_v38, %v8110_v41  ;;  %v8261_v60 = vadd.f32 %v6115_v63, %v2993_v44  ;;  %6280 = vtanh.f32 %v8256_v7  ;;  %v8280_v63 = vpop.permute.xlu1 %3532 }
 0x22f   : > { %v6082_v53 = vpop.f32.mrf.mxu1  ;;  %v6269_v39 = vpop.eup %6268 }
 0x230   : > { %v3151_v43 = vpop.f32.mrf.mxu0  ;;  %v2996_v2 = vadd.f32 %v6082_v53, %v8113_v47  ;;  %6282 = vtanh.f32 %v8261_v60  ;;  %v8269_v56 = vadd.f32 %v3138_v23, %v2991_v37 }
 0x231   : > { %v2927_v50 = vpop.f32.mrf.mxu1  ;;  %v6271_v19 = vpop.eup %6270 }
 0x232   : > { %3696 = vrot.lane.b32.xlu1 %v6269_v39, %s6598_s15  ;;  %3706 = vrot.lane.b32.xlu0 %v6271_v19, %s6598_s15  ;;  %v6119_v3 = vpop.f32.mrf.mxu0  ;;  %v2994_v40 = vadd.f32 %v2927_v50, %v8116_v33  ;;  %v8275_v6 = vadd.f32 %v6118_v22, %v2996_v2  ;;  %6284 = vtanh.f32 %v8269_v56  ;;  %v8285_v33 = vpop.permute.xlu0 %3534 }
 0x233   : > { %v6083_v48 = vpop.f32.mrf.mxu1  ;;  %v6273_v51 = vpop.eup %6272 }
 0x234   : > { %v3154_v52 = vpop.f32.mrf.mxu0  ;;  %v2997_v38 = vadd.f32 %v6083_v48, %v8119_v49  ;;  %6286 = vtanh.f32 %v8275_v6  ;;  %v8283_v54 = vadd.f32 %v3151_v43, %v2994_v40  ;;  %v8294_v44 = vpop.permute.xlu1 %3536 }
 0x235   : > { %v2930_v36 = vpop.f32.mrf.mxu1  ;;  %v6275_v41 = vpop.eup %6274 }
 0x236   : > { %3702 = vrot.lane.b32.xlu0 %v6273_v51, %s6598_s15  ;;  %3708 = vrot.lane.b32.xlu1 %v6275_v41, %s6598_s15  ;;  %v6122_v23 = vpop.f32.mrf.mxu0  ;;  %v2995_v15 = vadd.f32 %v2930_v36, %v8122_v17  ;;  %v8289_v50 = vadd.f32 %v6119_v3, %v2997_v38  ;;  %6288 = vtanh.f32 %v8283_v54  ;;  %v8299_v19 = vpop.permute.xlu0 %3538 }
 0x237   : > { %v6086_v47 = vpop.f32.mrf.mxu1  ;;  %v6277_v27 = vpop.eup %6276 }
 0x238   : > { %v3167_v22 = vpop.f32.mrf.mxu0  ;;  %v3000_v4 = vadd.f32 %v6086_v47, %v8125_v14  ;;  %6290 = vtanh.f32 %v8289_v50  ;;  %v8297_v43 = vadd.f32 %v3154_v52, %v2995_v15  ;;  %v8308_v51 = vpop.permute.xlu1 %3540 }
 0x239   : > { %v2943_v53 = vpop.f32.mrf.mxu1  ;;  %v6279_v59 = vpop.eup %6278 }
 0x23a   : > { %3704 = vrot.lane.b32.xlu1 %v6277_v27, %s6598_s15  ;;  %3714 = vrot.lane.b32.xlu0 %v6279_v59, %s6598_s15  ;;  %v6123_v37 = vpop.f32.mrf.mxu0  ;;  %v2998_v2 = vadd.f32 %v2943_v53, %v8128_v32  ;;  %v8304_v36 = vadd.f32 %v6122_v23, %v3000_v4  ;;  %6292 = vtanh.f32 %v8297_v43  ;;  %v8314_v38 = vpop.permute.xlu0 %3542 }
 0x23b   : > { %v6087_v49 = vpop.f32.mrf.mxu1  ;;  %v6281_v39 = vpop.eup %6280 }
 0x23c   : > { %v3001_v3 = vadd.f32 %v6087_v49, %v8131_v28  ;;  %v3170_v40 = vpop.f32.mrf.mxu0  ;;  %6294 = vtanh.f32 %v8304_v36  ;;  %v8312_v52 = vadd.f32 %v3167_v22, %v2998_v2  ;;  %v8322_v15 = vpop.permute.xlu1 %3544 }
 0x23d   : > { %v6283_v48 = vpop.eup %6282  ;;  %v2946_v17 = vpop.f32.mrf.mxu1 }
 0x23e   : > { %3710 = vrot.lane.b32.xlu0 %v6281_v39, %s6598_s15  ;;  %3716 = vrot.lane.b32.xlu1 %v6283_v48, %s6598_s15  ;;  %v2999_v32 = vadd.f32 %v2946_v17, %v8134_v24  ;;  %v8318_v27 = vadd.f32 %v6123_v37, %v3001_v3  ;;  %v6126_v53 = vpop.f32.mrf.mxu0  ;;  %6296 = vtanh.f32 %v8312_v52  ;;  %v8328_v22 = vpop.permute.xlu0 %3546 }
 0x23f   : > { %v6285_v14 = vpop.eup %6284  ;;  %v6090_v41 = vpop.f32.mrf.mxu1 }
 0x240   : > { %v3004_v59 = vadd.f32 %v6090_v41, %v8139_v12  ;;  %6298 = vtanh.f32 %v8318_v27  ;;  %v8326_v49 = vadd.f32 %v3170_v40, %v2999_v32  ;;  %v3183_v39 = vpop.f32.mrf.mxu0  ;;  %v8336_v37 = vpop.permute.xlu1 %3548 }
 0x241   : > { %v6287_v47 = vpop.eup %6286  ;;  %v2959_v28 = vpop.f32.mrf.mxu1 }
 0x242   : > { %3712 = vrot.lane.b32.xlu1 %v6285_v14, %s6598_s15  ;;  %3722 = vrot.lane.b32.xlu0 %v6287_v47, %s6598_s15  ;;  %v3002_v48 = vadd.f32 %v2959_v28, %v8144_v1  ;;  %v8331_v17 = vadd.f32 %v6126_v53, %v3004_v59  ;;  %6300 = vtanh.f32 %v8326_v49  ;;  %v6127_v3 = vpop.f32.mrf.mxu0  ;;  %v8341_v40 = vpop.permute.xlu0 %3550 }
 0x243   : > { %v6289_v23 = vpop.eup %6288  ;;  %v6091_v4 = vpop.f32.mrf.mxu1 }
 0x244   : > { %v3005_v12 = vadd.f32 %v6091_v4, %v8150_v57  ;;  %6302 = vtanh.f32 %v8331_v17  ;;  %v8339_v41 = vadd.f32 %v3183_v39, %v3002_v48  ;;  %v3186_v57 = vpop.f32.mrf.mxu0  ;;  %v8349_v53 = vpop.permute.xlu1 %3552 }
 0x245   : > { %v6291_v24 = vpop.eup %6290  ;;  %v2962_v14 = vpop.f32.mrf.mxu1 }
 0x246   : > { %3718 = vrot.lane.b32.xlu0 %v6289_v23, %s6598_s15  ;;  %3724 = vrot.lane.b32.xlu1 %v6291_v24, %s6598_s15  ;;  %v3003_v47 = vadd.f32 %v2962_v14, %v8156_v10  ;;  %v8345_v32 = vadd.f32 %v6127_v3, %v3005_v12  ;;  %6304 = vtanh.f32 %v8339_v41  ;;  %v8354_v59 = vpop.permute.xlu0 %3554  ;;  %v5542_v10 = vmul.f32 -1.442695, %v8161_v20 }
 0x247   : > { %v6293_v2 = vpop.eup %6292  ;;  %v5543_v14 = vmul.f32 -1.442695, %v8172_v25  ;;  %v5541_v20 = vmul.f32 -1.442695, %v8178_v31  ;;  %v5547_v25 = vmul.f32 -1.442695, %v8192_v18 }
 0x248   : > { %6306 = vtanh.f32 %v8345_v32  ;;  %v8352_v23 = vadd.f32 %v3186_v57, %v3003_v47  ;;  %v8360_v39 = vpop.permute.xlu1 %3556  ;;  %v5546_v47 = vmul.f32 -1.442695, %v8184_v42  ;;  %v5545_v42 = vmul.f32 -1.442695, %v8195_v16 }
 0x249   : > { %v6295_v1 = vpop.eup %6294 }
 0x24a   : > { %3720 = vrot.lane.b32.xlu1 %v6293_v2, %s6598_s15  ;;  %3730 = vrot.lane.b32.xlu0 %v6295_v1, %s6598_s15  ;;  %6308 = vtanh.f32 %v8352_v23  ;;  %v8362_v48 = vpop.permute.xlu0 %3558  ;;  %v5540_v2 = vmul.f32 -1.442695, %v8167_v11  ;;  %v5544_v11 = vmul.f32 -1.442695, %v8188_v62 }
 0x24b   : > { %v6297_v28 = vpop.eup %6296  ;;  %6310 = vpow2.f32 %v5542_v10 }
 0x24c   : > { %6312 = vpow2.f32 %v5540_v2  ;;  %v8369_v1 = vpop.permute.xlu1 %3560 }
 0x24d   : > { %v6299_v24 = vpop.eup %6298  ;;  %6314 = vpow2.f32 %v5543_v14 }
 0x24e   : > { %3726 = vrot.lane.b32.xlu0 %v6297_v28, %s6598_s15  ;;  %3732 = vrot.lane.b32.xlu1 %v6299_v24, %s6598_s15  ;;  %v8372_v57 = vpop.permute.xlu0 %3562  ;;  %6316 = vpow2.f32 %v5541_v20  ;;  %v5548_v20 = vmul.f32 -1.442695, %v8206_v21  ;;  %v5549_v21 = vmul.f32 -1.442695, %v8217_v30 }
 0x24f   : > { %v6301_v4 = vpop.eup %6300  ;;  %6318 = vpow2.f32 %v5546_v47 }
 0x250   : > { %v8378_v31 = vpop.permute.xlu1 %3564  ;;  %6320 = vpow2.f32 %v5544_v11 }
 0x251   : > { %v6303_v12 = vpop.eup %6302  ;;  %6322 = vpow2.f32 %v5547_v25 }
 0x252   : > { %3728 = vrot.lane.b32.xlu1 %v6301_v4, %s6598_s15  ;;  %3738 = vrot.lane.b32.xlu0 %v6303_v12, %s6598_s15  ;;  %v8380_v10 = vpop.permute.xlu0 %3566  ;;  %v5550_v12 = vmul.f32 -1.442695, %v8198_v9  ;;  %6324 = vpow2.f32 %v5545_v42  ;;  %v5551_v9 = vmul.f32 -1.442695, %v8211_v8 }
 0x253   : > { %v6305_v3 = vpop.eup %6304 }
 0x254   : > { %v8385_v62 = vpop.permute.xlu1 %3568  ;;  %6326 = vpow2.f32 %v5550_v12 }
 0x255   : > { %v6307_v28 = vpop.eup %6306  ;;  %9258 = vst [vmem:[#allocation19_spill] sm:$0xff] %v8385_v62 }
 0x256   : > { %3734 = vrot.lane.b32.xlu0 %v6305_v3, %s6598_s15  ;;  %3740 = vrot.lane.b32.xlu1 %v6307_v28, %s6598_s15  ;;  %v8387_v18 = vpop.permute.xlu0 %3570 }
 0x257   : > { %v6309_v24 = vpop.eup %6308 }
 0x258   : > { %v6311_v4 = vpop.eup %6310  ;;  %v8390_v25 = vpop.permute.xlu1 %3572 }
 0x259   : > { %v3328_v2 = vadd.f32 1.0, %v6311_v4  ;;  %v6313_v14 = vpop.eup %6312  ;;  %9259 = vst [vmem:[#allocation7_spill] sm:$0xff] %v8390_v25 }
 0x25a   : > { %3736 = vrot.lane.b32.xlu1 %v6309_v24, %s6598_s15  ;;  %v6315_v3 = vpop.eup %6314  ;;  %v3326_v47 = vadd.f32 1.0, %v6313_v14  ;;  %v8393_v24 = vpop.permute.xlu0 %3574 }
 0x25b   : > { %6328 = vrcp.f32 %v3328_v2  ;;  %v6317_v28 = vpop.eup %6316  ;;  %v3329_v11 = vadd.f32 1.0, %v6315_v3  ;;  %9260 = vst [vmem:[#allocation8_spill] sm:$0xff] %v8393_v24 }
 0x25c   : > { %v6319_v16 = vpop.eup %6318  ;;  %6330 = vpow2.f32 %v5548_v20  ;;  %v3327_v42 = vadd.f32 1.0, %v6317_v28  ;;  %v8396_v14 = vpop.permute.xlu1 %3576 }
 0x25d   : > { %6332 = vrcp.f32 %v3326_v47  ;;  %v6321_v4 = vpop.eup %6320  ;;  %v3332_v12 = vadd.f32 1.0, %v6319_v16  ;;  %9261 = vst [vmem:[#allocation21_spill] sm:$0xff] %v8396_v14  ;;  %v5554_v47 = vmul.f32 -1.442695, %v8222_v58 }
 0x25e   : > { %6334 = vrcp.f32 %v3329_v11  ;;  %v6323_v62 = vpop.eup %6322  ;;  %v3330_v2 = vadd.f32 1.0, %v6321_v4  ;;  %v8398_v25 = vpop.permute.xlu0 %3578 }
 0x25f   : > { %6336 = vpow2.f32 %v5551_v9  ;;  %v6325_v3 = vpop.eup %6324  ;;  %v3333_v20 = vadd.f32 1.0, %v6323_v62  ;;  %9262 = vst [vmem:[#allocation20_spill] sm:$0xff] %v8398_v25  ;;  %v5552_v9 = vmul.f32 -1.442695, %v8229_v46 }
 0x260   : > { %6338 = vrcp.f32 %v3327_v42  ;;  %v3331_v28 = vadd.f32 1.0, %v6325_v3  ;;  %v8404_v42 = vpop.permute.xlu1 %3580 }
 0x261   : > { %6340 = vrcp.f32 %v3332_v12  ;;  %v6327_v8 = vpop.eup %6326  ;;  %9263 = vst [vmem:[#allocation23_spill] sm:$0xff] %v8404_v42  ;;  %v5555_v12 = vmul.f32 -1.442695, %v8234_v35 }
 0x262   : > { %6342 = vpow2.f32 %v5549_v21  ;;  %v3336_v30 = vadd.f32 1.0, %v6327_v8  ;;  %v5553_v8 = vmul.f32 -1.442695, %v8242_v29 }
 0x263   : > { %6344 = vrcp.f32 %v3330_v2 }
 0x264   : > { %6346 = vrcp.f32 %v3333_v20 }
 0x265   : > { %6348 = vpow2.f32 %v5554_v47 }
 0x266   : > { %6350 = vrcp.f32 %v3331_v28 }
 0x267   : > { %6352 = vrcp.f32 %v3336_v30 }
 0x268   : > { %v8401_v11 = vpop.eup %6328  ;;  %6354 = vpow2.f32 %v5552_v9 }
 0x269   : > { %v6331_v4 = vpop.eup %6330  ;;  %6356 = vpow2.f32 %v5555_v12 }
 0x26a   : > { %v8409_v58 = vpop.eup %6332  ;;  %v3334_v3 = vadd.f32 1.0, %v6331_v4 }
 0x26b   : > { %v8411_v2 = vpop.eup %6334 }
 0x26c   : > { %v6337_v28 = vpop.eup %6336  ;;  %6358 = vrcp.f32 %v3334_v3 }
 0x26d   : > { %v8417_v35 = vpop.eup %6338  ;;  %6360 = vpow2.f32 %v5553_v8  ;;  %v5559_v8 = vmul.f32 -1.442695, %v8261_v60  ;;  %v5557_v60 = vmul.f32 -1.442695, %v8269_v56  ;;  %v5560_v56 = vmul.f32 -1.442695, %v8283_v54 }
 0x26e   : > { %v8420_v30 = vpop.eup %6340  ;;  %v5561_v54 = vmul.f32 -1.442695, %v8297_v43 }
 0x26f   : > { %v6343_v4 = vpop.eup %6342 }
 0x28c   : > { %v3683_v16 = vpop.permute.xlu0 %3682 }
 0x28d   : > { %v3776_v62 = vmul.f32 %v8401_v11, %v3683_v16  ;;  %v5558_v16 = vmul.f32 -1.442695, %v8248_v45  ;;  %v3335_v45 = vadd.f32 1.0, %v6343_v4 }
 0x28f   : > { %3842 = vrot.lane.b32.xlu0 %v3776_v62, %s6598_s15  ;;  %6362 = vpow2.f32 %v5558_v16 }
 0x290   : > { %v3679_v21 = vpop.permute.xlu0 %3678  ;;  %v3685_v20 = vpop.permute.xlu1 %3684 }
 0x291   : > { %v3774_v46 = vmul.f32 %v8409_v58, %v3679_v21  ;;  %v3777_v47 = vmul.f32 %v8411_v2, %v3685_v20  ;;  %v3337_v21 = vadd.f32 1.0, %v6337_v28  ;;  %v8425_v20 = vpop.eup %6344 }
 0x292   : > { %v8430_v3 = vpop.eup %6346 }
 0x293   : > { %3838 = vrot.lane.b32.xlu0 %v3774_v46, %s6598_s15  ;;  %3844 = vrot.lane.b32.xlu1 %v3777_v47, %s6598_s15  ;;  %v5556_v46 = vmul.f32 -1.442695, %v8256_v7  ;;  %v6349_v28 = vpop.eup %6348  ;;  %6364 = vrcp.f32 %v3337_v21 }
 0x294   : > { %v3681_v9 = vpop.permute.xlu1 %3680  ;;  %v3691_v62 = vpop.permute.xlu0 %3690  ;;  %v3340_v16 = vadd.f32 1.0, %v6349_v28 }
 0x295   : > { %v3775_v29 = vmul.f32 %v8417_v35, %v3681_v9  ;;  %v3780_v12 = vmul.f32 %v8420_v30, %v3691_v62  ;;  %v8435_v42 = vpop.eup %6350  ;;  %6366 = vpow2.f32 %v5556_v46  ;;  %v5562_v46 = vmul.f32 -1.442695, %v8275_v6 }
 0x296   : > { %v8439_v7 = vpop.eup %6352  ;;  %6368 = vrcp.f32 %v3335_v45 }
 0x297   : > { %3850 = vrot.lane.b32.xlu0 %v3780_v12, %s6598_s15  ;;  %3840 = vrot.lane.b32.xlu1 %v3775_v29, %s6598_s15  ;;  %v6355_v21 = vpop.eup %6354  ;;  %6370 = vpow2.f32 %v5559_v8 }
 0x298   : > { %v3687_v47 = vpop.permute.xlu0 %3686  ;;  %v3693_v14 = vpop.permute.xlu1 %3692  ;;  %6372 = vrcp.f32 %v3340_v16  ;;  %v3338_v45 = vadd.f32 1.0, %v6355_v21  ;;  %v5563_v16 = vmul.f32 -1.442695, %v8289_v50  ;;  %v5566_v50 = vmul.f32 -1.442695, %v8304_v36 }
 0x299   : > { %v3778_v9 = vmul.f32 %v8425_v20, %v3687_v47  ;;  %v3781_v62 = vmul.f32 %v8430_v3, %v3693_v14  ;;  %v6357_v47 = vpop.eup %6356  ;;  %6374 = vpow2.f32 %v5557_v60 }
 0x29a   : > { %v8447_v28 = vpop.eup %6358  ;;  %v3341_v8 = vadd.f32 1.0, %v6357_v47  ;;  %6376 = vpow2.f32 %v5562_v46 }
 0x29b   : > { %3846 = vrot.lane.b32.xlu0 %v3778_v9, %s6598_s15  ;;  %3852 = vrot.lane.b32.xlu1 %v3781_v62, %s6598_s15  ;;  %v6361_v9 = vpop.eup %6360  ;;  %6378 = vrcp.f32 %v3338_v45 }
 0x29c   : > { %v3689_v4 = vpop.permute.xlu1 %3688  ;;  %v3699_v29 = vpop.permute.xlu0 %3698  ;;  %v3339_v6 = vadd.f32 1.0, %v6361_v9  ;;  %6380 = vrcp.f32 %v3341_v8 }
 0x29d   : > { %v3779_v12 = vmul.f32 %v8435_v42, %v3689_v4  ;;  %v3784_v14 = vmul.f32 %v8439_v7, %v3699_v29  ;;  %v6363_v29 = vpop.eup %6362  ;;  %6382 = vpow2.f32 %v5560_v56 }
 0x29e   : > { %v3344_v47 = vadd.f32 1.0, %v6363_v29  ;;  %6384 = vrcp.f32 %v3339_v6 }
 0x29f   : > { %3858 = vrot.lane.b32.xlu0 %v3784_v14, %s6598_s15  ;;  %3848 = vrot.lane.b32.xlu1 %v3779_v12, %s6598_s15  ;;  %6386 = vpow2.f32 %v5563_v16  ;;  %v5564_v16 = vmul.f32 -1.442695, %v8312_v52 }
 0x2a0   : > { %v3695_v62 = vpop.permute.xlu0 %3694  ;;  %v8452_v14 = vpop.eup %6364  ;;  %6388 = vrcp.f32 %v3344_v47  ;;  %v5567_v47 = vmul.f32 -1.442695, %v8318_v27 }
 0x2a1   : > { %v3782_v4 = vmul.f32 %v8447_v28, %v3695_v62  ;;  %v3701_v21 = vpop.permute.xlu1 %3700  ;;  %6390 = vpow2.f32 %v5561_v54 }
 0x2a2   : > { %v3785_v60 = vmul.f32 %v8452_v14, %v3701_v21  ;;  %v6367_v12 = vpop.eup %6366 }
 0x2a3   : > { %3854 = vrot.lane.b32.xlu0 %v3782_v4, %s6598_s15  ;;  %v8456_v46 = vpop.eup %6368  ;;  %v3342_v62 = vadd.f32 1.0, %v6367_v12 }
 0x2a4   : > { %3860 = vrot.lane.b32.xlu1 %v3785_v60, %s6598_s15  ;;  %v6371_v45 = vpop.eup %6370  ;;  %v3707_v29 = vpop.permute.xlu0 %3706 }
 0x2a5   : > { %v3697_v9 = vpop.permute.xlu1 %3696  ;;  %v8462_v56 = vpop.eup %6372  ;;  %v3345_v4 = vadd.f32 1.0, %v6371_v45  ;;  %6392 = vrcp.f32 %v3342_v62 }
 0x2a6   : > { %v3783_v8 = vmul.f32 %v8456_v46, %v3697_v9  ;;  %v6375_v6 = vpop.eup %6374  ;;  %v3788_v43 = vmul.f32 %v8462_v56, %v3707_v29  ;;  %6394 = vpow2.f32 %v5566_v50 }
 0x2a7   : > { %v6377_v21 = vpop.eup %6376  ;;  %6396 = vrcp.f32 %v3345_v4  ;;  %v3343_v36 = vadd.f32 1.0, %v6375_v6  ;;  %v5565_v4 = vmul.f32 -1.442695, %v8326_v49 }
 0x2a8   : > { %3856 = vrot.lane.b32.xlu1 %v3783_v8, %s6598_s15  ;;  %3866 = vrot.lane.b32.xlu0 %v3788_v43, %s6598_s15  ;;  %v8468_v60 = vpop.eup %6378  ;;  %v3703_v12 = vpop.permute.xlu0 %3702  ;;  %v3348_v9 = vadd.f32 1.0, %v6377_v21  ;;  %6398 = vpow2.f32 %v5564_v16  ;;  %v5570_v43 = vmul.f32 -1.442695, %v8331_v17 }
 0x2a9   : > { %v3786_v54 = vmul.f32 %v8468_v60, %v3703_v12  ;;  %v8472_v45 = vpop.eup %6380  ;;  %v3709_v8 = vpop.permute.xlu1 %3708  ;;  %6400 = vrcp.f32 %v3343_v36 }
 0x2aa   : > { %v6383_v62 = vpop.eup %6382  ;;  %v3789_v50 = vmul.f32 %v8472_v45, %v3709_v8  ;;  %6402 = vpow2.f32 %v5567_v47 }
 0x2ab   : > { %v8476_v52 = vpop.eup %6384  ;;  %6404 = vrcp.f32 %v3348_v9  ;;  %v3346_v29 = vadd.f32 1.0, %v6383_v62  ;;  %v5568_v9 = vmul.f32 -1.442695, %v8339_v41 }
 0x2ac   : > { %3862 = vrot.lane.b32.xlu0 %v3786_v54, %s6598_s15  ;;  %3868 = vrot.lane.b32.xlu1 %v3789_v50, %s6598_s15  ;;  %v6387_v27 = vpop.eup %6386  ;;  %v3715_v12 = vpop.permute.xlu0 %3714  ;;  %6406 = vpow2.f32 %v5565_v4  ;;  %v5571_v4 = vmul.f32 -1.442695, %v8345_v32 }
 0x2ad   : > { %v3705_v6 = vpop.permute.xlu1 %3704  ;;  %v8482_v16 = vpop.eup %6388  ;;  %v3349_v36 = vadd.f32 1.0, %v6387_v27  ;;  %6408 = vrcp.f32 %v3346_v29 }
 0x2ae   : > { %v3787_v21 = vmul.f32 %v8476_v52, %v3705_v6  ;;  %v6391_v54 = vpop.eup %6390  ;;  %v3792_v47 = vmul.f32 %v8482_v16, %v3715_v12  ;;  %6410 = vpow2.f32 %v5570_v43  ;;  %v5569_v12 = vmul.f32 -1.442695, %v8352_v23 }
 0x2af   : > { %v3347_v8 = vadd.f32 1.0, %v6391_v54  ;;  %6412 = vrcp.f32 %v3349_v36 }
 0x2b0   : > { %3864 = vrot.lane.b32.xlu1 %v3787_v21, %s6598_s15  ;;  %3874 = vrot.lane.b32.xlu0 %v3792_v47, %s6598_s15  ;;  %v3711_v62 = vpop.permute.xlu0 %3710  ;;  %6414 = vpow2.f32 %v5568_v9 }
 0x2b1   : > { %v3717_v6 = vpop.permute.xlu1 %3716  ;;  %6416 = vrcp.f32 %v3347_v8 }
 0x2b2   : > { %v8486_v49 = vpop.eup %6392  ;;  %6418 = vpow2.f32 %v5571_v4 }
 0x2b3   : > { %v6395_v17 = vpop.eup %6394  ;;  %v3790_v27 = vmul.f32 %v8486_v49, %v3711_v62 }
 0x2b4   : > { %v8490_v50 = vpop.eup %6396  ;;  %v3352_v21 = vadd.f32 1.0, %v6395_v17  ;;  %v3723_v9 = vpop.permute.xlu0 %3722 }
 0x2b5   : > { %v3793_v29 = vmul.f32 %v8490_v50, %v3717_v6  ;;  %3870 = vrot.lane.b32.xlu0 %v3790_v27, %s6598_s15  ;;  %v6399_v41 = vpop.eup %6398  ;;  %v3713_v54 = vpop.permute.xlu1 %3712 }
 0x2b6   : > { %v8497_v43 = vpop.eup %6400  ;;  %6420 = vrcp.f32 %v3352_v21  ;;  %v3350_v17 = vadd.f32 1.0, %v6399_v41 }
 0x2b7   : > { %3876 = vrot.lane.b32.xlu1 %v3793_v29, %s6598_s15  ;;  %v6403_v32 = vpop.eup %6402  ;;  %v3791_v36 = vmul.f32 %v8497_v43, %v3713_v54  ;;  %6422 = vpow2.f32 %v5569_v12 }
 0x2b8   : > { %v8501_v47 = vpop.eup %6404  ;;  %v3353_v8 = vadd.f32 1.0, %v6403_v32  ;;  %6424 = vrcp.f32 %v3350_v17  ;;  %v3719_v23 = vpop.permute.xlu0 %3718 }
 0x2b9   : > { %v3796_v62 = vmul.f32 %v8501_v47, %v3723_v9  ;;  %v6407_v27 = vpop.eup %6406  ;;  %v3725_v54 = vpop.permute.xlu1 %3724 }
 0x2ba   : > { %v8506_v4 = vpop.eup %6408  ;;  %6426 = vrcp.f32 %v3353_v8  ;;  %v3351_v21 = vadd.f32 1.0, %v6407_v27 }
 0x2bb   : > { %3872 = vrot.lane.b32.xlu1 %v3791_v36, %s6598_s15  ;;  %3882 = vrot.lane.b32.xlu0 %v3796_v62, %s6598_s15  ;;  %v6411_v6 = vpop.eup %6410  ;;  %v3794_v29 = vmul.f32 %v8506_v4, %v3719_v23 }
 0x2bc   : > { %v8509_v41 = vpop.eup %6412  ;;  %v3356_v36 = vadd.f32 1.0, %v6411_v6  ;;  %6428 = vrcp.f32 %v3351_v21  ;;  %v3731_v24 = vpop.permute.xlu0 %3730 }
 0x2bd   : > { %v3797_v12 = vmul.f32 %v8509_v41, %v3725_v54  ;;  %v6415_v32 = vpop.eup %6414  ;;  %v3721_v62 = vpop.permute.xlu1 %3720 }
 0x2be   : > { %v8513_v9 = vpop.eup %6416  ;;  %6430 = vrcp.f32 %v3356_v36  ;;  %v3354_v23 = vadd.f32 1.0, %v6415_v32 }
 0x2bf   : > { %3878 = vrot.lane.b32.xlu0 %v3794_v29, %s6598_s15  ;;  %3884 = vrot.lane.b32.xlu1 %v3797_v12, %s6598_s15  ;;  %v6419_v17 = vpop.eup %6418  ;;  %v3795_v8 = vmul.f32 %v8513_v9, %v3721_v62 }
 0x2c0   : > { %v3357_v25 = vadd.f32 1.0, %v6419_v17  ;;  %6432 = vrcp.f32 %v3354_v23  ;;  %v3727_v54 = vpop.permute.xlu0 %3726 }
 0x2c1   : > { %v3733_v62 = vpop.permute.xlu1 %3732 }
 0x2c2   : > { %6434 = vrcp.f32 %v3357_v25 }
 0x2c3   : > { %v8517_v27 = vpop.eup %6420  ;;  %3880 = vrot.lane.b32.xlu1 %v3795_v8, %s6598_s15 }
 0x2c4   : > { %v3800_v6 = vmul.f32 %v8517_v27, %v3731_v24  ;;  %v6423_v29 = vpop.eup %6422  ;;  %v3739_v25 = vpop.permute.xlu0 %3738 }
 0x2c5   : > { %v8522_v21 = vpop.eup %6424  ;;  %v3355_v36 = vadd.f32 1.0, %v6423_v29  ;;  %v3729_v23 = vpop.permute.xlu1 %3728 }
 0x2c6   : > { %3890 = vrot.lane.b32.xlu0 %v3800_v6, %s6598_s15  ;;  %v3798_v12 = vmul.f32 %v8522_v21, %v3727_v54 }
 0x2c7   : > { %v8525_v32 = vpop.eup %6426  ;;  %6436 = vrcp.f32 %v3355_v36 }
 0x2c8   : > { %9264 = vst [vmem:[#allocation22_spill] sm:$0xff] %v8525_v32  ;;  %v3801_v17 = vmul.f32 %v8525_v32, %v3733_v62 }
 0x2c9   : > { %v8530_v24 = vpop.eup %6428 }
 0x2ca   : > { %3886 = vrot.lane.b32.xlu0 %v3798_v12, %s6598_s15  ;;  %3892 = vrot.lane.b32.xlu1 %v3801_v17, %s6598_s15  ;;  %v3799_v8 = vmul.f32 %v8530_v24, %v3729_v23  ;;  %v3735_v12 = vpop.permute.xlu0 %3734  ;;  %v3741_v17 = vpop.permute.xlu1 %3740 }
 0x2cb   : > { %v8533_v6 = vpop.eup %6430 }
 0x2cc   : > { %9265 = vst [vmem:[#allocation9_spill] sm:$0xff] %v8533_v6  ;;  %v3804_v29 = vmul.f32 %v8533_v6, %v3739_v25  ;;  %v3614_v6 = vmul.f32 %v8409_v58, %v8231_v34 }
 0x2cd   : > { %v8538_v54 = vpop.eup %6432 }
 0x2ce   : > { %3888 = vrot.lane.b32.xlu1 %v3799_v8, %s6598_s15  ;;  %3898 = vrot.lane.b32.xlu0 %v3804_v29, %s6598_s15  ;;  %9266 = vst [vmem:[#allocation10_spill] sm:$0xff] %v8538_v54  ;;  %v3802_v36 = vmul.f32 %v8538_v54, %v3735_v12  ;;  %v3737_v25 = vpop.permute.xlu1 %3736  ;;  %v3616_v29 = vmul.f32 %v8401_v11, %v8239_v26 }
 0x2cf   : > { %v8541_v62 = vpop.eup %6434  ;;  %v3615_v26 = vmul.f32 %v8417_v35, %v8244_v5 }
 0x2d0   : > { %9267 = vst [vmem:[#allocation12_spill] sm:$0xff] %v8541_v62  ;;  %v3805_v32 = vmul.f32 %v8541_v62, %v3741_v17 }
 0x2d2   : > { %3894 = vrot.lane.b32.xlu0 %v3802_v36, %s6598_s15  ;;  %3900 = vrot.lane.b32.xlu1 %v3805_v32, %s6598_s15  ;;  %v3617_v32 = vmul.f32 %v8411_v2, %v8252_v61 }
 0x2d4   : > { %v8546_v23 = vpop.eup %6436 }
 0x2d5   : > { %v3803_v8 = vmul.f32 %v8546_v23, %v3737_v25 }
 0x2d7   : > { %3896 = vrot.lane.b32.xlu1 %v3803_v8, %s6598_s15  ;;  %v3620_v8 = vmul.f32 %v8420_v30, %v8271_v0 }
 0x301   : > { %v3843_v12 = vpop.permute.xlu0 %3842 }
 0x302   : > { %v3936_v54 = vadd.f32 %v3843_v12, %v3616_v29 }
 0x304   : > { %4194 = vrot.lane.b32.xlu0 %v3936_v54, %s6599_s20  ;;  %6438 = vtanh.f32 %v3936_v54  ;;  %v3621_v54 = vmul.f32 %v8430_v3, %v8280_v63 }
 0x305   : > { %v3839_v36 = vpop.permute.xlu0 %3838  ;;  %v3845_v62 = vpop.permute.xlu1 %3844 }
 0x306   : > { %v3934_v17 = vadd.f32 %v3839_v36, %v3614_v6  ;;  %v3937_v25 = vadd.f32 %v3845_v62, %v3617_v32  ;;  %v3618_v6 = vmul.f32 %v8425_v20, %v8258_v13  ;;  %v3619_v36 = vmul.f32 %v8435_v42, %v8266_v55 }
 0x308   : > { %4190 = vrot.lane.b32.xlu0 %v3934_v17, %s6599_s20  ;;  %4196 = vrot.lane.b32.xlu1 %v3937_v25, %s6599_s20  ;;  %6440 = vtanh.f32 %v3934_v17 }
 0x309   : > { %v3851_v34 = vpop.permute.xlu0 %3850  ;;  %v3841_v29 = vpop.permute.xlu1 %3840  ;;  %6442 = vtanh.f32 %v3937_v25 }
 0x30a   : > { %v3940_v61 = vadd.f32 %v3851_v34, %v3620_v8  ;;  %v3935_v12 = vadd.f32 %v3841_v29, %v3615_v26  ;;  %v3624_v34 = vmul.f32 %v8439_v7, %v8299_v19 }
 0x30c   : > { %4202 = vrot.lane.b32.xlu0 %v3940_v61, %s6599_s20  ;;  %4192 = vrot.lane.b32.xlu1 %v3935_v12, %s6599_s20  ;;  %6444 = vtanh.f32 %v3935_v12 }
 0x30d   : > { %v3847_v5 = vpop.permute.xlu0 %3846  ;;  %v3853_v0 = vpop.permute.xlu1 %3852  ;;  %6446 = vtanh.f32 %v3940_v61  ;;  %v3625_v61 = vmul.f32 %v8452_v14, %v8308_v51 }
 0x30e   : > { %v3938_v62 = vadd.f32 %v3847_v5, %v3618_v6  ;;  %v3941_v32 = vadd.f32 %v3853_v0, %v3621_v54  ;;  %v3622_v54 = vmul.f32 %v8447_v28, %v8285_v33 }
 0x310   : > { %4198 = vrot.lane.b32.xlu0 %v3938_v62, %s6599_s20  ;;  %4204 = vrot.lane.b32.xlu1 %v3941_v32, %s6599_s20  ;;  %6448 = vtanh.f32 %v3938_v62  ;;  %v3623_v62 = vmul.f32 %v8456_v46, %v8294_v44 }
 0x311   : > { %v3849_v13 = vpop.permute.xlu1 %3848  ;;  %v6439_v25 = vpop.eup %6438  ;;  %6450 = vtanh.f32 %v3941_v32 }
 0x312   : > { %v3939_v17 = vadd.f32 %v3849_v13, %v3619_v36  ;;  %v3859_v63 = vpop.permute.xlu0 %3858 }
 0x313   : > { %v3944_v55 = vadd.f32 %v3859_v63, %v3624_v34  ;;  %v3629_v34 = vmul.f32 %v8472_v45, %v8336_v37 }
 0x314   : > { %4034 = vrot.lane.b32.xlu0 %v6439_v25, %s6598_s15  ;;  %4200 = vrot.lane.b32.xlu1 %v3939_v17, %s6599_s20  ;;  %6452 = vtanh.f32 %v3939_v17  ;;  %v3628_v17 = vmul.f32 %v8462_v56, %v8328_v22 }
 0x315   : > { %v6441_v26 = vpop.eup %6440  ;;  %6454 = vtanh.f32 %v3944_v55 }
 0x316   : > { %v6443_v8 = vpop.eup %6442  ;;  %v3855_v12 = vpop.permute.xlu0 %3854 }
 0x317   : > { %v3861_v6 = vpop.permute.xlu1 %3860  ;;  %v3942_v19 = vadd.f32 %v3855_v12, %v3622_v54  ;;  %v3627_v12 = vmul.f32 %v8476_v52, %v8322_v15 }
 0x318   : > { %4030 = vrot.lane.b32.xlu0 %v6441_v26, %s6598_s15  ;;  %4036 = vrot.lane.b32.xlu1 %v6443_v8, %s6598_s15  ;;  %v3945_v5 = vadd.f32 %v3861_v6, %v3625_v61  ;;  %v3626_v8 = vmul.f32 %v8468_v60, %v8314_v38 }
 0x319   : > { %v6445_v29 = vpop.eup %6444  ;;  %6456 = vtanh.f32 %v3942_v19 }
 0x31a   : > { %v6447_v33 = vpop.eup %6446  ;;  %v3867_v51 = vpop.permute.xlu0 %3866  ;;  %6458 = vtanh.f32 %v3945_v5 }
 0x31b   : > { %v3857_v0 = vpop.permute.xlu1 %3856  ;;  %v3948_v25 = vadd.f32 %v3867_v51, %v3628_v17 }
 0x31c   : > { %4210 = vrot.lane.b32.xlu0 %v3944_v55, %s6599_s20  ;;  %4032 = vrot.lane.b32.xlu1 %v6445_v29, %s6598_s15  ;;  %v3943_v32 = vadd.f32 %v3857_v0, %v3623_v62 }
 0x31d   : > { %v6449_v36 = vpop.eup %6448 }
 0x31e   : > { %v6451_v13 = vpop.eup %6450  ;;  %v3863_v26 = vpop.permute.xlu0 %3862  ;;  %6460 = vtanh.f32 %v3943_v32 }
 0x31f   : > { %v3869_v44 = vpop.permute.xlu1 %3868  ;;  %v3946_v22 = vadd.f32 %v3863_v26, %v3626_v8  ;;  %6462 = vtanh.f32 %v3948_v25 }
 0x320   : > { %4206 = vrot.lane.b32.xlu0 %v3942_v19, %s6599_s20  ;;  %4212 = vrot.lane.b32.xlu1 %v3945_v5, %s6599_s20  ;;  %v3949_v55 = vadd.f32 %v3869_v44, %v3629_v34  ;;  %v3632_v19 = vmul.f32 %v8482_v16, %v8354_v59 }
 0x321   : > { %v6453_v63 = vpop.eup %6452  ;;  %6464 = vtanh.f32 %v3946_v22 }
 0x322   : > { %v6455_v38 = vpop.eup %6454  ;;  %v3875_v37 = vpop.permute.xlu0 %3874  ;;  %6466 = vtanh.f32 %v3949_v55 }
 0x323   : > { %v3865_v29 = vpop.permute.xlu1 %3864  ;;  %v3952_v5 = vadd.f32 %v3875_v37, %v3632_v19 }
 0x324   : > { %4042 = vrot.lane.b32.xlu0 %v6447_v33, %s6598_s15  ;;  %4208 = vrot.lane.b32.xlu1 %v3943_v32, %s6599_s20  ;;  %v3947_v6 = vadd.f32 %v3865_v29, %v3627_v12  ;;  %v3630_v32 = vmul.f32 %v8486_v49, %v8341_v40  ;;  %v3633_v33 = vmul.f32 %v8490_v50, %v8360_v39 }
 0x326   : > { %v6457_v54 = vpop.eup %6456  ;;  %6468 = vtanh.f32 %v3947_v6 }
 0x327   : > { %v6459_v61 = vpop.eup %6458  ;;  %v3871_v62 = vpop.permute.xlu0 %3870  ;;  %6470 = vtanh.f32 %v3952_v5 }
 0x328   : > { %4038 = vrot.lane.b32.xlu0 %v6449_v36, %s6598_s15  ;;  %4044 = vrot.lane.b32.xlu1 %v6451_v13, %s6598_s15  ;;  %v3950_v59 = vadd.f32 %v3871_v62, %v3630_v32  ;;  %v3631_v13 = vmul.f32 %v8497_v43, %v8349_v53  ;;  %v9268_v62 = vld [vmem:[#allocation7_spill] sm:$0xff]  ;;  %v9269_v32 = vld [vmem:[#allocation22_spill] sm:$0xff] }
 0x329   : > { %v3877_v15 = vpop.permute.xlu1 %3876 }
 0x32a   : > { %v3953_v51 = vadd.f32 %v3877_v15, %v3633_v33  ;;  %6472 = vtanh.f32 %v3950_v59  ;;  %v3641_v33 = vmul.f32 %v9269_v32, %v9268_v62 }
 0x32b   : > { %v6461_v0 = vpop.eup %6460 }
 0x32c   : > { %4218 = vrot.lane.b32.xlu0 %v3948_v25, %s6599_s20  ;;  %4040 = vrot.lane.b32.xlu1 %v6453_v63, %s6598_s15  ;;  %v6463_v40 = vpop.eup %6462  ;;  %v3636_v63 = vmul.f32 %v8501_v47, %v8372_v57  ;;  %6474 = vtanh.f32 %v3953_v51 }
 0x32d   : > { %v3873_v36 = vpop.permute.xlu1 %3872  ;;  %v3883_v39 = vpop.permute.xlu0 %3882 }
 0x32e   : > { %v3951_v17 = vadd.f32 %v3873_v36, %v3631_v13  ;;  %v6465_v44 = vpop.eup %6464  ;;  %v3956_v26 = vadd.f32 %v3883_v39, %v3636_v63  ;;  %v9270_v36 = vld [vmem:[#allocation19_spill] sm:$0xff]  ;;  %v9272_v63 = vld [vmem:[#allocation9_spill] sm:$0xff] }
 0x32f   : > { %v6467_v25 = vpop.eup %6466  ;;  %v3639_v13 = vmul.f32 %v8530_v24, %v9270_v36 }
 0x330   : > { %4214 = vrot.lane.b32.xlu0 %v3946_v22, %s6599_s20  ;;  %4220 = vrot.lane.b32.xlu1 %v3949_v55, %s6599_s20  ;;  %v3634_v22 = vmul.f32 %v8506_v4, %v8362_v48  ;;  %v3637_v55 = vmul.f32 %v8509_v41, %v8378_v31  ;;  %6476 = vtanh.f32 %v3951_v17 }
 0x331   : > { %v3885_v53 = vpop.permute.xlu1 %3884  ;;  %v3879_v34 = vpop.permute.xlu0 %3878  ;;  %6478 = vtanh.f32 %v3956_v26 }
 0x332   : > { %v3954_v57 = vadd.f32 %v3879_v34, %v3634_v22  ;;  %v3957_v29 = vadd.f32 %v3885_v53, %v3637_v55  ;;  %v9273_v55 = vld [vmem:[#allocation8_spill] sm:$0xff] }
 0x333   : > { %v6469_v8 = vpop.eup %6468 }
 0x334   : > { %4050 = vrot.lane.b32.xlu0 %v6455_v38, %s6598_s15  ;;  %4216 = vrot.lane.b32.xlu1 %v3947_v6, %s6599_s20  ;;  %v3635_v6 = vmul.f32 %v8513_v9, %v8369_v1  ;;  %v6471_v48 = vpop.eup %6470  ;;  %6480 = vtanh.f32 %v3954_v57 }
 0x335   : > { %v3881_v12 = vpop.permute.xlu1 %3880  ;;  %6482 = vtanh.f32 %v3957_v29 }
 0x336   : > { %v3955_v38 = vadd.f32 %v3881_v12, %v3635_v6  ;;  %v9275_v12 = vld [vmem:[#allocation23_spill] sm:$0xff]  ;;  %v9276_v6 = vld [vmem:[#allocation12_spill] sm:$0xff] }
 0x337   : > { %v6473_v37 = vpop.eup %6472 }
 0x338   : > { %4046 = vrot.lane.b32.xlu0 %v6457_v54, %s6598_s15  ;;  %4052 = vrot.lane.b32.xlu1 %v6459_v61, %s6598_s15  ;;  %v3891_v31 = vpop.permute.xlu0 %3890  ;;  %v3640_v61 = vmul.f32 %v8517_v27, %v8387_v18  ;;  %6484 = vtanh.f32 %v3955_v38 }
 0x339   : > { %v6475_v54 = vpop.eup %6474 }
 0x33a   : > { %v3960_v19 = vadd.f32 %v3891_v31, %v3640_v61 }
 0x33c   : > { %4226 = vrot.lane.b32.xlu0 %v3952_v5, %s6599_s20  ;;  %4048 = vrot.lane.b32.xlu1 %v6461_v0, %s6598_s15  ;;  %v3893_v1 = vpop.permute.xlu1 %3892  ;;  %v3887_v5 = vpop.permute.xlu0 %3886  ;;  %v3638_v0 = vmul.f32 %v8522_v21, %v8380_v10  ;;  %6486 = vtanh.f32 %v3960_v19 }
 0x33d   : > { %v6477_v15 = vpop.eup %6476 }
 0x33e   : > { %v3958_v18 = vadd.f32 %v3887_v5, %v3638_v0  ;;  %v6479_v10 = vpop.eup %6478 }
 0x340   : > { %4222 = vrot.lane.b32.xlu0 %v3950_v59, %s6599_s20  ;;  %4228 = vrot.lane.b32.xlu1 %v3953_v51, %s6599_s20  ;;  %v3961_v59 = vadd.f32 %v3893_v1, %v3641_v33  ;;  %v3889_v51 = vpop.permute.xlu1 %3888  ;;  %6488 = vtanh.f32 %v3958_v18 }
 0x341   : > { %v6481_v39 = vpop.eup %6480 }
 0x342   : > { %6490 = vtanh.f32 %v3961_v59 }
 0x344   : > { %4058 = vrot.lane.b32.xlu0 %v6463_v40, %s6598_s15  ;;  %4224 = vrot.lane.b32.xlu1 %v3951_v17, %s6599_s20  ;;  %v3959_v17 = vadd.f32 %v3889_v51, %v3639_v13  ;;  %v3899_v40 = vpop.permute.xlu0 %3898 }
 0x346   : > { %6492 = vtanh.f32 %v3959_v17 }
 0x348   : > { %4054 = vrot.lane.b32.xlu0 %v6465_v44, %s6598_s15  ;;  %4060 = vrot.lane.b32.xlu1 %v6467_v25, %s6598_s15  ;;  %v6483_v44 = vpop.eup %6482  ;;  %v9271_v25 = vld [vmem:[#allocation20_spill] sm:$0xff]  ;;  %v3895_v34 = vpop.permute.xlu0 %3894 }
 0x349   : > { %v3644_v53 = vmul.f32 %v9272_v63, %v9271_v25  ;;  %v6485_v22 = vpop.eup %6484 }
 0x34c   : > { %4234 = vrot.lane.b32.xlu0 %v3956_v26, %s6599_s20  ;;  %4056 = vrot.lane.b32.xlu1 %v6469_v8, %s6598_s15  ;;  %v3901_v26 = vpop.permute.xlu1 %3900  ;;  %v3964_v8 = vadd.f32 %v3899_v40, %v3644_v53 }
 0x34e   : > { %6494 = vtanh.f32 %v3964_v8 }
 0x350   : > { %4230 = vrot.lane.b32.xlu0 %v3954_v57, %s6599_s20  ;;  %4236 = vrot.lane.b32.xlu1 %v3957_v29, %s6599_s20  ;;  %v9274_v57 = vld [vmem:[#allocation10_spill] sm:$0xff] }
 0x351   : > { %v3642_v29 = vmul.f32 %v9274_v57, %v9273_v55 }
 0x354   : > { %4066 = vrot.lane.b32.xlu0 %v6471_v48, %s6598_s15  ;;  %4232 = vrot.lane.b32.xlu1 %v3955_v38, %s6599_s20  ;;  %v3645_v38 = vmul.f32 %v9276_v6, %v9275_v12  ;;  %v3962_v48 = vadd.f32 %v3895_v34, %v3642_v29 }
 0x356   : > { %v3965_v31 = vadd.f32 %v3901_v26, %v3645_v38  ;;  %6496 = vtanh.f32 %v3962_v48 }
 0x358   : > { %4062 = vrot.lane.b32.xlu0 %v6473_v37, %s6598_s15  ;;  %4068 = vrot.lane.b32.xlu1 %v6475_v54, %s6598_s15  ;;  %v3897_v37 = vpop.permute.xlu1 %3896  ;;  %v9277_v54 = vld [vmem:[#allocation21_spill] sm:$0xff]  ;;  %6498 = vtanh.f32 %v3965_v31 }
 0x359   : > { %v3643_v61 = vmul.f32 %v8546_v23, %v9277_v54 }
 0x35b   : > { %v3963_v1 = vadd.f32 %v3897_v37, %v3643_v61 }
 0x35c   : > { %4242 = vrot.lane.b32.xlu0 %v3960_v19, %s6599_s20  ;;  %4064 = vrot.lane.b32.xlu1 %v6477_v15, %s6598_s15  ;;  %v6487_v19 = vpop.eup %6486 }
 0x35d   : > { %v6489_v5 = vpop.eup %6488  ;;  %6500 = vtanh.f32 %v3963_v1 }
 0x35e   : > { %v6491_v0 = vpop.eup %6490 }
 0x35f   : > { %v6493_v33 = vpop.eup %6492 }
 0x360   : > { %4238 = vrot.lane.b32.xlu0 %v3958_v18, %s6599_s20  ;;  %4244 = vrot.lane.b32.xlu1 %v3961_v59, %s6599_s20  ;;  %v6495_v59 = vpop.eup %6494 }
 0x363   : > { %v6497_v51 = vpop.eup %6496 }
 0x364   : > { %4074 = vrot.lane.b32.xlu0 %v6479_v10, %s6598_s15  ;;  %4240 = vrot.lane.b32.xlu1 %v3959_v17, %s6599_s20 }
 0x365   : > { %v6499_v17 = vpop.eup %6498 }
 0x368   : > { %4070 = vrot.lane.b32.xlu0 %v6481_v39, %s6598_s15  ;;  %4076 = vrot.lane.b32.xlu1 %v6483_v44, %s6598_s15 }
 0x36a   : > { %v6501_v39 = vpop.eup %6500 }
 0x36c   : > { %4250 = vrot.lane.b32.xlu0 %v3964_v8, %s6599_s20  ;;  %4072 = vrot.lane.b32.xlu1 %v6485_v22, %s6598_s15 }
 0x370   : > { %4246 = vrot.lane.b32.xlu0 %v3962_v48, %s6599_s20  ;;  %4252 = vrot.lane.b32.xlu1 %v3965_v31, %s6599_s20 }
 0x374   : > { %4082 = vrot.lane.b32.xlu0 %v6487_v19, %s6598_s15  ;;  %4248 = vrot.lane.b32.xlu1 %v3963_v1, %s6599_s20 }
 0x376   : > { %v4195_v15 = vpop.permute.xlu0 %4194 }
 0x377   : > { %4288 = vst.msk [vmem:[%s6710_s23 + $0x10] sm:$0xff] %vm494_vm3, %v4195_v15 }
 0x378   : > { %4078 = vrot.lane.b32.xlu0 %v6489_v5, %s6598_s15  ;;  %4084 = vrot.lane.b32.xlu1 %v6491_v0, %s6598_s15 }
 0x37a   : > { %v4191_v62 = vpop.permute.xlu0 %4190  ;;  %v4197_v18 = vpop.permute.xlu1 %4196 }
 0x37b   : > { %4286 = vst.msk [vmem:[%s6710_s23] sm:$0xff] %vm494_vm3, %v4191_v62  ;;  %4289 = vst.msk [vmem:[%s6710_s23 + $0x18] sm:$0xff] %vm494_vm3, %v4197_v18 }
 0x37c   : > { %4090 = vrot.lane.b32.xlu0 %v6495_v59, %s6598_s15  ;;  %4080 = vrot.lane.b32.xlu1 %v6493_v33, %s6598_s15 }
 0x37e   : > { %v4203_v36 = vpop.permute.xlu0 %4202  ;;  %v4193_v13 = vpop.permute.xlu1 %4192 }
 0x37f   : > { %4292 = vst.msk [vmem:[%s6710_s23 + $0x30] sm:$0xff] %vm494_vm3, %v4203_v36  ;;  %4287 = vst.msk [vmem:[%s6710_s23 + $0x8] sm:$0xff] %vm494_vm3, %v4193_v13 }
 0x380   : > { %4086 = vrot.lane.b32.xlu0 %v6497_v51, %s6598_s15  ;;  %4092 = vrot.lane.b32.xlu1 %v6499_v17, %s6598_s15 }
 0x382   : > { %v4199_v10 = vpop.permute.xlu0 %4198  ;;  %v4205_v40 = vpop.permute.xlu1 %4204 }
 0x383   : > { %4290 = vst.msk [vmem:[%s6710_s23 + $0x20] sm:$0xff] %vm494_vm3, %v4199_v10  ;;  %4293 = vst.msk [vmem:[%s6710_s23 + $0x38] sm:$0xff] %vm494_vm3, %v4205_v40 }
 0x384   : > { %4088 = vrot.lane.b32.xlu1 %v6501_v39, %s6598_s15 }
 0x386   : > { %v4035_v44 = vpop.permute.xlu0 %4034  ;;  %v4201_v25 = vpop.permute.xlu1 %4200 }
 0x387   : > { %v4128_v53 = vmul.f32 %v8401_v11, %v4035_v44  ;;  %4291 = vst.msk [vmem:[%s6710_s23 + $0x28] sm:$0xff] %vm494_vm3, %v4201_v25 }
 0x389   : > { %v5611_v26 = vpack.c.bf16 %v4128_v53, %v4128_v53  ;;  %4354 = vrot.lane.b32.xlu0 %v4128_v53, %s6600_s30 }
 0x38a   : > { %v4031_v8 = vpop.permute.xlu0 %4030  ;;  %v4037_v34 = vpop.permute.xlu1 %4036 }
 0x38b   : > { %v4126_v22 = vmul.f32 %v8409_v58, %v4031_v8  ;;  %v4129_v55 = vmul.f32 %v8411_v2, %v4037_v34  ;;  %v4595_v29 = vshrl.u32 %v5611_v26, 16  ;;  %v4598_v31 = vshll.u32 %v5611_v26, 16 }
 0x38d   : > { %4350 = vrot.lane.b32.xlu0 %v4126_v22, %s6600_s30  ;;  %4356 = vrot.lane.b32.xlu1 %v4129_v55, %s6600_s30  ;;  %v4597_v38 = vrot.slane %v4595_v29, 7  ;;  %v5609_v2 = vpack.c.bf16 %v4126_v22, %v4126_v22  ;;  %v5612_v54 = vpack.c.bf16 %v4129_v55, %v4129_v55 }
 0x38e   : > { %v4211_v11 = vpop.permute.xlu0 %4210  ;;  %v4033_v12 = vpop.permute.xlu1 %4032 }
 0x38f   : > { %4296 = vst.msk [vmem:[%s6710_s23 + $0x50] sm:$0xff] %vm494_vm3, %v4211_v11  ;;  %v4127_v48 = vmul.f32 %v8417_v35, %v4033_v12  ;;  %v4600_v61 = vor.u32 %v4598_v31, %v4597_v38  ;;  %v4578_v15 = vshrl.u32 %v5609_v2, 16  ;;  %v4603_v5 = vshrl.u32 %v5612_v54, 16 }
 0x390   : > { %v4581_v17 = vshll.u32 %v5609_v2, 16  ;;  %v4601_v22 = vrot.slane %v4597_v38, 4 }
 0x391   : > { %4352 = vrot.lane.b32.xlu1 %v4127_v48, %s6600_s30  ;;  %v5610_v0 = vpack.c.bf16 %v4127_v48, %v4127_v48  ;;  %v4580_v18 = vrot.slane %v4578_v15, 7  ;;  %v4605_v59 = vrot.slane %v4603_v5, 7 }
 0x392   : > { %v4207_v58 = vpop.permute.xlu0 %4206  ;;  %v4213_v37 = vpop.permute.xlu1 %4212 }
 0x393   : > { %4294 = vst.msk [vmem:[%s6710_s23 + $0x40] sm:$0xff] %vm494_vm3, %v4207_v58  ;;  %4297 = vst.msk [vmem:[%s6710_s23 + $0x58] sm:$0xff] %vm494_vm3, %v4213_v37  ;;  %v4586_v13 = vshrl.u32 %v5610_v0, 16  ;;  %v4583_v44 = vor.u32 %v4581_v17, %v4580_v18  ;;  %v4589_v26 = vshll.u32 %v5610_v0, 16  ;;  %v4584_v58 = vrot.slane %v4580_v18, 4 }
 0x395   : > { %4855 = vrot.lane.b32.xlu1 %v4600_v61, %s6600_s30 }
 0x396   : > { %v4043_v1 = vpop.permute.xlu0 %4042  ;;  %v4209_v19 = vpop.permute.xlu1 %4208 }
 0x397   : > { %v4132_v35 = vmul.f32 %v8420_v30, %v4043_v1  ;;  %4295 = vst.msk [vmem:[%s6710_s23 + $0x48] sm:$0xff] %vm494_vm3, %v4209_v19  ;;  %v4606_v30 = vshll.u32 %v5612_v54, 16 }
 0x399   : > { %4362 = vrot.lane.b32.xlu0 %v4132_v35, %s6600_s30  ;;  %v5615_v39 = vpack.c.bf16 %v4132_v35, %v4132_v35  ;;  %v4608_v25 = vor.u32 %v4606_v30, %v4605_v59 }
 0x39a   : > { %v4039_v62 = vpop.permute.xlu0 %4038  ;;  %v4045_v33 = vpop.permute.xlu1 %4044 }
 0x39b   : > { %v4130_v51 = vmul.f32 %v8425_v20, %v4039_v62  ;;  %v4133_v36 = vmul.f32 %v8430_v3, %v4045_v33  ;;  %v4610_v20 = vrot.slane %v4605_v59, 4  ;;  %v4588_v3 = vrot.slane %v4586_v13, 7 }
 0x39c   : > { %v4629_v55 = vshrl.u32 %v5615_v39, 16  ;;  %v4609_v12 = vsel %vm8722_vm12, %v4601_v22, %v4608_v25  ;;  %v4632_v61 = vshll.u32 %v5615_v39, 16 }
 0x39d   : > { %4358 = vrot.lane.b32.xlu0 %v4130_v51, %s6600_s30  ;;  %4364 = vrot.lane.b32.xlu1 %v4133_v36, %s6600_s30  ;;  %v4591_v11 = vor.u32 %v4589_v26, %v4588_v3  ;;  %v5613_v38 = vpack.c.bf16 %v4130_v51, %v4130_v51  ;;  %v5616_v2 = vpack.c.bf16 %v4133_v36, %v4133_v36 }
 0x39e   : > { %v4219_v10 = vpop.permute.xlu0 %4218  ;;  %v4041_v40 = vpop.permute.xlu1 %4040  ;;  %v4631_v37 = vrot.slane %v4629_v55, 7 }
 0x39f   : > { %4300 = vst.msk [vmem:[%s6710_s23 + $0x70] sm:$0xff] %vm494_vm3, %v4219_v10  ;;  %v4131_v29 = vmul.f32 %v8435_v42, %v4041_v40  ;;  %v4593_v42 = vrot.slane %v4588_v3, 4  ;;  %v4592_v54 = vsel %vm8722_vm12, %v4584_v58, %v4591_v11  ;;  %v4612_v15 = vshrl.u32 %v5613_v38, 16 }
 0x3a0   : > { %v4637_v5 = vshrl.u32 %v5616_v2, 16  ;;  %v4634_v0 = vor.u32 %v4632_v61, %v4631_v37  ;;  %v4640_v30 = vshll.u32 %v5616_v2, 16 }
 0x3a1   : > { %4849 = vrot.lane.b32.xlu0 %v4583_v44, %s6600_s30  ;;  %4859 = vrot.lane.b32.xlu1 %v4610_v20, %s6600_s30  ;;  %v5614_v62 = vpack.c.bf16 %v4131_v29, %v4131_v29  ;;  %v4614_v59 = vrot.slane %v4612_v15, 7 }
 0x3a2   : > { %v4215_v8 = vpop.permute.xlu0 %4214  ;;  %v4221_v34 = vpop.permute.xlu1 %4220  ;;  %v4639_v51 = vrot.slane %v4637_v5, 7 }
 0x3a3   : > { %4298 = vst.msk [vmem:[%s6710_s23 + $0x60] sm:$0xff] %vm494_vm3, %v4215_v8  ;;  %4301 = vst.msk [vmem:[%s6710_s23 + $0x78] sm:$0xff] %vm494_vm3, %v4221_v34  ;;  %v4620_v17 = vshrl.u32 %v5614_v62, 16  ;;  %v4623_v25 = vshll.u32 %v5614_v62, 16  ;;  %v4635_v8 = vrot.slane %v4631_v37, 4 }
 0x3a4   : > { %v4644_v44 = vrot.slane %v4639_v51, 4 }
 0x3a5   : > { %4857 = vrot.lane.b32.xlu0 %v4609_v12, %s6600_s30  ;;  %4360 = vrot.lane.b32.xlu1 %v4131_v29, %s6600_s30  ;;  %v4622_v20 = vrot.slane %v4620_v17, 7 }
 0x3a6   : > { %v4051_v48 = vpop.permute.xlu0 %4050  ;;  %v4217_v31 = vpop.permute.xlu1 %4216 }
 0x3a7   : > { %4299 = vst.msk [vmem:[%s6710_s23 + $0x68] sm:$0xff] %vm494_vm3, %v4217_v31  ;;  %v4136_v35 = vmul.f32 %v8439_v7, %v4051_v48  ;;  %v4615_v7 = vshll.u32 %v5613_v38, 16  ;;  %v4625_v55 = vor.u32 %v4623_v25, %v4622_v20  ;;  %v4618_v48 = vrot.slane %v4614_v59, 4 }
 0x3a8   : > { %v4627_v38 = vrot.slane %v4622_v20, 4 }
 0x3a9   : > { %4853 = vrot.lane.b32.xlu0 %v4593_v42, %s6600_s30  ;;  %4851 = vrot.lane.b32.xlu1 %v4592_v54, %s6600_s30  ;;  %v5619_v39 = vpack.c.bf16 %v4136_v35, %v4136_v35 }
 0x3aa   : > { %v4047_v1 = vpop.permute.xlu0 %4046  ;;  %v4053_v19 = vpop.permute.xlu1 %4052 }
 0x3ab   : > { %v4134_v36 = vmul.f32 %v8447_v28, %v4047_v1  ;;  %v4137_v13 = vmul.f32 %v8452_v14, %v4053_v19  ;;  %v4617_v28 = vor.u32 %v4615_v7, %v4614_v59  ;;  %v4642_v14 = vor.u32 %v4640_v30, %v4639_v51 }
 0x3ac   : > { %v4663_v34 = vshrl.u32 %v5619_v39, 16  ;;  %v4666_v2 = vshll.u32 %v5619_v39, 16 }
 0x3ad   : > { %4370 = vrot.lane.b32.xlu0 %v4136_v35, %s6600_s30  ;;  %4867 = vrot.lane.b32.xlu1 %v4634_v0, %s6600_s30  ;;  %v4643_v29 = vsel %vm8722_vm12, %v4635_v8, %v4642_v14  ;;  %v5617_v58 = vpack.c.bf16 %v4134_v36, %v4134_v36  ;;  %v5620_v37 = vpack.c.bf16 %v4137_v13, %v4137_v13 }
 0x3ae   : > { %v4227_v33 = vpop.permute.xlu0 %4226  ;;  %v4049_v18 = vpop.permute.xlu1 %4048  ;;  %v4665_v31 = vrot.slane %v4663_v34, 7 }
 0x3af   : > { %4304 = vst.msk [vmem:[%s6710_s23 + $0x90] sm:$0xff] %vm494_vm3, %v4227_v33  ;;  %v4135_v22 = vmul.f32 %v8456_v46, %v4049_v18  ;;  %v4626_v46 = vsel %vm8722_vm12, %v4618_v48, %v4625_v55  ;;  %v4646_v61 = vshrl.u32 %v5617_v58, 16  ;;  %v4671_v1 = vshrl.u32 %v5620_v37, 16 }
 0x3b0   : > { %v4668_v15 = vor.u32 %v4666_v2, %v4665_v31  ;;  %v4649_v51 = vshll.u32 %v5617_v58, 16 }
 0x3b1   : > { %4366 = vrot.lane.b32.xlu0 %v4134_v36, %s6600_s30  ;;  %4372 = vrot.lane.b32.xlu1 %v4137_v13, %s6600_s30  ;;  %v5618_v5 = vpack.c.bf16 %v4135_v22, %v4135_v22  ;;  %v4648_v62 = vrot.slane %v4646_v61, 7  ;;  %v4673_v33 = vrot.slane %v4671_v1, 7  ;;  %v4674_v36 = vshll.u32 %v5620_v37, 16 }
 0x3b2   : > { %v4223_v10 = vpop.permute.xlu0 %4222  ;;  %v4229_v40 = vpop.permute.xlu1 %4228 }
 0x3b3   : > { %4302 = vst.msk [vmem:[%s6710_s23 + $0x80] sm:$0xff] %vm494_vm3, %v4223_v10  ;;  %4305 = vst.msk [vmem:[%s6710_s23 + $0x98] sm:$0xff] %vm494_vm3, %v4229_v40  ;;  %v4651_v7 = vor.u32 %v4649_v51, %v4648_v62  ;;  %v4678_v30 = vrot.slane %v4673_v33, 4 }
 0x3b5   : > { %4861 = vrot.lane.b32.xlu0 %v4617_v28, %s6600_s30  ;;  %4871 = vrot.lane.b32.xlu1 %v4644_v44, %s6600_s30  ;;  %v4669_v44 = vrot.slane %v4665_v31, 4 }
 0x3b6   : > { %v4059_v3 = vpop.permute.xlu0 %4058  ;;  %v4225_v26 = vpop.permute.xlu1 %4224 }
 0x3b7   : > { %4303 = vst.msk [vmem:[%s6710_s23 + $0x88] sm:$0xff] %vm494_vm3, %v4225_v26  ;;  %v4140_v19 = vmul.f32 %v8462_v56, %v4059_v3  ;;  %v4654_v56 = vshrl.u32 %v5618_v5, 16 }
 0x3b9   : > { %4869 = vrot.lane.b32.xlu0 %v4643_v29, %s6600_s30  ;;  %4368 = vrot.lane.b32.xlu1 %v4135_v22, %s6600_s30  ;;  %v4656_v10 = vrot.slane %v4654_v56, 7  ;;  %v5623_v40 = vpack.c.bf16 %v4140_v19, %v4140_v19  ;;  %v4652_v22 = vrot.slane %v4648_v62, 4 }
 0x3ba   : > { %v4055_v11 = vpop.permute.xlu0 %4054  ;;  %v4061_v12 = vpop.permute.xlu1 %4060 }
 0x3bb   : > { %v4138_v18 = vmul.f32 %v8468_v60, %v4055_v11  ;;  %v4141_v59 = vmul.f32 %v8472_v45, %v4061_v12  ;;  %v4676_v60 = vor.u32 %v4674_v36, %v4673_v33  ;;  %v4657_v45 = vshll.u32 %v5618_v5, 16 }
 0x3bc   : > { %v4697_v26 = vshrl.u32 %v5623_v40, 16  ;;  %v4661_v29 = vrot.slane %v4656_v10, 4  ;;  %v4700_v2 = vshll.u32 %v5623_v40, 16 }
 0x3bd   : > { %4865 = vrot.lane.b32.xlu0 %v4627_v38, %s6600_s30  ;;  %4863 = vrot.lane.b32.xlu1 %v4626_v46, %s6600_s30  ;;  %v5624_v14 = vpack.c.bf16 %v4141_v59, %v4141_v59  ;;  %v4659_v25 = vor.u32 %v4657_v45, %v4656_v10  ;;  %v4677_v3 = vsel %vm8722_vm12, %v4669_v44, %v4676_v60 }
 0x3be   : > { %v4235_v42 = vpop.permute.xlu0 %4234  ;;  %v4057_v54 = vpop.permute.xlu1 %4056  ;;  %v4699_v11 = vrot.slane %v4697_v26, 7  ;;  %v5621_v31 = vpack.c.bf16 %v4138_v18, %v4138_v18 }
 0x3bf   : > { %4308 = vst.msk [vmem:[%s6710_s23 + $0xb0] sm:$0xff] %vm494_vm3, %v4235_v42  ;;  %v4139_v20 = vmul.f32 %v8476_v52, %v4057_v54  ;;  %v4705_v55 = vshrl.u32 %v5624_v14, 16  ;;  %v4660_v52 = vsel %vm8722_vm12, %v4652_v22, %v4659_v25  ;;  %v4708_v42 = vshll.u32 %v5624_v14, 16 }
 0x3c0   : > { %v4680_v1 = vshrl.u32 %v5621_v31, 16  ;;  %v4683_v56 = vshll.u32 %v5621_v31, 16 }
 0x3c1   : > { %4378 = vrot.lane.b32.xlu0 %v4140_v19, %s6600_s30  ;;  %4879 = vrot.lane.b32.xlu1 %v4668_v15, %s6600_s30  ;;  %v4707_v58 = vrot.slane %v4705_v55, 7  ;;  %v5622_v46 = vpack.c.bf16 %v4139_v20, %v4139_v20  ;;  %v4702_v19 = vor.u32 %v4700_v2, %v4699_v11 }
 0x3c2   : > { %v4231_v35 = vpop.permute.xlu0 %4230  ;;  %v4237_v0 = vpop.permute.xlu1 %4236  ;;  %v4682_v62 = vrot.slane %v4680_v1, 7 }
 0x3c3   : > { %4306 = vst.msk [vmem:[%s6710_s23 + $0xa0] sm:$0xff] %vm494_vm3, %v4231_v35  ;;  %4309 = vst.msk [vmem:[%s6710_s23 + $0xb8] sm:$0xff] %vm494_vm3, %v4237_v0  ;;  %v4710_v15 = vor.u32 %v4708_v42, %v4707_v58  ;;  %v4703_v0 = vrot.slane %v4699_v11, 4  ;;  %v4691_v51 = vshll.u32 %v5622_v46, 16 }
 0x3c5   : > { %4374 = vrot.lane.b32.xlu0 %v4138_v18, %s6600_s30  ;;  %4380 = vrot.lane.b32.xlu1 %v4141_v59, %s6600_s30  ;;  %v4711_v59 = vsel %vm8722_vm12, %v4703_v0, %v4710_v15 }
 0x3c6   : > { %v4067_v13 = vpop.permute.xlu0 %4066  ;;  %v4233_v17 = vpop.permute.xlu1 %4232 }
 0x3c7   : > { %4307 = vst.msk [vmem:[%s6710_s23 + $0xa8] sm:$0xff] %vm494_vm3, %v4233_v17  ;;  %v4144_v37 = vmul.f32 %v8482_v16, %v4067_v13  ;;  %v4712_v16 = vrot.slane %v4707_v58, 4 }
 0x3c9   : > { %4873 = vrot.lane.b32.xlu0 %v4651_v7, %s6600_s30  ;;  %4883 = vrot.lane.b32.xlu1 %v4678_v30, %s6600_s30  ;;  %v5627_v36 = vpack.c.bf16 %v4144_v37, %v4144_v37 }
 0x3ca   : > { %v4063_v39 = vpop.permute.xlu0 %4062  ;;  %v4069_v28 = vpop.permute.xlu1 %4068 }
 0x3cb   : > { %v4145_v38 = vmul.f32 %v8490_v50, %v4069_v28  ;;  %v4688_v50 = vshrl.u32 %v5622_v46, 16  ;;  %v4142_v33 = vmul.f32 %v8486_v49, %v4063_v39  ;;  %v4685_v49 = vor.u32 %v4683_v56, %v4682_v62 }
 0x3cc   : > { %v4731_v10 = vshrl.u32 %v5627_v36, 16  ;;  %v4686_v39 = vrot.slane %v4682_v62, 4  ;;  %v4734_v55 = vshll.u32 %v5627_v36, 16 }
 0x3cd   : > { %4881 = vrot.lane.b32.xlu0 %v4677_v3, %s6600_s30  ;;  %4376 = vrot.lane.b32.xlu1 %v4139_v20, %s6600_s30  ;;  %v4690_v18 = vrot.slane %v4688_v50, 7  ;;  %v5628_v7 = vpack.c.bf16 %v4145_v38, %v4145_v38  ;;  %v5625_v3 = vpack.c.bf16 %v4142_v33, %v4142_v33 }
 0x3ce   : > { %v4243_v8 = vpop.permute.xlu0 %4242  ;;  %v4065_v34 = vpop.permute.xlu1 %4064  ;;  %v4733_v14 = vrot.slane %v4731_v10, 7 }
 0x3cf   : > { %4312 = vst.msk [vmem:[%s6710_s23 + $0xd0] sm:$0xff] %vm494_vm3, %v4243_v8  ;;  %v4143_v30 = vmul.f32 %v8497_v43, %v4065_v34  ;;  %v4693_v60 = vor.u32 %v4691_v51, %v4690_v18  ;;  %v4739_v28 = vshrl.u32 %v5628_v7, 16  ;;  %v4695_v44 = vrot.slane %v4690_v18, 4 }
 0x3d0   : > { %v4714_v11 = vshrl.u32 %v5625_v3, 16 }
 0x3d1   : > { %4877 = vrot.lane.b32.xlu0 %v4661_v29, %s6600_s30  ;;  %4875 = vrot.lane.b32.xlu1 %v4660_v52, %s6600_s30  ;;  %v4694_v43 = vsel %vm8722_vm12, %v4686_v39, %v4693_v60  ;;  %v4741_v26 = vrot.slane %v4739_v28, 7  ;;  %v5626_v22 = vpack.c.bf16 %v4143_v30, %v4143_v30  ;;  %v4742_v29 = vshll.u32 %v5628_v7, 16 }
 0x3d2   : > { %v4239_v12 = vpop.permute.xlu0 %4238  ;;  %v4245_v48 = vpop.permute.xlu1 %4244 }
 0x3d3   : > { %4310 = vst.msk [vmem:[%s6710_s23 + $0xc0] sm:$0xff] %vm494_vm3, %v4239_v12  ;;  %4313 = vst.msk [vmem:[%s6710_s23 + $0xd8] sm:$0xff] %vm494_vm3, %v4245_v48  ;;  %v4736_v48 = vor.u32 %v4734_v55, %v4733_v14  ;;  %v4746_v31 = vrot.slane %v4741_v26, 4  ;;  %v4744_v58 = vor.u32 %v4742_v29, %v4741_v26  ;;  %v4725_v1 = vshll.u32 %v5626_v22, 16 }
 0x3d5   : > { %4386 = vrot.lane.b32.xlu0 %v4144_v37, %s6600_s30  ;;  %4388 = vrot.lane.b32.xlu1 %v4145_v38, %s6600_s30  ;;  %v4722_v37 = vshrl.u32 %v5626_v22, 16 }
 0x3d6   : > { %v4075_v54 = vpop.permute.xlu0 %4074  ;;  %v4241_v61 = vpop.permute.xlu1 %4240 }
 0x3d7   : > { %4311 = vst.msk [vmem:[%s6710_s23 + $0xc8] sm:$0xff] %vm494_vm3, %v4241_v61  ;;  %v4148_v8 = vmul.f32 %v8501_v47, %v4075_v54  ;;  %v4737_v47 = vrot.slane %v4733_v14, 4  ;;  %v4724_v2 = vrot.slane %v4722_v37, 7  ;;  %v4717_v54 = vshll.u32 %v5625_v3, 16 }
 0x3d9   : > { %4891 = vrot.lane.b32.xlu0 %v4702_v19, %s6600_s30  ;;  %4895 = vrot.lane.b32.xlu1 %v4712_v16, %s6600_s30  ;;  %v4745_v42 = vsel %vm8722_vm12, %v4737_v47, %v4744_v58  ;;  %v5631_v19 = vpack.c.bf16 %v4148_v8, %v4148_v8  ;;  %v4729_v18 = vrot.slane %v4724_v2, 4 }
 0x3da   : > { %v4071_v5 = vpop.permute.xlu0 %4070  ;;  %v4077_v35 = vpop.permute.xlu1 %4076 }
 0x3db   : > { %v4149_v34 = vmul.f32 %v8509_v41, %v4077_v35  ;;  %v4716_v41 = vrot.slane %v4714_v11, 7  ;;  %v4146_v38 = vmul.f32 %v8506_v4, %v4071_v5  ;;  %v4727_v4 = vor.u32 %v4725_v1, %v4724_v2 }
 0x3dc   : > { %v4765_v35 = vshrl.u32 %v5631_v19, 16 }
 0x3dd   : > { %4382 = vrot.lane.b32.xlu0 %v4142_v33, %s6600_s30  ;;  %4893 = vrot.lane.b32.xlu1 %v4711_v59, %s6600_s30  ;;  %v5632_v16 = vpack.c.bf16 %v4149_v34, %v4149_v34  ;;  %v4719_v50 = vor.u32 %v4717_v54, %v4716_v41  ;;  %v4720_v0 = vrot.slane %v4716_v41, 4  ;;  %v5629_v56 = vpack.c.bf16 %v4146_v38, %v4146_v38 }
 0x3de   : > { %v4251_v13 = vpop.permute.xlu0 %4250  ;;  %v4073_v17 = vpop.permute.xlu1 %4072 }
 0x3df   : > { %4316 = vst.msk [vmem:[%s6710_s23 + $0xf0] sm:$0xff] %vm494_vm3, %v4251_v13  ;;  %v4147_v15 = vmul.f32 %v8513_v9, %v4073_v17  ;;  %v4773_v62 = vshrl.u32 %v5632_v16, 16  ;;  %v4728_v59 = vsel %vm8722_vm12, %v4720_v0, %v4727_v4  ;;  %v4767_v9 = vrot.slane %v4765_v35, 7 }
 0x3e0   : > { %v4776_v60 = vshll.u32 %v5632_v16, 16  ;;  %v4751_v26 = vshll.u32 %v5629_v56, 16 }
 0x3e1   : > { %4885 = vrot.lane.b32.xlu0 %v4685_v49, %s6600_s30  ;;  %4384 = vrot.lane.b32.xlu1 %v4143_v30, %s6600_s30  ;;  %v4775_v51 = vrot.slane %v4773_v62, 7  ;;  %v5630_v30 = vpack.c.bf16 %v4147_v15, %v4147_v15  ;;  %v4768_v49 = vshll.u32 %v5631_v19, 16 }
 0x3e2   : > { %v4247_v45 = vpop.permute.xlu0 %4246  ;;  %v4253_v40 = vpop.permute.xlu1 %4252 }
 0x3e3   : > { %4314 = vst.msk [vmem:[%s6710_s23 + $0xe0] sm:$0xff] %vm494_vm3, %v4247_v45  ;;  %4317 = vst.msk [vmem:[%s6710_s23 + $0xf8] sm:$0xff] %vm494_vm3, %v4253_v40  ;;  %v4770_v10 = vor.u32 %v4768_v49, %v4767_v9  ;;  %v4748_v45 = vshrl.u32 %v5629_v56, 16  ;;  %v4780_v40 = vrot.slane %v4775_v51, 4  ;;  %v4756_v28 = vshrl.u32 %v5630_v30, 16 }
 0x3e5   : > { %4887 = vrot.lane.b32.xlu0 %v4694_v43, %s6600_s30  ;;  %4889 = vrot.lane.b32.xlu1 %v4695_v44, %s6600_s30  ;;  %v4771_v44 = vrot.slane %v4767_v9, 4  ;;  %v4750_v43 = vrot.slane %v4748_v45, 7 }
 0x3e6   : > { %v4083_v20 = vpop.permute.xlu0 %4082  ;;  %v4249_v25 = vpop.permute.xlu1 %4248 }
 0x3e7   : > { %4315 = vst.msk [vmem:[%s6710_s23 + $0xe8] sm:$0xff] %vm494_vm3, %v4249_v25  ;;  %v4152_v36 = vmul.f32 %v8517_v27, %v4083_v20  ;;  %v4758_v20 = vrot.slane %v4756_v28, 7  ;;  %v4753_v55 = vor.u32 %v4751_v26, %v4750_v43  ;;  %s6502_s23 = scalar_lea.vmem %s8954_s8, 4096 }
 0x3e8   : > { %p6503_p1 = scmp.ne.s32.totalorder %s8954_s8, %s6502_s23  ;;  %p6510_p6 = scmp.lt.s32.totalorder %s6508_s11, %s6502_s23 }
 0x3e9   : > { %4394 = vrot.lane.b32.xlu0 %v4148_v8, %s6600_s30  ;;  %4396 = vrot.lane.b32.xlu1 %v4149_v34, %s6600_s30  ;;  %v4759_v8 = vshll.u32 %v5630_v30, 16  ;;  %v5635_v34 = vpack.c.bf16 %v4152_v36, %v4152_v36  ;;  %v4763_v37 = vrot.slane %v4758_v20, 4 }
 0x3ea   : > { %v4085_v52 = vpop.permute.xlu1 %4084  ;;  %v4079_v12 = vpop.permute.xlu0 %4078  ;;  %p6504_p2 = pnand %p6503_p1, %p6673_p3  ;;  %p6511_p7 = por %p6510_p6, %p6509_p5 }
 0x3eb   : > { %v4153_v13 = vmul.f32 %v9269_v32, %v4085_v52  ;;  %v4778_v32 = vor.u32 %v4776_v60, %v4775_v51  ;;  %v4150_v14 = vmul.f32 %v8522_v21, %v4079_v12  ;;  %v5007_v21 = vld [vmem:[#allocation2 + $0x18] sm:$0xf]  ;;  %v4761_v11 = vor.u32 %v4759_v8, %v4758_v20 }
 0x3ec   : > { %v4799_v58 = vshrl.u32 %v5635_v34, 16  ;;  %p6505_p4 = pneg %p6504_p2 }
 0x3ed   : > { %4903 = vrot.lane.b32.xlu0 %v4736_v48, %s6600_s30  ;;  %4907 = vrot.lane.b32.xlu1 %v4746_v31, %s6600_s30  ;;  %v4779_v3 = vsel %vm8722_vm12, %v4771_v44, %v4778_v32  ;;  %v5636_v29 = vpack.c.bf16 %v4153_v13, %v4153_v13  ;;  %v4754_v31 = vrot.slane %v4750_v43, 4 }
 0x3ee   : > { %v8834_v46 = vpop.permute.xlu1 %4080  ;;  %v8838_v61 = vpop.permute.xlu0 %4090  ;;  %p6512_p8 = pnand %p6511_p7, %p6505_p4 }
 0x3ef   : > { %v4151_v52 = vmul.f32 %v8530_v24, %v8834_v46  ;;  %v4807_v47 = vshrl.u32 %v5636_v29, 16  ;;  %v4762_v24 = vsel %vm8722_vm12, %v4754_v31, %v4761_v11  ;;  %v5633_v46 = vpack.c.bf16 %v4150_v14, %v4150_v14 }
 0x3f1   : > { %4390 = vrot.lane.b32.xlu0 %v4146_v38, %s6600_s30  ;;  %4905 = vrot.lane.b32.xlu1 %v4745_v42, %s6600_s30  ;;  %v4801_v38 = vrot.slane %v4799_v58, 7  ;;  %v4809_v2 = vrot.slane %v4807_v47, 7  ;;  %v4156_v42 = vmul.f32 %v9272_v63, %v8838_v61  ;;  %v5634_v16 = vpack.c.bf16 %v4151_v52, %v4151_v52  ;;  %v5011_v63 = vld [vmem:[#allocation2 + $0x20] sm:$0x1] }
 0x3f2   : > { %v8843_v5 = vpop.permute.xlu1 %4092  ;;  %v8847_v33 = vpop.permute.xlu0 %4086 }
 0x3f3   : > { %v4157_v54 = vmul.f32 %v9276_v6, %v8843_v5  ;;  %v4810_v6 = vshll.u32 %v5636_v29, 16  ;;  %v4782_v5 = vshrl.u32 %v5633_v46, 16  ;;  %v4814_v35 = vrot.slane %v4809_v2, 4 }
 0x3f4   : > { %v4805_v51 = vrot.slane %v4801_v38, 4 }
 0x3f5   : > { %4897 = vrot.lane.b32.xlu0 %v4719_v50, %s6600_s30  ;;  %4392 = vrot.lane.b32.xlu1 %v4147_v15, %s6600_s30  ;;  %v4802_v15 = vshll.u32 %v5635_v34, 16  ;;  %v4997_v50 = vld [vmem:[#allocation2 + $0xc] sm:$0xf]  ;;  %v8914_v30 = vpack.c.bf16 %v4157_v54, %v4157_v54 }
 0x3f6   : > { %v8855_v17 = vpop.permute.xlu1 %4088 }
 0x3f7   : > { %v4804_v61 = vor.u32 %v4802_v15, %v4801_v38  ;;  %v4155_v49 = vmul.f32 %v8546_v23, %v8855_v17  ;;  %v4841_v17 = vshrl.u32 %v8914_v30, 16 }
 0x3f9   : > { %4899 = vrot.lane.b32.xlu0 %v4728_v59, %s6600_s30  ;;  %4901 = vrot.lane.b32.xlu1 %v4729_v18, %s6600_s30  ;;  %v4812_v18 = vor.u32 %v4810_v6, %v4809_v2  ;;  %v4790_v59 = vshrl.u32 %v5634_v16, 16  ;;  %v8928_v28 = vpack.c.bf16 %v4155_v49, %v4155_v49 }
 0x3fb   : > { %v4355_v7 = vpop.permute.xlu0 %4354  ;;  %v4792_v45 = vrot.slane %v4790_v59, 7 }
 0x3fc   : > { %4448 = vst.msk [vmem:[%s6708_s27 + $0x10] sm:$0xff] %vm494_vm3, %v4355_v7  ;;  %v4154_v7 = vmul.f32 %v9274_v57, %v8847_v33  ;;  %v5004_v57 = vld [vmem:[#allocation2 + $0x14] sm:$0x1] }
 0x3fd   : > { %4402 = vrot.lane.b32.xlu0 %v4152_v36, %s6600_s30  ;;  %4404 = vrot.lane.b32.xlu1 %v4153_v13, %s6600_s30  ;;  %v5639_v36 = vpack.c.bf16 %v4156_v42, %v4156_v42  ;;  %v4784_v13 = vrot.slane %v4782_v5, 7  ;;  %v4797_v8 = vrot.slane %v4792_v45, 4 }
 0x3fe   : > { %v8925_v23 = vpack.c.bf16 %v4154_v7, %v4154_v7 }
 0x3ff   : > { %v4351_v27 = vpop.permute.xlu0 %4350  ;;  %v4357_v39 = vpop.permute.xlu1 %4356  ;;  %v4833_v33 = vshrl.u32 %v5639_v36, 16 }
 0x400   : > { %4446 = vst.msk [vmem:[%s6708_s27] sm:$0xff] %vm494_vm3, %v4351_v27  ;;  %4449 = vst.msk [vmem:[%s6708_s27 + $0x18] sm:$0xff] %vm494_vm3, %v4357_v39  ;;  %v4785_v27 = vshll.u32 %v5633_v46, 16  ;;  %v4793_v39 = vshll.u32 %v5634_v16, 16  ;;  %v4816_v34 = vshrl.u32 %v8925_v23, 16 }
 0x401   : > { %4915 = vrot.lane.b32.xlu0 %v4770_v10, %s6600_s30  ;;  %4919 = vrot.lane.b32.xlu1 %v4780_v40, %s6600_s30  ;;  %v4813_v40 = vsel %vm8722_vm12, %v4805_v51, %v4812_v18  ;;  %v8935_v26 = vrot.slane %v4833_v33, 7 }
 0x402   : > { %v4787_v32 = vor.u32 %v4785_v27, %v4784_v13  ;;  %v4818_v58 = vrot.slane %v4816_v34, 7 }
 0x403   : > { %v4353_v25 = vpop.permute.xlu1 %4352 }
 0x404   : > { %4447 = vst.msk [vmem:[%s6708_s27 + $0x8] sm:$0xff] %vm494_vm3, %v4353_v25  ;;  %v5021_v25 = vld [vmem:[#allocation2 + $0x30] sm:$0xf] }
 0x405   : > { %4398 = vrot.lane.b32.xlu0 %v4150_v14, %s6600_s30  ;;  %4917 = vrot.lane.b32.xlu1 %v4779_v3, %s6600_s30  ;;  %v4795_v14 = vor.u32 %v4793_v39, %v4792_v45  ;;  %v4788_v3 = vrot.slane %v4784_v13, 4 }
 0x407   : > { %v4856_v12 = vpop.permute.xlu1 %4855 }
 0x408   : > { %v5008_v48 = vsel %vm8875_vm15, %v4856_v12, %v5007_v21  ;;  %v4843_v21 = vrot.slane %v4841_v17, 7  ;;  %v4796_v12 = vsel %vm8722_vm12, %v4788_v3, %v4795_v14 }
 0x409   : > { %4909 = vrot.lane.b32.xlu0 %v4753_v55, %s6600_s30  ;;  %4400 = vrot.lane.b32.xlu1 %v4151_v52, %s6600_s30  ;;  %5009 = vst [vmem:[#allocation2 + $0x18] sm:$0xf] %v5008_v48  ;;  %v4824_v55 = vshrl.u32 %v8928_v28, 16  ;;  %v4836_v48 = vshll.u32 %v5639_v36, 16 }
 0x40b   : > { %v4363_v41 = vpop.permute.xlu0 %4362  ;;  %v4838_v31 = vor.u32 %v4836_v48, %v8935_v26  ;;  %v4826_v47 = vrot.slane %v4824_v55, 7 }
 0x40c   : > { %4452 = vst.msk [vmem:[%s6708_s27 + $0x30] sm:$0xff] %vm494_vm3, %v4363_v41 }
 0x40d   : > { %4911 = vrot.lane.b32.xlu0 %v4762_v24, %s6600_s30  ;;  %4913 = vrot.lane.b32.xlu1 %v4763_v37, %s6600_s30  ;;  %v4848_v37 = vrot.slane %v4843_v21, 4 }
 0x40f   : > { %v4359_v1 = vpop.permute.xlu0 %4358  ;;  %v4365_v19 = vpop.permute.xlu1 %4364 }
 0x410   : > { %4450 = vst.msk [vmem:[%s6708_s27 + $0x20] sm:$0xff] %vm494_vm3, %v4359_v1  ;;  %4453 = vst.msk [vmem:[%s6708_s27 + $0x38] sm:$0xff] %vm494_vm3, %v4365_v19 }
 0x411   : > { %4410 = vrot.lane.b32.xlu0 %v4156_v42, %s6600_s30  ;;  %4412 = vrot.lane.b32.xlu1 %v4157_v54, %s6600_s30 }
 0x413   : > { %v4850_v0 = vpop.permute.xlu0 %4849  ;;  %v4860_v62 = vpop.permute.xlu1 %4859 }
 0x414   : > { %v4998_v9 = vsel %vm8875_vm15, %v4850_v0, %v4997_v50  ;;  %v5012_v56 = vsel %vm8902_vm1, %v4860_v62, %v5011_v63 }
 0x415   : > { %4999 = vst [vmem:[#allocation2 + $0xc] sm:$0xf] %v4998_v9  ;;  %5013 = vst [vmem:[#allocation2 + $0x20] sm:$0x1] %v5012_v56  ;;  %4927 = vrot.lane.b32.xlu0 %v4804_v61, %s6600_s30  ;;  %4931 = vrot.lane.b32.xlu1 %v4814_v35, %s6600_s30 }
 0x417   : > { %v4858_v60 = vpop.permute.xlu0 %4857  ;;  %v4361_v10 = vpop.permute.xlu1 %4360 }
 0x418   : > { %5010 = vst.msk [vmem:[#allocation2 + $0x1c] sm:$0xf] %vm4994_vm13, %v4858_v60 }
 0x419   : > { %4451 = vst.msk [vmem:[%s6708_s27 + $0x28] sm:$0xff] %vm494_vm3, %v4361_v10  ;;  %4406 = vrot.lane.b32.xlu0 %v4154_v7, %s6600_s30  ;;  %4929 = vrot.lane.b32.xlu1 %v4813_v40, %s6600_s30 }
 0x41b   : > { %v4854_v44 = vpop.permute.xlu0 %4853  ;;  %v4852_v43 = vpop.permute.xlu1 %4851 }
 0x41c   : > { %v5005_v20 = vsel %vm8902_vm1, %v4854_v44, %v5004_v57  ;;  %5001 = vst.msk [vmem:[#allocation2 + $0x10] sm:$0xf] %vm4994_vm13, %v4852_v43 }
 0x41d   : > { %5006 = vst [vmem:[#allocation2 + $0x14] sm:$0x1] %v5005_v20  ;;  %4921 = vrot.lane.b32.xlu0 %v4787_v32, %s6600_s30  ;;  %4408 = vrot.lane.b32.xlu1 %v4155_v49, %s6600_s30 }
 0x41f   : > { %v4371_v29 = vpop.permute.xlu0 %4370  ;;  %v4868_v52 = vpop.permute.xlu1 %4867 }
 0x420   : > { %4456 = vst.msk [vmem:[%s6708_s27 + $0x50] sm:$0xff] %vm494_vm3, %v4371_v29  ;;  %v5022_v11 = vsel %vm8875_vm15, %v4868_v52, %v5021_v25 }
 0x421   : > { %5023 = vst [vmem:[#allocation2 + $0x30] sm:$0xf] %v5022_v11  ;;  %4923 = vrot.lane.b32.xlu0 %v4796_v12, %s6600_s30  ;;  %4925 = vrot.lane.b32.xlu1 %v4797_v8, %s6600_s30 }
 0x423   : > { %v4367_v41 = vpop.permute.xlu0 %4366  ;;  %v4373_v24 = vpop.permute.xlu1 %4372 }
 0x424   : > { %4454 = vst.msk [vmem:[%s6708_s27 + $0x40] sm:$0xff] %vm494_vm3, %v4367_v41  ;;  %4457 = vst.msk [vmem:[%s6708_s27 + $0x58] sm:$0xff] %vm494_vm3, %v4373_v24 }
 0x425   : > { %6515 = shalt.err (!%p6512_p8)
}
 0x426   : > { %s6516_s29 = scalar_lea.hbm %s8951_s7, 4096  ;;  %s6520_s15 = scalar_lea.hbm %s9141_s3, 8192 }
 0x427   : > { %p6517_p10 = scmp.ne.s32.totalorder %s8951_s7, %s6516_s29  ;;  %p6521_p13 = scmp.lt.s32.totalorder %s8951_s7, %s9141_s3 }
 0x428   : > { %p6522_p0 = scmp.lt.s32.totalorder %s6520_s15, %s6516_s29 }
 0x429   : > { %p6518_p11 = pnand %p6517_p10, %p6673_p3 }
 0x42a   : > { %p6523_p1 = por %p6522_p0, %p6521_p13 }
 0x42b   : > { %p6519_p12 = pneg %p6518_p11 }
 0x42d   : > { %p6524_p2 = pnand %p6523_p1, %p6519_p12 }
 0x42f   : > { %6527 = shalt.err (!%p6524_p2)
}
 0x430   : > { %s6602_s5 = smov 128   ;;  %s6603_s6 = smov 8   ;;  %v4819_v38 = vshll.u32 %v8925_v23, 16  ;;  %4939 = vrot.lane.b32.xlu0 %v4838_v31, %s6600_s30  ;;  %4943 = vrot.lane.b32.xlu1 %v4848_v37, %s6600_s30  ;;  %v5014_v46 = vld [vmem:[#allocation2 + $0x24] sm:$0xf]  ;;  %v4844_v42 = vshll.u32 %v8914_v30, 16  ;;  %v4862_v16 = vpop.permute.xlu0 %4861  ;;  %v4872_v15 = vpop.permute.xlu1 %4871 }
 0x431   : > { %6132 = dma.vmem_to_hbm [thread:$0]  (%p6673_p3), %s8954_s8, 4096, %s8951_s7, %s8963_s16, %s6602_s5, %s6602_s5, %s6603_s6   ;;  %v5025_v2 = vld [vmem:[#allocation2 + $0x38] sm:$0x1]  ;;  %v4827_v54 = vshll.u32 %v8928_v28, 16  ;;  %v4831_v19 = vrot.slane %v4826_v47, 4  ;;  %v5015_v6 = vsel %vm8875_vm15, %v4862_v16, %v5014_v46  ;;  %v4839_v5 = vrot.slane %v8935_v26, 4 }
 0x432   : > { %v4821_v1 = vor.u32 %v4819_v38, %v4818_v58  ;;  %v4846_v50 = vor.u32 %v4844_v42, %v4843_v21  ;;  %v5026_v61 = vsel %vm8902_vm1, %v4872_v15, %v5025_v2  ;;  %5016 = vst [vmem:[#allocation2 + $0x24] sm:$0xf] %v5015_v6  ;;  %v4822_v35 = vrot.slane %v4818_v58, 4  ;;  %v5018_v9 = vld [vmem:[#allocation2 + $0x2c] sm:$0x1] }
 0x433   : > { %v4829_v63 = vor.u32 %v4827_v54, %v4826_v47  ;;  %5027 = vst [vmem:[#allocation2 + $0x38] sm:$0x1] %v5026_v61  ;;  %v5035_v13 = vld [vmem:[#allocation2 + $0x48] sm:$0xf]  ;;  %v5028_v10 = vld [vmem:[#allocation2 + $0x3c] sm:$0xf] }
 0x434   : > { %4933 = vrot.lane.b32.xlu0 %v4821_v1, %s6600_s30  ;;  %4937 = vrot.lane.b32.xlu1 %v4831_v19, %s6600_s30  ;;  %v4870_v0 = vpop.permute.xlu0 %4869  ;;  %v4369_v62 = vpop.permute.xlu1 %4368  ;;  %v4847_v18 = vsel %vm8722_vm12, %v4839_v5, %v4846_v50  ;;  %v5039_v45 = vld [vmem:[#allocation2 + $0x50] sm:$0x1]  ;;  %v5032_v23 = vld [vmem:[#allocation2 + $0x44] sm:$0x1]  ;;  %v5049_v20 = vld [vmem:[#allocation2 + $0x60] sm:$0xf] }
 0x435   : > { %5024 = vst.msk [vmem:[#allocation2 + $0x34] sm:$0xf] %vm4994_vm13, %v4870_v0  ;;  %v4830_v59 = vsel %vm8722_vm12, %v4822_v35, %v4829_v63  ;;  %v5053_v25 = vld [vmem:[#allocation2 + $0x68] sm:$0x1]  ;;  %v5042_v29 = vld [vmem:[#allocation2 + $0x54] sm:$0xf] }
 0x436   : > { %4455 = vst.msk [vmem:[%s6708_s27 + $0x48] sm:$0xff] %vm494_vm3, %v4369_v62  ;;  %v5046_v48 = vld [vmem:[#allocation2 + $0x5c] sm:$0x1]  ;;  %v5063_v24 = vld [vmem:[#allocation2 + $0x78] sm:$0xf] }
 0x437   : > { %v5067_v38 = vld [vmem:[#allocation2 + $0x80] sm:$0x1]  ;;  %v5056_v16 = vld [vmem:[#allocation2 + $0x6c] sm:$0xf]  ;;  %v5060_v6 = vld [vmem:[#allocation2 + $0x74] sm:$0x1] }
 0x438   : > { %4941 = vrot.lane.b32.xlu1 %v4847_v18, %s6600_s30  ;;  %4935 = vrot.lane.b32.xlu0 %v4830_v59, %s6600_s30  ;;  %v4866_v56 = vpop.permute.xlu0 %4865  ;;  %v4864_v51 = vpop.permute.xlu1 %4863  ;;  %v5077_v18 = vld [vmem:[#allocation2 + $0x90] sm:$0xf]  ;;  %v5081_v59 = vld [vmem:[#allocation2 + $0x98] sm:$0x1] }
 0x439   : > { %v5019_v36 = vsel %vm8902_vm1, %v4866_v56, %v5018_v9  ;;  %5017 = vst.msk [vmem:[#allocation2 + $0x28] sm:$0xf] %vm4994_vm13, %v4864_v51 }
 0x43a   : > { %5020 = vst [vmem:[#allocation2 + $0x2c] sm:$0x1] %v5019_v36 }
 0x43c   : > { %v4379_v7 = vpop.permute.xlu0 %4378  ;;  %v4880_v30 = vpop.permute.xlu1 %4879 }
 0x43d   : > { %4460 = vst.msk [vmem:[%s6708_s27 + $0x70] sm:$0xff] %vm494_vm3, %v4379_v7  ;;  %v5036_v53 = vsel %vm8875_vm15, %v4880_v30, %v5035_v13  ;;  %v5070_v30 = vld [vmem:[#allocation2 + $0x84] sm:$0xf] }
 0x43e   : > { %5037 = vst [vmem:[#allocation2 + $0x48] sm:$0xf] %v5036_v53 }
 0x440   : > { %v4375_v49 = vpop.permute.xlu0 %4374  ;;  %v4381_v60 = vpop.permute.xlu1 %4380 }
 0x441   : > { %4458 = vst.msk [vmem:[%s6708_s27 + $0x60] sm:$0xff] %vm494_vm3, %v4375_v49  ;;  %4461 = vst.msk [vmem:[%s6708_s27 + $0x78] sm:$0xff] %vm494_vm3, %v4381_v60 }
 0x444   : > { %v4874_v40 = vpop.permute.xlu0 %4873  ;;  %v4884_v27 = vpop.permute.xlu1 %4883 }
 0x445   : > { %v5029_v57 = vsel %vm8875_vm15, %v4874_v40, %v5028_v10  ;;  %v5040_v33 = vsel %vm8902_vm1, %v4884_v27, %v5039_v45  ;;  %v5074_v10 = vld [vmem:[#allocation2 + $0x8c] sm:$0x1] }
 0x446   : > { %5030 = vst [vmem:[#allocation2 + $0x3c] sm:$0xf] %v5029_v57  ;;  %5041 = vst [vmem:[#allocation2 + $0x50] sm:$0x1] %v5040_v33 }
 0x448   : > { %v4882_v39 = vpop.permute.xlu0 %4881  ;;  %v4377_v32 = vpop.permute.xlu1 %4376 }
 0x449   : > { %5038 = vst.msk [vmem:[#allocation2 + $0x4c] sm:$0xf] %vm4994_vm13, %v4882_v39  ;;  %v5091_v39 = vld [vmem:[#allocation2 + $0xa8] sm:$0xf] }
 0x44a   : > { %4459 = vst.msk [vmem:[%s6708_s27 + $0x68] sm:$0xff] %vm494_vm3, %v4377_v32  ;;  %v5095_v32 = vld [vmem:[#allocation2 + $0xb0] sm:$0x1] }
 0x44c   : > { %v4878_v17 = vpop.permute.xlu0 %4877  ;;  %v4876_v28 = vpop.permute.xlu1 %4875 }
 0x44d   : > { %v5033_v44 = vsel %vm8902_vm1, %v4878_v17, %v5032_v23  ;;  %5031 = vst.msk [vmem:[#allocation2 + $0x40] sm:$0xf] %vm4994_vm13, %v4876_v28 }
 0x44e   : > { %5034 = vst [vmem:[#allocation2 + $0x44] sm:$0x1] %v5033_v44 }
 0x450   : > { %v4387_v43 = vpop.permute.xlu0 %4386  ;;  %v4389_v14 = vpop.permute.xlu1 %4388 }
 0x451   : > { %4464 = vst.msk [vmem:[%s6708_s27 + $0x90] sm:$0xff] %vm494_vm3, %v4387_v43  ;;  %4465 = vst.msk [vmem:[%s6708_s27 + $0x98] sm:$0xff] %vm494_vm3, %v4389_v14 }
 0x454   : > { %v4892_v3 = vpop.permute.xlu0 %4891  ;;  %v4896_v26 = vpop.permute.xlu1 %4895 }
 0x455   : > { %v5050_v8 = vsel %vm8875_vm15, %v4892_v3, %v5049_v20  ;;  %v5054_v34 = vsel %vm8902_vm1, %v4896_v26, %v5053_v25  ;;  %v5084_v20 = vld [vmem:[#allocation2 + $0x9c] sm:$0xf] }
 0x456   : > { %5051 = vst [vmem:[#allocation2 + $0x60] sm:$0xf] %v5050_v8  ;;  %5055 = vst [vmem:[#allocation2 + $0x68] sm:$0x1] %v5054_v34  ;;  %v5088_v8 = vld [vmem:[#allocation2 + $0xa4] sm:$0x1] }
 0x458   : > { %v4383_v21 = vpop.permute.xlu0 %4382  ;;  %v4894_v55 = vpop.permute.xlu1 %4893 }
 0x459   : > { %4462 = vst.msk [vmem:[%s6708_s27 + $0x80] sm:$0xff] %vm494_vm3, %v4383_v21 }
 0x45a   : > { %5052 = vst.msk [vmem:[#allocation2 + $0x64] sm:$0xf] %vm4994_vm13, %v4894_v55 }
 0x45c   : > { %v4886_v52 = vpop.permute.xlu0 %4885  ;;  %v4385_v11 = vpop.permute.xlu1 %4384 }
 0x45d   : > { %v5043_v12 = vsel %vm8875_vm15, %v4886_v52, %v5042_v29  ;;  %4463 = vst.msk [vmem:[%s6708_s27 + $0x88] sm:$0xff] %vm494_vm3, %v4385_v11  ;;  %v5105_v29 = vld [vmem:[#allocation2 + $0xc0] sm:$0xf]  ;;  %v5109_v52 = vld [vmem:[#allocation2 + $0xc8] sm:$0x1] }
 0x45e   : > { %5044 = vst [vmem:[#allocation2 + $0x54] sm:$0xf] %v5043_v12 }
 0x460   : > { %v4888_v31 = vpop.permute.xlu0 %4887  ;;  %v4890_v58 = vpop.permute.xlu1 %4889 }
 0x461   : > { %5045 = vst.msk [vmem:[#allocation2 + $0x58] sm:$0xf] %vm4994_vm13, %v4888_v31  ;;  %v5047_v37 = vsel %vm8902_vm1, %v4890_v58, %v5046_v48  ;;  %v5098_v58 = vld [vmem:[#allocation2 + $0xb4] sm:$0xf] }
 0x462   : > { %5048 = vst [vmem:[#allocation2 + $0x5c] sm:$0x1] %v5047_v37  ;;  %v5102_v37 = vld [vmem:[#allocation2 + $0xbc] sm:$0x1] }
 0x464   : > { %v4395_v47 = vpop.permute.xlu0 %4394  ;;  %v4397_v41 = vpop.permute.xlu1 %4396 }
 0x465   : > { %4468 = vst.msk [vmem:[%s6708_s27 + $0xb0] sm:$0xff] %vm494_vm3, %v4395_v47  ;;  %4469 = vst.msk [vmem:[%s6708_s27 + $0xb8] sm:$0xff] %vm494_vm3, %v4397_v41 }
 0x468   : > { %v4904_v46 = vpop.permute.xlu0 %4903  ;;  %v4908_v2 = vpop.permute.xlu1 %4907 }
 0x469   : > { %v5064_v42 = vsel %vm8875_vm15, %v4904_v46, %v5063_v24  ;;  %v5068_v54 = vsel %vm8902_vm1, %v4908_v2, %v5067_v38 }
 0x46a   : > { %5065 = vst [vmem:[#allocation2 + $0x78] sm:$0xf] %v5064_v42  ;;  %5069 = vst [vmem:[#allocation2 + $0x80] sm:$0x1] %v5068_v54 }
 0x46c   : > { %v4391_v1 = vpop.permute.xlu0 %4390  ;;  %v4906_v19 = vpop.permute.xlu1 %4905 }
 0x46d   : > { %4466 = vst.msk [vmem:[%s6708_s27 + $0xa0] sm:$0xff] %vm494_vm3, %v4391_v1 }
 0x46e   : > { %5066 = vst.msk [vmem:[#allocation2 + $0x7c] sm:$0xf] %vm4994_vm13, %v4906_v19 }
 0x470   : > { %v4898_v15 = vpop.permute.xlu0 %4897  ;;  %v4393_v50 = vpop.permute.xlu1 %4392 }
 0x471   : > { %v5057_v63 = vsel %vm8875_vm15, %v4898_v15, %v5056_v16  ;;  %4467 = vst.msk [vmem:[%s6708_s27 + $0xa8] sm:$0xff] %vm494_vm3, %v4393_v50 }
 0x472   : > { %5058 = vst [vmem:[#allocation2 + $0x6c] sm:$0xf] %v5057_v63 }
 0x474   : > { %v4900_v61 = vpop.permute.xlu0 %4899  ;;  %v4902_v5 = vpop.permute.xlu1 %4901 }
 0x475   : > { %5059 = vst.msk [vmem:[#allocation2 + $0x70] sm:$0xf] %vm4994_vm13, %v4900_v61  ;;  %v5061_v35 = vsel %vm8902_vm1, %v4902_v5, %v5060_v6 }
 0x476   : > { %5062 = vst [vmem:[#allocation2 + $0x74] sm:$0x1] %v5061_v35 }
 0x478   : > { %v4403_v0 = vpop.permute.xlu0 %4402  ;;  %v4405_v62 = vpop.permute.xlu1 %4404 }
 0x479   : > { %4472 = vst.msk [vmem:[%s6708_s27 + $0xd0] sm:$0xff] %vm494_vm3, %v4403_v0  ;;  %4473 = vst.msk [vmem:[%s6708_s27 + $0xd8] sm:$0xff] %vm494_vm3, %v4405_v62 }
 0x47c   : > { %v4916_v9 = vpop.permute.xlu0 %4915  ;;  %v4920_v56 = vpop.permute.xlu1 %4919 }
 0x47d   : > { %v5078_v51 = vsel %vm8875_vm15, %v4916_v9, %v5077_v18  ;;  %v5082_v36 = vsel %vm8902_vm1, %v4920_v56, %v5081_v59 }
 0x47e   : > { %5079 = vst [vmem:[#allocation2 + $0x90] sm:$0xf] %v5078_v51  ;;  %5083 = vst [vmem:[#allocation2 + $0x98] sm:$0x1] %v5082_v36 }
 0x480   : > { %v4399_v13 = vpop.permute.xlu0 %4398  ;;  %v4918_v7 = vpop.permute.xlu1 %4917 }
 0x481   : > { %4470 = vst.msk [vmem:[%s6708_s27 + $0xc0] sm:$0xff] %vm494_vm3, %v4399_v13 }
 0x482   : > { %5080 = vst.msk [vmem:[#allocation2 + $0x94] sm:$0xf] %vm4994_vm13, %v4918_v7 }
 0x484   : > { %v4910_v53 = vpop.permute.xlu0 %4909  ;;  %v4401_v49 = vpop.permute.xlu1 %4400 }
 0x485   : > { %v5071_v60 = vsel %vm8875_vm15, %v4910_v53, %v5070_v30  ;;  %4471 = vst.msk [vmem:[%s6708_s27 + $0xc8] sm:$0xff] %vm494_vm3, %v4401_v49 }
 0x486   : > { %5072 = vst [vmem:[#allocation2 + $0x84] sm:$0xf] %v5071_v60 }
 0x488   : > { %v4912_v45 = vpop.permute.xlu0 %4911  ;;  %v4914_v40 = vpop.permute.xlu1 %4913 }
 0x489   : > { %5073 = vst.msk [vmem:[#allocation2 + $0x88] sm:$0xf] %vm4994_vm13, %v4912_v45  ;;  %v5075_v27 = vsel %vm8902_vm1, %v4914_v40, %v5074_v10 }
 0x48a   : > { %5076 = vst [vmem:[#allocation2 + $0x8c] sm:$0x1] %v5075_v27 }
 0x48c   : > { %v4411_v57 = vpop.permute.xlu0 %4410  ;;  %v4413_v33 = vpop.permute.xlu1 %4412 }
 0x48d   : > { %4476 = vst.msk [vmem:[%s6708_s27 + $0xf0] sm:$0xff] %vm494_vm3, %v4411_v57  ;;  %4477 = vst.msk [vmem:[%s6708_s27 + $0xf8] sm:$0xff] %vm494_vm3, %v4413_v33 }
 0x490   : > { %v4928_v23 = vpop.permute.xlu0 %4927  ;;  %v4932_v17 = vpop.permute.xlu1 %4931 }
 0x491   : > { %v5092_v28 = vsel %vm8875_vm15, %v4928_v23, %v5091_v39  ;;  %v5096_v44 = vsel %vm8902_vm1, %v4932_v17, %v5095_v32 }
 0x492   : > { %5093 = vst [vmem:[#allocation2 + $0xa8] sm:$0xf] %v5092_v28  ;;  %5097 = vst [vmem:[#allocation2 + $0xb0] sm:$0x1] %v5096_v44 }
 0x494   : > { %v4407_v43 = vpop.permute.xlu0 %4406  ;;  %v4930_v14 = vpop.permute.xlu1 %4929 }
 0x495   : > { %4474 = vst.msk [vmem:[%s6708_s27 + $0xe0] sm:$0xff] %vm494_vm3, %v4407_v43 }
 0x496   : > { %5094 = vst.msk [vmem:[#allocation2 + $0xac] sm:$0xf] %vm4994_vm13, %v4930_v14 }
 0x498   : > { %v4922_v25 = vpop.permute.xlu0 %4921  ;;  %v4409_v3 = vpop.permute.xlu1 %4408 }
 0x499   : > { %v5085_v26 = vsel %vm8875_vm15, %v4922_v25, %v5084_v20  ;;  %4475 = vst.msk [vmem:[%s6708_s27 + $0xe8] sm:$0xff] %vm494_vm3, %v4409_v3 }
 0x49a   : > { %5086 = vst [vmem:[#allocation2 + $0x9c] sm:$0xf] %v5085_v26 }
 0x49c   : > { %v4924_v34 = vpop.permute.xlu0 %4923  ;;  %v4926_v21 = vpop.permute.xlu1 %4925 }
 0x49d   : > { %5087 = vst.msk [vmem:[#allocation2 + $0xa0] sm:$0xf] %vm4994_vm13, %v4924_v34  ;;  %v5089_v55 = vsel %vm8902_vm1, %v4926_v21, %v5088_v8 }
 0x49e   : > { %5090 = vst [vmem:[#allocation2 + $0xa4] sm:$0x1] %v5089_v55 }
 0x4a2   : > { %v4940_v11 = vpop.permute.xlu0 %4939  ;;  %v4944_v12 = vpop.permute.xlu1 %4943 }
 0x4a3   : > { %v5106_v48 = vsel %vm8875_vm15, %v4940_v11, %v5105_v29  ;;  %v5110_v31 = vsel %vm8902_vm1, %v4944_v12, %v5109_v52 }
 0x4a4   : > { %5107 = vst [vmem:[#allocation2 + $0xc0] sm:$0xf] %v5106_v48  ;;  %5111 = vst [vmem:[#allocation2 + $0xc8] sm:$0x1] %v5110_v31 }
 0x4a6   : > { %v4934_v47 = vpop.permute.xlu0 %4933  ;;  %v4938_v41 = vpop.permute.xlu1 %4937 }
 0x4a7   : > { %v5099_v24 = vsel %vm8875_vm15, %v4934_v47, %v5098_v58  ;;  %v5103_v38 = vsel %vm8902_vm1, %v4938_v41, %v5102_v37 }
 0x4a8   : > { %5100 = vst [vmem:[#allocation2 + $0xb4] sm:$0xf] %v5099_v24  ;;  %5104 = vst [vmem:[#allocation2 + $0xbc] sm:$0x1] %v5103_v38 }
 0x4aa   : > { %v4936_v46 = vpop.permute.xlu0 %4935  ;;  %v4942_v2 = vpop.permute.xlu1 %4941 }
 0x4ab   : > { %5101 = vst.msk [vmem:[#allocation2 + $0xb8] sm:$0xf] %vm4994_vm13, %v4936_v46  ;;  %5108 = vst.msk [vmem:[#allocation2 + $0xc4] sm:$0xf] %vm4994_vm13, %v4942_v2 }
 0x4ac PF: > { %p6138_p3 = scmp.ge.s32.totalorder %s6594_s19, 2  ;;  %s5165_s24 = sand.u32 1, %s6566_s12  }
 0x4ad   : > { %s5166_s27 = scalar_lea.sflag [#allocation4], %s5165_s24 }
 0x4ae   : > { %p6135_p4 = pnand %p6138_p3, %p6683_p9 }
 0x4b0   : > { %p6136_p5 = pneg %p6135_p4 }
 0x4b2   : > { %6561 = dma.done.wait (%p6136_p5), %s5166_s27, 4096  }
 0x4b3   : > { %6563 = vsyncadd (%p6136_p5), %s5166_s27, 4294963200  ;;  %s17_s19 = sadd.s32 1, %s6594_s19   ;;  %s9284_s30 = sld [smem:[#allocation6_spill]] }
 0x4b4   : > { %p14_p6 = scmp.ge.s32.totalorder %s17_s19, 18   ;;  %s9285_s12 = smov %s6570_s13 }
 0x4b5   : > { %s9286_s13 = smov %s6574_s14  ;;  %s9287_s14 = smov %s6691_s28 }
 0x4b6   : > { %s9288_s15 = smov %s6586_s17  ;;  %s9289_s16 = smov %s6590_s18 }
 0x4b7   : > { %s9290_s17 = smov %s9293_s22  ;;  %16 = sbr.rel (!%p14_p6) target bundleno = 5 (0x5), region = 88 }
 0x4b9   : > { %s9291_s18 = smov %s9284_s30 }
 0x4bc   :  { %5171 = vsyncpa [#allocation4], 1 }
 0x4bd   :  { %5173 = vsyncpa [#allocation4 + $0x1], 1 }

// kernel: clstm_forward.7
= control target key start
LH: loop header
LB: loop body
LE: loop exit
PB: predicated region body
PF: predicated region fallthrough
CT: control target
= control target key end

     0   :  { %s1653_s12 = smov 0   ;;  %s1655_s13 = smov 0   ;;  %s1936_s0 = inlined_call_operand.vmem [shape: bf16[8,2,256,288], index: 0, kind: input, shape index: {}]   ;;  %s1937_s1 = inlined_call_operand.vmem [shape: bf16[288,128], index: 1, kind: input, shape index: {}]   ;;  %s1938_s2 = inlined_call_operand.vmem [shape: f32[1,128], index: 2, kind: input, shape index: {}]   ;;  %s1939_s3 = inlined_call_operand.vmem [shape: f32[8,2,256,128], index: 3, kind: output, shape index: {}]  }
   0x1   :  { %s1657_s14 = smov 0   ;;  %s1659_s15 = smov 0  }
   0x2   :  { %s1661_s16 = smov 0  }
   0x3 LB: > { %s22_s17 = sadd.s32 1, %s1623_s14  ;;  %s25_s18 = sadd.s32 1, %s1627_s15  ;;  %s1631_s16 = sphi %s1661_s16, %s13_s16   ;;  %s1627_s15 = sphi %s1659_s15, %s1943_s15   ;;  %s1623_s14 = sphi %s1657_s14, %s1942_s14   ;;  %s1619_s13 = sphi %s1655_s13, %s1941_s13   ;;  %s1615_s12 = sphi %s1653_s12, %s1940_s12  }
   0x4   : > { %p23_p0 = scmp.ge.s32.totalorder %s22_s17, 2  ;;  %p1197_p1 = scmp.ge.s32.totalorder %s1631_s16, 1 }
   0x5   : > { %p157_p2 = scmp.lt.s32.totalorder %s1631_s16, 17 }
   0x6   : > { %s1945_s17 = smov (%p23_p0, %s22_s17), 0  ;;  %s1947_s18 = smov (!%p23_p0, %s25_s18), %s1627_s15 }
   0x7   : > { %p158_p3 = pnand %p1197_p1, %p157_p2  ;;  %p27_p4 = scmp.ge.s32.totalorder %s1947_s18, 8 }
   0x8   : > { %p189_p5 = scmp.lt.s32.totalorder (!%p158_p3), %s1619_s13, 7  ;;  %p191_p6 = scmp.lt.s32.totalorder (!%p158_p3), %s1615_s12, 1 }
   0x9   : > { %s1949_s18 = smov (%p27_p4, %s1947_s18), 0  ;;  %161 = sbr.rel (%p158_p3) target bundleno = 341 (0x155), region = 32 }
   0xe   : > { %v1511_v0 = vld [vmem:[%s1937_s1 + $0x78] sm:$0xff]   ;;  %v1513_v2 = vld [vmem:[%s1937_s1 + $0x70] sm:$0xff]   ;;  %s1951_s13 = smov (!%p189_p5, %s1619_s13), 7  ;;  %s1953_s12 = smov (!%p191_p6, %s1615_s12), 1  ;;  %v1515_v4 = vld [vmem:[%s1937_s1 + $0x68] sm:$0xff]   ;;  %vm657_vm0 = vcmask 261120  }
   0xf   : > { %v1512_v1 = vld [vmem:[%s1937_s1 + $0x38] sm:$0xff]   ;;  %1287 = vmatprep.subr.bf16.mxu0 %v1511_v0  ;;  %1453 = vmatprep.subr.bf16.mxu1 %v1511_v0  ;;  %v1514_v3 = vld [vmem:[%s1937_s1 + $0x30] sm:$0xff]   ;;  %s1470_s29 = smul.u32 192, %s1951_s13  ;;  %v1516_v5 = vld [vmem:[%s1937_s1 + $0x28] sm:$0xff]   ;;  %s1199_s22 = sshll.u32 %s1953_s12, 5 }
  0x10   : > { %1288 = vmatpush3.bf16.msra.mxu0 %v1512_v1  ;;  %1461 = vmatpush3.bf16.msra.mxu1 %v1512_v1  ;;  %s1469_s30 = smul.u32 96, %s1953_s12  ;;  %v1517_v6 = vld [vmem:[%s1937_s1 + $0x60] sm:$0xff]   ;;  %v1519_v8 = vld [vmem:[%s1937_s1 + $0x58] sm:$0xff]   ;;  %v1521_v10 = vld [vmem:[%s1937_s1 + $0x50] sm:$0xff]  }
  0x11   : > { %1289 = vmatprep.subr.bf16.mxu0 %v1513_v2  ;;  %1454 = vmatprep.subr.bf16.mxu1 %v1513_v2  ;;  %v1518_v7 = vld [vmem:[%s1937_s1 + $0x20] sm:$0xff]   ;;  %v1520_v9 = vld [vmem:[%s1937_s1 + $0x18] sm:$0xff]   ;;  %v1522_v13 = vld [vmem:[%s1937_s1 + $0x10] sm:$0xff]  }
  0x12   : > { %s195_s8 = sadd.s32 %s1470_s29, %s1469_s30  ;;  %v1523_v14 = vld [vmem:[%s1937_s1 + $0x48] sm:$0xff]   ;;  %v1525_v16 = vld [vmem:[%s1937_s1 + $0x40] sm:$0xff]  }
  0x13   : > { %s1198_s11 = sshll.u32 %s195_s8, 2  ;;  %v1524_v15 = vld [vmem:[%s1937_s1 + $0x8] sm:$0xff]   ;;  %v1526_v17 = vld [vmem:[%s1937_s1] sm:$0xff]  }
  0x14   : > { %1290 = vmatpush3.bf16.msra.mxu0 %v1514_v3  ;;  %1462 = vmatpush3.bf16.msra.mxu1 %v1514_v3  ;;  %s1719_s23 = scalar_lea.vmem %s1936_s0, %s1198_s11  ;;  %v1533_v18 = vld [vmem:[%s1937_s1 + $0x88] sm:$0xff]   ;;  %v1546_v23 = vld [vmem:[%s1937_s1 + $0x80] sm:$0xff]  }
  0x15   : > { %1291 = vmatprep.subr.bf16.mxu0 %v1515_v4  ;;  %1455 = vmatprep.subr.bf16.mxu1 %v1515_v4  ;;  %v1529_v11 = vld [vmem:[%s1719_s23 + $0x4] ss:$12 sps:$4 sm:$0xff]   ;;  %v1527_v19 = vld [vmem:[%s1719_s23] ss:$12 sps:$4 sm:$0xff]   ;;  %v1534_v21 = vld [vmem:[%s1719_s23 + $0x1c] ss:$12 sps:$4 sm:$0xff]  }
  0x16   : > { %v1532_v12 = vld [vmem:[%s1719_s23 + $0x124] ss:$12 sps:$4 sm:$0xff]   ;;  %738 = vmatprep.mubr.bf16.mxu0 %v1529_v11  ;;  %v1530_v20 = vld [vmem:[%s1719_s23 + $0x120] ss:$12 sps:$4 sm:$0xff]   ;;  %v1536_v22 = vld [vmem:[%s1719_s23 + $0x13c] ss:$12 sps:$4 sm:$0xff]  }
  0x17   : > { %834 = vmatprep.mubr.bf16.mxu1 %v1532_v12  ;;  %v1538_v24 = vld [vmem:[%s1719_s23 + $0x18] ss:$12 sps:$4 sm:$0xff]   ;;  %v1540_v26 = vld [vmem:[%s1719_s23 + $0x34] ss:$12 sps:$4 sm:$0xff]   ;;  %v1544_v28 = vld [vmem:[%s1719_s23 + $0x30] ss:$12 sps:$4 sm:$0xff]  }
  0x18   : > { %1292 = vmatpush3.bf16.msra.mxu0 %v1516_v5  ;;  %1463 = vmatpush3.bf16.msra.mxu1 %v1516_v5  ;;  %v1539_v25 = vld [vmem:[%s1719_s23 + $0x138] ss:$12 sps:$4 sm:$0xff]   ;;  %v1542_v27 = vld [vmem:[%s1719_s23 + $0x154] ss:$12 sps:$4 sm:$0xff]   ;;  %v1545_v29 = vld [vmem:[%s1719_s23 + $0x150] ss:$12 sps:$4 sm:$0xff]  }
  0x19   : > { %1293 = vmatprep.subr.bf16.mxu0 %v1517_v6  ;;  %1456 = vmatprep.subr.bf16.mxu1 %v1517_v6  ;;  %v1547_v30 = vld [vmem:[%s1719_s23 + $0x4c] ss:$12 sps:$4 sm:$0xff]   ;;  %v1551_v32 = vld [vmem:[%s1719_s23 + $0x48] ss:$12 sps:$4 sm:$0xff]   ;;  %v1553_v34 = vld [vmem:[%s1719_s23 + $0x64] ss:$12 sps:$4 sm:$0xff]  }
  0x1a   : > { %v1549_v31 = vld [vmem:[%s1719_s23 + $0x16c] ss:$12 sps:$4 sm:$0xff]   ;;  %v1552_v33 = vld [vmem:[%s1719_s23 + $0x168] ss:$12 sps:$4 sm:$0xff]   ;;  %v1562_v41 = vld [vmem:[%s1719_s23 + $0x50] ss:$12 sps:$4 sm:$0xff]  }
  0x1b   : > { %v1555_v35 = vld [vmem:[%s1719_s23 + $0x8] ss:$12 sps:$4 sm:$0xff]   ;;  %v1556_v36 = vld [vmem:[%s1719_s23 + $0x60] ss:$12 sps:$4 sm:$0xff]   ;;  %v1560_v39 = vld [vmem:[%s1719_s23 + $0x38] ss:$12 sps:$4 sm:$0xff]  }
  0x1c   : > { %1294 = vmatpush3.bf16.msra.mxu0 %v1518_v7  ;;  %1464 = vmatpush3.bf16.msra.mxu1 %v1518_v7  ;;  %v1557_v37 = vld [vmem:[%s1719_s23 + $0x20] ss:$12 sps:$4 sm:$0xff]   ;;  %v1558_v38 = vld [vmem:[%s1719_s23 + $0x7c] ss:$12 sps:$4 sm:$0xff]   ;;  %v1561_v40 = vld [vmem:[%s1719_s23 + $0x78] ss:$12 sps:$4 sm:$0xff]  }
  0x1d   : > { %1295 = vmatprep.subr.bf16.mxu0 %v1519_v8  ;;  %1457 = vmatprep.subr.bf16.mxu1 %v1519_v8  ;;  %v1563_v42 = vld [vmem:[%s1719_s23 + $0x94] ss:$12 sps:$4 sm:$0xff]   ;;  %v1566_v44 = vld [vmem:[%s1719_s23 + $0x90] ss:$12 sps:$4 sm:$0xff]   ;;  %v1568_v46 = vld [vmem:[%s1719_s23 + $0xac] ss:$12 sps:$4 sm:$0xff]  }
  0x1e   : > { %v1565_v43 = vld [vmem:[%s1719_s23 + $0x68] ss:$12 sps:$4 sm:$0xff]   ;;  %v1567_v45 = vld [vmem:[%s1719_s23 + $0x80] ss:$12 sps:$4 sm:$0xff]   ;;  %v1570_v47 = vld [vmem:[%s1719_s23 + $0x98] ss:$12 sps:$4 sm:$0xff]  }
  0x1f   : > { %v1571_v48 = vld [vmem:[%s1719_s23 + $0xa8] ss:$12 sps:$4 sm:$0xff]   ;;  %v1572_v49 = vld [vmem:[%s1719_s23 + $0xb0] ss:$12 sps:$4 sm:$0xff]   ;;  %v1576_v52 = vld [vmem:[%s1719_s23 + $0xc0] ss:$12 sps:$4 sm:$0xff]  }
  0x20   : > { %1296 = vmatpush3.bf16.msra.mxu0 %v1520_v9  ;;  %1465 = vmatpush3.bf16.msra.mxu1 %v1520_v9  ;;  %v1573_v50 = vld [vmem:[%s1719_s23 + $0xc4] ss:$12 sps:$4 sm:$0xff]   ;;  %v1575_v51 = vld [vmem:[%s1719_s23 + $0xc8] ss:$12 sps:$4 sm:$0xff]   ;;  %v1577_v53 = vld [vmem:[%s1719_s23 + $0xe0] ss:$12 sps:$4 sm:$0xff]  }
  0x21   : > { %1297 = vmatprep.subr.bf16.mxu0 %v1521_v10  ;;  %1458 = vmatprep.subr.bf16.mxu1 %v1521_v10  ;;  %v1578_v54 = vld [vmem:[%s1719_s23 + $0xdc] ss:$12 sps:$4 sm:$0xff]   ;;  %v1580_v55 = vld [vmem:[%s1719_s23 + $0xf8] ss:$12 sps:$4 sm:$0xff]   ;;  %v1583_v58 = vld [vmem:[%s1719_s23 + $0xf4] ss:$12 sps:$4 sm:$0xff]  }
  0x22   : > { %v1581_v56 = vld [vmem:[%s1719_s23 + $0xd8] ss:$12 sps:$4 sm:$0xff]   ;;  %v1582_v57 = vld [vmem:[%s1719_s23 + $0x110] ss:$12 sps:$4 sm:$0xff]   ;;  %v1585_v59 = vld [vmem:[%s1719_s23 + $0x128] ss:$12 sps:$4 sm:$0xff]  }
  0x23   : > { %v1586_v60 = vld [vmem:[%s1719_s23 + $0xf0] ss:$12 sps:$4 sm:$0xff]   ;;  %v1587_v61 = vld [vmem:[%s1719_s23 + $0x140] ss:$12 sps:$4 sm:$0xff]   ;;  %v1590_v63 = vld [vmem:[%s1719_s23 + $0x158] ss:$12 sps:$4 sm:$0xff]  }
  0x24   : > { %1298 = vmatpush3.bf16.msra.mxu0 %v1522_v13  ;;  %1466 = vmatpush3.bf16.msra.mxu1 %v1522_v13  ;;  %v1588_v62 = vld [vmem:[%s1719_s23 + $0x10c] ss:$12 sps:$4 sm:$0xff]   ;;  %v1591_v0 = vld [vmem:[%s1719_s23 + $0x108] ss:$12 sps:$4 sm:$0xff]   ;;  %v1592_v1 = vld [vmem:[%s1719_s23 + $0x170] ss:$12 sps:$4 sm:$0xff]  }
  0x25   : > { %1299 = vmatprep.subr.bf16.mxu0 %v1523_v14  ;;  %1459 = vmatprep.subr.bf16.mxu1 %v1523_v14  ;;  %s1200_s23 = sshll.u32 %s1951_s13, 6 }
  0x26   : > { %s204_s24 = sadd.s32 %s1200_s23, %s1199_s22 }
  0x27   : > { %s1201_s25 = sshll.u32 %s204_s24, 3 }
  0x28   : > { %1300 = vmatpush3.bf16.msra.mxu0 %v1524_v15  ;;  %1467 = vmatpush3.bf16.msra.mxu1 %v1524_v15  ;;  %s1842_s28 = scalar_lea.vmem %s1939_s3, %s1201_s25 }
  0x29   : > { %1301 = vmatprep.subr.bf16.mxu0 %v1525_v16  ;;  %1460 = vmatprep.subr.bf16.mxu1 %v1525_v16 }
  0x2c   : > { %1302 = vmatpush3.bf16.msra.mxu0 %v1526_v17  ;;  %1468 = vmatpush3.bf16.msra.mxu1 %v1526_v17 }
  0x2d   : > { %1417 = vmatprep.subr.bf16.mxu1 %v1533_v18 }
  0x2f   : > { %739 = vmatmul.mubr.bf16.vlgmr.msra.gmra.mxu0 %v1527_v19  ;;  %835 = vmatmul.mubr.bf16.vlgmr.msra.gmra.mxu1 %v1530_v20 }
  0x30   : > { %1418 = vmatpush3.bf16.msra.mxu1 %v1533_v18  ;;  %746 = vmatprep.mubr.bf16.mxu0 %v1534_v21 }
  0x31   : > { %842 = vmatprep.mubr.bf16.mxu1 %v1536_v22  ;;  %1419 = vmatprep.subr.bf16.mxu1 %v1546_v23 }
  0x34   : > { %1420 = vmatpush3.bf16.msra.mxu1 %v1546_v23 }
  0x37   : > { %747 = vmatmul.mubr.bf16.gmra.mxu0 %v1538_v24  ;;  %843 = vmatmul.mubr.bf16.gmra.mxu1 %v1539_v25 }
  0x38   : > { %754 = vmatprep.mubr.bf16.mxu0 %v1540_v26  ;;  %850 = vmatprep.mubr.bf16.mxu1 %v1542_v27 }
  0x3f   : > { %755 = vmatmul.mubr.bf16.gmra.mxu0 %v1544_v28  ;;  %851 = vmatmul.mubr.bf16.gmra.mxu1 %v1545_v29 }
  0x40   : > { %762 = vmatprep.mubr.bf16.mxu0 %v1547_v30  ;;  %858 = vmatprep.mubr.bf16.mxu1 %v1549_v31 }
  0x47   : > { %763 = vmatmul.mubr.bf16.gmra.mxu0 %v1551_v32  ;;  %859 = vmatmul.mubr.bf16.gmra.mxu1 %v1552_v33 }
  0x48   : > { %770 = vmatprep.mubr.bf16.mxu0 %v1553_v34  ;;  %1421 = vmatprep.mubr.msk.bf16.mxu1 %vm657_vm0, %v1555_v35 }
  0x4f   : > { %771 = vmatmul.mubr.bf16.gmra.mxu0 %v1556_v36  ;;  %1422 = vmatmul.mubr.msk.bf16.vlgmr.msra.gmra.mxu1 %vm657_vm0, %v1557_v37 }
  0x50   : > { %778 = vmatprep.mubr.bf16.mxu0 %v1558_v38  ;;  %1425 = vmatprep.mubr.msk.bf16.mxu1 %vm657_vm0, %v1560_v39 }
  0x57   : > { %779 = vmatmul.mubr.bf16.gmra.mxu0 %v1561_v40  ;;  %1426 = vmatmul.mubr.msk.bf16.gmra.mxu1 %vm657_vm0, %v1562_v41 }
  0x58   : > { %786 = vmatprep.mubr.bf16.mxu0 %v1563_v42  ;;  %1429 = vmatprep.mubr.msk.bf16.mxu1 %vm657_vm0, %v1565_v43  ;;  %v1837_v42 = vld [vmem:[%s1938_s2] ss:$0 sm:$0xff] }
  0x5f   : > { %787 = vmatmul.mubr.bf16.gmra.mxu0 %v1566_v44  ;;  %1430 = vmatmul.mubr.msk.bf16.gmra.mxu1 %vm657_vm0, %v1567_v45 }
  0x60   : > { %794 = vmatprep.mubr.bf16.mxu0 %v1568_v46  ;;  %1433 = vmatprep.mubr.msk.bf16.mxu1 %vm657_vm0, %v1570_v47 }
  0x67   : > { %795 = vmatmul.mubr.bf16.gmra.mxu0 %v1571_v48  ;;  %1434 = vmatmul.mubr.msk.bf16.gmra.mxu1 %vm657_vm0, %v1572_v49 }
  0x68   : > { %802 = vmatprep.mubr.bf16.mxu0 %v1573_v50  ;;  %1437 = vmatprep.mubr.msk.bf16.mxu1 %vm657_vm0, %v1575_v51 }
  0x6f   : > { %803 = vmatmul.mubr.bf16.gmra.mxu0 %v1576_v52  ;;  %1438 = vmatmul.mubr.msk.bf16.gmra.mxu1 %vm657_vm0, %v1577_v53 }
  0x70   : > { %810 = vmatprep.mubr.bf16.mxu0 %v1578_v54  ;;  %1441 = vmatprep.mubr.msk.bf16.mxu1 %vm657_vm0, %v1580_v55 }
  0x77   : > { %811 = vmatmul.mubr.bf16.gmra.mxu0 %v1581_v56  ;;  %1442 = vmatmul.mubr.msk.bf16.gmra.mxu1 %vm657_vm0, %v1582_v57 }
  0x78   : > { %818 = vmatprep.mubr.bf16.mxu0 %v1583_v58  ;;  %1445 = vmatprep.mubr.msk.bf16.mxu1 %vm657_vm0, %v1585_v59 }
  0x7f   : > { %819 = vmatmul.mubr.bf16.gmra.mxu0 %v1586_v60  ;;  %1446 = vmatmul.mubr.msk.bf16.gmra.mxu1 %vm657_vm0, %v1587_v61 }
  0x80   : > { %826 = vmatprep.mubr.bf16.mxu0 %v1588_v62  ;;  %1449 = vmatprep.mubr.msk.bf16.mxu1 %vm657_vm0, %v1590_v63 }
  0x87   : > { %827 = vmatmul.mubr.bf16.gmra.mxu0 %v1591_v0  ;;  %1450 = vmatmul.mubr.msk.bf16.gmra.mxu1 %vm657_vm0, %v1592_v1 }
  0xef   : > { %v1303_v2 = vpop.f32.mrf.mxu0  ;;  %v1375_v3 = vpop.f32.mrf.mxu1 }
  0xf1   : > { %v1304_v4 = vpop.f32.mrf.mxu0  ;;  %v1376_v5 = vpop.f32.mrf.mxu1 }
  0xf2   : > { %v1812_v6 = vadd.f32 %v1376_v5, %v1375_v3  ;;  %v1305_v44 = vadd.f32 %v1304_v4, %v1303_v2 }
  0xf3   : > { %v1306_v7 = vpop.f32.mrf.mxu0  ;;  %v1378_v8 = vpop.f32.mrf.mxu1 }
  0xf5   : > { %v1307_v9 = vpop.f32.mrf.mxu0  ;;  %v1379_v10 = vpop.f32.mrf.mxu1 }
  0xf6   : > { %v1814_v11 = vadd.f32 %v1379_v10, %v1378_v8  ;;  %v1308_v53 = vadd.f32 %v1307_v9, %v1306_v7 }
  0xf7   : > { %v1309_v12 = vpop.f32.mrf.mxu0  ;;  %v1381_v13 = vpop.f32.mrf.mxu1 }
  0xf9   : > { %v1310_v14 = vpop.f32.mrf.mxu0  ;;  %v1382_v15 = vpop.f32.mrf.mxu1 }
  0xfa   : > { %v1816_v16 = vadd.f32 %v1382_v15, %v1381_v13  ;;  %v1311_v40 = vadd.f32 %v1310_v14, %v1309_v12 }
  0xfb   : > { %v1312_v17 = vpop.f32.mrf.mxu0  ;;  %v1384_v18 = vpop.f32.mrf.mxu1 }
  0xfd   : > { %v1313_v19 = vpop.f32.mrf.mxu0  ;;  %v1385_v20 = vpop.f32.mrf.mxu1 }
  0xfe   : > { %v1818_v21 = vadd.f32 %v1385_v20, %v1384_v18  ;;  %v1314_v48 = vadd.f32 %v1313_v19, %v1312_v17 }
  0xff   : > { %v1315_v22 = vpop.f32.mrf.mxu0  ;;  %v1387_v23 = vpop.f32.mrf.mxu1 }
 0x101   : > { %v1316_v24 = vpop.f32.mrf.mxu0  ;;  %v1388_v25 = vpop.f32.mrf.mxu1 }
 0x102   : > { %v1820_v26 = vadd.f32 %v1388_v25, %v1387_v23  ;;  %v1317_v63 = vadd.f32 %v1316_v24, %v1315_v22 }
 0x103   : > { %v1318_v27 = vpop.f32.mrf.mxu0  ;;  %v1390_v28 = vpop.f32.mrf.mxu1 }
 0x105   : > { %v1319_v29 = vpop.f32.mrf.mxu0  ;;  %v1391_v30 = vpop.f32.mrf.mxu1 }
 0x106   : > { %v1822_v31 = vadd.f32 %v1391_v30, %v1390_v28  ;;  %v1320_v10 = vadd.f32 %v1319_v29, %v1318_v27 }
 0x107   : > { %v1321_v32 = vpop.f32.mrf.mxu0  ;;  %v1824_v33 = vpop.f32.mrf.mxu1 }
 0x109   : > { %v1322_v34 = vpop.f32.mrf.mxu0  ;;  %v1828_v35 = vpop.f32.mrf.mxu1 }
 0x10a   : > { %v1323_v58 = vadd.f32 %v1322_v34, %v1321_v32 }
 0x10b   : > { %v1324_v36 = vpop.f32.mrf.mxu0  ;;  %v1830_v37 = vpop.f32.mrf.mxu1 }
 0x10d   : > { %v1325_v38 = vpop.f32.mrf.mxu0  ;;  %v1832_v39 = vpop.f32.mrf.mxu1 }
 0x10e   : > { %v1326_v4 = vadd.f32 %v1325_v38, %v1324_v36 }
 0x10f   : > { %v1327_v41 = vpop.f32.mrf.mxu0  ;;  %v1423_v43 = vpop.f32.mrf.mxu1 }
 0x110   : > { %v910_v45 = vadd.f32 %v1423_v43, %v1311_v40 }
 0x111   : > { %v1328_v46 = vpop.f32.mrf.mxu0  ;;  %v901_v47 = vpop.f32.mrf.mxu1 }
 0x112   : > { %v1036_v49 = vadd.f32 %v1837_v42, %v910_v45  ;;  %v902_v50 = vadd.f32 %v1305_v44, %v901_v47  ;;  %v1329_v23 = vadd.f32 %v1328_v46, %v1327_v41 }
 0x113   : > { %v1330_v51 = vpop.f32.mrf.mxu0  ;;  %v1424_v52 = vpop.f32.mrf.mxu1 }
 0x114   : > { %1068 = vst [vmem:[%s1842_s28 + $0x10] sm:$0xff] %v1036_v49  ;;  %v1034_v54 = vadd.f32 %v1837_v42, %v902_v50  ;;  %v913_v55 = vadd.f32 %v1424_v52, %v1314_v48 }
 0x115   : > { %v1331_v56 = vpop.f32.mrf.mxu0  ;;  %v904_v57 = vpop.f32.mrf.mxu1 }
 0x116   : > { %1066 = vst [vmem:[%s1842_s28] sm:$0xff] %v1034_v54  ;;  %v1037_v59 = vadd.f32 %v1837_v42, %v913_v55  ;;  %v905_v60 = vadd.f32 %v1308_v53, %v904_v57  ;;  %v1332_v38 = vadd.f32 %v1331_v56, %v1330_v51 }
 0x117   : > { %v1333_v61 = vpop.f32.mrf.mxu0  ;;  %v1427_v62 = vpop.f32.mrf.mxu1 }
 0x118   : > { %1069 = vst [vmem:[%s1842_s28 + $0x18] sm:$0xff] %v1037_v59  ;;  %v1035_v0 = vadd.f32 %v1837_v42, %v905_v60  ;;  %v926_v1 = vadd.f32 %v1427_v62, %v1323_v58 }
 0x119   : > { %v1334_v2 = vpop.f32.mrf.mxu0  ;;  %v917_v3 = vpop.f32.mrf.mxu1 }
 0x11a   : > { %1067 = vst [vmem:[%s1842_s28 + $0x8] sm:$0xff] %v1035_v0  ;;  %v1040_v5 = vadd.f32 %v1837_v42, %v926_v1  ;;  %v918_v7 = vadd.f32 %v1317_v63, %v917_v3  ;;  %v1335_v17 = vadd.f32 %v1334_v2, %v1333_v61 }
 0x11b   : > { %v1336_v8 = vpop.f32.mrf.mxu0  ;;  %v1428_v9 = vpop.f32.mrf.mxu1 }
 0x11c   : > { %1072 = vst [vmem:[%s1842_s28 + $0x30] sm:$0xff] %v1040_v5  ;;  %v1038_v12 = vadd.f32 %v1837_v42, %v918_v7  ;;  %v929_v13 = vadd.f32 %v1428_v9, %v1326_v4 }
 0x11d   : > { %v1337_v14 = vpop.f32.mrf.mxu0  ;;  %v920_v15 = vpop.f32.mrf.mxu1 }
 0x11e   : > { %1070 = vst [vmem:[%s1842_s28 + $0x20] sm:$0xff] %v1038_v12  ;;  %v1041_v18 = vadd.f32 %v1837_v42, %v929_v13  ;;  %v921_v19 = vadd.f32 %v1320_v10, %v920_v15  ;;  %v1338_v29 = vadd.f32 %v1337_v14, %v1336_v8 }
 0x11f   : > { %v1339_v20 = vpop.f32.mrf.mxu0  ;;  %v1431_v22 = vpop.f32.mrf.mxu1 }
 0x120   : > { %1073 = vst [vmem:[%s1842_s28 + $0x38] sm:$0xff] %v1041_v18  ;;  %v1039_v24 = vadd.f32 %v1837_v42, %v921_v19  ;;  %v942_v25 = vadd.f32 %v1431_v22, %v1335_v17 }
 0x121   : > { %v1340_v27 = vpop.f32.mrf.mxu0  ;;  %v933_v28 = vpop.f32.mrf.mxu1 }
 0x122   : > { %1071 = vst [vmem:[%s1842_s28 + $0x28] sm:$0xff] %v1039_v24  ;;  %v1044_v30 = vadd.f32 %v1837_v42, %v942_v25  ;;  %v934_v32 = vadd.f32 %v1329_v23, %v933_v28  ;;  %v1341_v49 = vadd.f32 %v1340_v27, %v1339_v20 }
 0x123   : > { %v1342_v34 = vpop.f32.mrf.mxu0  ;;  %v1432_v36 = vpop.f32.mrf.mxu1 }
 0x124   : > { %1076 = vst [vmem:[%s1842_s28 + $0x50] sm:$0xff] %v1044_v30  ;;  %v1042_v40 = vadd.f32 %v1837_v42, %v934_v32  ;;  %v945_v41 = vadd.f32 %v1432_v36, %v1338_v29 }
 0x125   : > { %v1343_v43 = vpop.f32.mrf.mxu0  ;;  %v936_v44 = vpop.f32.mrf.mxu1 }
 0x126   : > { %1074 = vst [vmem:[%s1842_s28 + $0x40] sm:$0xff] %v1042_v40  ;;  %v1045_v45 = vadd.f32 %v1837_v42, %v945_v41  ;;  %v937_v46 = vadd.f32 %v1332_v38, %v936_v44  ;;  %v1344_v57 = vadd.f32 %v1343_v43, %v1342_v34 }
 0x127   : > { %v1345_v47 = vpop.f32.mrf.mxu0  ;;  %v1435_v48 = vpop.f32.mrf.mxu1 }
 0x128   : > { %1077 = vst [vmem:[%s1842_s28 + $0x58] sm:$0xff] %v1045_v45  ;;  %v1043_v50 = vadd.f32 %v1837_v42, %v937_v46 }
 0x129   : > { %v1346_v52 = vpop.f32.mrf.mxu0  ;;  %v949_v51 = vpop.f32.mrf.mxu1 }
 0x12a   : > { %1075 = vst [vmem:[%s1842_s28 + $0x48] sm:$0xff] %v1043_v50  ;;  %v1347_v53 = vadd.f32 %v1346_v52, %v1345_v47  ;;  %v950_v54 = vadd.f32 %v1341_v49, %v949_v51 }
 0x12b   : > { %v1348_v55 = vpop.f32.mrf.mxu0  ;;  %v1436_v56 = vpop.f32.mrf.mxu1 }
 0x12c   : > { %v958_v58 = vadd.f32 %v1435_v48, %v1347_v53  ;;  %v1046_v59 = vadd.f32 %v1837_v42, %v950_v54 }
 0x12d   : > { %v1349_v60 = vpop.f32.mrf.mxu0  ;;  %v952_v61 = vpop.f32.mrf.mxu1 }
 0x12e   : > { %v1048_v62 = vadd.f32 %v1837_v42, %v958_v58  ;;  %1078 = vst [vmem:[%s1842_s28 + $0x60] sm:$0xff] %v1046_v59  ;;  %v1350_v63 = vadd.f32 %v1349_v60, %v1348_v55  ;;  %v953_v0 = vadd.f32 %v1344_v57, %v952_v61  ;;  %v1395_v55 = vadd.f32 %v1828_v35, %v1824_v33 }
 0x12f   : > { %v1351_v1 = vpop.f32.mrf.mxu0  ;;  %v1439_v2 = vpop.f32.mrf.mxu1 }
 0x130   : > { %1080 = vst [vmem:[%s1842_s28 + $0x70] sm:$0xff] %v1048_v62  ;;  %v961_v3 = vadd.f32 %v1436_v56, %v1350_v63  ;;  %v1047_v4 = vadd.f32 %v1837_v42, %v953_v0  ;;  %v1398_v63 = vadd.f32 %v1832_v39, %v1830_v37 }
 0x131   : > { %v1352_v5 = vpop.f32.mrf.mxu0  ;;  %v965_v7 = vpop.f32.mrf.mxu1 }
 0x132   : > { %v1049_v8 = vadd.f32 %v1837_v42, %v961_v3  ;;  %1079 = vst [vmem:[%s1842_s28 + $0x68] sm:$0xff] %v1047_v4  ;;  %v1353_v9 = vadd.f32 %v1352_v5, %v1351_v1 }
 0x133   : > { %v1354_v10 = vpop.f32.mrf.mxu0  ;;  %v1440_v12 = vpop.f32.mrf.mxu1 }
 0x134   : > { %1081 = vst [vmem:[%s1842_s28 + $0x78] sm:$0xff] %v1049_v8  ;;  %v966_v13 = vadd.f32 %v1353_v9, %v965_v7 }
 0x135   : > { %v1355_v14 = vpop.f32.mrf.mxu0  ;;  %v968_v15 = vpop.f32.mrf.mxu1 }
 0x136   : > { %v1050_v17 = vadd.f32 %v1837_v42, %v966_v13  ;;  %v1356_v18 = vadd.f32 %v1355_v14, %v1354_v10 }
 0x137   : > { %v1357_v19 = vpop.f32.mrf.mxu0  ;;  %v1443_v20 = vpop.f32.mrf.mxu1 }
 0x138   : > { %1082 = vst [vmem:[%s1842_s28 + $0x80] sm:$0xff] %v1050_v17  ;;  %v969_v22 = vadd.f32 %v1356_v18, %v968_v15 }
 0x139   : > { %v1358_v23 = vpop.f32.mrf.mxu0  ;;  %v981_v24 = vpop.f32.mrf.mxu1 }
 0x13a   : > { %v1051_v25 = vadd.f32 %v1837_v42, %v969_v22  ;;  %v1359_v27 = vadd.f32 %v1358_v23, %v1357_v19 }
 0x13b   : > { %v1360_v28 = vpop.f32.mrf.mxu0  ;;  %v1879_v29 = vpop.f32.mrf.mxu1 }
 0x13c   : > { %1083 = vst [vmem:[%s1842_s28 + $0x88] sm:$0xff] %v1051_v25  ;;  %v974_v30 = vadd.f32 %v1439_v2, %v1359_v27 }
 0x13d   : > { %v1361_v32 = vpop.f32.mrf.mxu0  ;;  %v984_v34 = vpop.f32.mrf.mxu1 }
 0x13e   : > { %v1052_v36 = vadd.f32 %v1837_v42, %v974_v30  ;;  %v1362_v38 = vadd.f32 %v1361_v32, %v1360_v28 }
 0x13f   : > { %v1363_v40 = vpop.f32.mrf.mxu0  ;;  %v1447_v41 = vpop.f32.mrf.mxu1 }
 0x140   : > { %1084 = vst [vmem:[%s1842_s28 + $0x90] sm:$0xff] %v1052_v36  ;;  %v977_v43 = vadd.f32 %v1440_v12, %v1362_v38  ;;  %v1006_v44 = vadd.f32 %v1447_v41, %v1816_v16 }
 0x141   : > { %v1364_v45 = vpop.f32.mrf.mxu0  ;;  %v997_v46 = vpop.f32.mrf.mxu1 }
 0x142   : > { %v1053_v47 = vadd.f32 %v1837_v42, %v977_v43  ;;  %v1060_v48 = vadd.f32 %v1837_v42, %v1006_v44  ;;  %v1365_v49 = vadd.f32 %v1364_v45, %v1363_v40  ;;  %v998_v50 = vadd.f32 %v1812_v6, %v997_v46 }
 0x143   : > { %v1366_v52 = vpop.f32.mrf.mxu0  ;;  %v1448_v51 = vpop.f32.mrf.mxu1 }
 0x144   : > { %1085 = vst [vmem:[%s1842_s28 + $0x98] sm:$0xff] %v1053_v47  ;;  %1092 = vst [vmem:[%s1842_s28 + $0xd0] sm:$0xff] %v1060_v48  ;;  %v982_v53 = vadd.f32 %v1365_v49, %v981_v24  ;;  %v1058_v54 = vadd.f32 %v1837_v42, %v998_v50  ;;  %v1009_v16 = vadd.f32 %v1448_v51, %v1818_v21 }
 0x145   : > { %v1367_v56 = vpop.f32.mrf.mxu0  ;;  %v1000_v57 = vpop.f32.mrf.mxu1 }
 0x146   : > { %v1054_v58 = vadd.f32 %v1837_v42, %v982_v53  ;;  %1090 = vst [vmem:[%s1842_s28 + $0xc0] sm:$0xff] %v1058_v54  ;;  %v1061_v6 = vadd.f32 %v1837_v42, %v1009_v16  ;;  %v1368_v59 = vadd.f32 %v1367_v56, %v1366_v52  ;;  %v1001_v60 = vadd.f32 %v1814_v11, %v1000_v57 }
 0x147   : > { %v1369_v61 = vpop.f32.mrf.mxu0  ;;  %v1451_v62 = vpop.f32.mrf.mxu1 }
 0x148   : > { %1086 = vst [vmem:[%s1842_s28 + $0xa0] sm:$0xff] %v1054_v58  ;;  %1093 = vst [vmem:[%s1842_s28 + $0xd8] sm:$0xff] %v1061_v6  ;;  %v985_v21 = vadd.f32 %v1368_v59, %v984_v34  ;;  %v1059_v33 = vadd.f32 %v1837_v42, %v1001_v60  ;;  %v1022_v35 = vadd.f32 %v1451_v62, %v1395_v55 }
 0x149   : > { %v1370_v0 = vpop.f32.mrf.mxu0  ;;  %v1013_v1 = vpop.f32.mrf.mxu1 }
 0x14a   : > { %v1055_v2 = vadd.f32 %v1837_v42, %v985_v21  ;;  %1091 = vst [vmem:[%s1842_s28 + $0xc8] sm:$0xff] %v1059_v33  ;;  %v1064_v11 = vadd.f32 %v1837_v42, %v1022_v35  ;;  %v1371_v3 = vadd.f32 %v1370_v0, %v1369_v61  ;;  %v1014_v4 = vadd.f32 %v1820_v26, %v1013_v1 }
 0x14b   : > { %v1372_v5 = vpop.f32.mrf.mxu0  ;;  %v1452_v7 = vpop.f32.mrf.mxu1 }
 0x14c   : > { %1087 = vst [vmem:[%s1842_s28 + $0xa8] sm:$0xff] %v1055_v2  ;;  %1096 = vst [vmem:[%s1842_s28 + $0xf0] sm:$0xff] %v1064_v11  ;;  %v990_v8 = vadd.f32 %v1443_v20, %v1371_v3  ;;  %v1062_v37 = vadd.f32 %v1837_v42, %v1014_v4  ;;  %v1025_v39 = vadd.f32 %v1452_v7, %v1398_v63 }
 0x14d   : > { %v1373_v9 = vpop.f32.mrf.mxu0  ;;  %v1016_v10 = vpop.f32.mrf.mxu1 }
 0x14e   : > { %v1056_v12 = vadd.f32 %v1837_v42, %v990_v8  ;;  %1094 = vst [vmem:[%s1842_s28 + $0xe0] sm:$0xff] %v1062_v37  ;;  %v1065_v13 = vadd.f32 %v1837_v42, %v1025_v39  ;;  %v1374_v14 = vadd.f32 %v1373_v9, %v1372_v5  ;;  %v1017_v26 = vadd.f32 %v1822_v31, %v1016_v10 }
 0x150   : > { %1088 = vst [vmem:[%s1842_s28 + $0xb0] sm:$0xff] %v1056_v12  ;;  %1097 = vst [vmem:[%s1842_s28 + $0xf8] sm:$0xff] %v1065_v13  ;;  %v993_v15 = vadd.f32 %v1879_v29, %v1374_v14  ;;  %v1063_v17 = vadd.f32 %v1837_v42, %v1017_v26 }
 0x152   : > { %v1057_v18 = vadd.f32 %v1837_v42, %v993_v15  ;;  %1095 = vst [vmem:[%s1842_s28 + $0xe8] sm:$0xff] %v1063_v17 }
 0x154   : > { %1089 = vst [vmem:[%s1842_s28 + $0xb8] sm:$0xff] %v1057_v18 }
 0x155 PF: > { %s13_s16 = sadd.s32 1, %s1631_s16   ;;  %s1940_s12 = smov %s1623_s14 }
 0x156   : > { %p10_p7 = scmp.ge.s32.totalorder %s13_s16, 18   ;;  %s1941_s13 = smov %s1627_s15 }
 0x157   : > { %s1942_s14 = smov %s1945_s17  ;;  %s1943_s15 = smov %s1949_s18 }
 0x158   :  { %12 = sbr.rel (!%p10_p7) target bundleno = 3 (0x3), region = 62 }

// kernel: clstm_forward.9
= control target key start
LH: loop header
LB: loop body
LE: loop exit
PB: predicated region body
PF: predicated region fallthrough
CT: control target
= control target key end

     0   :  { %s1544_s12 = smov 0   ;;  %s1792_s0 = inlined_call_operand.vmem [shape: bf16[2,256,288], index: 0, kind: input, shape index: {}]   ;;  %s1793_s1 = inlined_call_operand.vmem [shape: bf16[288,128], index: 1, kind: input, shape index: {}]   ;;  %s1794_s2 = inlined_call_operand.vmem [shape: f32[1,128], index: 2, kind: input, shape index: {}]   ;;  %s1795_s3 = inlined_call_operand.vmem [shape: f32[2,256,128], index: 3, kind: output, shape index: {}]  }
   0x1 LB: > { %s1149_s13 = sadd.s32 4294967295, %s1522_s12   ;;  %p1153_p0 = scmp.ge.s32.totalorder %s1522_s12, 1  ;;  %s1522_s12 = sphi %s1544_s12, %s13_s12  }
   0x2   : > { %p137_p1 = scmp.lt.s32.totalorder %s1522_s12, 3 }
   0x4   : > { %p138_p2 = pnand %p1153_p0, %p137_p1 }
   0x5   : > { %p161_p3 = scmp.lt.s32.totalorder (!%p138_p2), %s1149_s13, 1 }
   0x6   : > { %141 = sbr.rel (%p138_p2) target bundleno = 340 (0x154), region = 32 }
   0xb   : > { %v1434_v0 = vld [vmem:[%s1793_s1 + $0x78] sm:$0xff]   ;;  %v1436_v2 = vld [vmem:[%s1793_s1 + $0x70] sm:$0xff]   ;;  %v1438_v4 = vld [vmem:[%s1793_s1 + $0x68] sm:$0xff]   ;;  %s1797_s13 = smov (!%p161_p3, %s1149_s13), 1  ;;  %vm621_vm0 = vcmask 261120  }
   0xc   : > { %v1435_v1 = vld [vmem:[%s1793_s1 + $0x38] sm:$0xff]   ;;  %1243 = vmatprep.subr.bf16.mxu0 %v1434_v0  ;;  %1409 = vmatprep.subr.bf16.mxu1 %v1434_v0  ;;  %v1437_v3 = vld [vmem:[%s1793_s1 + $0x30] sm:$0xff]   ;;  %v1439_v5 = vld [vmem:[%s1793_s1 + $0x28] sm:$0xff]   ;;  %s1425_s28 = smul.u32 384, %s1797_s13  ;;  %s1242_s4 = sshll.u32 %s1797_s13, 8 }
   0xd   : > { %1244 = vmatpush3.bf16.msra.mxu0 %v1435_v1  ;;  %1417 = vmatpush3.bf16.msra.mxu1 %v1435_v1  ;;  %v1440_v6 = vld [vmem:[%s1793_s1 + $0x60] sm:$0xff]   ;;  %v1442_v8 = vld [vmem:[%s1793_s1 + $0x58] sm:$0xff]   ;;  %v1444_v10 = vld [vmem:[%s1793_s1 + $0x50] sm:$0xff]   ;;  %s1708_s7 = scalar_lea.vmem %s1795_s3, %s1242_s4 }
   0xe   : > { %1245 = vmatprep.subr.bf16.mxu0 %v1436_v2  ;;  %1410 = vmatprep.subr.bf16.mxu1 %v1436_v2  ;;  %v1441_v7 = vld [vmem:[%s1793_s1 + $0x20] sm:$0xff]   ;;  %s1585_s8 = scalar_lea.vmem %s1792_s0, %s1425_s28  ;;  %v1443_v9 = vld [vmem:[%s1793_s1 + $0x18] sm:$0xff]   ;;  %v1445_v13 = vld [vmem:[%s1793_s1 + $0x10] sm:$0xff]  }
   0xf   : > { %v1452_v11 = vld [vmem:[%s1585_s8 + $0x4] ss:$12 sps:$4 sm:$0xff]   ;;  %v1446_v14 = vld [vmem:[%s1793_s1 + $0x48] sm:$0xff]   ;;  %v1463_v26 = vld [vmem:[%s1585_s8 + $0x34] ss:$12 sps:$4 sm:$0xff]  }
  0x10   : > { %v1455_v12 = vld [vmem:[%s1585_s8 + $0x124] ss:$12 sps:$4 sm:$0xff]   ;;  %702 = vmatprep.mubr.bf16.mxu0 %v1452_v11  ;;  %v1447_v15 = vld [vmem:[%s1793_s1 + $0x8] sm:$0xff]   ;;  %v1465_v27 = vld [vmem:[%s1585_s8 + $0x154] ss:$12 sps:$4 sm:$0xff]  }
  0x11   : > { %1246 = vmatpush3.bf16.msra.mxu0 %v1437_v3  ;;  %1418 = vmatpush3.bf16.msra.mxu1 %v1437_v3  ;;  %v1448_v16 = vld [vmem:[%s1793_s1 + $0x40] sm:$0xff]   ;;  %v1456_v18 = vld [vmem:[%s1793_s1 + $0x88] sm:$0xff]   ;;  %v1467_v28 = vld [vmem:[%s1585_s8 + $0x30] ss:$12 sps:$4 sm:$0xff]  }
  0x12   : > { %1247 = vmatprep.subr.bf16.mxu0 %v1438_v4  ;;  %1411 = vmatprep.subr.bf16.mxu1 %v1438_v4  ;;  %v1449_v17 = vld [vmem:[%s1793_s1] sm:$0xff]   ;;  %v1457_v21 = vld [vmem:[%s1585_s8 + $0x1c] ss:$12 sps:$4 sm:$0xff]   ;;  %v1470_v30 = vld [vmem:[%s1585_s8 + $0x4c] ss:$12 sps:$4 sm:$0xff]  }
  0x13   : > { %798 = vmatprep.mubr.bf16.mxu1 %v1455_v12  ;;  %v1450_v19 = vld [vmem:[%s1585_s8] ss:$12 sps:$4 sm:$0xff]   ;;  %v1459_v22 = vld [vmem:[%s1585_s8 + $0x13c] ss:$12 sps:$4 sm:$0xff]   ;;  %v1461_v24 = vld [vmem:[%s1585_s8 + $0x18] ss:$12 sps:$4 sm:$0xff]  }
  0x14   : > { %v1453_v20 = vld [vmem:[%s1585_s8 + $0x120] ss:$12 sps:$4 sm:$0xff]   ;;  %v1462_v25 = vld [vmem:[%s1585_s8 + $0x138] ss:$12 sps:$4 sm:$0xff]   ;;  %v1468_v29 = vld [vmem:[%s1585_s8 + $0x150] ss:$12 sps:$4 sm:$0xff]  }
  0x15   : > { %1248 = vmatpush3.bf16.msra.mxu0 %v1439_v5  ;;  %1419 = vmatpush3.bf16.msra.mxu1 %v1439_v5  ;;  %v1469_v23 = vld [vmem:[%s1793_s1 + $0x80] sm:$0xff]   ;;  %v1472_v31 = vld [vmem:[%s1585_s8 + $0x16c] ss:$12 sps:$4 sm:$0xff]   ;;  %v1474_v32 = vld [vmem:[%s1585_s8 + $0x48] ss:$12 sps:$4 sm:$0xff]  }
  0x16   : > { %1249 = vmatprep.subr.bf16.mxu0 %v1440_v6  ;;  %1412 = vmatprep.subr.bf16.mxu1 %v1440_v6  ;;  %v1475_v33 = vld [vmem:[%s1585_s8 + $0x168] ss:$12 sps:$4 sm:$0xff]   ;;  %v1476_v34 = vld [vmem:[%s1585_s8 + $0x64] ss:$12 sps:$4 sm:$0xff]   ;;  %v1479_v36 = vld [vmem:[%s1585_s8 + $0x60] ss:$12 sps:$4 sm:$0xff]  }
  0x17   : > { %v1478_v35 = vld [vmem:[%s1585_s8 + $0x8] ss:$12 sps:$4 sm:$0xff]   ;;  %v1480_v37 = vld [vmem:[%s1585_s8 + $0x20] ss:$12 sps:$4 sm:$0xff]   ;;  %v1483_v39 = vld [vmem:[%s1585_s8 + $0x38] ss:$12 sps:$4 sm:$0xff]  }
  0x18   : > { %v1481_v38 = vld [vmem:[%s1585_s8 + $0x7c] ss:$12 sps:$4 sm:$0xff]   ;;  %v1484_v40 = vld [vmem:[%s1585_s8 + $0x78] ss:$12 sps:$4 sm:$0xff]   ;;  %v1486_v42 = vld [vmem:[%s1585_s8 + $0x94] ss:$12 sps:$4 sm:$0xff]  }
  0x19   : > { %1250 = vmatpush3.bf16.msra.mxu0 %v1441_v7  ;;  %1420 = vmatpush3.bf16.msra.mxu1 %v1441_v7  ;;  %v1485_v41 = vld [vmem:[%s1585_s8 + $0x50] ss:$12 sps:$4 sm:$0xff]   ;;  %v1488_v43 = vld [vmem:[%s1585_s8 + $0x68] ss:$12 sps:$4 sm:$0xff]   ;;  %v1490_v45 = vld [vmem:[%s1585_s8 + $0x80] ss:$12 sps:$4 sm:$0xff]  }
  0x1a   : > { %1251 = vmatprep.subr.bf16.mxu0 %v1442_v8  ;;  %1413 = vmatprep.subr.bf16.mxu1 %v1442_v8  ;;  %v1489_v44 = vld [vmem:[%s1585_s8 + $0x90] ss:$12 sps:$4 sm:$0xff]   ;;  %v1491_v46 = vld [vmem:[%s1585_s8 + $0xac] ss:$12 sps:$4 sm:$0xff]   ;;  %v1494_v48 = vld [vmem:[%s1585_s8 + $0xa8] ss:$12 sps:$4 sm:$0xff]  }
  0x1b   : > { %v1493_v47 = vld [vmem:[%s1585_s8 + $0x98] ss:$12 sps:$4 sm:$0xff]   ;;  %v1495_v49 = vld [vmem:[%s1585_s8 + $0xb0] ss:$12 sps:$4 sm:$0xff]   ;;  %v1498_v51 = vld [vmem:[%s1585_s8 + $0xc8] ss:$12 sps:$4 sm:$0xff]  }
  0x1c   : > { %v1496_v50 = vld [vmem:[%s1585_s8 + $0xc4] ss:$12 sps:$4 sm:$0xff]   ;;  %v1499_v52 = vld [vmem:[%s1585_s8 + $0xc0] ss:$12 sps:$4 sm:$0xff]   ;;  %v1501_v54 = vld [vmem:[%s1585_s8 + $0xdc] ss:$12 sps:$4 sm:$0xff]  }
  0x1d   : > { %1252 = vmatpush3.bf16.msra.mxu0 %v1443_v9  ;;  %1421 = vmatpush3.bf16.msra.mxu1 %v1443_v9  ;;  %v1500_v53 = vld [vmem:[%s1585_s8 + $0xe0] ss:$12 sps:$4 sm:$0xff]   ;;  %v1503_v55 = vld [vmem:[%s1585_s8 + $0xf8] ss:$12 sps:$4 sm:$0xff]   ;;  %v1505_v57 = vld [vmem:[%s1585_s8 + $0x110] ss:$12 sps:$4 sm:$0xff]  }
  0x1e   : > { %1253 = vmatprep.subr.bf16.mxu0 %v1444_v10  ;;  %1414 = vmatprep.subr.bf16.mxu1 %v1444_v10  ;;  %v1504_v56 = vld [vmem:[%s1585_s8 + $0xd8] ss:$12 sps:$4 sm:$0xff]   ;;  %v1506_v58 = vld [vmem:[%s1585_s8 + $0xf4] ss:$12 sps:$4 sm:$0xff]   ;;  %v1509_v60 = vld [vmem:[%s1585_s8 + $0xf0] ss:$12 sps:$4 sm:$0xff]  }
  0x1f   : > { %v1508_v59 = vld [vmem:[%s1585_s8 + $0x128] ss:$12 sps:$4 sm:$0xff]   ;;  %v1510_v61 = vld [vmem:[%s1585_s8 + $0x140] ss:$12 sps:$4 sm:$0xff]   ;;  %v1513_v63 = vld [vmem:[%s1585_s8 + $0x158] ss:$12 sps:$4 sm:$0xff]  }
  0x20   : > { %v1511_v62 = vld [vmem:[%s1585_s8 + $0x10c] ss:$12 sps:$4 sm:$0xff]   ;;  %v1514_v0 = vld [vmem:[%s1585_s8 + $0x108] ss:$12 sps:$4 sm:$0xff]   ;;  %v1515_v1 = vld [vmem:[%s1585_s8 + $0x170] ss:$12 sps:$4 sm:$0xff]  }
  0x21   : > { %1254 = vmatpush3.bf16.msra.mxu0 %v1445_v13  ;;  %1422 = vmatpush3.bf16.msra.mxu1 %v1445_v13 }
  0x22   : > { %1255 = vmatprep.subr.bf16.mxu0 %v1446_v14  ;;  %1415 = vmatprep.subr.bf16.mxu1 %v1446_v14 }
  0x25   : > { %1256 = vmatpush3.bf16.msra.mxu0 %v1447_v15  ;;  %1423 = vmatpush3.bf16.msra.mxu1 %v1447_v15 }
  0x26   : > { %1257 = vmatprep.subr.bf16.mxu0 %v1448_v16  ;;  %1416 = vmatprep.subr.bf16.mxu1 %v1448_v16 }
  0x29   : > { %1258 = vmatpush3.bf16.msra.mxu0 %v1449_v17  ;;  %1424 = vmatpush3.bf16.msra.mxu1 %v1449_v17 }
  0x2a   : > { %1373 = vmatprep.subr.bf16.mxu1 %v1456_v18 }
  0x2c   : > { %703 = vmatmul.mubr.bf16.vlgmr.msra.gmra.mxu0 %v1450_v19  ;;  %799 = vmatmul.mubr.bf16.vlgmr.msra.gmra.mxu1 %v1453_v20 }
  0x2d   : > { %1374 = vmatpush3.bf16.msra.mxu1 %v1456_v18  ;;  %710 = vmatprep.mubr.bf16.mxu0 %v1457_v21 }
  0x2e   : > { %806 = vmatprep.mubr.bf16.mxu1 %v1459_v22  ;;  %1375 = vmatprep.subr.bf16.mxu1 %v1469_v23 }
  0x31   : > { %1376 = vmatpush3.bf16.msra.mxu1 %v1469_v23 }
  0x34   : > { %711 = vmatmul.mubr.bf16.gmra.mxu0 %v1461_v24  ;;  %807 = vmatmul.mubr.bf16.gmra.mxu1 %v1462_v25 }
  0x35   : > { %718 = vmatprep.mubr.bf16.mxu0 %v1463_v26  ;;  %814 = vmatprep.mubr.bf16.mxu1 %v1465_v27 }
  0x3c   : > { %719 = vmatmul.mubr.bf16.gmra.mxu0 %v1467_v28  ;;  %815 = vmatmul.mubr.bf16.gmra.mxu1 %v1468_v29 }
  0x3d   : > { %726 = vmatprep.mubr.bf16.mxu0 %v1470_v30  ;;  %822 = vmatprep.mubr.bf16.mxu1 %v1472_v31 }
  0x44   : > { %727 = vmatmul.mubr.bf16.gmra.mxu0 %v1474_v32  ;;  %823 = vmatmul.mubr.bf16.gmra.mxu1 %v1475_v33 }
  0x45   : > { %734 = vmatprep.mubr.bf16.mxu0 %v1476_v34  ;;  %1377 = vmatprep.mubr.msk.bf16.mxu1 %vm621_vm0, %v1478_v35 }
  0x4c   : > { %735 = vmatmul.mubr.bf16.gmra.mxu0 %v1479_v36  ;;  %1378 = vmatmul.mubr.msk.bf16.vlgmr.msra.gmra.mxu1 %vm621_vm0, %v1480_v37 }
  0x4d   : > { %742 = vmatprep.mubr.bf16.mxu0 %v1481_v38  ;;  %1381 = vmatprep.mubr.msk.bf16.mxu1 %vm621_vm0, %v1483_v39 }
  0x54   : > { %743 = vmatmul.mubr.bf16.gmra.mxu0 %v1484_v40  ;;  %1382 = vmatmul.mubr.msk.bf16.gmra.mxu1 %vm621_vm0, %v1485_v41 }
  0x55   : > { %750 = vmatprep.mubr.bf16.mxu0 %v1486_v42  ;;  %1385 = vmatprep.mubr.msk.bf16.mxu1 %vm621_vm0, %v1488_v43  ;;  %v1701_v42 = vld [vmem:[%s1794_s2] ss:$0 sm:$0xff] }
  0x5c   : > { %751 = vmatmul.mubr.bf16.gmra.mxu0 %v1489_v44  ;;  %1386 = vmatmul.mubr.msk.bf16.gmra.mxu1 %vm621_vm0, %v1490_v45 }
  0x5d   : > { %758 = vmatprep.mubr.bf16.mxu0 %v1491_v46  ;;  %1389 = vmatprep.mubr.msk.bf16.mxu1 %vm621_vm0, %v1493_v47 }
  0x64   : > { %759 = vmatmul.mubr.bf16.gmra.mxu0 %v1494_v48  ;;  %1390 = vmatmul.mubr.msk.bf16.gmra.mxu1 %vm621_vm0, %v1495_v49 }
  0x65   : > { %766 = vmatprep.mubr.bf16.mxu0 %v1496_v50  ;;  %1393 = vmatprep.mubr.msk.bf16.mxu1 %vm621_vm0, %v1498_v51 }
  0x6c   : > { %767 = vmatmul.mubr.bf16.gmra.mxu0 %v1499_v52  ;;  %1394 = vmatmul.mubr.msk.bf16.gmra.mxu1 %vm621_vm0, %v1500_v53 }
  0x6d   : > { %774 = vmatprep.mubr.bf16.mxu0 %v1501_v54  ;;  %1397 = vmatprep.mubr.msk.bf16.mxu1 %vm621_vm0, %v1503_v55 }
  0x74   : > { %775 = vmatmul.mubr.bf16.gmra.mxu0 %v1504_v56  ;;  %1398 = vmatmul.mubr.msk.bf16.gmra.mxu1 %vm621_vm0, %v1505_v57 }
  0x75   : > { %782 = vmatprep.mubr.bf16.mxu0 %v1506_v58  ;;  %1401 = vmatprep.mubr.msk.bf16.mxu1 %vm621_vm0, %v1508_v59 }
  0x7c   : > { %783 = vmatmul.mubr.bf16.gmra.mxu0 %v1509_v60  ;;  %1402 = vmatmul.mubr.msk.bf16.gmra.mxu1 %vm621_vm0, %v1510_v61 }
  0x7d   : > { %790 = vmatprep.mubr.bf16.mxu0 %v1511_v62  ;;  %1405 = vmatprep.mubr.msk.bf16.mxu1 %vm621_vm0, %v1513_v63 }
  0x84   : > { %791 = vmatmul.mubr.bf16.gmra.mxu0 %v1514_v0  ;;  %1406 = vmatmul.mubr.msk.bf16.gmra.mxu1 %vm621_vm0, %v1515_v1 }
  0xec   : > { %v1259_v2 = vpop.f32.mrf.mxu0  ;;  %v1331_v3 = vpop.f32.mrf.mxu1 }
  0xee   : > { %v1260_v4 = vpop.f32.mrf.mxu0  ;;  %v1332_v5 = vpop.f32.mrf.mxu1 }
  0xef   : > { %v1678_v6 = vadd.f32 %v1332_v5, %v1331_v3  ;;  %v1261_v44 = vadd.f32 %v1260_v4, %v1259_v2 }
  0xf0   : > { %v1262_v7 = vpop.f32.mrf.mxu0  ;;  %v1334_v8 = vpop.f32.mrf.mxu1 }
  0xf2   : > { %v1263_v9 = vpop.f32.mrf.mxu0  ;;  %v1335_v10 = vpop.f32.mrf.mxu1 }
  0xf3   : > { %v1680_v11 = vadd.f32 %v1335_v10, %v1334_v8  ;;  %v1264_v53 = vadd.f32 %v1263_v9, %v1262_v7 }
  0xf4   : > { %v1265_v12 = vpop.f32.mrf.mxu0  ;;  %v1337_v13 = vpop.f32.mrf.mxu1 }
  0xf6   : > { %v1266_v14 = vpop.f32.mrf.mxu0  ;;  %v1338_v15 = vpop.f32.mrf.mxu1 }
  0xf7   : > { %v1682_v16 = vadd.f32 %v1338_v15, %v1337_v13  ;;  %v1267_v40 = vadd.f32 %v1266_v14, %v1265_v12 }
  0xf8   : > { %v1268_v17 = vpop.f32.mrf.mxu0  ;;  %v1340_v18 = vpop.f32.mrf.mxu1 }
  0xfa   : > { %v1269_v19 = vpop.f32.mrf.mxu0  ;;  %v1341_v20 = vpop.f32.mrf.mxu1 }
  0xfb   : > { %v1684_v21 = vadd.f32 %v1341_v20, %v1340_v18  ;;  %v1270_v48 = vadd.f32 %v1269_v19, %v1268_v17 }
  0xfc   : > { %v1271_v22 = vpop.f32.mrf.mxu0  ;;  %v1343_v23 = vpop.f32.mrf.mxu1 }
  0xfe   : > { %v1272_v24 = vpop.f32.mrf.mxu0  ;;  %v1344_v25 = vpop.f32.mrf.mxu1 }
  0xff   : > { %v1686_v26 = vadd.f32 %v1344_v25, %v1343_v23  ;;  %v1273_v1 = vadd.f32 %v1272_v24, %v1271_v22 }
 0x100   : > { %v1274_v27 = vpop.f32.mrf.mxu0  ;;  %v1346_v28 = vpop.f32.mrf.mxu1 }
 0x102   : > { %v1275_v29 = vpop.f32.mrf.mxu0  ;;  %v1347_v30 = vpop.f32.mrf.mxu1 }
 0x103   : > { %v1688_v31 = vadd.f32 %v1347_v30, %v1346_v28  ;;  %v1276_v15 = vadd.f32 %v1275_v29, %v1274_v27 }
 0x104   : > { %v1277_v32 = vpop.f32.mrf.mxu0  ;;  %v1690_v33 = vpop.f32.mrf.mxu1 }
 0x106   : > { %v1278_v34 = vpop.f32.mrf.mxu0  ;;  %v1692_v35 = vpop.f32.mrf.mxu1 }
 0x107   : > { %v1279_v59 = vadd.f32 %v1278_v34, %v1277_v32 }
 0x108   : > { %v1280_v36 = vpop.f32.mrf.mxu0  ;;  %v1694_v37 = vpop.f32.mrf.mxu1 }
 0x10a   : > { %v1281_v38 = vpop.f32.mrf.mxu0  ;;  %v1696_v39 = vpop.f32.mrf.mxu1 }
 0x10b   : > { %v1282_v8 = vadd.f32 %v1281_v38, %v1280_v36 }
 0x10c   : > { %v1283_v41 = vpop.f32.mrf.mxu0  ;;  %v1379_v43 = vpop.f32.mrf.mxu1 }
 0x10d   : > { %v874_v45 = vadd.f32 %v1379_v43, %v1267_v40 }
 0x10e   : > { %v1284_v46 = vpop.f32.mrf.mxu0  ;;  %v865_v47 = vpop.f32.mrf.mxu1 }
 0x10f   : > { %v1000_v49 = vadd.f32 %v1701_v42, %v874_v45  ;;  %v866_v50 = vadd.f32 %v1261_v44, %v865_v47  ;;  %v1285_v34 = vadd.f32 %v1284_v46, %v1283_v41 }
 0x110   : > { %v1286_v51 = vpop.f32.mrf.mxu0  ;;  %v1380_v52 = vpop.f32.mrf.mxu1 }
 0x111   : > { %v1032_v54 = vmax.f32 %v1000_v49, 0.0  ;;  %v998_v55 = vadd.f32 %v1701_v42, %v866_v50  ;;  %v877_v56 = vadd.f32 %v1380_v52, %v1270_v48 }
 0x112   : > { %v1287_v57 = vpop.f32.mrf.mxu0  ;;  %v868_v58 = vpop.f32.mrf.mxu1 }
 0x113   : > { %1064 = vst [vmem:[%s1708_s7 + $0x10] sm:$0xff] %v1032_v54  ;;  %v1030_v60 = vmax.f32 %v998_v55, 0.0  ;;  %v1001_v61 = vadd.f32 %v1701_v42, %v877_v56  ;;  %v869_v62 = vadd.f32 %v1264_v53, %v868_v58  ;;  %v1288_v50 = vadd.f32 %v1287_v57, %v1286_v51 }
 0x114   : > { %v1289_v63 = vpop.f32.mrf.mxu0  ;;  %v1383_v0 = vpop.f32.mrf.mxu1 }
 0x115   : > { %1062 = vst [vmem:[%s1708_s7] sm:$0xff] %v1030_v60  ;;  %v1033_v2 = vmax.f32 %v1001_v61, 0.0  ;;  %v999_v3 = vadd.f32 %v1701_v42, %v869_v62  ;;  %v890_v4 = vadd.f32 %v1383_v0, %v1279_v59 }
 0x116   : > { %v1290_v5 = vpop.f32.mrf.mxu0  ;;  %v881_v7 = vpop.f32.mrf.mxu1 }
 0x117   : > { %1065 = vst [vmem:[%s1708_s7 + $0x18] sm:$0xff] %v1033_v2  ;;  %v1031_v9 = vmax.f32 %v999_v3, 0.0  ;;  %v1004_v10 = vadd.f32 %v1701_v42, %v890_v4  ;;  %v882_v12 = vadd.f32 %v1273_v1, %v881_v7  ;;  %v1291_v23 = vadd.f32 %v1290_v5, %v1289_v63 }
 0x118   : > { %v1292_v13 = vpop.f32.mrf.mxu0  ;;  %v1384_v14 = vpop.f32.mrf.mxu1 }
 0x119   : > { %1063 = vst [vmem:[%s1708_s7 + $0x8] sm:$0xff] %v1031_v9  ;;  %v1036_v17 = vmax.f32 %v1004_v10, 0.0  ;;  %v1002_v18 = vadd.f32 %v1701_v42, %v882_v12  ;;  %v893_v19 = vadd.f32 %v1384_v14, %v1282_v8 }
 0x11a   : > { %v1293_v20 = vpop.f32.mrf.mxu0  ;;  %v884_v22 = vpop.f32.mrf.mxu1 }
 0x11b   : > { %1068 = vst [vmem:[%s1708_s7 + $0x30] sm:$0xff] %v1036_v17  ;;  %v1034_v24 = vmax.f32 %v1002_v18, 0.0  ;;  %v1005_v25 = vadd.f32 %v1701_v42, %v893_v19  ;;  %v885_v28 = vadd.f32 %v1276_v15, %v884_v22  ;;  %v1294_v43 = vadd.f32 %v1293_v20, %v1292_v13 }
 0x11c   : > { %v1295_v30 = vpop.f32.mrf.mxu0  ;;  %v1387_v32 = vpop.f32.mrf.mxu1 }
 0x11d   : > { %1066 = vst [vmem:[%s1708_s7 + $0x20] sm:$0xff] %v1034_v24  ;;  %v1037_v27 = vmax.f32 %v1005_v25, 0.0  ;;  %v1003_v29 = vadd.f32 %v1701_v42, %v885_v28  ;;  %v906_v36 = vadd.f32 %v1387_v32, %v1291_v23 }
 0x11e   : > { %v1296_v38 = vpop.f32.mrf.mxu0  ;;  %v897_v40 = vpop.f32.mrf.mxu1 }
 0x11f   : > { %1069 = vst [vmem:[%s1708_s7 + $0x38] sm:$0xff] %v1037_v27  ;;  %v1035_v44 = vmax.f32 %v1003_v29, 0.0  ;;  %v1008_v45 = vadd.f32 %v1701_v42, %v906_v36  ;;  %v898_v47 = vadd.f32 %v1285_v34, %v897_v40  ;;  %v1297_v61 = vadd.f32 %v1296_v38, %v1295_v30 }
 0x120   : > { %v1298_v48 = vpop.f32.mrf.mxu0  ;;  %v1388_v49 = vpop.f32.mrf.mxu1 }
 0x121   : > { %1067 = vst [vmem:[%s1708_s7 + $0x28] sm:$0xff] %v1035_v44  ;;  %v1040_v41 = vmax.f32 %v1008_v45, 0.0  ;;  %v1006_v46 = vadd.f32 %v1701_v42, %v898_v47  ;;  %v909_v52 = vadd.f32 %v1388_v49, %v1294_v43 }
 0x122   : > { %v1299_v53 = vpop.f32.mrf.mxu0  ;;  %v900_v54 = vpop.f32.mrf.mxu1 }
 0x123   : > { %1072 = vst [vmem:[%s1708_s7 + $0x50] sm:$0xff] %v1040_v41  ;;  %v1038_v55 = vmax.f32 %v1006_v46, 0.0  ;;  %v1009_v56 = vadd.f32 %v1701_v42, %v909_v52  ;;  %v901_v58 = vadd.f32 %v1288_v50, %v900_v54  ;;  %v1300_v5 = vadd.f32 %v1299_v53, %v1298_v48 }
 0x124   : > { %v1301_v59 = vpop.f32.mrf.mxu0  ;;  %v1391_v60 = vpop.f32.mrf.mxu1 }
 0x125   : > { %1070 = vst [vmem:[%s1708_s7 + $0x40] sm:$0xff] %v1038_v55  ;;  %v1041_v62 = vmax.f32 %v1009_v56, 0.0  ;;  %v1007_v51 = vadd.f32 %v1701_v42, %v901_v58 }
 0x126   : > { %v1302_v57 = vpop.f32.mrf.mxu0  ;;  %v913_v63 = vpop.f32.mrf.mxu1 }
 0x127   : > { %1073 = vst [vmem:[%s1708_s7 + $0x58] sm:$0xff] %v1041_v62  ;;  %v1039_v0 = vmax.f32 %v1007_v51, 0.0  ;;  %v1303_v1 = vadd.f32 %v1302_v57, %v1301_v59  ;;  %v914_v2 = vadd.f32 %v1297_v61, %v913_v63 }
 0x128   : > { %v1304_v3 = vpop.f32.mrf.mxu0  ;;  %v1392_v4 = vpop.f32.mrf.mxu1 }
 0x129   : > { %1071 = vst [vmem:[%s1708_s7 + $0x48] sm:$0xff] %v1039_v0  ;;  %v922_v7 = vadd.f32 %v1391_v60, %v1303_v1  ;;  %v1010_v8 = vadd.f32 %v1701_v42, %v914_v2 }
 0x12a   : > { %v1305_v9 = vpop.f32.mrf.mxu0  ;;  %v916_v10 = vpop.f32.mrf.mxu1 }
 0x12b   : > { %v1012_v12 = vadd.f32 %v1701_v42, %v922_v7  ;;  %v1042_v13 = vmax.f32 %v1010_v8, 0.0  ;;  %v1306_v14 = vadd.f32 %v1305_v9, %v1304_v3  ;;  %v917_v15 = vadd.f32 %v1300_v5, %v916_v10 }
 0x12c   : > { %v1307_v17 = vpop.f32.mrf.mxu0  ;;  %v1395_v18 = vpop.f32.mrf.mxu1 }
 0x12d   : > { %v1044_v19 = vmax.f32 %v1012_v12, 0.0  ;;  %1074 = vst [vmem:[%s1708_s7 + $0x60] sm:$0xff] %v1042_v13  ;;  %v925_v20 = vadd.f32 %v1392_v4, %v1306_v14  ;;  %v1011_v22 = vadd.f32 %v1701_v42, %v917_v15  ;;  %v1351_v13 = vadd.f32 %v1692_v35, %v1690_v33 }
 0x12e   : > { %v1308_v23 = vpop.f32.mrf.mxu0  ;;  %v929_v24 = vpop.f32.mrf.mxu1 }
 0x12f   : > { %1076 = vst [vmem:[%s1708_s7 + $0x70] sm:$0xff] %v1044_v19  ;;  %v1013_v25 = vadd.f32 %v1701_v42, %v925_v20  ;;  %v1043_v28 = vmax.f32 %v1011_v22, 0.0  ;;  %v1309_v30 = vadd.f32 %v1308_v23, %v1307_v17 }
 0x130   : > { %v1310_v32 = vpop.f32.mrf.mxu0  ;;  %v1396_v34 = vpop.f32.mrf.mxu1 }
 0x131   : > { %v1045_v27 = vmax.f32 %v1013_v25, 0.0  ;;  %1075 = vst [vmem:[%s1708_s7 + $0x68] sm:$0xff] %v1043_v28  ;;  %v930_v29 = vadd.f32 %v1309_v30, %v929_v24  ;;  %v1354_v28 = vadd.f32 %v1696_v39, %v1694_v37 }
 0x132   : > { %v1311_v36 = vpop.f32.mrf.mxu0  ;;  %v932_v38 = vpop.f32.mrf.mxu1 }
 0x133   : > { %1077 = vst [vmem:[%s1708_s7 + $0x78] sm:$0xff] %v1045_v27  ;;  %v1014_v40 = vadd.f32 %v1701_v42, %v930_v29  ;;  %v1312_v43 = vadd.f32 %v1311_v36, %v1310_v32 }
 0x134   : > { %v1313_v44 = vpop.f32.mrf.mxu0  ;;  %v1742_v45 = vpop.f32.mrf.mxu1 }
 0x135   : > { %v1046_v47 = vmax.f32 %v1014_v40, 0.0  ;;  %v933_v48 = vadd.f32 %v1312_v43, %v932_v38 }
 0x136   : > { %v1314_v49 = vpop.f32.mrf.mxu0  ;;  %v945_v50 = vpop.f32.mrf.mxu1 }
 0x137   : > { %1078 = vst [vmem:[%s1708_s7 + $0x80] sm:$0xff] %v1046_v47  ;;  %v1015_v41 = vadd.f32 %v1701_v42, %v933_v48  ;;  %v1315_v46 = vadd.f32 %v1314_v49, %v1313_v44 }
 0x138   : > { %v1316_v52 = vpop.f32.mrf.mxu0  ;;  %v1746_v53 = vpop.f32.mrf.mxu1 }
 0x139   : > { %v1047_v54 = vmax.f32 %v1015_v41, 0.0  ;;  %v938_v55 = vadd.f32 %v1395_v18, %v1315_v46 }
 0x13a   : > { %v1317_v56 = vpop.f32.mrf.mxu0  ;;  %v948_v58 = vpop.f32.mrf.mxu1 }
 0x13b   : > { %1079 = vst [vmem:[%s1708_s7 + $0x88] sm:$0xff] %v1047_v54  ;;  %v1016_v59 = vadd.f32 %v1701_v42, %v938_v55  ;;  %v1318_v60 = vadd.f32 %v1317_v56, %v1316_v52 }
 0x13c   : > { %v1319_v61 = vpop.f32.mrf.mxu0  ;;  %v1403_v62 = vpop.f32.mrf.mxu1 }
 0x13d   : > { %v1048_v51 = vmax.f32 %v1016_v59, 0.0  ;;  %v941_v57 = vadd.f32 %v1396_v34, %v1318_v60  ;;  %v970_v63 = vadd.f32 %v1403_v62, %v1682_v16 }
 0x13e   : > { %v1320_v0 = vpop.f32.mrf.mxu0  ;;  %v961_v1 = vpop.f32.mrf.mxu1 }
 0x13f   : > { %1080 = vst [vmem:[%s1708_s7 + $0x90] sm:$0xff] %v1048_v51  ;;  %v1017_v2 = vadd.f32 %v1701_v42, %v941_v57  ;;  %v1024_v3 = vadd.f32 %v1701_v42, %v970_v63  ;;  %v1321_v4 = vadd.f32 %v1320_v0, %v1319_v61  ;;  %v962_v5 = vadd.f32 %v1678_v6, %v961_v1 }
 0x140   : > { %v1322_v7 = vpop.f32.mrf.mxu0  ;;  %v1404_v8 = vpop.f32.mrf.mxu1 }
 0x141   : > { %v1049_v9 = vmax.f32 %v1017_v2, 0.0  ;;  %v1056_v10 = vmax.f32 %v1024_v3, 0.0  ;;  %v946_v12 = vadd.f32 %v1321_v4, %v945_v50  ;;  %v1022_v16 = vadd.f32 %v1701_v42, %v962_v5 }
 0x142   : > { %v973_v14 = vadd.f32 %v1404_v8, %v1684_v21  ;;  %v1323_v15 = vpop.f32.mrf.mxu0  ;;  %v964_v17 = vpop.f32.mrf.mxu1 }
 0x143   : > { %1081 = vst [vmem:[%s1708_s7 + $0x98] sm:$0xff] %v1049_v9  ;;  %1088 = vst [vmem:[%s1708_s7 + $0xd0] sm:$0xff] %v1056_v10  ;;  %v1018_v18 = vadd.f32 %v1701_v42, %v946_v12  ;;  %v1054_v6 = vmax.f32 %v1022_v16, 0.0  ;;  %v1324_v19 = vadd.f32 %v1323_v15, %v1322_v7  ;;  %v965_v20 = vadd.f32 %v1680_v11, %v964_v17 }
 0x144   : > { %v1025_v22 = vadd.f32 %v1701_v42, %v973_v14  ;;  %v1325_v23 = vpop.f32.mrf.mxu0  ;;  %v1407_v24 = vpop.f32.mrf.mxu1 }
 0x145   : > { %v1050_v25 = vmax.f32 %v1018_v18, 0.0  ;;  %1086 = vst [vmem:[%s1708_s7 + $0xc0] sm:$0xff] %v1054_v6  ;;  %v949_v33 = vadd.f32 %v1324_v19, %v948_v58  ;;  %v1023_v21 = vadd.f32 %v1701_v42, %v965_v20  ;;  %v986_v35 = vadd.f32 %v1407_v24, %v1351_v13 }
 0x146   : > { %v1057_v30 = vmax.f32 %v1025_v22, 0.0  ;;  %v1326_v32 = vpop.f32.mrf.mxu0  ;;  %v977_v34 = vpop.f32.mrf.mxu1 }
 0x147   : > { %1082 = vst [vmem:[%s1708_s7 + $0xa0] sm:$0xff] %v1050_v25  ;;  %v1019_v11 = vadd.f32 %v1701_v42, %v949_v33  ;;  %v1055_v27 = vmax.f32 %v1023_v21, 0.0  ;;  %v1028_v29 = vadd.f32 %v1701_v42, %v986_v35  ;;  %v1327_v36 = vadd.f32 %v1326_v32, %v1325_v23 }
 0x148   : > { %1089 = vst [vmem:[%s1708_s7 + $0xd8] sm:$0xff] %v1057_v30  ;;  %v978_v38 = vadd.f32 %v1686_v26, %v977_v34  ;;  %v1328_v40 = vpop.f32.mrf.mxu0  ;;  %v1408_v43 = vpop.f32.mrf.mxu1 }
 0x149   : > { %v1051_v44 = vmax.f32 %v1019_v11, 0.0  ;;  %1087 = vst [vmem:[%s1708_s7 + $0xc8] sm:$0xff] %v1055_v27  ;;  %v1060_v37 = vmax.f32 %v1028_v29, 0.0  ;;  %v954_v39 = vadd.f32 %v1742_v45, %v1327_v36  ;;  %v989_v47 = vadd.f32 %v1408_v43, %v1354_v28 }
 0x14a   : > { %v1026_v48 = vadd.f32 %v1701_v42, %v978_v38  ;;  %v1329_v49 = vpop.f32.mrf.mxu0  ;;  %v980_v50 = vpop.f32.mrf.mxu1 }
 0x14b   : > { %1083 = vst [vmem:[%s1708_s7 + $0xa8] sm:$0xff] %v1051_v44  ;;  %1092 = vst [vmem:[%s1708_s7 + $0xf0] sm:$0xff] %v1060_v37  ;;  %v1020_v26 = vadd.f32 %v1701_v42, %v954_v39  ;;  %v1029_v41 = vadd.f32 %v1701_v42, %v989_v47  ;;  %v1330_v46 = vadd.f32 %v1329_v49, %v1328_v40 }
 0x14c   : > { %v981_v52 = vadd.f32 %v1688_v31, %v980_v50  ;;  %v1058_v45 = vmax.f32 %v1026_v48, 0.0 }
 0x14d   : > { %v1052_v54 = vmax.f32 %v1020_v26, 0.0  ;;  %v1061_v55 = vmax.f32 %v1029_v41, 0.0  ;;  %v957_v56 = vadd.f32 %v1746_v53, %v1330_v46 }
 0x14e   : > { %v1027_v58 = vadd.f32 %v1701_v42, %v981_v52  ;;  %1090 = vst [vmem:[%s1708_s7 + $0xe0] sm:$0xff] %v1058_v45 }
 0x14f   : > { %1084 = vst [vmem:[%s1708_s7 + $0xb0] sm:$0xff] %v1052_v54  ;;  %1093 = vst [vmem:[%s1708_s7 + $0xf8] sm:$0xff] %v1061_v55  ;;  %v1021_v59 = vadd.f32 %v1701_v42, %v957_v56 }
 0x150   : > { %v1059_v60 = vmax.f32 %v1027_v58, 0.0 }
 0x151   : > { %v1053_v61 = vmax.f32 %v1021_v59, 0.0 }
 0x152   : > { %1091 = vst [vmem:[%s1708_s7 + $0xe8] sm:$0xff] %v1059_v60 }
 0x153   : > { %1085 = vst [vmem:[%s1708_s7 + $0xb8] sm:$0xff] %v1053_v61 }
 0x154 PF: > { %s13_s12 = sadd.s32 1, %s1522_s12  }
 0x155   : > { %p10_p4 = scmp.ge.s32.totalorder %s13_s12, 4  }
 0x157   :  { %12 = sbr.rel (!%p10_p4) target bundleno = 1 (0x1), region = 62 }

</bundles_post_ra>
